<compile_context>
chip_gen: v5e
topology: v5e:2x2
jax: 0.10.0
libtpu: 0.0.40
codegen_flags: <defaults>
</compile_context>

<pallas_src>
import functools

import jax
import jax.numpy as jnp
from jax.experimental import pallas as pl
from jax.experimental.pallas import tpu as pltpu


def _round_up(x, m):
    return (x + m - 1) // m * m


def _make_conv_kernel(n_rows_out, wp, coutp):
    """Conv3d(k=3, p=1, no bias) for one (batch, output-depth) plane.

    Refs:
      x0/x1/x2 : (n_rows_in, Cinp) bf16 -- padded plane at depth d, d+1, d+2,
                 rows flattened as (H+3)*(W+2) with W minor.
      w_ref    : (27, Cinp, Coutp) bf16 -- packed taps, t = kd*9 + kh*3 + kw.
      o_ref    : (n_rows_out, Coutp) f32 -- row r corresponds to (h, w) with
                 r = h*(W+2) + w; columns w >= W are garbage, sliced off later.
    """
    def kernel(x0_ref, x1_ref, x2_ref, w_ref, o_ref):
        x_refs = (x0_ref, x1_ref, x2_ref)
        acc = jnp.zeros((n_rows_out, coutp), jnp.float32)
        t = 0
        for kd in range(3):
            for kh in range(3):
                for kw in range(3):
                    s = kh * wp + kw                         # static row offset
                    a = x_refs[kd][pl.ds(s, n_rows_out), :]  # (rows, Cinp) bf16
                    acc = acc + jnp.dot(a, w_ref[t],
                                        preferred_element_type=jnp.float32)
                    t += 1
        o_ref[...] = acc
    return kernel


def conv3d_3x3x3_same(x, weight):
    """x: (B, Cin, D, H, W) f32; weight: (Cout, Cin, 3, 3, 3) f32.
    Returns (B, Cout, D, H, W) f32.  stride=1, padding=1, no bias."""
    B, Cin, D, H, W = x.shape
    Cout = weight.shape[0]
    Cinp = _round_up(Cin, 8)
    Coutp = _round_up(Cout, 128)          # lane-dense output
    Wp = W + 2                            # W padded (1, 1)
    Hr = H + 3                            # H padded (1, 2): keeps every tap's
                                          # row window of the flat plane in-bounds
    n_rows_in = Hr * Wp
    n_rows_out = H * Wp

    # ---- layout glue (fused by the enclosing jit) --------------------------
    xcl = jnp.transpose(x, (0, 2, 3, 4, 1))                       # (B, D, H, W, Cin)
    xcl = jnp.pad(xcl, ((0, 0), (1, 1), (1, 2), (1, 1), (0, Cinp - Cin)))
    xcl = xcl.astype(jnp.bfloat16).reshape(B, D + 2, n_rows_in, Cinp)

    wk = jnp.transpose(weight, (2, 3, 4, 1, 0)).reshape(27, Cin, Cout)
    wk = jnp.pad(wk, ((0, 0), (0, Cinp - Cin), (0, Coutp - Cout)))
    wk = wk.astype(jnp.bfloat16)                                  # (27, Cinp, Coutp)

    kernel = _make_conv_kernel(n_rows_out, Wp, Coutp)

    def x_map(kd):
        return lambda b, d: (b, d + kd, 0, 0)

    # ---- VMEM budget & cost hint -------------------------------------------
    in_block = n_rows_in * Cinp * 2        # bf16
    w_block = 27 * Cinp * Coutp * 2        # bf16, VMEM-resident (constant map)
    out_block = n_rows_out * Coutp * 4     # f32
    needed = 2 * (3 * in_block + out_block) + 2 * w_block + (4 << 20)
    vmem_limit = int(min(max(needed, 32 << 20), 64 << 20))

    cost = pl.CostEstimate(
        flops=2 * B * D * 27 * n_rows_out * Cinp * Coutp,
        transcendentals=0,
        bytes_accessed=B * D * (3 * in_block + out_block) + w_block,
    )

    # TODO(synk): for very large H*W planes add a grid axis tiling the row
    # dimension so per-step VMEM stays bounded (not needed at these sizes).
    out_flat = pl.pallas_call(
        kernel,
        out_shape=jax.ShapeDtypeStruct((B, D, n_rows_out, Coutp), jnp.float32),
        grid_spec=pltpu.PrefetchScalarGridSpec(
            num_scalar_prefetch=0,
            grid=(B, D),
            in_specs=[
                pl.BlockSpec((None, None, n_rows_in, Cinp), x_map(0)),
                pl.BlockSpec((None, None, n_rows_in, Cinp), x_map(1)),
                pl.BlockSpec((None, None, n_rows_in, Cinp), x_map(2)),
                pl.BlockSpec((27, Cinp, Coutp), lambda b, d: (0, 0, 0)),
            ],
            out_specs=pl.BlockSpec((None, None, n_rows_out, Coutp),
                                   lambda b, d: (b, d, 0, 0)),
        ),
        compiler_params=pltpu.CompilerParams(
            dimension_semantics=("parallel", "parallel"),
            vmem_limit_bytes=vmem_limit,
        ),
        cost_estimate=cost,
    )(xcl, xcl, xcl, wk)

    # (B, D, H*Wp, Coutp) -> (B, Cout, D, H, W); slice + transpose fuse in XLA.
    out = out_flat.reshape(B, D, H, Wp, Coutp)[:, :, :, :W, :Cout]
    return jnp.transpose(out, (0, 4, 1, 2, 3))


@functools.partial(jax.jit, static_argnames=("output_size",))
def bilinear_upsample_25d(x, weight, output_size=None):
    """Pallas port of BilinearUpsample25D.forward: project(x) then trilinear."""
    y = conv3d_3x3x3_same(x, weight)
    if output_size is None:
        return y
    B, C = y.shape[:2]
    # TODO(synk): trilinear interpolation (align_corners=False) is left to
    # jax.image.resize inside the same jit; it is gather/weighted-sum glue,
    # not a matmul/reduction hot path.
    return jax.image.resize(y, (B, C) + tuple(output_size),
                            method="trilinear", antialias=False)


def _reference(x, weight, output_size):
    y = jax.lax.conv_general_dilated(
        x, weight, window_strides=(1, 1, 1),
        padding=((1, 1), (1, 1), (1, 1)),
        dimension_numbers=("NCDHW", "OIDHW", "NCDHW"))
    B, C = y.shape[:2]
    return jax.image.resize(y, (B, C) + tuple(output_size),
                            method="trilinear", antialias=False)


if __name__ == "__main__":
    B, Cin, Cout, D, H, W = 2, 32, 64, 4, 16, 16
    output_size = (2 * D, 2 * H, 2 * W)

    kx, kw = jax.random.split(jax.random.PRNGKey(0))
    x = jax.random.normal(kx, (B, Cin, D, H, W), jnp.float32)
    weight = jax.random.normal(kw, (Cout, Cin, 3, 3, 3), jnp.float32)
    weight = weight * (1.0 / (27 * Cin) ** 0.5)

    out = bilinear_upsample_25d(x, weight, output_size=output_size)
    out = jax.block_until_ready(out)
    assert out.shape == (B, Cout) + output_size, out.shape

    ref = jax.block_until_ready(_reference(x, weight, output_size))
    rel_err = float(jnp.sqrt(jnp.mean((out - ref) ** 2) /
                             (jnp.mean(ref ** 2) + 1e-12)))
    assert rel_err < 0.05, f"relative L2 error vs reference too large: {rel_err}"

    print("KERNEL_OK")
</pallas_src>

<mosaic_0001>
module attributes {stable_mosaic.version = 11 : i64} {
  func.func @kernel(%arg0: i32, %arg1: i32, %arg2: memref<1x1x342x32xbf16, #tpu.memory_space<vmem>>, %arg3: memref<1x1x342x32xbf16, #tpu.memory_space<vmem>>, %arg4: memref<1x1x342x32xbf16, #tpu.memory_space<vmem>>, %arg5: memref<27x32x128xbf16, #tpu.memory_space<vmem>>, %arg6: memref<1x1x288x128xf32, #tpu.memory_space<vmem>>) attributes {dimension_semantics = [#tpu.dimension_semantics<parallel>, #tpu.dimension_semantics<parallel>], iteration_bounds = array<i64: 2, 4>, scalar_prefetch = 0 : i64, scratch_operands = 0 : i64, tpu.core_type = #tpu.core_type<tc>, window_params = [{transform_indices = @transform_0, window_bounds = array<i64: 1, 1, 342, 32>}, {transform_indices = @transform_1, window_bounds = array<i64: 1, 1, 342, 32>}, {transform_indices = @transform_2, window_bounds = array<i64: 1, 1, 342, 32>}, {pipeline_mode = #tpu.pipeline_mode<synchronous>, transform_indices = @transform_3, window_bounds = array<i64: 27, 32, 128>}, {transform_indices = @transform_4, window_bounds = array<i64: 1, 1, 288, 128>}]} {
    %cst = arith.constant 0.000000e+00 : f32
    %0 = vector.broadcast %cst : f32 to vector<288x128xf32>
    %c0 = arith.constant 0 : index
    %c0_0 = arith.constant 0 : index
    %c0_1 = arith.constant 0 : index
    %c0_2 = arith.constant 0 : index
    %1 = vector.load %arg2[%c0, %c0_0, %c0_1, %c0_2] : memref<1x1x342x32xbf16, #tpu.memory_space<vmem>>, vector<1x1x288x32xbf16>
    %2 = vector.shape_cast %1 : vector<1x1x288x32xbf16> to vector<288x32xbf16>
    %c0_3 = arith.constant 0 : index
    %c0_4 = arith.constant 0 : index
    %c0_5 = arith.constant 0 : index
    %3 = vector.load %arg5[%c0_3, %c0_4, %c0_5] : memref<27x32x128xbf16, #tpu.memory_space<vmem>>, vector<1x32x128xbf16>
    %4 = vector.shape_cast %3 : vector<1x32x128xbf16> to vector<32x128xbf16>
    %cst_6 = arith.constant dense<0.000000e+00> : vector<288x128xf32>
    %5 = tpu.matmul %2, %4, %cst_6 {dimension_numbers = #tpu.dot_dimension_numbers<[1], [0], [0], [1], [0, 0, 1, 1], [], []>} : vector<288x32xbf16>, vector<32x128xbf16>, vector<288x128xf32> -> vector<288x128xf32>
    %6 = arith.addf %0, %5 : vector<288x128xf32>
    %c0_7 = arith.constant 0 : index
    %c0_8 = arith.constant 0 : index
    %c1 = arith.constant 1 : index
    %c0_9 = arith.constant 0 : index
    %7 = vector.load %arg2[%c0_7, %c0_8, %c1, %c0_9] : memref<1x1x342x32xbf16, #tpu.memory_space<vmem>>, vector<1x1x288x32xbf16>
    %8 = vector.shape_cast %7 : vector<1x1x288x32xbf16> to vector<288x32xbf16>
    %c1_10 = arith.constant 1 : index
    %c0_11 = arith.constant 0 : index
    %c0_12 = arith.constant 0 : index
    %9 = vector.load %arg5[%c1_10, %c0_11, %c0_12] : memref<27x32x128xbf16, #tpu.memory_space<vmem>>, vector<1x32x128xbf16>
    %10 = vector.shape_cast %9 : vector<1x32x128xbf16> to vector<32x128xbf16>
    %cst_13 = arith.constant dense<0.000000e+00> : vector<288x128xf32>
    %11 = tpu.matmul %8, %10, %cst_13 {dimension_numbers = #tpu.dot_dimension_numbers<[1], [0], [0], [1], [0, 0, 1, 1], [], []>} : vector<288x32xbf16>, vector<32x128xbf16>, vector<288x128xf32> -> vector<288x128xf32>
    %12 = arith.addf %6, %11 : vector<288x128xf32>
    %c0_14 = arith.constant 0 : index
    %c0_15 = arith.constant 0 : index
    %c2 = arith.constant 2 : index
    %c0_16 = arith.constant 0 : index
    %13 = vector.load %arg2[%c0_14, %c0_15, %c2, %c0_16] : memref<1x1x342x32xbf16, #tpu.memory_space<vmem>>, vector<1x1x288x32xbf16>
    %14 = vector.shape_cast %13 : vector<1x1x288x32xbf16> to vector<288x32xbf16>
    %c2_17 = arith.constant 2 : index
    %c0_18 = arith.constant 0 : index
    %c0_19 = arith.constant 0 : index
    %15 = vector.load %arg5[%c2_17, %c0_18, %c0_19] : memref<27x32x128xbf16, #tpu.memory_space<vmem>>, vector<1x32x128xbf16>
    %16 = vector.shape_cast %15 : vector<1x32x128xbf16> to vector<32x128xbf16>
    %cst_20 = arith.constant dense<0.000000e+00> : vector<288x128xf32>
    %17 = tpu.matmul %14, %16, %cst_20 {dimension_numbers = #tpu.dot_dimension_numbers<[1], [0], [0], [1], [0, 0, 1, 1], [], []>} : vector<288x32xbf16>, vector<32x128xbf16>, vector<288x128xf32> -> vector<288x128xf32>
    %18 = arith.addf %12, %17 : vector<288x128xf32>
    %c0_21 = arith.constant 0 : index
    %c0_22 = arith.constant 0 : index
    %c18 = arith.constant 18 : index
    %c0_23 = arith.constant 0 : index
    %19 = vector.load %arg2[%c0_21, %c0_22, %c18, %c0_23] : memref<1x1x342x32xbf16, #tpu.memory_space<vmem>>, vector<1x1x288x32xbf16>
    %20 = vector.shape_cast %19 : vector<1x1x288x32xbf16> to vector<288x32xbf16>
    %c3 = arith.constant 3 : index
    %c0_24 = arith.constant 0 : index
    %c0_25 = arith.constant 0 : index
    %21 = vector.load %arg5[%c3, %c0_24, %c0_25] : memref<27x32x128xbf16, #tpu.memory_space<vmem>>, vector<1x32x128xbf16>
    %22 = vector.shape_cast %21 : vector<1x32x128xbf16> to vector<32x128xbf16>
    %cst_26 = arith.constant dense<0.000000e+00> : vector<288x128xf32>
    %23 = tpu.matmul %20, %22, %cst_26 {dimension_numbers = #tpu.dot_dimension_numbers<[1], [0], [0], [1], [0, 0, 1, 1], [], []>} : vector<288x32xbf16>, vector<32x128xbf16>, vector<288x128xf32> -> vector<288x128xf32>
    %24 = arith.addf %18, %23 : vector<288x128xf32>
    %c0_27 = arith.constant 0 : index
    %c0_28 = arith.constant 0 : index
    %c19 = arith.constant 19 : index
    %c0_29 = arith.constant 0 : index
    %25 = vector.load %arg2[%c0_27, %c0_28, %c19, %c0_29] : memref<1x1x342x32xbf16, #tpu.memory_space<vmem>>, vector<1x1x288x32xbf16>
    %26 = vector.shape_cast %25 : vector<1x1x288x32xbf16> to vector<288x32xbf16>
    %c4 = arith.constant 4 : index
    %c0_30 = arith.constant 0 : index
    %c0_31 = arith.constant 0 : index
    %27 = vector.load %arg5[%c4, %c0_30, %c0_31] : memref<27x32x128xbf16, #tpu.memory_space<vmem>>, vector<1x32x128xbf16>
    %28 = vector.shape_cast %27 : vector<1x32x128xbf16> to vector<32x128xbf16>
    %cst_32 = arith.constant dense<0.000000e+00> : vector<288x128xf32>
    %29 = tpu.matmul %26, %28, %cst_32 {dimension_numbers = #tpu.dot_dimension_numbers<[1], [0], [0], [1], [0, 0, 1, 1], [], []>} : vector<288x32xbf16>, vector<32x128xbf16>, vector<288x128xf32> -> vector<288x128xf32>
    %30 = arith.addf %24, %29 : vector<288x128xf32>
    %c0_33 = arith.constant 0 : index
    %c0_34 = arith.constant 0 : index
    %c20 = arith.constant 20 : index
    %c0_35 = arith.constant 0 : index
    %31 = vector.load %arg2[%c0_33, %c0_34, %c20, %c0_35] : memref<1x1x342x32xbf16, #tpu.memory_space<vmem>>, vector<1x1x288x32xbf16>
    %32 = vector.shape_cast %31 : vector<1x1x288x32xbf16> to vector<288x32xbf16>
    %c5 = arith.constant 5 : index
    %c0_36 = arith.constant 0 : index
    %c0_37 = arith.constant 0 : index
    %33 = vector.load %arg5[%c5, %c0_36, %c0_37] : memref<27x32x128xbf16, #tpu.memory_space<vmem>>, vector<1x32x128xbf16>
    %34 = vector.shape_cast %33 : vector<1x32x128xbf16> to vector<32x128xbf16>
    %cst_38 = arith.constant dense<0.000000e+00> : vector<288x128xf32>
    %35 = tpu.matmul %32, %34, %cst_38 {dimension_numbers = #tpu.dot_dimension_numbers<[1], [0], [0], [1], [0, 0, 1, 1], [], []>} : vector<288x32xbf16>, vector<32x128xbf16>, vector<288x128xf32> -> vector<288x128xf32>
    %36 = arith.addf %30, %35 : vector<288x128xf32>
    %c0_39 = arith.constant 0 : index
    %c0_40 = arith.constant 0 : index
    %c36 = arith.constant 36 : index
    %c0_41 = arith.constant 0 : index
    %37 = vector.load %arg2[%c0_39, %c0_40, %c36, %c0_41] : memref<1x1x342x32xbf16, #tpu.memory_space<vmem>>, vector<1x1x288x32xbf16>
    %38 = vector.shape_cast %37 : vector<1x1x288x32xbf16> to vector<288x32xbf16>
    %c6 = arith.constant 6 : index
    %c0_42 = arith.constant 0 : index
    %c0_43 = arith.constant 0 : index
    %39 = vector.load %arg5[%c6, %c0_42, %c0_43] : memref<27x32x128xbf16, #tpu.memory_space<vmem>>, vector<1x32x128xbf16>
    %40 = vector.shape_cast %39 : vector<1x32x128xbf16> to vector<32x128xbf16>
    %cst_44 = arith.constant dense<0.000000e+00> : vector<288x128xf32>
    %41 = tpu.matmul %38, %40, %cst_44 {dimension_numbers = #tpu.dot_dimension_numbers<[1], [0], [0], [1], [0, 0, 1, 1], [], []>} : vector<288x32xbf16>, vector<32x128xbf16>, vector<288x128xf32> -> vector<288x128xf32>
    %42 = arith.addf %36, %41 : vector<288x128xf32>
    %c0_45 = arith.constant 0 : index
    %c0_46 = arith.constant 0 : index
    %c37 = arith.constant 37 : index
    %c0_47 = arith.constant 0 : index
    %43 = vector.load %arg2[%c0_45, %c0_46, %c37, %c0_47] : memref<1x1x342x32xbf16, #tpu.memory_space<vmem>>, vector<1x1x288x32xbf16>
    %44 = vector.shape_cast %43 : vector<1x1x288x32xbf16> to vector<288x32xbf16>
    %c7 = arith.constant 7 : index
    %c0_48 = arith.constant 0 : index
    %c0_49 = arith.constant 0 : index
    %45 = vector.load %arg5[%c7, %c0_48, %c0_49] : memref<27x32x128xbf16, #tpu.memory_space<vmem>>, vector<1x32x128xbf16>
    %46 = vector.shape_cast %45 : vector<1x32x128xbf16> to vector<32x128xbf16>
    %cst_50 = arith.constant dense<0.000000e+00> : vector<288x128xf32>
    %47 = tpu.matmul %44, %46, %cst_50 {dimension_numbers = #tpu.dot_dimension_numbers<[1], [0], [0], [1], [0, 0, 1, 1], [], []>} : vector<288x32xbf16>, vector<32x128xbf16>, vector<288x128xf32> -> vector<288x128xf32>
    %48 = arith.addf %42, %47 : vector<288x128xf32>
    %c0_51 = arith.constant 0 : index
    %c0_52 = arith.constant 0 : index
    %c38 = arith.constant 38 : index
    %c0_53 = arith.constant 0 : index
    %49 = vector.load %arg2[%c0_51, %c0_52, %c38, %c0_53] : memref<1x1x342x32xbf16, #tpu.memory_space<vmem>>, vector<1x1x288x32xbf16>
    %50 = vector.shape_cast %49 : vector<1x1x288x32xbf16> to vector<288x32xbf16>
    %c8 = arith.constant 8 : index
    %c0_54 = arith.constant 0 : index
    %c0_55 = arith.constant 0 : index
    %51 = vector.load %arg5[%c8, %c0_54, %c0_55] : memref<27x32x128xbf16, #tpu.memory_space<vmem>>, vector<1x32x128xbf16>
    %52 = vector.shape_cast %51 : vector<1x32x128xbf16> to vector<32x128xbf16>
    %cst_56 = arith.constant dense<0.000000e+00> : vector<288x128xf32>
    %53 = tpu.matmul %50, %52, %cst_56 {dimension_numbers = #tpu.dot_dimension_numbers<[1], [0], [0], [1], [0, 0, 1, 1], [], []>} : vector<288x32xbf16>, vector<32x128xbf16>, vector<288x128xf32> -> vector<288x128xf32>
    %54 = arith.addf %48, %53 : vector<288x128xf32>
    %c0_57 = arith.constant 0 : index
    %c0_58 = arith.constant 0 : index
    %c0_59 = arith.constant 0 : index
    %c0_60 = arith.constant 0 : index
    %55 = vector.load %arg3[%c0_57, %c0_58, %c0_59, %c0_60] : memref<1x1x342x32xbf16, #tpu.memory_space<vmem>>, vector<1x1x288x32xbf16>
    %56 = vector.shape_cast %55 : vector<1x1x288x32xbf16> to vector<288x32xbf16>
    %c9 = arith.constant 9 : index
    %c0_61 = arith.constant 0 : index
    %c0_62 = arith.constant 0 : index
    %57 = vector.load %arg5[%c9, %c0_61, %c0_62] : memref<27x32x128xbf16, #tpu.memory_space<vmem>>, vector<1x32x128xbf16>
    %58 = vector.shape_cast %57 : vector<1x32x128xbf16> to vector<32x128xbf16>
    %cst_63 = arith.constant dense<0.000000e+00> : vector<288x128xf32>
    %59 = tpu.matmul %56, %58, %cst_63 {dimension_numbers = #tpu.dot_dimension_numbers<[1], [0], [0], [1], [0, 0, 1, 1], [], []>} : vector<288x32xbf16>, vector<32x128xbf16>, vector<288x128xf32> -> vector<288x128xf32>
    %60 = arith.addf %54, %59 : vector<288x128xf32>
    %c0_64 = arith.constant 0 : index
    %c0_65 = arith.constant 0 : index
    %c1_66 = arith.constant 1 : index
    %c0_67 = arith.constant 0 : index
    %61 = vector.load %arg3[%c0_64, %c0_65, %c1_66, %c0_67] : memref<1x1x342x32xbf16, #tpu.memory_space<vmem>>, vector<1x1x288x32xbf16>
    %62 = vector.shape_cast %61 : vector<1x1x288x32xbf16> to vector<288x32xbf16>
    %c10 = arith.constant 10 : index
    %c0_68 = arith.constant 0 : index
    %c0_69 = arith.constant 0 : index
    %63 = vector.load %arg5[%c10, %c0_68, %c0_69] : memref<27x32x128xbf16, #tpu.memory_space<vmem>>, vector<1x32x128xbf16>
    %64 = vector.shape_cast %63 : vector<1x32x128xbf16> to vector<32x128xbf16>
    %cst_70 = arith.constant dense<0.000000e+00> : vector<288x128xf32>
    %65 = tpu.matmul %62, %64, %cst_70 {dimension_numbers = #tpu.dot_dimension_numbers<[1], [0], [0], [1], [0, 0, 1, 1], [], []>} : vector<288x32xbf16>, vector<32x128xbf16>, vector<288x128xf32> -> vector<288x128xf32>
    %66 = arith.addf %60, %65 : vector<288x128xf32>
    %c0_71 = arith.constant 0 : index
    %c0_72 = arith.constant 0 : index
    %c2_73 = arith.constant 2 : index
    %c0_74 = arith.constant 0 : index
    %67 = vector.load %arg3[%c0_71, %c0_72, %c2_73, %c0_74] : memref<1x1x342x32xbf16, #tpu.memory_space<vmem>>, vector<1x1x288x32xbf16>
    %68 = vector.shape_cast %67 : vector<1x1x288x32xbf16> to vector<288x32xbf16>
    %c11 = arith.constant 11 : index
    %c0_75 = arith.constant 0 : index
    %c0_76 = arith.constant 0 : index
    %69 = vector.load %arg5[%c11, %c0_75, %c0_76] : memref<27x32x128xbf16, #tpu.memory_space<vmem>>, vector<1x32x128xbf16>
    %70 = vector.shape_cast %69 : vector<1x32x128xbf16> to vector<32x128xbf16>
    %cst_77 = arith.constant dense<0.000000e+00> : vector<288x128xf32>
    %71 = tpu.matmul %68, %70, %cst_77 {dimension_numbers = #tpu.dot_dimension_numbers<[1], [0], [0], [1], [0, 0, 1, 1], [], []>} : vector<288x32xbf16>, vector<32x128xbf16>, vector<288x128xf32> -> vector<288x128xf32>
    %72 = arith.addf %66, %71 : vector<288x128xf32>
    %c0_78 = arith.constant 0 : index
    %c0_79 = arith.constant 0 : index
    %c18_80 = arith.constant 18 : index
    %c0_81 = arith.constant 0 : index
    %73 = vector.load %arg3[%c0_78, %c0_79, %c18_80, %c0_81] : memref<1x1x342x32xbf16, #tpu.memory_space<vmem>>, vector<1x1x288x32xbf16>
    %74 = vector.shape_cast %73 : vector<1x1x288x32xbf16> to vector<288x32xbf16>
    %c12 = arith.constant 12 : index
    %c0_82 = arith.constant 0 : index
    %c0_83 = arith.constant 0 : index
    %75 = vector.load %arg5[%c12, %c0_82, %c0_83] : memref<27x32x128xbf16, #tpu.memory_space<vmem>>, vector<1x32x128xbf16>
    %76 = vector.shape_cast %75 : vector<1x32x128xbf16> to vector<32x128xbf16>
    %cst_84 = arith.constant dense<0.000000e+00> : vector<288x128xf32>
    %77 = tpu.matmul %74, %76, %cst_84 {dimension_numbers = #tpu.dot_dimension_numbers<[1], [0], [0], [1], [0, 0, 1, 1], [], []>} : vector<288x32xbf16>, vector<32x128xbf16>, vector<288x128xf32> -> vector<288x128xf32>
    %78 = arith.addf %72, %77 : vector<288x128xf32>
    %c0_85 = arith.constant 0 : index
    %c0_86 = arith.constant 0 : index
    %c19_87 = arith.constant 19 : index
    %c0_88 = arith.constant 0 : index
    %79 = vector.load %arg3[%c0_85, %c0_86, %c19_87, %c0_88] : memref<1x1x342x32xbf16, #tpu.memory_space<vmem>>, vector<1x1x288x32xbf16>
    %80 = vector.shape_cast %79 : vector<1x1x288x32xbf16> to vector<288x32xbf16>
    %c13 = arith.constant 13 : index
    %c0_89 = arith.constant 0 : index
    %c0_90 = arith.constant 0 : index
    %81 = vector.load %arg5[%c13, %c0_89, %c0_90] : memref<27x32x128xbf16, #tpu.memory_space<vmem>>, vector<1x32x128xbf16>
    %82 = vector.shape_cast %81 : vector<1x32x128xbf16> to vector<32x128xbf16>
    %cst_91 = arith.constant dense<0.000000e+00> : vector<288x128xf32>
    %83 = tpu.matmul %80, %82, %cst_91 {dimension_numbers = #tpu.dot_dimension_numbers<[1], [0], [0], [1], [0, 0, 1, 1], [], []>} : vector<288x32xbf16>, vector<32x128xbf16>, vector<288x128xf32> -> vector<288x128xf32>
    %84 = arith.addf %78, %83 : vector<288x128xf32>
    %c0_92 = arith.constant 0 : index
    %c0_93 = arith.constant 0 : index
    %c20_94 = arith.constant 20 : index
    %c0_95 = arith.constant 0 : index
    %85 = vector.load %arg3[%c0_92, %c0_93, %c20_94, %c0_95] : memref<1x1x342x32xbf16, #tpu.memory_space<vmem>>, vector<1x1x288x32xbf16>
    %86 = vector.shape_cast %85 : vector<1x1x288x32xbf16> to vector<288x32xbf16>
    %c14 = arith.constant 14 : index
    %c0_96 = arith.constant 0 : index
    %c0_97 = arith.constant 0 : index
    %87 = vector.load %arg5[%c14, %c0_96, %c0_97] : memref<27x32x128xbf16, #tpu.memory_space<vmem>>, vector<1x32x128xbf16>
    %88 = vector.shape_cast %87 : vector<1x32x128xbf16> to vector<32x128xbf16>
    %cst_98 = arith.constant dense<0.000000e+00> : vector<288x128xf32>
    %89 = tpu.matmul %86, %88, %cst_98 {dimension_numbers = #tpu.dot_dimension_numbers<[1], [0], [0], [1], [0, 0, 1, 1], [], []>} : vector<288x32xbf16>, vector<32x128xbf16>, vector<288x128xf32> -> vector<288x128xf32>
    %90 = arith.addf %84, %89 : vector<288x128xf32>
    %c0_99 = arith.constant 0 : index
    %c0_100 = arith.constant 0 : index
    %c36_101 = arith.constant 36 : index
    %c0_102 = arith.constant 0 : index
    %91 = vector.load %arg3[%c0_99, %c0_100, %c36_101, %c0_102] : memref<1x1x342x32xbf16, #tpu.memory_space<vmem>>, vector<1x1x288x32xbf16>
    %92 = vector.shape_cast %91 : vector<1x1x288x32xbf16> to vector<288x32xbf16>
    %c15 = arith.constant 15 : index
    %c0_103 = arith.constant 0 : index
    %c0_104 = arith.constant 0 : index
    %93 = vector.load %arg5[%c15, %c0_103, %c0_104] : memref<27x32x128xbf16, #tpu.memory_space<vmem>>, vector<1x32x128xbf16>
    %94 = vector.shape_cast %93 : vector<1x32x128xbf16> to vector<32x128xbf16>
    %cst_105 = arith.constant dense<0.000000e+00> : vector<288x128xf32>
    %95 = tpu.matmul %92, %94, %cst_105 {dimension_numbers = #tpu.dot_dimension_numbers<[1], [0], [0], [1], [0, 0, 1, 1], [], []>} : vector<288x32xbf16>, vector<32x128xbf16>, vector<288x128xf32> -> vector<288x128xf32>
    %96 = arith.addf %90, %95 : vector<288x128xf32>
    %c0_106 = arith.constant 0 : index
    %c0_107 = arith.constant 0 : index
    %c37_108 = arith.constant 37 : index
    %c0_109 = arith.constant 0 : index
    %97 = vector.load %arg3[%c0_106, %c0_107, %c37_108, %c0_109] : memref<1x1x342x32xbf16, #tpu.memory_space<vmem>>, vector<1x1x288x32xbf16>
    %98 = vector.shape_cast %97 : vector<1x1x288x32xbf16> to vector<288x32xbf16>
    %c16 = arith.constant 16 : index
    %c0_110 = arith.constant 0 : index
    %c0_111 = arith.constant 0 : index
    %99 = vector.load %arg5[%c16, %c0_110, %c0_111] : memref<27x32x128xbf16, #tpu.memory_space<vmem>>, vector<1x32x128xbf16>
    %100 = vector.shape_cast %99 : vector<1x32x128xbf16> to vector<32x128xbf16>
    %cst_112 = arith.constant dense<0.000000e+00> : vector<288x128xf32>
    %101 = tpu.matmul %98, %100, %cst_112 {dimension_numbers = #tpu.dot_dimension_numbers<[1], [0], [0], [1], [0, 0, 1, 1], [], []>} : vector<288x32xbf16>, vector<32x128xbf16>, vector<288x128xf32> -> vector<288x128xf32>
    %102 = arith.addf %96, %101 : vector<288x128xf32>
    %c0_113 = arith.constant 0 : index
    %c0_114 = arith.constant 0 : index
    %c38_115 = arith.constant 38 : index
    %c0_116 = arith.constant 0 : index
    %103 = vector.load %arg3[%c0_113, %c0_114, %c38_115, %c0_116] : memref<1x1x342x32xbf16, #tpu.memory_space<vmem>>, vector<1x1x288x32xbf16>
    %104 = vector.shape_cast %103 : vector<1x1x288x32xbf16> to vector<288x32xbf16>
    %c17 = arith.constant 17 : index
    %c0_117 = arith.constant 0 : index
    %c0_118 = arith.constant 0 : index
    %105 = vector.load %arg5[%c17, %c0_117, %c0_118] : memref<27x32x128xbf16, #tpu.memory_space<vmem>>, vector<1x32x128xbf16>
    %106 = vector.shape_cast %105 : vector<1x32x128xbf16> to vector<32x128xbf16>
    %cst_119 = arith.constant dense<0.000000e+00> : vector<288x128xf32>
    %107 = tpu.matmul %104, %106, %cst_119 {dimension_numbers = #tpu.dot_dimension_numbers<[1], [0], [0], [1], [0, 0, 1, 1], [], []>} : vector<288x32xbf16>, vector<32x128xbf16>, vector<288x128xf32> -> vector<288x128xf32>
    %108 = arith.addf %102, %107 : vector<288x128xf32>
    %c0_120 = arith.constant 0 : index
    %c0_121 = arith.constant 0 : index
    %c0_122 = arith.constant 0 : index
    %c0_123 = arith.constant 0 : index
    %109 = vector.load %arg4[%c0_120, %c0_121, %c0_122, %c0_123] : memref<1x1x342x32xbf16, #tpu.memory_space<vmem>>, vector<1x1x288x32xbf16>
    %110 = vector.shape_cast %109 : vector<1x1x288x32xbf16> to vector<288x32xbf16>
    %c18_124 = arith.constant 18 : index
    %c0_125 = arith.constant 0 : index
    %c0_126 = arith.constant 0 : index
    %111 = vector.load %arg5[%c18_124, %c0_125, %c0_126] : memref<27x32x128xbf16, #tpu.memory_space<vmem>>, vector<1x32x128xbf16>
    %112 = vector.shape_cast %111 : vector<1x32x128xbf16> to vector<32x128xbf16>
    %cst_127 = arith.constant dense<0.000000e+00> : vector<288x128xf32>
    %113 = tpu.matmul %110, %112, %cst_127 {dimension_numbers = #tpu.dot_dimension_numbers<[1], [0], [0], [1], [0, 0, 1, 1], [], []>} : vector<288x32xbf16>, vector<32x128xbf16>, vector<288x128xf32> -> vector<288x128xf32>
    %114 = arith.addf %108, %113 : vector<288x128xf32>
    %c0_128 = arith.constant 0 : index
    %c0_129 = arith.constant 0 : index
    %c1_130 = arith.constant 1 : index
    %c0_131 = arith.constant 0 : index
    %115 = vector.load %arg4[%c0_128, %c0_129, %c1_130, %c0_131] : memref<1x1x342x32xbf16, #tpu.memory_space<vmem>>, vector<1x1x288x32xbf16>
    %116 = vector.shape_cast %115 : vector<1x1x288x32xbf16> to vector<288x32xbf16>
    %c19_132 = arith.constant 19 : index
    %c0_133 = arith.constant 0 : index
    %c0_134 = arith.constant 0 : index
    %117 = vector.load %arg5[%c19_132, %c0_133, %c0_134] : memref<27x32x128xbf16, #tpu.memory_space<vmem>>, vector<1x32x128xbf16>
    %118 = vector.shape_cast %117 : vector<1x32x128xbf16> to vector<32x128xbf16>
    %cst_135 = arith.constant dense<0.000000e+00> : vector<288x128xf32>
    %119 = tpu.matmul %116, %118, %cst_135 {dimension_numbers = #tpu.dot_dimension_numbers<[1], [0], [0], [1], [0, 0, 1, 1], [], []>} : vector<288x32xbf16>, vector<32x128xbf16>, vector<288x128xf32> -> vector<288x128xf32>
    %120 = arith.addf %114, %119 : vector<288x128xf32>
    %c0_136 = arith.constant 0 : index
    %c0_137 = arith.constant 0 : index
    %c2_138 = arith.constant 2 : index
    %c0_139 = arith.constant 0 : index
    %121 = vector.load %arg4[%c0_136, %c0_137, %c2_138, %c0_139] : memref<1x1x342x32xbf16, #tpu.memory_space<vmem>>, vector<1x1x288x32xbf16>
    %122 = vector.shape_cast %121 : vector<1x1x288x32xbf16> to vector<288x32xbf16>
    %c20_140 = arith.constant 20 : index
    %c0_141 = arith.constant 0 : index
    %c0_142 = arith.constant 0 : index
    %123 = vector.load %arg5[%c20_140, %c0_141, %c0_142] : memref<27x32x128xbf16, #tpu.memory_space<vmem>>, vector<1x32x128xbf16>
    %124 = vector.shape_cast %123 : vector<1x32x128xbf16> to vector<32x128xbf16>
    %cst_143 = arith.constant dense<0.000000e+00> : vector<288x128xf32>
    %125 = tpu.matmul %122, %124, %cst_143 {dimension_numbers = #tpu.dot_dimension_numbers<[1], [0], [0], [1], [0, 0, 1, 1], [], []>} : vector<288x32xbf16>, vector<32x128xbf16>, vector<288x128xf32> -> vector<288x128xf32>
    %126 = arith.addf %120, %125 : vector<288x128xf32>
    %c0_144 = arith.constant 0 : index
    %c0_145 = arith.constant 0 : index
    %c18_146 = arith.constant 18 : index
    %c0_147 = arith.constant 0 : index
    %127 = vector.load %arg4[%c0_144, %c0_145, %c18_146, %c0_147] : memref<1x1x342x32xbf16, #tpu.memory_space<vmem>>, vector<1x1x288x32xbf16>
    %128 = vector.shape_cast %127 : vector<1x1x288x32xbf16> to vector<288x32xbf16>
    %c21 = arith.constant 21 : index
    %c0_148 = arith.constant 0 : index
    %c0_149 = arith.constant 0 : index
    %129 = vector.load %arg5[%c21, %c0_148, %c0_149] : memref<27x32x128xbf16, #tpu.memory_space<vmem>>, vector<1x32x128xbf16>
    %130 = vector.shape_cast %129 : vector<1x32x128xbf16> to vector<32x128xbf16>
    %cst_150 = arith.constant dense<0.000000e+00> : vector<288x128xf32>
    %131 = tpu.matmul %128, %130, %cst_150 {dimension_numbers = #tpu.dot_dimension_numbers<[1], [0], [0], [1], [0, 0, 1, 1], [], []>} : vector<288x32xbf16>, vector<32x128xbf16>, vector<288x128xf32> -> vector<288x128xf32>
    %132 = arith.addf %126, %131 : vector<288x128xf32>
    %c0_151 = arith.constant 0 : index
    %c0_152 = arith.constant 0 : index
    %c19_153 = arith.constant 19 : index
    %c0_154 = arith.constant 0 : index
    %133 = vector.load %arg4[%c0_151, %c0_152, %c19_153, %c0_154] : memref<1x1x342x32xbf16, #tpu.memory_space<vmem>>, vector<1x1x288x32xbf16>
    %134 = vector.shape_cast %133 : vector<1x1x288x32xbf16> to vector<288x32xbf16>
    %c22 = arith.constant 22 : index
    %c0_155 = arith.constant 0 : index
    %c0_156 = arith.constant 0 : index
    %135 = vector.load %arg5[%c22, %c0_155, %c0_156] : memref<27x32x128xbf16, #tpu.memory_space<vmem>>, vector<1x32x128xbf16>
    %136 = vector.shape_cast %135 : vector<1x32x128xbf16> to vector<32x128xbf16>
    %cst_157 = arith.constant dense<0.000000e+00> : vector<288x128xf32>
    %137 = tpu.matmul %134, %136, %cst_157 {dimension_numbers = #tpu.dot_dimension_numbers<[1], [0], [0], [1], [0, 0, 1, 1], [], []>} : vector<288x32xbf16>, vector<32x128xbf16>, vector<288x128xf32> -> vector<288x128xf32>
    %138 = arith.addf %132, %137 : vector<288x128xf32>
    %c0_158 = arith.constant 0 : index
    %c0_159 = arith.constant 0 : index
    %c20_160 = arith.constant 20 : index
    %c0_161 = arith.constant 0 : index
    %139 = vector.load %arg4[%c0_158, %c0_159, %c20_160, %c0_161] : memref<1x1x342x32xbf16, #tpu.memory_space<vmem>>, vector<1x1x288x32xbf16>
    %140 = vector.shape_cast %139 : vector<1x1x288x32xbf16> to vector<288x32xbf16>
    %c23 = arith.constant 23 : index
    %c0_162 = arith.constant 0 : index
    %c0_163 = arith.constant 0 : index
    %141 = vector.load %arg5[%c23, %c0_162, %c0_163] : memref<27x32x128xbf16, #tpu.memory_space<vmem>>, vector<1x32x128xbf16>
    %142 = vector.shape_cast %141 : vector<1x32x128xbf16> to vector<32x128xbf16>
    %cst_164 = arith.constant dense<0.000000e+00> : vector<288x128xf32>
    %143 = tpu.matmul %140, %142, %cst_164 {dimension_numbers = #tpu.dot_dimension_numbers<[1], [0], [0], [1], [0, 0, 1, 1], [], []>} : vector<288x32xbf16>, vector<32x128xbf16>, vector<288x128xf32> -> vector<288x128xf32>
    %144 = arith.addf %138, %143 : vector<288x128xf32>
    %c0_165 = arith.constant 0 : index
    %c0_166 = arith.constant 0 : index
    %c36_167 = arith.constant 36 : index
    %c0_168 = arith.constant 0 : index
    %145 = vector.load %arg4[%c0_165, %c0_166, %c36_167, %c0_168] : memref<1x1x342x32xbf16, #tpu.memory_space<vmem>>, vector<1x1x288x32xbf16>
    %146 = vector.shape_cast %145 : vector<1x1x288x32xbf16> to vector<288x32xbf16>
    %c24 = arith.constant 24 : index
    %c0_169 = arith.constant 0 : index
    %c0_170 = arith.constant 0 : index
    %147 = vector.load %arg5[%c24, %c0_169, %c0_170] : memref<27x32x128xbf16, #tpu.memory_space<vmem>>, vector<1x32x128xbf16>
    %148 = vector.shape_cast %147 : vector<1x32x128xbf16> to vector<32x128xbf16>
    %cst_171 = arith.constant dense<0.000000e+00> : vector<288x128xf32>
    %149 = tpu.matmul %146, %148, %cst_171 {dimension_numbers = #tpu.dot_dimension_numbers<[1], [0], [0], [1], [0, 0, 1, 1], [], []>} : vector<288x32xbf16>, vector<32x128xbf16>, vector<288x128xf32> -> vector<288x128xf32>
    %150 = arith.addf %144, %149 : vector<288x128xf32>
    %c0_172 = arith.constant 0 : index
    %c0_173 = arith.constant 0 : index
    %c37_174 = arith.constant 37 : index
    %c0_175 = arith.constant 0 : index
    %151 = vector.load %arg4[%c0_172, %c0_173, %c37_174, %c0_175] : memref<1x1x342x32xbf16, #tpu.memory_space<vmem>>, vector<1x1x288x32xbf16>
    %152 = vector.shape_cast %151 : vector<1x1x288x32xbf16> to vector<288x32xbf16>
    %c25 = arith.constant 25 : index
    %c0_176 = arith.constant 0 : index
    %c0_177 = arith.constant 0 : index
    %153 = vector.load %arg5[%c25, %c0_176, %c0_177] : memref<27x32x128xbf16, #tpu.memory_space<vmem>>, vector<1x32x128xbf16>
    %154 = vector.shape_cast %153 : vector<1x32x128xbf16> to vector<32x128xbf16>
    %cst_178 = arith.constant dense<0.000000e+00> : vector<288x128xf32>
    %155 = tpu.matmul %152, %154, %cst_178 {dimension_numbers = #tpu.dot_dimension_numbers<[1], [0], [0], [1], [0, 0, 1, 1], [], []>} : vector<288x32xbf16>, vector<32x128xbf16>, vector<288x128xf32> -> vector<288x128xf32>
    %156 = arith.addf %150, %155 : vector<288x128xf32>
    %c0_179 = arith.constant 0 : index
    %c0_180 = arith.constant 0 : index
    %c38_181 = arith.constant 38 : index
    %c0_182 = arith.constant 0 : index
    %157 = vector.load %arg4[%c0_179, %c0_180, %c38_181, %c0_182] : memref<1x1x342x32xbf16, #tpu.memory_space<vmem>>, vector<1x1x288x32xbf16>
    %158 = vector.shape_cast %157 : vector<1x1x288x32xbf16> to vector<288x32xbf16>
    %c26 = arith.constant 26 : index
    %c0_183 = arith.constant 0 : index
    %c0_184 = arith.constant 0 : index
    %159 = vector.load %arg5[%c26, %c0_183, %c0_184] : memref<27x32x128xbf16, #tpu.memory_space<vmem>>, vector<1x32x128xbf16>
    %160 = vector.shape_cast %159 : vector<1x32x128xbf16> to vector<32x128xbf16>
    %cst_185 = arith.constant dense<0.000000e+00> : vector<288x128xf32>
    %161 = tpu.matmul %158, %160, %cst_185 {dimension_numbers = #tpu.dot_dimension_numbers<[1], [0], [0], [1], [0, 0, 1, 1], [], []>} : vector<288x32xbf16>, vector<32x128xbf16>, vector<288x128xf32> -> vector<288x128xf32>
    %162 = arith.addf %156, %161 : vector<288x128xf32>
    %c0_186 = arith.constant 0 : index
    %c0_187 = arith.constant 0 : index
    %c0_188 = arith.constant 0 : index
    %c0_189 = arith.constant 0 : index
    %163 = vector.load %arg6[%c0_186, %c0_187, %c0_188, %c0_189] : memref<1x1x288x128xf32, #tpu.memory_space<vmem>>, vector<1x1x288x128xf32>
    %164 = vector.shape_cast %163 : vector<1x1x288x128xf32> to vector<288x128xf32>
    %165 = vector.shape_cast %162 : vector<288x128xf32> to vector<1x1x288x128xf32>
    tpu.vector_store %arg6[%c0_186, %c0_187, %c0_188, %c0_189], %165 {strides = array<i32>} : memref<1x1x288x128xf32, #tpu.memory_space<vmem>>, vector<1x1x288x128xf32>,
    return
  }
  func.func @transform_0(%arg0: i32, %arg1: i32) -> (i32, i32, i32, i32) {
    %c0_i32 = arith.constant 0 : i32
    %0 = arith.addi %arg1, %c0_i32 : i32
    %c0_i32_0 = arith.constant 0 : i32
    %c0_i32_1 = arith.constant 0 : i32
    %c0_i32_2 = arith.constant 0 : i32
    return %arg0, %0, %c0_i32_0, %c0_i32_1 : i32, i32, i32, i32
  }
  func.func @transform_1(%arg0: i32, %arg1: i32) -> (i32, i32, i32, i32) {
    %c1_i32 = arith.constant 1 : i32
    %0 = arith.addi %arg1, %c1_i32 : i32
    %c0_i32 = arith.constant 0 : i32
    %c0_i32_0 = arith.constant 0 : i32
    %c0_i32_1 = arith.constant 0 : i32
    return %arg0, %0, %c0_i32, %c0_i32_0 : i32, i32, i32, i32
  }
  func.func @transform_2(%arg0: i32, %arg1: i32) -> (i32, i32, i32, i32) {
    %c2_i32 = arith.constant 2 : i32
    %0 = arith.addi %arg1, %c2_i32 : i32
    %c0_i32 = arith.constant 0 : i32
    %c0_i32_0 = arith.constant 0 : i32
    %c0_i32_1 = arith.constant 0 : i32
    return %arg0, %0, %c0_i32, %c0_i32_0 : i32, i32, i32, i32
  }
  func.func @transform_3(%arg0: i32, %arg1: i32) -> (i32, i32, i32) {
    %c0_i32 = arith.constant 0 : i32
    %c0_i32_0 = arith.constant 0 : i32
    %c0_i32_1 = arith.constant 0 : i32
    %c0_i32_2 = arith.constant 0 : i32
    return %c0_i32, %c0_i32_0, %c0_i32_1 : i32, i32, i32
  }
  func.func @transform_4(%arg0: i32, %arg1: i32) -> (i32, i32, i32, i32) {
    %c0_i32 = arith.constant 0 : i32
    %c0_i32_0 = arith.constant 0 : i32
    %c0_i32_1 = arith.constant 0 : i32
    return %arg0, %arg1, %c0_i32, %c0_i32_0 : i32, i32, i32, i32
  }
}

</mosaic_0001>

<bundles_post_ra>
// kernel: bilinear_upsample_25d.1
= control target key start
LH: loop header
LB: loop body
LE: loop exit
PB: predicated region body
PF: predicated region fallthrough
CT: control target
= control target key end

     0   :  { %s11474_s15 = smov 0   ;;  %s11476_s16 = smov 0   ;;  %s14540_s0 = inlined_call_operand.vmem [shape: bf16[2,6,342,32], index: 0, kind: input, shape index: {}, may-alias: {0,1,2}]   ;;  %s14541_s1 = inlined_call_operand.vmem [shape: bf16[2,6,342,32], index: 1, kind: input, shape index: {}, may-alias: {0,1,2}]   ;;  %s14542_s2 = inlined_call_operand.vmem [shape: bf16[2,6,342,32], index: 2, kind: input, shape index: {}, may-alias: {0,1,2}]   ;;  %s14543_s3 = inlined_call_operand.vmem [shape: bf16[27,32,128], index: 3, kind: input, shape index: {}]   ;;  %s14544_s4 = inlined_call_operand.vmem [shape: f32[2,4,288,128], index: 4, kind: output, shape index: {}]  }
   0x1   :  { %s11478_s17 = smov 0   ;;  %s11480_s18 = smov 0  }
   0x2   :  { %s11482_s19 = smov 0  }
   0x3 LB: > { %s23_s20 = sadd.s32 1, %s11439_s17  ;;  %s26_s21 = sadd.s32 1, %s11443_s18  ;;  %s11447_s19 = sphi %s11482_s19, %s14_s19   ;;  %s11443_s18 = sphi %s11480_s18, %s14568_s18   ;;  %s11439_s17 = sphi %s11478_s17, %s14567_s17   ;;  %s11435_s16 = sphi %s11476_s16, %s14566_s16   ;;  %s11431_s15 = sphi %s11474_s15, %s14565_s15  }
   0x4   : > { %p24_p0 = scmp.ge.s32.totalorder %s23_s20, 4  ;;  %p9473_p1 = scmp.ge.s32.totalorder %s11447_s19, 1 }
   0x5   : > { %p222_p2 = scmp.lt.s32.totalorder %s11447_s19, 9 }
   0x6   : > { %s14570_s20 = smov (%p24_p0, %s23_s20), 0  ;;  %s14572_s21 = smov (!%p24_p0, %s26_s21), %s11443_s18 }
   0x7   : > { %p223_p3 = pnand %p9473_p1, %p222_p2  ;;  %p28_p4 = scmp.ge.s32.totalorder %s14572_s21, 2 }
   0x9   : > { %s14574_s21 = smov (%p28_p4, %s14572_s21), 0  ;;  %226 = sbr.rel (%p223_p3) target bundleno = 2110 (0x83e), region = 36 }
   0xe   : > { %v11060_v0 = vld [vmem:[%s14543_s3 + $0x8] sm:$0xff]  ;;  %p276_p5 = scmp.lt.s32.totalorder %s11435_s16, 1  ;;  %p278_p6 = scmp.lt.s32.totalorder %s11431_s15, 5  ;;  %v11062_v2 = vld [vmem:[%s14543_s3 + $0x18] sm:$0xff]  ;;  %v11059_v3 = vld [vmem:[%s14543_s3] sm:$0xff]  ;;  %vm617_vm0 = vcmask 261120  }
   0xf   : > { %v11064_v1 = vld [vmem:[%s14543_s3 + $0x28] sm:$0xff]  ;;  %825 = vmatpush.bf16.msra.mxu1 %v11060_v0  ;;  %v11063_v4 = vld [vmem:[%s14543_s3 + $0x20] sm:$0xff]  ;;  %678 = vmatpush.bf16.msra.mxu0 %v11062_v2  ;;  %v11061_v5 = vld [vmem:[%s14543_s3 + $0x10] sm:$0xff]  ;;  %vm927_vm1 = vcmask 1046528   ;;  %vm456_vm2 = vsmask.f32 7424 }
  0x10   : > { %1037 = vmatpush.bf16.msra.mxu2 %v11064_v1  ;;  %s14576_s16 = smov (!%p276_p5, %s11435_s16), 1  ;;  %11306 = vmatpush.bf16.msra.mxu3 %v11062_v2  ;;  %v11106_v6 = vld [vmem:[%s14543_s3 + $0x68] sm:$0xff]  ;;  %v11087_v8 = vld [vmem:[%s14543_s3 + $0x58] sm:$0xff]  ;;  %vm1929_vm3 = vcmask 1045504   ;;  %vm1548_vm4 = vsmask.f32 6400 }
  0x11   : > { %s279_s6 = scalar_select %p278_p6, %s11431_s15, 5  ;;  %v11085_v7 = vld [vmem:[%s14543_s3 + $0x48] sm:$0xff]  ;;  %vm2550_vm5 = vsmask.f32 5376  ;;  %vm2931_vm6 = vcmask 1044480  }
  0x12   : > { %s11532_s11 = smul.u32 258, %s14576_s16  ;;  %s285_s13 = sadd.s32 1, %s11431_s15 }
  0x13   : > { %s11312_s14 = smul.u32 43, %s279_s6  ;;  %826 = vmatpush.bf16.msra.mxu1 %v11059_v3  ;;  %679 = vmatpush.bf16.msra.mxu0 %v11061_v5  ;;  %p288_p7 = scmp.lt.s32.totalorder %s285_s13, 5 }
  0x14   : > { %1038 = vmatpush.bf16.msra.mxu2 %v11063_v4  ;;  %11307 = vmatpush.bf16.msra.mxu3 %v11061_v5  ;;  %p309_p9 = scmp.lt.s32.totalorder %s11431_s15, 3  ;;  %s11317_s29 = smul.u32 144, %s14576_s16 }
  0x15   : > { %s282_s24 = sadd.s32 %s11532_s11, %s11312_s14  ;;  %s14578_s13 = smov (!%p288_p7, %s285_s13), 5 }
  0x16   : > { %s9474_s25 = sshll.u32 %s282_s24, 2 }
  0x17   : > { %1791 = vmatpush.bf16.msrb.mxu0 %v11085_v7  ;;  %s11544_s28 = scalar_lea.vmem %s14540_s0, %s9474_s25  ;;  %2039 = vmatpush.bf16.msrb.mxu1 %v11087_v8  ;;  %s11314_s25 = smul.u32 43, %s14578_s13 }
  0x18   : > { %2412 = vmatpush.bf16.msrb.mxu2 %v11106_v6  ;;  %11308 = vmatpush.bf16.msrb.mxu3 %v11060_v0  ;;  %v11286_v9 = vld [vmem:[%s11544_s28] sm:$0xff]   ;;  %v11042_v11 = vld [vmem:[%s11544_s28 + $0x8] sm:$0xff]  ;;  %v11552_v15 = vld [vmem:[%s11544_s28 + $0x70] sm:$0xff] }
  0x19   : > { %v11297_v10 = vld [vmem:[%s11544_s28] sm:$0xf0]  ;;  %v458_v12 = vshrl.u32 %v11286_v9, 16  ;;  %v460_v13 = vshll.u32 %v11286_v9, 16  ;;  %9584 = vmatmul.msk.bf16.vlgmr.msra.gmra.mxu1 %vm617_vm0, %v11286_v9  ;;  %v11298_v14 = vld [vmem:[%s11544_s28] sm:$0xe]  ;;  %s292_s5 = sadd.s32 %s11314_s25, %s11532_s11 }
  0x1a   : > { %v11299_v16 = vor.u32 %v11298_v14, %v11297_v10  ;;  %v929_v17 = vrot.slane %v11042_v11, 1  ;;  %v465_v18 = vshll.u32 %v11042_v11, 16  ;;  %v11555_v19 = vld [vmem:[%s11544_s28 + $0x78] sm:$0xff]  ;;  %v569_v21 = vshll.u32 %v11552_v15, 16  ;;  %v11043_v33 = vld [vmem:[%s11544_s28 + $0x10] sm:$0xff]  ;;  %v11571_v34 = vld [vmem:[%s11544_s28 + $0x80] sm:$0xff] }
  0x1b   : > { %v462_v20 = vrot.slane %v460_v13, 1  ;;  %v573_v22 = vshrl.u32 %v11552_v15, 16  ;;  %v577_v25 = vshll.u32 %v11555_v19, 16  ;;  %v469_v35 = vshrl.u32 %v11042_v11, 16  ;;  %v11044_v47 = vld [vmem:[%s11544_s28 + $0x18] sm:$0xff]  ;;  %v11584_v48 = vld [vmem:[%s11544_s28 + $0x88] sm:$0xff] }
  0x1c   : > { %11309 = vmatpush.bf16.msrb.mxu3 %v11059_v3  ;;  %v928_v23 = vrot.slane %v11299_v16, 1  ;;  %v467_v24 = vrot.slane %v465_v18, 1  ;;  %v11560_v27 = vrot.slane %v569_v21, 1  ;;  %v473_v36 = vshll.u32 %v11043_v33, 16  ;;  %v357_v59 = vld [vmem:[%s11544_s28 + $0x90] sm:$0x1] }
  0x1d   : > { %v463_v26 = vor.u32 %v462_v20, %v458_v12  ;;  %v579_v29 = vrot.slane %v577_v25, 1  ;;  %v581_v37 = vshrl.u32 %v11555_v19, 16  ;;  %v585_v38 = vshll.u32 %v11571_v34, 16  ;;  %v11045_v63 = vld [vmem:[%s11544_s28 + $0x20] sm:$0xff]  ;;  %v11046_v13 = vld [vmem:[%s11544_s28 + $0x28] sm:$0xff]  ;;  %s9475_s6 = sshll.u32 %s292_s5, 2 }
  0x1e   : > { %v930_v28 = vsel %vm927_vm1, %v928_v23, %v929_v17  ;;  %v575_v31 = vor.u32 %v573_v22, %v11560_v27  ;;  %v931_v39 = vrot.slane %v11043_v33, 1  ;;  %v471_v40 = vor.u32 %v469_v35, %v467_v24  ;;  %v11047_v23 = vld [vmem:[%s11544_s28 + $0x30] sm:$0xff]  ;;  %v11048_v35 = vld [vmem:[%s11544_s28 + $0x38] sm:$0xff]  ;;  %s12271_s9 = scalar_lea.vmem %s14541_s1, %s9475_s6  ;;  %s296_s5 = sadd.s32 2, %s11431_s15 }
  0x1f   : > { %9614 = vmatmul.msk.bf16.vlgmr.msra.gmra.mxu2 %vm617_vm0, %v930_v28  ;;  %v468_v30 = vsel %vm456_vm2, %v463_v26, %v467_v24  ;;  %v475_v41 = vrot.slane %v473_v36, 1  ;;  %v583_v42 = vor.u32 %v581_v37, %v579_v29  ;;  %v587_v43 = vrot.slane %v585_v38, 1  ;;  %v11086_v36 = vld [vmem:[%s14543_s3 + $0x50] sm:$0xff]  ;;  %p299_p8 = scmp.lt.s32.totalorder %s296_s5, 5  ;;  %s14582_s15 = smov (!%p309_p9, %s11431_s15), 3 }
  0x20   : > { %9558 = vmatmul.msk.bf16.vlgmr.msra.gmra.mxu0 %vm617_vm0, %v468_v30  ;;  %v580_v32 = vsel %vm456_vm2, %v575_v31, %v579_v29  ;;  %v932_v44 = vsel %vm927_vm1, %v929_v17, %v931_v39  ;;  %v477_v49 = vshrl.u32 %v11043_v33, 16  ;;  %v481_v50 = vshll.u32 %v11044_v47, 16  ;;  %2040 = vmatpush.bf16.msrb.mxu1 %v11086_v36  ;;  %s11316_s27 = smul.u32 36, %s14582_s15 }
  0x21   : > { %9572 = vmatmul.msk.bf16.vlgmr.msra.gmra.mxu3 %vm617_vm0, %v580_v32  ;;  %v476_v45 = vsel %vm456_vm2, %v471_v40, %v475_v41  ;;  %v588_v46 = vsel %vm456_vm2, %v583_v42, %v587_v43  ;;  %v589_v51 = vshrl.u32 %v11571_v34, 16  ;;  %v593_v52 = vshll.u32 %v11584_v48, 16  ;;  %v11105_v32 = vld [vmem:[%s14543_s3 + $0x60] sm:$0xff]  ;;  %s14580_s5 = smov (!%p299_p8, %s296_s5), 5 }
  0x22   : > { %11310 = vmatpush.bf16.msra.mxu3 %v11064_v1  ;;  %v933_v53 = vrot.slane %v11044_v47, 1  ;;  %v479_v54 = vor.u32 %v477_v49, %v475_v41  ;;  %v483_v55 = vrot.slane %v481_v50, 1  ;;  %v436_v62 = vunpack.c.l.b16 %v357_v59  ;;  %2413 = vmatpush.bf16.msrb.mxu2 %v11105_v32  ;;  %s11315_s8 = smul.u32 43, %s14580_s5  ;;  %s313_s15 = sadd.s32 %s11317_s29, %s11316_s27 }
  0x23   : > { %v591_v56 = vor.u32 %v589_v51, %v587_v43  ;;  %v595_v57 = vrot.slane %v593_v52, 1  ;;  %v485_v1 = vshrl.u32 %v11044_v47, 16  ;;  %v489_v2 = vshll.u32 %v11045_v63, 16  ;;  %s9477_s16 = sshll.u32 %s313_s15, 3 }
  0x24   : > { %v934_v58 = vsel %vm927_vm1, %v931_v39, %v933_v53  ;;  %v484_v60 = vsel %vm456_vm2, %v479_v54, %v483_v55  ;;  %v11597_v0 = vpack.c.b16 %v436_v62, %v436_v62  ;;  %v597_v3 = vshrl.u32 %v11584_v48, 16  ;;  %s303_s10 = sadd.s32 %s11315_s8, %s11532_s11 }
  0x25   : > { %v596_v61 = vsel %vm456_vm2, %v591_v56, %v595_v57  ;;  %v935_v5 = vrot.slane %v11045_v63, 1  ;;  %v487_v6 = vor.u32 %v485_v1, %v483_v55  ;;  %v491_v7 = vrot.slane %v489_v2, 1  ;;  %s9476_s12 = sshll.u32 %s303_s10, 2 }
  0x26   : > { %11311 = vmatpush.bf16.msra.mxu3 %v11063_v4  ;;  %v601_v4 = vshll.u32 %v11597_v0, 16  ;;  %v599_v8 = vor.u32 %v597_v3, %v595_v57  ;;  %v493_v14 = vshrl.u32 %v11045_v63, 16  ;;  %v497_v16 = vshll.u32 %v11046_v13, 16  ;;  %v11083_v57 = vld [vmem:[%s14543_s3 + $0x38] sm:$0xff]  ;;  %s13201_s14 = scalar_lea.vmem %s14542_s2, %s9476_s12 }
  0x27   : > { %v936_v10 = vsel %vm927_vm1, %v933_v53, %v935_v5  ;;  %v937_v17 = vrot.slane %v11046_v13, 1  ;;  %v501_v24 = vshrl.u32 %v11046_v13, 16  ;;  %v505_v25 = vshll.u32 %v11047_v23, 16  ;;  %v11050_v53 = vld [vmem:[%s11544_s28 + $0x48] sm:$0xff] }
  0x28   : > { %v603_v9 = vrot.slane %v601_v4, 1  ;;  %v495_v18 = vor.u32 %v493_v14, %v491_v7  ;;  %v499_v20 = vrot.slane %v497_v16, 1  ;;  %v939_v26 = vrot.slane %v11047_v23, 1 }
  0x29   : > { %9585 = vmatmul.msk.bf16.gmra.mxu1 %vm617_vm0, %v11042_v11  ;;  %v492_v11 = vsel %vm456_vm2, %v487_v6, %v491_v7  ;;  %v938_v21 = vsel %vm927_vm1, %v935_v5, %v937_v17  ;;  %v507_v29 = vrot.slane %v505_v25, 1  ;;  %v509_v37 = vshrl.u32 %v11047_v23, 16  ;;  %v11051_v6 = vld [vmem:[%s11544_s28 + $0x50] sm:$0xff] }
  0x2a   : > { %v604_v12 = vsel %vm456_vm2, %v599_v8, %v603_v9  ;;  %v500_v22 = vsel %vm456_vm2, %v495_v18, %v499_v20  ;;  %v503_v28 = vor.u32 %v501_v24, %v499_v20  ;;  %v940_v30 = vsel %vm927_vm1, %v937_v17, %v939_v26 }
  0x2b   : > { %v513_v38 = vshll.u32 %v11048_v35, 16  ;;  %v941_v39 = vrot.slane %v11048_v35, 1  ;;  %v511_v40 = vor.u32 %v509_v37, %v507_v29  ;;  %v529_v55 = vshll.u32 %v11050_v53, 16 }
  0x2c   : > { %v508_v31 = vsel %vm456_vm2, %v503_v28, %v507_v29  ;;  %v957_v62 = vrot.slane %v11555_v19, 1  ;;  %v947_v14 = vrot.slane %v11051_v6, 1 }
  0x2d   : > { %v515_v41 = vrot.slane %v513_v38, 1  ;;  %v942_v42 = vsel %vm927_vm1, %v939_v26, %v941_v39 }
  0x2f   : > { %9615 = vmatmul.msk.bf16.gmra.mxu2 %vm617_vm0, %v932_v44  ;;  %v516_v43 = vsel %vm456_vm2, %v511_v40, %v515_v41  ;;  %v11049_v44 = vld [vmem:[%s11544_s28 + $0x40] sm:$0xff] }
  0x30   : > { %9559 = vmatmul.msk.bf16.gmra.mxu0 %vm617_vm0, %v476_v45  ;;  %v517_v45 = vshrl.u32 %v11048_v35, 16  ;;  %v525_v54 = vshrl.u32 %v11049_v44, 16 }
  0x31   : > { %9573 = vmatmul.msk.bf16.gmra.mxu3 %vm617_vm0, %v588_v46  ;;  %v521_v46 = vshll.u32 %v11049_v44, 16 }
  0x32   : > { %v519_v49 = vor.u32 %v517_v45, %v515_v41  ;;  %v961_v45 = vrot.slane %v11584_v48, 1 }
  0x33   : > { %v523_v50 = vrot.slane %v521_v46, 1 }
  0x35   : > { %v524_v52 = vsel %vm456_vm2, %v519_v49, %v523_v50  ;;  %v527_v59 = vor.u32 %v525_v54, %v523_v50  ;;  %v11053_v54 = vld [vmem:[%s11544_s28 + $0x60] sm:$0xff] }
  0x39   : > { %9586 = vmatmul.msk.bf16.gmra.mxu1 %vm617_vm0, %v11043_v33  ;;  %v11084_v33 = vld [vmem:[%s14543_s3 + $0x40] sm:$0xff] }
  0x3a   : > { %1792 = vmatpush.bf16.msrb.mxu0 %v11084_v33 }
  0x3f   : > { %9616 = vmatmul.msk.bf16.gmra.mxu2 %vm617_vm0, %v934_v58  ;;  %v945_v58 = vrot.slane %v11050_v53, 1 }
  0x40   : > { %9560 = vmatmul.msk.bf16.gmra.mxu0 %vm617_vm0, %v484_v60  ;;  %v531_v60 = vrot.slane %v529_v55, 1 }
  0x41   : > { %9574 = vmatmul.msk.bf16.gmra.mxu3 %vm617_vm0, %v596_v61  ;;  %v955_v61 = vrot.slane %v11552_v15, 1 }
  0x42   : > { %v532_v2 = vsel %vm456_vm2, %v527_v59, %v531_v60  ;;  %v553_v59 = vshll.u32 %v11053_v54, 16 }
  0x43   : > { %v958_v5 = vsel %vm927_vm1, %v955_v61, %v957_v62 }
  0x49   : > { %9587 = vmatmul.msk.bf16.gmra.mxu1 %vm617_vm0, %v11044_v47  ;;  %v943_v47 = vrot.slane %v11049_v44, 1 }
  0x4b   : > { %v944_v51 = vsel %vm927_vm1, %v941_v39, %v943_v47  ;;  %v11082_v39 = vld [vmem:[%s14543_s3 + $0x30] sm:$0xff] }
  0x4f   : > { %9617 = vmatmul.msk.bf16.gmra.mxu2 %vm617_vm0, %v936_v10  ;;  %v533_v10 = vshrl.u32 %v11050_v53, 16 }
  0x50   : > { %9561 = vmatmul.msk.bf16.gmra.mxu0 %vm617_vm0, %v492_v11  ;;  %v537_v11 = vshll.u32 %v11051_v6, 16 }
  0x51   : > { %9575 = vmatmul.msk.bf16.gmra.mxu3 %vm617_vm0, %v604_v12  ;;  %v535_v16 = vor.u32 %v533_v10, %v531_v60 }
  0x52   : > { %v539_v17 = vrot.slane %v537_v11, 1 }
  0x54   : > { %v540_v25 = vsel %vm456_vm2, %v535_v16, %v539_v17  ;;  %v11719_v16 = vld [vmem:[%s11544_s28 + $0xc] sm:$0xf] }
  0x59   : > { %9588 = vmatmul.msk.bf16.gmra.mxu1 %vm617_vm0, %v11045_v63  ;;  %v946_v63 = vsel %vm927_vm1, %v943_v47, %v945_v58 }
  0x5f   : > { %9618 = vmatmul.msk.bf16.gmra.mxu2 %vm617_vm0, %v938_v21  ;;  %v959_v21 = vrot.slane %v11571_v34, 1 }
  0x60   : > { %9562 = vmatmul.msk.bf16.gmra.mxu0 %vm617_vm0, %v500_v22  ;;  %v948_v22 = vsel %vm927_vm1, %v945_v58, %v947_v14 }
  0x61   : > { %9598 = vmatmul.msk.bf16.vlgmr.msrb.gmra.mxu3 %vm617_vm0, %v11552_v15  ;;  %v960_v29 = vsel %vm927_vm1, %v957_v62, %v959_v21 }
  0x62   : > { %1410 = vmatpush.bf16.msrb.mxu3 %v11083_v57 }
  0x66   : > { %1411 = vmatpush.bf16.msrb.mxu3 %v11082_v39 }
  0x69   : > { %9589 = vmatmul.msk.bf16.gmra.mxu1 %vm617_vm0, %v11046_v13 }
  0x6f   : > { %9619 = vmatmul.msk.bf16.gmra.mxu2 %vm617_vm0, %v940_v30  ;;  %v11052_v30 = vld [vmem:[%s11544_s28 + $0x58] sm:$0xff] }
  0x70   : > { %9563 = vmatmul.msk.bf16.gmra.mxu0 %vm617_vm0, %v508_v31  ;;  %v545_v36 = vshll.u32 %v11052_v30, 16  ;;  %v949_v40 = vrot.slane %v11052_v30, 1  ;;  %v549_v58 = vshrl.u32 %v11052_v30, 16 }
  0x71   : > { %9599 = vmatmul.msk.bf16.gmra.mxu3 %vm617_vm0, %v11555_v19 }
  0x72   : > { %v950_v46 = vsel %vm927_vm1, %v947_v14, %v949_v40  ;;  %v1166_v14 = vld [vmem:[%s11544_s28 + $0x8] sm:$0xe] }
  0x79   : > { %9590 = vmatmul.msk.bf16.gmra.mxu1 %vm617_vm0, %v11047_v23 }
  0x7f   : > { %9620 = vmatmul.msk.bf16.gmra.mxu2 %vm617_vm0, %v942_v42  ;;  %v547_v42 = vrot.slane %v545_v36, 1 }
  0x80   : > { %9564 = vmatmul.msk.bf16.gmra.mxu0 %vm617_vm0, %v516_v43 }
  0x81   : > { %9600 = vmatmul.msk.bf16.gmra.mxu3 %vm617_vm0, %v11571_v34 }
  0x89   : > { %9591 = vmatmul.msk.bf16.gmra.mxu1 %vm617_vm0, %v11048_v35  ;;  %v541_v35 = vshrl.u32 %v11051_v6, 16 }
  0x8b   : > { %v543_v41 = vor.u32 %v541_v35, %v539_v17 }
  0x8d   : > { %v548_v50 = vsel %vm456_vm2, %v543_v41, %v547_v42 }
  0x8f   : > { %9621 = vmatmul.msk.bf16.gmra.mxu2 %vm617_vm0, %v944_v51 }
  0x90   : > { %9565 = vmatmul.msk.bf16.gmra.mxu0 %vm617_vm0, %v524_v52 }
  0x91   : > { %9601 = vmatmul.msk.bf16.gmra.mxu3 %vm617_vm0, %v11584_v48 }
  0x96   : > { %v828_v56 = vpop.f32.mrf.mxu1 }
  0x99   : > { %9592 = vmatmul.msk.bf16.gmra.mxu1 %vm617_vm0, %v11049_v44 }
  0x9d   : > { %v681_v1 = vpop.f32.mrf.mxu0 }
  0x9e   : > { %v829_v3 = vadd.f32 %v828_v56, %v681_v1  ;;  %v830_v4 = vpop.f32.mrf.mxu1  ;;  %v551_v1 = vor.u32 %v549_v58, %v547_v42  ;;  %v11130_v58 = vld [vmem:[%s14543_s3 + $0x98] sm:$0xff] }
  0x9f   : > { %9622 = vmatmul.msk.bf16.gmra.mxu2 %vm617_vm0, %v946_v63  ;;  %v951_v63 = vrot.slane %v11053_v54, 1  ;;  %3373 = vmatpush.bf16.msra.mxu1 %v11130_v58 }
  0xa0   : > { %9566 = vmatmul.msk.bf16.gmra.mxu0 %vm617_vm0, %v532_v2  ;;  %v555_v2 = vrot.slane %v553_v59, 1 }
  0xa1   : > { %9628 = vmatmul.msk.bf16.vlgmr.msra.gmra.mxu3 %vm617_vm0, %v958_v5  ;;  %v963_v5 = vrot.slane %v11597_v0, 1  ;;  %v11054_v0 = vld [vmem:[%s11544_s28 + $0x68] sm:$0xff] }
  0xa2   : > { %v1040_v7 = vpop.f32.mrf.mxu2  ;;  %v556_v10 = vsel %vm456_vm2, %v551_v1, %v555_v2  ;;  %v953_v36 = vrot.slane %v11054_v0, 1 }
  0xa3   : > { %v11665_v19 = vadd.f32 %v1040_v7, %v829_v3 }
  0xa4   : > { %v11667_v9 = vpop.f32.mrf.mxu3 }
  0xa5   : > { %v683_v8 = vpop.f32.mrf.mxu0 }
  0xa6   : > { %v831_v12 = vadd.f32 %v830_v4, %v683_v8  ;;  %v833_v13 = vpop.f32.mrf.mxu1 }
  0xa9   : > { %9593 = vmatmul.msk.bf16.gmra.mxu1 %vm617_vm0, %v11050_v53  ;;  %v962_v53 = vsel %vm927_vm1, %v959_v21, %v961_v45  ;;  %v1245_v21 = vunpack.c.l.b16 %v1166_v14 }
  0xaa   : > { %v1042_v18 = vpop.f32.mrf.mxu2 }
  0xab   : > { %v11670_v20 = vadd.f32 %v1042_v18, %v831_v12 }
  0xac   : > { %v11674_v24 = vpop.f32.mrf.mxu3 }
  0xad   : > { %v686_v23 = vpop.f32.mrf.mxu0 }
  0xae   : > { %v834_v26 = vadd.f32 %v833_v13, %v686_v23  ;;  %v835_v28 = vpop.f32.mrf.mxu1  ;;  %v964_v13 = vsel %vm927_vm1, %v961_v45, %v963_v5  ;;  %v1920_v5 = vld [vmem:[%s11544_s28 + $0x8] sm:$0xc] }
  0xaf   : > { %9623 = vmatmul.msk.bf16.gmra.mxu2 %vm617_vm0, %v948_v22  ;;  %v1246_v22 = vunpack.c.l.b16 %v11719_v16 }
  0xb0   : > { %9567 = vmatmul.msk.bf16.gmra.mxu0 %vm617_vm0, %v540_v25 }
  0xb1   : > { %9629 = vmatmul.msk.bf16.gmra.mxu3 %vm617_vm0, %v960_v29  ;;  %v11734_v35 = vpack.c.b16 %v1246_v22, %v1245_v21  ;;  %v11778_v21 = vld [vmem:[%s11544_s28 + $0x14] sm:$0xf] }
  0xb2   : > { %v1045_v31 = vpop.f32.mrf.mxu2 }
  0xb3   : > { %v11682_v34 = vadd.f32 %v1045_v31, %v834_v26  ;;  %v557_v26 = vshrl.u32 %v11053_v54, 16  ;;  %v11108_v31 = vld [vmem:[%s14543_s3 + $0x78] sm:$0xff]  ;;  %v1301_v41 = vrot.slane %v11734_v35, 1 }
  0xb4   : > { %v11684_v33 = vpop.f32.mrf.mxu3  ;;  %2793 = vmatpush.bf16.msra.mxu3 %v11108_v31 }
  0xb5   : > { %v688_v32 = vpop.f32.mrf.mxu0 }
  0xb6   : > { %v836_v37 = vadd.f32 %v835_v28, %v688_v32  ;;  %v838_v38 = vpop.f32.mrf.mxu1  ;;  %v561_v28 = vshll.u32 %v11054_v0, 16  ;;  %v11732_v32 = vld [vmem:[%s11544_s28 + $0x10] sm:$0xff] }
  0xb7   : > { %v1302_v42 = vrot.slane %v11732_v32, 1  ;;  %v1558_v31 = vshrl.u32 %v11732_v32, 16 }
  0xb9   : > { %9594 = vmatmul.msk.bf16.gmra.mxu1 %vm617_vm0, %v11051_v6  ;;  %v952_v6 = vsel %vm927_vm1, %v949_v40, %v951_v63 }
  0xba   : > { %v1047_v43 = vpop.f32.mrf.mxu2 }
  0xbb   : > { %v11690_v44 = vadd.f32 %v1047_v43, %v836_v37  ;;  %v559_v37 = vor.u32 %v557_v26, %v555_v2  ;;  %v954_v43 = vsel %vm927_vm1, %v951_v63, %v953_v36 }
  0xbc   : > { %v11694_v49 = vpop.f32.mrf.mxu3 }
  0xbd   : > { %v691_v47 = vpop.f32.mrf.mxu0 }
  0xbe   : > { %v839_v51 = vadd.f32 %v838_v38, %v691_v47  ;;  %v840_v52 = vpop.f32.mrf.mxu1  ;;  %v563_v38 = vrot.slane %v561_v28, 1 }
  0xbf   : > { %9624 = vmatmul.msk.bf16.gmra.mxu2 %vm617_vm0, %v950_v46 }
  0xc0   : > { %9568 = vmatmul.msk.bf16.gmra.mxu0 %vm617_vm0, %v548_v50  ;;  %v564_v47 = vsel %vm456_vm2, %v559_v37, %v563_v38  ;;  %v1931_v37 = vrot.slane %v11732_v32, 2 }
  0xc1   : > { %9630 = vmatmul.msk.bf16.gmra.mxu3 %vm617_vm0, %v962_v53  ;;  %v11149_v53 = vld [vmem:[%s14543_s3 + $0xa8] sm:$0xff] }
  0xc2   : > { %v1050_v55 = vpop.f32.mrf.mxu2  ;;  %3857 = vmatpush.bf16.msra.mxu2 %v11149_v53 }
  0xc3   : > { %v11702_v48 = vadd.f32 %v1050_v55, %v839_v51 }
  0xc4   : > { %v11704_v57 = vpop.f32.mrf.mxu3 }
  0xc5   : > { %v693_v56 = vpop.f32.mrf.mxu0 }
  0xc6   : > { %v841_v60 = vadd.f32 %v840_v52, %v693_v56  ;;  %v843_v62 = vpop.f32.mrf.mxu1  ;;  %v1303_v52 = vsel %vm927_vm1, %v1301_v41, %v1302_v42 }
  0xc9   : > { %9595 = vmatmul.msk.bf16.gmra.mxu1 %vm617_vm0, %v11052_v30 }
  0xca   : > { %v1052_v3 = vpop.f32.mrf.mxu2 }
  0xcb   : > { %v11707_v4 = vadd.f32 %v1052_v3, %v841_v60  ;;  %v11764_v3 = vld [vmem:[%s11544_s28 + $0x18] sm:$0xff] }
  0xcc   : > { %v11711_v8 = vpop.f32.mrf.mxu3 }
  0xcd   : > { %v696_v7 = vpop.f32.mrf.mxu0 }
  0xce   : > { %v844_v11 = vadd.f32 %v843_v62, %v696_v7  ;;  %v845_v12 = vpop.f32.mrf.mxu1  ;;  %v565_v62 = vshrl.u32 %v11054_v0, 16 }
  0xcf   : > { %9625 = vmatmul.msk.bf16.gmra.mxu2 %vm617_vm0, %v952_v6 }
  0xd0   : > { %9569 = vmatmul.msk.bf16.gmra.mxu0 %vm617_vm0, %v556_v10  ;;  %v567_v6 = vor.u32 %v565_v62, %v563_v38  ;;  %v1927_v10 = vunpack.c.l.b16 %v1920_v5 }
  0xd1   : > { %9631 = vmatmul.msk.bf16.gmra.mxu3 %vm617_vm0, %v964_v13  ;;  %v956_v13 = vsel %vm927_vm1, %v953_v36, %v955_v61 }
  0xd2   : > { %v1055_v17 = vpop.f32.mrf.mxu2  ;;  %v572_v16 = vsel %vm456_vm2, %v567_v6, %v11560_v27  ;;  %v1928_v28 = vpack.c.b16 %v1246_v22, %v1927_v10  ;;  %v1550_v27 = vshrl.u32 %v11734_v35, 16 }
  0xd3   : > { %v11723_v18 = vadd.f32 %v1055_v17, %v844_v11  ;;  %v2168_v17 = vld [vmem:[%s11544_s28 + $0x10] sm:$0xc] }
  0xd4   : > { %v11726_v25 = vpop.f32.mrf.mxu3  ;;  %v2247_v61 = vunpack.c.l.b16 %v2168_v17  ;;  %v1930_v22 = vrot.slane %v1928_v28, 2  ;;  %v1570_v17 = vshll.u32 %v11764_v3, 16 }
  0xd5   : > { %v698_v23 = vpop.f32.mrf.mxu0 }
  0xd6   : > { %v846_v29 = vadd.f32 %v845_v12, %v698_v23  ;;  %v848_v30 = vpop.f32.mrf.mxu1  ;;  %v1304_v12 = vrot.slane %v11764_v3, 1 }
  0xd8   : > { %v1305_v15 = vsel %vm927_vm1, %v1302_v42, %v1304_v12 }
  0xd9   : > { %9596 = vmatmul.msk.bf16.gmra.mxu1 %vm617_vm0, %v11053_v54  ;;  %v11110_v54 = vld [vmem:[%s14543_s3 + $0x88] sm:$0xff] }
  0xda   : > { %v1057_v39 = vpop.f32.mrf.mxu2  ;;  %3041 = vmatpush.bf16.msra.mxu0 %v11110_v54  ;;  %v11805_v54 = vld [vmem:[%s11544_s28 + $0x20] sm:$0xff] }
  0xdb   : > { %v11737_v40 = vadd.f32 %v1057_v39, %v846_v29  ;;  %v14545_v29 = vunpack.c.l.b16 %v11778_v21  ;;  %v11088_v39 = vld [vmem:[%s11544_s28 + $0x18] sm:$0xff] }
  0xdc   : > { %v11742_v46 = vpop.f32.mrf.mxu3  ;;  %v2304_v58 = vrot.slane %v11088_v39, 2 }
  0xdd   : > { %v701_v45 = vpop.f32.mrf.mxu0  ;;  %v11798_v41 = vpack.c.b16 %v14545_v29, %v2247_v61 }
  0xde   : > { %v849_v50 = vadd.f32 %v848_v30, %v701_v45  ;;  %v850_v51 = vpop.f32.mrf.mxu1  ;;  %v1553_v30 = vshll.u32 %v11734_v35, 16 }
  0xdf   : > { %9626 = vmatmul.msk.bf16.gmra.mxu2 %vm617_vm0, %v954_v43  ;;  %v1552_v43 = vrot.slane %v1550_v27, 1 }
  0xe0   : > { %9570 = vmatmul.msk.bf16.gmra.mxu0 %vm617_vm0, %v564_v47  ;;  %v1555_v45 = vrot.slane %v1553_v30, 2  ;;  %v1560_v47 = vrot.slane %v1558_v31, 1  ;;  %v1572_v30 = vrot.slane %v1570_v17, 2 }
  0xe1   : > { %9712 = vmatmul.msk.bf16.vlgmr.msrb.gmra.mxu3 %vm617_vm0, %v1303_v52 }
  0xe2   : > { %v1060_v55 = vpop.f32.mrf.mxu2 }
  0xe3   : > { %v11755_v56 = vadd.f32 %v1060_v55, %v849_v50  ;;  %v2303_v55 = vrot.slane %v11798_v41, 2 }
  0xe4   : > { %v898_v60 = vpop.f32.mrf.mxu3 }
  0xe5   : > { %v703_v59 = vpop.f32.mrf.mxu0  ;;  %v11761_v1 = vadd.f32 %v898_v60, %v11667_v9 }
  0xe6   : > { %v851_v63 = vadd.f32 %v850_v51, %v703_v59  ;;  %v853_v2 = vpop.f32.mrf.mxu1  ;;  %v1556_v59 = vor.u32 %v1555_v45, %v1552_v43 }
  0xe9   : > { %9597 = vmatmul.msk.bf16.gmra.mxu1 %vm617_vm0, %v11054_v0 }
  0xea   : > { %v1062_v7 = vpop.f32.mrf.mxu2 }
  0xeb   : > { %v11768_v11 = vadd.f32 %v1062_v7, %v851_v63 }
  0xec   : > { %v900_v9 = vpop.f32.mrf.mxu3 }
  0xed   : > { %v706_v14 = vpop.f32.mrf.mxu0  ;;  %v11781_v23 = vadd.f32 %v900_v9, %v11674_v24  ;;  %v1561_v24 = vshll.u32 %v11732_v32, 16  ;;  %v1932_v32 = vsel %vm1929_vm3, %v1930_v22, %v1931_v37  ;;  %v11832_v22 = vld [vmem:[%s11544_s28 + $0x28] sm:$0xff] }
  0xee   : > { %v854_v0 = vadd.f32 %v853_v2, %v706_v14  ;;  %v855_v26 = vpop.f32.mrf.mxu1  ;;  %v1306_v2 = vrot.slane %v11805_v54, 1  ;;  %v1308_v43 = vrot.slane %v11832_v22, 1 }
  0xef   : > { %9627 = vmatmul.msk.bf16.gmra.mxu2 %vm617_vm0, %v956_v13  ;;  %v1563_v50 = vrot.slane %v1561_v24, 2 }
  0xf0   : > { %9571 = vmatmul.msk.bf16.gmra.mxu0 %vm617_vm0, %v572_v16  ;;  %v1307_v9 = vsel %vm927_vm1, %v1304_v12, %v1306_v2  ;;  %v1567_v16 = vshrl.u32 %v11764_v3, 16 }
  0xf1   : > { %9713 = vmatmul.msk.bf16.gmra.mxu3 %vm617_vm0, %v1305_v15  ;;  %v1564_v60 = vor.u32 %v1563_v50, %v1560_v47 }
  0xf2   : > { %v1065_v36 = vpop.f32.mrf.mxu2  ;;  %v1569_v27 = vrot.slane %v1567_v16, 1  ;;  %v11858_v16 = vld [vmem:[%s11544_s28 + $0x30] sm:$0xff] }
  0xf3   : > { %v11793_v38 = vadd.f32 %v1065_v36, %v854_v0  ;;  %v1565_v7 = vsel %vm1548_vm4, %v1556_v59, %v1564_v60 }
  0xf4   : > { %v903_v42 = vpop.f32.mrf.mxu3 }
  0xf5   : > { %v708_v35 = vpop.f32.mrf.mxu0  ;;  %v11801_v52 = vadd.f32 %v903_v42, %v11684_v33  ;;  %v2305_v33 = vsel %vm1929_vm3, %v2303_v55, %v2304_v58  ;;  %v1576_v55 = vshrl.u32 %v11805_v54, 16 }
  0xf6   : > { %v856_v51 = vadd.f32 %v855_v26, %v708_v35  ;;  %v858_v53 = vpop.f32.mrf.mxu1  ;;  %v1933_v26 = vrot.slane %v11764_v3, 2  ;;  %v1573_v3 = vor.u32 %v1572_v30, %v1569_v27 }
  0xf8   : > { %v1934_v36 = vsel %vm1929_vm3, %v1931_v37, %v1933_v26  ;;  %v1574_v50 = vsel %vm1548_vm4, %v1564_v60, %v1573_v3  ;;  %v1935_v60 = vrot.slane %v11805_v54, 2 }
  0xf9   : > { %9772 = vmatmul.msk.bf16.vlgmr.msrb.gmra.mxu1 %vm617_vm0, %v1932_v32  ;;  %v1309_v32 = vsel %vm927_vm1, %v1306_v2, %v1308_v43 }
  0xfa   : > { %v1067_v62 = vpop.f32.mrf.mxu2 }
  0xfb   : > { %v11809_v63 = vadd.f32 %v1067_v62, %v856_v51 }
  0xfc   : > { %v905_v6 = vpop.f32.mrf.mxu3 }
  0xfd   : > { %v711_v5 = vpop.f32.mrf.mxu0  ;;  %v11815_v13 = vadd.f32 %v905_v6, %v11694_v49  ;;  %v11089_v49 = vld [vmem:[%s11544_s28 + $0x20] sm:$0xff]  ;;  %v1578_v6 = vrot.slane %v1576_v55, 1 }
  0xfe   : > { %v859_v10 = vadd.f32 %v858_v53, %v711_v5  ;;  %v860_v14 = vpop.f32.mrf.mxu1  ;;  %v2306_v39 = vrot.slane %v11089_v49, 2 }
  0xff   : > { %9870 = vmatmul.msk.bf16.vlgmr.msrb.gmra.mxu2 %vm617_vm0, %v2305_v33 }
 0x100   : > { %9742 = vmatmul.msk.bf16.vlgmr.msrb.gmra.mxu0 %vm617_vm0, %v1565_v7  ;;  %v2307_v45 = vsel %vm1929_vm3, %v2304_v58, %v2306_v39  ;;  %v1579_v58 = vshll.u32 %v11805_v54, 16 }
 0x101   : > { %9714 = vmatmul.msk.bf16.gmra.mxu3 %vm617_vm0, %v1307_v9  ;;  %v1936_v9 = vsel %vm1929_vm3, %v1933_v26, %v1935_v60 }
 0x102   : > { %v1070_v0 = vpop.f32.mrf.mxu2  ;;  %v1581_v7 = vrot.slane %v1579_v58, 2 }
 0x103   : > { %v11824_v28 = vadd.f32 %v1070_v0, %v859_v10 }
 0x104   : > { %v908_v61 = vpop.f32.mrf.mxu3  ;;  %v1582_v54 = vor.u32 %v1581_v7, %v1578_v6 }
 0x105   : > { %v713_v15 = vpop.f32.mrf.mxu0  ;;  %v11828_v31 = vadd.f32 %v908_v61, %v11704_v57 }
 0x106   : > { %v861_v12 = vadd.f32 %v860_v14, %v713_v15  ;;  %v863_v24 = vpop.f32.mrf.mxu1  ;;  %v1310_v15 = vrot.slane %v11858_v16, 1  ;;  %v1583_v30 = vsel %vm1548_vm4, %v1573_v3, %v1582_v54  ;;  %v1937_v3 = vrot.slane %v11832_v22, 2 }
 0x108   : > { %v1938_v58 = vsel %vm1929_vm3, %v1935_v60, %v1937_v3 }
 0x109   : > { %9773 = vmatmul.msk.bf16.gmra.mxu1 %vm617_vm0, %v1934_v36  ;;  %v1311_v36 = vsel %vm927_vm1, %v1308_v43, %v1310_v15 }
 0x10a   : > { %v1072_v35 = vpop.f32.mrf.mxu2 }
 0x10b   : > { %v11835_v42 = vadd.f32 %v1072_v35, %v861_v12  ;;  %v1585_v35 = vshrl.u32 %v11832_v22, 16 }
 0x10c   : > { %v910_v57 = vpop.f32.mrf.mxu3 }
 0x10d   : > { %v716_v47 = vpop.f32.mrf.mxu0  ;;  %v11841_v37 = vadd.f32 %v910_v57, %v11711_v8  ;;  %v11090_v8 = vld [vmem:[%s11544_s28 + $0x28] sm:$0xff] }
 0x10e   : > { %v864_v51 = vadd.f32 %v863_v24, %v716_v47  ;;  %v865_v53 = vpop.f32.mrf.mxu1  ;;  %v2308_v17 = vrot.slane %v11090_v8, 2 }
 0x10f   : > { %9871 = vmatmul.msk.bf16.gmra.mxu2 %vm617_vm0, %v2307_v45 }
 0x110   : > { %9743 = vmatmul.msk.bf16.gmra.mxu0 %vm617_vm0, %v1574_v50  ;;  %v2309_v61 = vsel %vm1929_vm3, %v2306_v39, %v2308_v17  ;;  %v1588_v39 = vshll.u32 %v11832_v22, 16 }
 0x111   : > { %9715 = vmatmul.msk.bf16.gmra.mxu3 %vm617_vm0, %v1309_v32 }
 0x112   : > { %v1075_v59 = vpop.f32.mrf.mxu2 }
 0x113   : > { %v11850_v62 = vadd.f32 %v1075_v59, %v864_v51  ;;  %v1587_v51 = vrot.slane %v1585_v35, 1  ;;  %v11884_v59 = vld [vmem:[%s11544_s28 + $0x38] sm:$0xff] }
 0x114   : > { %v913_v5 = vpop.f32.mrf.mxu3  ;;  %v1312_v6 = vrot.slane %v11884_v59, 1 }
 0x115   : > { %v718_v33 = vpop.f32.mrf.mxu0  ;;  %v11854_v10 = vadd.f32 %v913_v5, %v11726_v25 }
 0x116   : > { %v866_v2 = vadd.f32 %v865_v53, %v718_v33  ;;  %v868_v14 = vpop.f32.mrf.mxu1  ;;  %v1590_v53 = vrot.slane %v1588_v39, 2 }
 0x118   : > { %v1591_v22 = vor.u32 %v1590_v53, %v1587_v51 }
 0x119   : > { %9774 = vmatmul.msk.bf16.gmra.mxu1 %vm617_vm0, %v1936_v9 }
 0x11a   : > { %v1077_v0 = vpop.f32.mrf.mxu2 }
 0x11b   : > { %v11861_v49 = vadd.f32 %v1077_v0, %v866_v2 }
 0x11c   : > { %v915_v25 = vpop.f32.mrf.mxu3 }
 0x11d   : > { %v721_v27 = vpop.f32.mrf.mxu0  ;;  %v11867_v26 = vadd.f32 %v915_v25, %v11742_v46  ;;  %v11091_v46 = vld [vmem:[%s11544_s28 + $0x30] sm:$0xff] }
 0x11e   : > { %v869_v12 = vadd.f32 %v868_v14, %v721_v27  ;;  %v870_v24 = vpop.f32.mrf.mxu1  ;;  %v2310_v8 = vrot.slane %v11091_v46, 2  ;;  %v1592_v14 = vsel %vm1548_vm4, %v1582_v54, %v1591_v22  ;;  %v1594_v27 = vshrl.u32 %v11858_v16, 16 }
 0x11f   : > { %9872 = vmatmul.msk.bf16.gmra.mxu2 %vm617_vm0, %v2309_v61  ;;  %v1313_v61 = vsel %vm927_vm1, %v1310_v15, %v1312_v6  ;;  %v1939_v54 = vrot.slane %v11858_v16, 2 }
 0x120   : > { %9744 = vmatmul.msk.bf16.gmra.mxu0 %vm617_vm0, %v1583_v30  ;;  %v2311_v7 = vsel %vm1929_vm3, %v2308_v17, %v2310_v8  ;;  %v1597_v17 = vshll.u32 %v11858_v16, 16 }
 0x121   : > { %9716 = vmatmul.msk.bf16.gmra.mxu3 %vm617_vm0, %v1311_v36  ;;  %v1596_v36 = vrot.slane %v1594_v27, 1  ;;  %v1940_v46 = vsel %vm1929_vm3, %v1937_v3, %v1939_v54 }
 0x122   : > { %v1080_v45 = vpop.f32.mrf.mxu2  ;;  %v1599_v35 = vrot.slane %v1597_v17, 2 }
 0x123   : > { %v11876_v47 = vadd.f32 %v1080_v45, %v869_v12 }
 0x124   : > { %v1110_v50 = vpop.f32.mrf.mxu3  ;;  %v1600_v16 = vor.u32 %v1599_v35, %v1596_v36  ;;  %v11936_v36 = vld [vmem:[%s11544_s28 + $0x48] sm:$0xff] }
 0x125   : > { %v723_v57 = vpop.f32.mrf.mxu0  ;;  %v11880_v32 = vadd.f32 %v1110_v50, %v11761_v1 }
 0x126   : > { %v871_v43 = vadd.f32 %v870_v24, %v723_v57  ;;  %v873_v55 = vpop.f32.mrf.mxu1  ;;  %v11910_v57 = vld [vmem:[%s11544_s28 + $0x40] sm:$0xff] }
 0x129   : > { %9775 = vmatmul.msk.bf16.gmra.mxu1 %vm617_vm0, %v1938_v58 }
 0x12a   : > { %v1082_v33 = vpop.f32.mrf.mxu2 }
 0x12b   : > { %v11887_v5 = vadd.f32 %v1082_v33, %v871_v43  ;;  %v1314_v43 = vrot.slane %v11910_v57, 1  ;;  %v1601_v33 = vsel %vm1548_vm4, %v1591_v22, %v1600_v16  ;;  %v1941_v22 = vrot.slane %v11884_v59, 2 }
 0x12c   : > { %v1112_v1 = vpop.f32.mrf.mxu3 }
 0x12d   : > { %v726_v2 = vpop.f32.mrf.mxu0  ;;  %v11893_v60 = vadd.f32 %v1112_v1, %v11781_v23  ;;  %v11092_v23 = vld [vmem:[%s11544_s28 + $0x38] sm:$0xff]  ;;  %v1315_v1 = vsel %vm927_vm1, %v1312_v6, %v1314_v43 }
 0x12e   : > { %v874_v9 = vadd.f32 %v873_v55, %v726_v2  ;;  %v875_v0 = vpop.f32.mrf.mxu1  ;;  %v2312_v50 = vrot.slane %v11092_v23, 2 }
 0x12f   : > { %9873 = vmatmul.msk.bf16.gmra.mxu2 %vm617_vm0, %v2311_v7 }
 0x130   : > { %9745 = vmatmul.msk.bf16.gmra.mxu0 %vm617_vm0, %v1592_v14  ;;  %v2313_v55 = vsel %vm1929_vm3, %v2310_v8, %v2312_v50  ;;  %v1603_v14 = vshrl.u32 %v11884_v59, 16  ;;  %v1606_v8 = vshll.u32 %v11884_v59, 16 }
 0x131   : > { %9717 = vmatmul.msk.bf16.gmra.mxu3 %vm617_vm0, %v1313_v61 }
 0x132   : > { %v1085_v25 = vpop.f32.mrf.mxu2  ;;  %v1605_v17 = vrot.slane %v1603_v14, 1 }
 0x133   : > { %v11902_v30 = vadd.f32 %v1085_v25, %v874_v9  ;;  %v1608_v25 = vrot.slane %v1606_v8, 2 }
 0x134   : > { %v1115_v24 = vpop.f32.mrf.mxu3 }
 0x135   : > { %v728_v12 = vpop.f32.mrf.mxu0  ;;  %v11906_v39 = vadd.f32 %v1115_v24, %v11801_v52  ;;  %v1942_v24 = vsel %vm1929_vm3, %v1939_v54, %v1941_v22  ;;  %v1609_v59 = vor.u32 %v1608_v25, %v1605_v17 }
 0x136   : > { %v876_v15 = vadd.f32 %v875_v0, %v728_v12  ;;  %v878_v45 = vpop.f32.mrf.mxu1 }
 0x139   : > { %9776 = vmatmul.msk.bf16.gmra.mxu1 %vm617_vm0, %v1940_v46  ;;  %v1316_v46 = vrot.slane %v11936_v36, 1 }
 0x13a   : > { %v1087_v51 = vpop.f32.mrf.mxu2 }
 0x13b   : > { %v11913_v53 = vadd.f32 %v1087_v51, %v876_v15 }
 0x13c   : > { %v1117_v52 = vpop.f32.mrf.mxu3 }
 0x13d   : > { %v731_v58 = vpop.f32.mrf.mxu0  ;;  %v11919_v3 = vadd.f32 %v1117_v52, %v11815_v13  ;;  %v11093_v13 = vld [vmem:[%s11544_s28 + $0x40] sm:$0xff] }
 0x13e   : > { %v879_v7 = vadd.f32 %v878_v45, %v731_v58  ;;  %v880_v2 = vpop.f32.mrf.mxu1  ;;  %v2314_v35 = vrot.slane %v11093_v13, 2  ;;  %v1610_v58 = vsel %vm1548_vm4, %v1600_v16, %v1609_v59  ;;  %v1943_v16 = vrot.slane %v11910_v57, 2 }
 0x13f   : > { %9874 = vmatmul.msk.bf16.gmra.mxu2 %vm617_vm0, %v2313_v55 }
 0x140   : > { %9746 = vmatmul.msk.bf16.gmra.mxu0 %vm617_vm0, %v1601_v33  ;;  %v2315_v51 = vsel %vm1929_vm3, %v2312_v50, %v2314_v35  ;;  %v1615_v50 = vshll.u32 %v11910_v57, 16  ;;  %v1944_v25 = vsel %vm1929_vm3, %v1941_v22, %v1943_v16 }
 0x141   : > { %9718 = vmatmul.msk.bf16.gmra.mxu3 %vm617_vm0, %v1315_v1 }
 0x142   : > { %v1090_v9 = vpop.f32.mrf.mxu2 }
 0x143   : > { %v11928_v0 = vadd.f32 %v1090_v9, %v879_v7  ;;  %v1317_v7 = vsel %vm927_vm1, %v1314_v43, %v1316_v46 }
 0x144   : > { %v1120_v27 = vpop.f32.mrf.mxu3 }
 0x145   : > { %v733_v61 = vpop.f32.mrf.mxu0  ;;  %v11932_v23 = vadd.f32 %v1120_v27, %v11828_v31 }
 0x146   : > { %v881_v6 = vadd.f32 %v880_v2, %v733_v61  ;;  %v883_v12 = vpop.f32.mrf.mxu1  ;;  %v1612_v2 = vshrl.u32 %v11910_v57, 16  ;;  %v1617_v61 = vrot.slane %v1615_v50, 2 }
 0x148   : > { %v1614_v13 = vrot.slane %v1612_v2, 1  ;;  %v1621_v2 = vshrl.u32 %v11936_v36, 16 }
 0x149   : > { %9777 = vmatmul.msk.bf16.gmra.mxu1 %vm617_vm0, %v1942_v24 }
 0x14a   : > { %v1092_v15 = vpop.f32.mrf.mxu2  ;;  %v1618_v57 = vor.u32 %v1617_v61, %v1614_v13 }
 0x14b   : > { %v11939_v45 = vadd.f32 %v1092_v15, %v881_v6  ;;  %v11962_v6 = vld [vmem:[%s11544_s28 + $0x50] sm:$0xff] }
 0x14c   : > { %v1122_v31 = vpop.f32.mrf.mxu3 }
 0x14d   : > { %v736_v55 = vpop.f32.mrf.mxu0  ;;  %v11945_v54 = vadd.f32 %v1122_v31, %v11841_v37  ;;  %v11094_v37 = vld [vmem:[%s11544_s28 + $0x48] sm:$0xff] }
 0x14e   : > { %v884_v52 = vadd.f32 %v883_v12, %v736_v55  ;;  %v885_v33 = vpop.f32.mrf.mxu1  ;;  %v2316_v12 = vrot.slane %v11094_v37, 2 }
 0x14f   : > { %9875 = vmatmul.msk.bf16.gmra.mxu2 %vm617_vm0, %v2315_v51  ;;  %v1318_v51 = vrot.slane %v11962_v6, 1 }
 0x150   : > { %9747 = vmatmul.msk.bf16.gmra.mxu0 %vm617_vm0, %v1610_v58  ;;  %v2317_v55 = vsel %vm1929_vm3, %v2314_v35, %v2316_v12  ;;  %v1619_v58 = vsel %vm1548_vm4, %v1609_v59, %v1618_v57  ;;  %v1624_v35 = vshll.u32 %v11936_v36, 16  ;;  %v1945_v59 = vrot.slane %v11936_v36, 2 }
 0x151   : > { %9719 = vmatmul.msk.bf16.gmra.mxu3 %vm617_vm0, %v1317_v7  ;;  %v1319_v7 = vsel %vm927_vm1, %v1316_v46, %v1318_v51 }
 0x152   : > { %v1095_v1 = vpop.f32.mrf.mxu2  ;;  %v1626_v13 = vrot.slane %v1624_v35, 2 }
 0x153   : > { %v11954_v14 = vadd.f32 %v1095_v1, %v884_v52 }
 0x154   : > { %v1125_v9 = vpop.f32.mrf.mxu3 }
 0x155   : > { %v738_v8 = vpop.f32.mrf.mxu0  ;;  %v11958_v27 = vadd.f32 %v1125_v9, %v11854_v10  ;;  %v1623_v9 = vrot.slane %v1621_v2, 1 }
 0x156   : > { %v886_v43 = vadd.f32 %v885_v33, %v738_v8  ;;  %v888_v17 = vpop.f32.mrf.mxu1 }
 0x159   : > { %9778 = vmatmul.msk.bf16.gmra.mxu1 %vm617_vm0, %v1944_v25  ;;  %v11107_v25 = vld [vmem:[%s14543_s3 + $0x70] sm:$0xff] }
 0x15a   : > { %v1097_v24 = vpop.f32.mrf.mxu2  ;;  %2794 = vmatpush.bf16.msra.mxu3 %v11107_v25 }
 0x15b   : > { %v11965_v15 = vadd.f32 %v1097_v24, %v886_v43  ;;  %v11989_v24 = vld [vmem:[%s11544_s28 + $0x58] sm:$0xff] }
 0x15c   : > { %v1127_v10 = vpop.f32.mrf.mxu3 }
 0x15d   : > { %v741_v31 = vpop.f32.mrf.mxu0  ;;  %v11971_v22 = vadd.f32 %v1127_v10, %v11867_v26  ;;  %v11095_v26 = vld [vmem:[%s11544_s28 + $0x50] sm:$0xff] }
 0x15e   : > { %v889_v52 = vadd.f32 %v888_v17, %v741_v31  ;;  %v890_v33 = vpop.f32.mrf.mxu1  ;;  %v1946_v17 = vsel %vm1929_vm3, %v1943_v16, %v1945_v59  ;;  %v2318_v36 = vrot.slane %v11095_v26, 2  ;;  %v11148_v26 = vld [vmem:[%s14543_s3 + $0xa0] sm:$0xff] }
 0x15f   : > { %9876 = vmatmul.msk.bf16.gmra.mxu2 %vm617_vm0, %v2317_v55  ;;  %v1627_v55 = vor.u32 %v1626_v13, %v1623_v9  ;;  %v11129_v9 = vld [vmem:[%s14543_s3 + $0x90] sm:$0xff]  ;;  %v11096_v13 = vld [vmem:[%s11544_s28 + $0x58] sm:$0xff] }
 0x160   : > { %9748 = vmatmul.msk.bf16.gmra.mxu0 %vm617_vm0, %v1619_v58  ;;  %v1320_v58 = vrot.slane %v11989_v24, 1  ;;  %3858 = vmatpush.bf16.msra.mxu2 %v11148_v26 }
 0x161   : > { %9720 = vmatmul.msk.bf16.gmra.mxu3 %vm617_vm0, %v1319_v7  ;;  %3374 = vmatpush.bf16.msra.mxu1 %v11129_v9 }
 0x162   : > { %v1100_v50 = vpop.f32.mrf.mxu2 }
 0x163   : > { %v11980_v1 = vadd.f32 %v1100_v50, %v889_v52  ;;  %v1321_v50 = vsel %vm927_vm1, %v1318_v51, %v1320_v58  ;;  %v1947_v51 = vrot.slane %v11962_v6, 2 }
 0x164   : > { %v1413_v8 = vpop.f32.mrf.mxu3 }
 0x165   : > { %v743_v37 = vpop.f32.mrf.mxu0  ;;  %v1503_v61 = vadd.f32 %v1413_v8, %v11665_v19  ;;  %v2319_v19 = vsel %vm1929_vm3, %v2316_v12, %v2318_v36  ;;  %v11109_v12 = vld [vmem:[%s14543_s3 + $0x80] sm:$0xff] }
 0x166   : > { %v891_v46 = vadd.f32 %v890_v33, %v743_v37  ;;  %v893_v43 = vpop.f32.mrf.mxu1  ;;  %v1628_v33 = vsel %vm1548_vm4, %v1618_v57, %v1627_v55  ;;  %v1630_v57 = vshrl.u32 %v11962_v6, 16  ;;  %3042 = vmatpush.bf16.msra.mxu0 %v11109_v12 }
 0x169   : > { %9779 = vmatmul.msk.bf16.gmra.mxu1 %vm617_vm0, %v1946_v17  ;;  %v1632_v17 = vrot.slane %v1630_v57, 1 }
 0x16a   : > { %v1102_v31 = vpop.f32.mrf.mxu2 }
 0x16b   : > { %v11992_v10 = vadd.f32 %v1102_v31, %v891_v46 }
 0x16c   : > { %v1415_v16 = vpop.f32.mrf.mxu3 }
 0x16d   : > { %v746_v52 = vpop.f32.mrf.mxu0  ;;  %v1504_v2 = vadd.f32 %v1415_v16, %v11670_v20  ;;  %v1633_v20 = vshll.u32 %v11962_v6, 16  ;;  %v1948_v16 = vsel %vm1929_vm3, %v1945_v59, %v1947_v51  ;;  %v12020_v6 = vld [vmem:[%s11544_s28 + $0x60] sm:$0xff] }
 0x16e   : > { %v894_v7 = vadd.f32 %v893_v43, %v746_v52  ;;  %v895_v35 = vpop.f32.mrf.mxu1  ;;  %v1322_v12 = vrot.slane %v12020_v6, 1 }
 0x16f   : > { %9877 = vmatmul.msk.bf16.gmra.mxu2 %vm617_vm0, %v2319_v19  ;;  %v1635_v25 = vrot.slane %v1633_v20, 2 }
 0x170   : > { %9749 = vmatmul.msk.bf16.gmra.mxu0 %vm617_vm0, %v1628_v33  ;;  %v2320_v33 = vrot.slane %v11096_v13, 2  ;;  %v1323_v13 = vsel %vm927_vm1, %v1320_v58, %v1322_v12 }
 0x171   : > { %9721 = vmatmul.msk.bf16.gmra.mxu3 %vm617_vm0, %v1321_v50 }
 0x172   : > { %v1105_v37 = vpop.f32.mrf.mxu2  ;;  %v2321_v57 = vsel %vm1929_vm3, %v2318_v36, %v2320_v33  ;;  %v1642_v36 = vshll.u32 %v11989_v24, 16 }
 0x173   : > { %v12011_v8 = vadd.f32 %v1105_v37, %v894_v7  ;;  %v1636_v7 = vor.u32 %v1635_v25, %v1632_v17 }
 0x174   : > { %v1418_v43 = vpop.f32.mrf.mxu3  ;;  %v1644_v58 = vrot.slane %v1642_v36, 2 }
 0x175   : > { %v748_v46 = vpop.f32.mrf.mxu0  ;;  %v1505_v19 = vadd.f32 %v1418_v43, %v11682_v34  ;;  %v1637_v34 = vsel %vm1548_vm4, %v1627_v55, %v1636_v7  ;;  %v1639_v43 = vshrl.u32 %v11989_v24, 16  ;;  %v1949_v55 = vrot.slane %v11989_v24, 2 }
 0x176   : > { %v896_v31 = vadd.f32 %v895_v35, %v748_v46  ;;  %v2042_v52 = vpop.f32.mrf.mxu1 }
 0x179   : > { %9780 = vmatmul.msk.bf16.gmra.mxu1 %vm617_vm0, %v1948_v16  ;;  %v1641_v16 = vrot.slane %v1639_v43, 1 }
 0x17a   : > { %v1107_v50 = vpop.f32.mrf.mxu2 }
 0x17b   : > { %v12023_v26 = vadd.f32 %v1107_v50, %v896_v31  ;;  %v1645_v24 = vor.u32 %v1644_v58, %v1641_v16  ;;  %v1648_v16 = vshrl.u32 %v12020_v6, 16 }
 0x17c   : > { %v1420_v20 = vpop.f32.mrf.mxu3 }
 0x17d   : > { %v1794_v35 = vpop.f32.mrf.mxu0  ;;  %v1506_v59 = vadd.f32 %v1420_v20, %v11690_v44  ;;  %v1950_v20 = vsel %vm1929_vm3, %v1947_v51, %v1949_v55 }
 0x17e   : > { %v1884_v37 = vadd.f32 %v1794_v35, %v1503_v61  ;;  %v2044_v9 = vpop.f32.mrf.mxu1  ;;  %v11097_v61 = vld [vmem:[%s11544_s28 + $0x60] sm:$0xff]  ;;  %v12042_v35 = vld [vmem:[%s11544_s28 + $0x68] sm:$0xff] }
 0x17f   : > { %9878 = vmatmul.msk.bf16.gmra.mxu2 %vm617_vm0, %v2321_v57 }
 0x180   : > { %9750 = vmatmul.msk.bf16.gmra.mxu0 %vm617_vm0, %v1637_v34  ;;  %v2132_v46 = vadd.f32 %v2042_v52, %v1884_v37  ;;  %v2322_v37 = vrot.slane %v11097_v61, 2 }
 0x181   : > { %9722 = vmatmul.msk.bf16.gmra.mxu3 %vm617_vm0, %v1323_v13 }
 0x182   : > { %v2415_v17 = vpop.f32.mrf.mxu2  ;;  %v2323_v43 = vsel %vm1929_vm3, %v2320_v33, %v2322_v37  ;;  %v1651_v33 = vshll.u32 %v12020_v6, 16 }
 0x183   : > { %v12036_v44 = vadd.f32 %v2415_v17, %v2132_v46  ;;  %v1324_v17 = vrot.slane %v12042_v35, 1 }
 0x184   : > { %v1423_v25 = vpop.f32.mrf.mxu3 }
 0x185   : > { %v1796_v31 = vpop.f32.mrf.mxu0  ;;  %v1507_v50 = vadd.f32 %v1423_v25, %v11702_v48  ;;  %v1325_v61 = vsel %vm927_vm1, %v1322_v12, %v1324_v17  ;;  %v1653_v12 = vrot.slane %v1651_v33, 2 }
 0x186   : > { %v1885_v52 = vadd.f32 %v1796_v31, %v1504_v2  ;;  %v2047_v57 = vpop.f32.mrf.mxu1  ;;  %v1646_v2 = vsel %vm1548_vm4, %v1636_v7, %v1645_v24  ;;  %v1951_v7 = vrot.slane %v12020_v6, 2 }
 0x188   : > { %v2133_v34 = vadd.f32 %v2044_v9, %v1885_v52 }
 0x189   : > { %9781 = vmatmul.msk.bf16.gmra.mxu1 %vm617_vm0, %v1950_v20 }
 0x18a   : > { %v2417_v13 = vpop.f32.mrf.mxu2 }
 0x18b   : > { %v12045_v46 = vadd.f32 %v2417_v13, %v2133_v34  ;;  %v1650_v34 = vrot.slane %v1648_v16, 1 }
 0x18c   : > { %v1425_v36 = vpop.f32.mrf.mxu3 }
 0x18d   : > { %v1799_v48 = vpop.f32.mrf.mxu0  ;;  %v1508_v51 = vadd.f32 %v1425_v36, %v11707_v4  ;;  %v1952_v36 = vsel %vm1929_vm3, %v1949_v55, %v1951_v7  ;;  %v1654_v6 = vor.u32 %v1653_v12, %v1650_v34  ;;  %v1657_v34 = vshrl.u32 %v12042_v35, 16 }
 0x18e   : > { %v1886_v25 = vadd.f32 %v1799_v48, %v1505_v19  ;;  %v2049_v9 = vpop.f32.mrf.mxu1  ;;  %v11098_v19 = vld [vmem:[%s11544_s28 + $0x68] sm:$0xff]  ;;  %v12064_v48 = vld [vmem:[%s11544_s28 + $0x70] sm:$0xff] }
 0x18f   : > { %9879 = vmatmul.msk.bf16.gmra.mxu2 %vm617_vm0, %v2323_v43 }
 0x190   : > { %9751 = vmatmul.msk.bf16.gmra.mxu0 %vm617_vm0, %v1646_v2  ;;  %v2134_v31 = vadd.f32 %v2047_v57, %v1886_v25  ;;  %v2324_v25 = vrot.slane %v11098_v19, 2 }
 0x191   : > { %9723 = vmatmul.msk.bf16.gmra.mxu3 %vm617_vm0, %v1325_v61 }
 0x192   : > { %v2420_v58 = vpop.f32.mrf.mxu2  ;;  %v2325_v16 = vsel %vm1929_vm3, %v2322_v37, %v2324_v25  ;;  %v1660_v37 = vshll.u32 %v12042_v35, 16 }
 0x193   : > { %v12058_v4 = vadd.f32 %v2420_v58, %v2134_v31  ;;  %v1326_v58 = vrot.slane %v12064_v48, 1 }
 0x194   : > { %v1428_v52 = vpop.f32.mrf.mxu3 }
 0x195   : > { %v1801_v20 = vpop.f32.mrf.mxu0  ;;  %v1509_v13 = vadd.f32 %v1428_v52, %v11723_v18  ;;  %v1327_v19 = vsel %vm927_vm1, %v1324_v17, %v1326_v58  ;;  %v1662_v17 = vrot.slane %v1660_v37, 2 }
 0x196   : > { %v1887_v57 = vadd.f32 %v1801_v20, %v1506_v59  ;;  %v2052_v43 = vpop.f32.mrf.mxu1  ;;  %v1655_v59 = vsel %vm1548_vm4, %v1645_v24, %v1654_v6  ;;  %v1953_v24 = vrot.slane %v12042_v35, 2 }
 0x198   : > { %v2135_v2 = vadd.f32 %v2049_v9, %v1887_v57 }
 0x199   : > { %9782 = vmatmul.msk.bf16.gmra.mxu1 %vm617_vm0, %v1952_v36 }
 0x19a   : > { %v2422_v61 = vpop.f32.mrf.mxu2 }
 0x19b   : > { %v12067_v31 = vadd.f32 %v2422_v61, %v2135_v2  ;;  %v1659_v2 = vrot.slane %v1657_v34, 1 }
 0x19c   : > { %v1430_v33 = vpop.f32.mrf.mxu3 }
 0x19d   : > { %v1804_v18 = vpop.f32.mrf.mxu0  ;;  %v1510_v55 = vadd.f32 %v1430_v33, %v11737_v40  ;;  %v1954_v33 = vsel %vm1929_vm3, %v1951_v7, %v1953_v24  ;;  %v1663_v35 = vor.u32 %v1662_v17, %v1659_v2  ;;  %v1666_v2 = vshrl.u32 %v12064_v48, 16 }
 0x19e   : > { %v1888_v52 = vadd.f32 %v1804_v18, %v1507_v50  ;;  %v2054_v9 = vpop.f32.mrf.mxu1  ;;  %v11099_v50 = vld [vmem:[%s11544_s28 + $0x70] sm:$0xff]  ;;  %v12086_v18 = vld [vmem:[%s11544_s28 + $0x78] sm:$0xff] }
 0x19f   : > { %9880 = vmatmul.msk.bf16.gmra.mxu2 %vm617_vm0, %v2325_v16 }
 0x1a0   : > { %9752 = vmatmul.msk.bf16.gmra.mxu0 %vm617_vm0, %v1655_v59  ;;  %v2136_v20 = vadd.f32 %v2052_v43, %v1888_v52  ;;  %v2326_v52 = vrot.slane %v11099_v50, 2 }
 0x1a1   : > { %9724 = vmatmul.msk.bf16.gmra.mxu3 %vm617_vm0, %v1327_v19 }
 0x1a2   : > { %v2425_v12 = vpop.f32.mrf.mxu2  ;;  %v2327_v34 = vsel %vm1929_vm3, %v2324_v25, %v2326_v52  ;;  %v1669_v25 = vshll.u32 %v12064_v48, 16 }
 0x1a3   : > { %v12080_v40 = vadd.f32 %v2425_v12, %v2136_v20  ;;  %v1328_v12 = vrot.slane %v12086_v18, 1 }
 0x1a4   : > { %v1433_v57 = vpop.f32.mrf.mxu3 }
 0x1a5   : > { %v1806_v36 = vpop.f32.mrf.mxu0  ;;  %v1511_v61 = vadd.f32 %v1433_v57, %v11755_v56  ;;  %v1329_v50 = vsel %vm927_vm1, %v1326_v58, %v1328_v12  ;;  %v1671_v58 = vrot.slane %v1669_v25, 2 }
 0x1a6   : > { %v1889_v43 = vadd.f32 %v1806_v36, %v1508_v51  ;;  %v2057_v16 = vpop.f32.mrf.mxu1  ;;  %v1664_v51 = vsel %vm1548_vm4, %v1654_v6, %v1663_v35  ;;  %v1955_v6 = vrot.slane %v12064_v48, 2 }
 0x1a8   : > { %v2137_v59 = vadd.f32 %v2054_v9, %v1889_v43 }
 0x1a9   : > { %9783 = vmatmul.msk.bf16.gmra.mxu1 %vm617_vm0, %v1954_v33 }
 0x1aa   : > { %v2427_v19 = vpop.f32.mrf.mxu2 }
 0x1ab   : > { %v12089_v20 = vadd.f32 %v2427_v19, %v2137_v59  ;;  %v1668_v59 = vrot.slane %v1666_v2, 1 }
 0x1ac   : > { %v1435_v37 = vpop.f32.mrf.mxu3 }
 0x1ad   : > { %v1809_v56 = vpop.f32.mrf.mxu0  ;;  %v1512_v7 = vadd.f32 %v1435_v37, %v11768_v11  ;;  %v1956_v37 = vsel %vm1929_vm3, %v1953_v24, %v1955_v6  ;;  %v1672_v48 = vor.u32 %v1671_v58, %v1668_v59  ;;  %v1675_v59 = vshrl.u32 %v12086_v18, 16 }
 0x1ae   : > { %v1890_v57 = vadd.f32 %v1809_v56, %v1509_v13  ;;  %v2059_v9 = vpop.f32.mrf.mxu1  ;;  %v11100_v13 = vld [vmem:[%s11544_s28 + $0x78] sm:$0xff]  ;;  %v12108_v56 = vld [vmem:[%s11544_s28 + $0x80] sm:$0xff] }
 0x1af   : > { %9881 = vmatmul.msk.bf16.gmra.mxu2 %vm617_vm0, %v2327_v34 }
 0x1b0   : > { %9753 = vmatmul.msk.bf16.gmra.mxu0 %vm617_vm0, %v1664_v51  ;;  %v2138_v36 = vadd.f32 %v2057_v16, %v1890_v57  ;;  %v2328_v57 = vrot.slane %v11100_v13, 2 }
 0x1b1   : > { %9725 = vmatmul.msk.bf16.gmra.mxu3 %vm617_vm0, %v1329_v50 }
 0x1b2   : > { %v2430_v17 = vpop.f32.mrf.mxu2  ;;  %v2329_v2 = vsel %vm1929_vm3, %v2326_v52, %v2328_v57  ;;  %v1678_v52 = vshll.u32 %v12086_v18, 16 }
 0x1b3   : > { %v12102_v11 = vadd.f32 %v2430_v17, %v2138_v36  ;;  %v1330_v17 = vrot.slane %v12108_v56, 1 }
 0x1b4   : > { %v1438_v43 = vpop.f32.mrf.mxu3 }
 0x1b5   : > { %v1811_v33 = vpop.f32.mrf.mxu0  ;;  %v1513_v19 = vadd.f32 %v1438_v43, %v11793_v38  ;;  %v1331_v13 = vsel %vm927_vm1, %v1328_v12, %v1330_v17  ;;  %v1680_v12 = vrot.slane %v1678_v52, 2 }
 0x1b6   : > { %v1891_v16 = vadd.f32 %v1811_v33, %v1510_v55  ;;  %v2062_v34 = vpop.f32.mrf.mxu1  ;;  %v1673_v55 = vsel %vm1548_vm4, %v1663_v35, %v1672_v48  ;;  %v1957_v35 = vrot.slane %v12086_v18, 2 }
 0x1b8   : > { %v2139_v51 = vadd.f32 %v2059_v9, %v1891_v16 }
 0x1b9   : > { %9784 = vmatmul.msk.bf16.gmra.mxu1 %vm617_vm0, %v1956_v37 }
 0x1ba   : > { %v2432_v50 = vpop.f32.mrf.mxu2 }
 0x1bb   : > { %v12111_v36 = vadd.f32 %v2432_v50, %v2139_v51  ;;  %v1677_v51 = vrot.slane %v1675_v59, 1 }
 0x1bc   : > { %v1440_v25 = vpop.f32.mrf.mxu3 }
 0x1bd   : > { %v1814_v38 = vpop.f32.mrf.mxu0  ;;  %v1514_v24 = vadd.f32 %v1440_v25, %v11809_v63  ;;  %v1958_v25 = vsel %vm1929_vm3, %v1955_v6, %v1957_v35  ;;  %v1681_v18 = vor.u32 %v1680_v12, %v1677_v51  ;;  %v1684_v51 = vshrl.u32 %v12108_v56, 16 }
 0x1be   : > { %v1892_v43 = vadd.f32 %v1814_v38, %v1511_v61  ;;  %v2064_v9 = vpop.f32.mrf.mxu1  ;;  %v11101_v61 = vld [vmem:[%s11544_s28 + $0x80] sm:$0xff]  ;;  %v12130_v38 = vld [vmem:[%s11544_s28 + $0x88] sm:$0xff] }
 0x1bf   : > { %9882 = vmatmul.msk.bf16.gmra.mxu2 %vm617_vm0, %v2329_v2 }
 0x1c0   : > { %9754 = vmatmul.msk.bf16.gmra.mxu0 %vm617_vm0, %v1673_v55  ;;  %v2140_v33 = vadd.f32 %v2062_v34, %v1892_v43  ;;  %v2330_v43 = vrot.slane %v11101_v61, 2 }
 0x1c1   : > { %9726 = vmatmul.msk.bf16.gmra.mxu3 %vm617_vm0, %v1331_v13 }
 0x1c2   : > { %v2435_v58 = vpop.f32.mrf.mxu2  ;;  %v2331_v59 = vsel %vm1929_vm3, %v2328_v57, %v2330_v43  ;;  %v1687_v57 = vshll.u32 %v12108_v56, 16 }
 0x1c3   : > { %v12124_v63 = vadd.f32 %v2435_v58, %v2140_v33  ;;  %v1332_v58 = vrot.slane %v12130_v38, 1 }
 0x1c4   : > { %v1443_v16 = vpop.f32.mrf.mxu3 }
 0x1c5   : > { %v1816_v37 = vpop.f32.mrf.mxu0  ;;  %v1515_v50 = vadd.f32 %v1443_v16, %v11824_v28  ;;  %v1333_v61 = vsel %vm927_vm1, %v1330_v17, %v1332_v58  ;;  %v1689_v17 = vrot.slane %v1687_v57, 2 }
 0x1c6   : > { %v1893_v34 = vadd.f32 %v1816_v37, %v1512_v7  ;;  %v2067_v2 = vpop.f32.mrf.mxu1  ;;  %v1682_v7 = vsel %vm1548_vm4, %v1672_v48, %v1681_v18  ;;  %v1959_v48 = vrot.slane %v12108_v56, 2 }
 0x1c8   : > { %v2141_v55 = vadd.f32 %v2064_v9, %v1893_v34 }
 0x1c9   : > { %9785 = vmatmul.msk.bf16.gmra.mxu1 %vm617_vm0, %v1958_v25 }
 0x1ca   : > { %v2437_v13 = vpop.f32.mrf.mxu2 }
 0x1cb   : > { %v12133_v33 = vadd.f32 %v2437_v13, %v2141_v55  ;;  %v1686_v55 = vrot.slane %v1684_v51, 1 }
 0x1cc   : > { %v1445_v52 = vpop.f32.mrf.mxu3 }
 0x1cd   : > { %v1819_v28 = vpop.f32.mrf.mxu0  ;;  %v1516_v6 = vadd.f32 %v1445_v52, %v11835_v42  ;;  %v1960_v52 = vsel %vm1929_vm3, %v1957_v35, %v1959_v48  ;;  %v1690_v56 = vor.u32 %v1689_v17, %v1686_v55  ;;  %v1202_v55 = vld [vmem:[%s11544_s28 + $0x98] sm:$0x1]  ;;  %v1693_v17 = vshrl.u32 %v12130_v38, 16 }
 0x1ce   : > { %v1894_v16 = vadd.f32 %v1819_v28, %v1513_v19  ;;  %v2069_v9 = vpop.f32.mrf.mxu1  ;;  %v11102_v19 = vld [vmem:[%s11544_s28 + $0x88] sm:$0xff]  ;;  %v12152_v28 = vld [vmem:[%s11544_s28 + $0x90] sm:$0xff] }
 0x1cf   : > { %9883 = vmatmul.msk.bf16.gmra.mxu2 %vm617_vm0, %v2331_v59  ;;  %v1334_v51 = vrot.slane %v12152_v28, 1 }
 0x1d0   : > { %9755 = vmatmul.msk.bf16.gmra.mxu0 %vm617_vm0, %v1682_v7  ;;  %v2142_v37 = vadd.f32 %v2067_v2, %v1894_v16  ;;  %v2332_v16 = vrot.slane %v11102_v19, 2 }
 0x1d1   : > { %9727 = vmatmul.msk.bf16.gmra.mxu3 %vm617_vm0, %v1333_v61 }
 0x1d2   : > { %v2440_v12 = vpop.f32.mrf.mxu2  ;;  %v2333_v57 = vsel %vm1929_vm3, %v2330_v43, %v2332_v16  ;;  %v1696_v43 = vshll.u32 %v12130_v38, 16 }
 0x1d3   : > { %v12146_v42 = vadd.f32 %v2440_v12, %v2142_v37  ;;  %v1691_v12 = vsel %vm1548_vm4, %v1681_v18, %v1690_v56  ;;  %v1961_v18 = vrot.slane %v12130_v38, 2 }
 0x1d4   : > { %v1448_v34 = vpop.f32.mrf.mxu3 }
 0x1d5   : > { %v1821_v25 = vpop.f32.mrf.mxu0  ;;  %v1517_v13 = vadd.f32 %v1448_v34, %v11850_v62  ;;  %v1335_v34 = vsel %vm927_vm1, %v1332_v58, %v1334_v51 }
 0x1d6   : > { %v1895_v2 = vadd.f32 %v1821_v25, %v1514_v24  ;;  %v2072_v59 = vpop.f32.mrf.mxu1 }
 0x1d8   : > { %v2143_v7 = vadd.f32 %v2069_v9, %v1895_v2 }
 0x1d9   : > { %9786 = vmatmul.msk.bf16.gmra.mxu1 %vm617_vm0, %v1960_v52  ;;  %v12172_v52 = vld [vmem:[%s11544_s28 + $0x90] sm:$0xff] }
 0x1da   : > { %v2442_v61 = vpop.f32.mrf.mxu2  ;;  %v2334_v38 = vrot.slane %v12172_v52, 2 }
 0x1db   : > { %v12155_v37 = vadd.f32 %v2442_v61, %v2143_v7  ;;  %v1695_v61 = vrot.slane %v1693_v17, 1 }
 0x1dc   : > { %v1450_v62 = vpop.f32.mrf.mxu3  ;;  %v2335_v17 = vsel %vm1929_vm3, %v2332_v16, %v2334_v38  ;;  %v1702_v16 = vshrl.u32 %v12152_v28, 16 }
 0x1dd   : > { %v1824_v24 = vpop.f32.mrf.mxu0  ;;  %v1518_v35 = vadd.f32 %v1450_v62, %v11861_v49 }
 0x1de   : > { %v1896_v9 = vadd.f32 %v1824_v24, %v1515_v50  ;;  %v2074_v19 = vpop.f32.mrf.mxu1  ;;  %v1281_v50 = vunpack.c.l.b16 %v1202_v55 }
 0x1df   : > { %9884 = vmatmul.msk.bf16.gmra.mxu2 %vm617_vm0, %v2333_v57  ;;  %v1698_v57 = vrot.slane %v1696_v43, 2 }
 0x1e0   : > { %9756 = vmatmul.msk.bf16.gmra.mxu0 %vm617_vm0, %v1691_v12  ;;  %v2144_v25 = vadd.f32 %v2072_v59, %v1896_v9  ;;  %v1962_v12 = vsel %vm1929_vm3, %v1959_v48, %v1961_v18  ;;  %v1300_v9 = vpack.c.b16 %v1281_v50, %v1281_v50 }
 0x1e1   : > { %9728 = vmatmul.msk.bf16.gmra.mxu3 %vm617_vm0, %v1335_v34 }
 0x1e2   : > { %v2445_v2 = vpop.f32.mrf.mxu2  ;;  %v1336_v29 = vrot.slane %v1300_v9, 1 }
 0x1e3   : > { %v12169_v49 = vadd.f32 %v2445_v2, %v2144_v25  ;;  %v1699_v25 = vor.u32 %v1698_v57, %v1695_v61  ;;  %v2555_v57 = vshll.u32 %v11798_v41, 16 }
 0x1e4   : > { %v1453_v7 = vpop.f32.mrf.mxu3  ;;  %v1337_v52 = vsel %vm927_vm1, %v1334_v51, %v1336_v29 }
 0x1e5   : > { %v1826_v58 = vpop.f32.mrf.mxu0  ;;  %v12175_v59 = vadd.f32 %v1453_v7, %v11876_v47 }
 0x1e6   : > { %v1897_v62 = vadd.f32 %v1826_v58, %v1516_v6  ;;  %v2077_v24 = vpop.f32.mrf.mxu1  ;;  %v1700_v6 = vsel %vm1548_vm4, %v1690_v56, %v1699_v25  ;;  %v1705_v58 = vshll.u32 %v12152_v28, 16 }
 0x1e8   : > { %v2145_v34 = vadd.f32 %v2074_v19, %v1897_v62  ;;  %v12199_v62 = vld [vmem:[%s11544_s28 + $0x18] sm:$0xff] }
 0x1e9   : > { %9787 = vmatmul.msk.bf16.gmra.mxu1 %vm617_vm0, %v1962_v12  ;;  %v2560_v29 = vshrl.u32 %v12199_v62, 16  ;;  %v2563_v51 = vshll.u32 %v12199_v62, 16 }
 0x1ea   : > { %v2447_v55 = vpop.f32.mrf.mxu2 }
 0x1eb   : > { %v12180_v2 = vadd.f32 %v2447_v55, %v2145_v34  ;;  %v1704_v34 = vrot.slane %v1702_v16, 1  ;;  %v1707_v55 = vrot.slane %v1705_v58, 2 }
 0x1ec   : > { %v1455_v43 = vpop.f32.mrf.mxu3 }
 0x1ed   : > { %v1829_v47 = vpop.f32.mrf.mxu0  ;;  %v12185_v48 = vadd.f32 %v1455_v43, %v11887_v5  ;;  %v1963_v5 = vrot.slane %v12152_v28, 2 }
 0x1ee   : > { %v1898_v19 = vadd.f32 %v1829_v47, %v1517_v13  ;;  %v2079_v50 = vpop.f32.mrf.mxu1  ;;  %v2552_v13 = vshrl.u32 %v11798_v41, 16 }
 0x1ef   : > { %9885 = vmatmul.msk.bf16.gmra.mxu2 %vm617_vm0, %v2335_v17  ;;  %v1964_v41 = vsel %vm1929_vm3, %v1961_v18, %v1963_v5 }
 0x1f0   : > { %9757 = vmatmul.msk.bf16.gmra.mxu0 %vm617_vm0, %v1700_v6  ;;  %v2146_v7 = vadd.f32 %v2077_v24, %v1898_v19  ;;  %v12204_v24 = vld [vmem:[%s11544_s28 + $0x98] sm:$0xff]  ;;  %v2554_v19 = vrot.slane %v2552_v13, 2 }
 0x1f1   : > { %9729 = vmatmul.msk.bf16.gmra.mxu3 %vm617_vm0, %v1337_v52  ;;  %v11151_v6 = vld [vmem:[%s14543_s3 + $0xb8] sm:$0xff]  ;;  %v2557_v52 = vrot.slane %v2555_v57, 3 }
 0x1f2   : > { %v2450_v56 = vpop.f32.mrf.mxu2  ;;  %4104 = vmatpush.bf16.msrb.mxu3 %v11151_v6  ;;  %v11174_v6 = vld [vmem:[%s14543_s3 + $0xe8] sm:$0xff] }
 0x1f3   : > { %v12195_v61 = vadd.f32 %v2450_v56, %v2146_v7  ;;  %v2562_v7 = vrot.slane %v2560_v29, 2  ;;  %v2565_v56 = vrot.slane %v2563_v51, 3  ;;  %5104 = vmatpush.bf16.msrb.mxu2 %v11174_v6 }
 0x1f4   : > { %v1458_v12 = vpop.f32.mrf.mxu3 }
 0x1f5   : > { %14550 = vst [vmem:[#allocation2_spill] sm:$0xff] %v12195_v61  ;;  %v1831_v9 = vpop.f32.mrf.mxu0  ;;  %v12208_v17 = vadd.f32 %v1458_v12, %v11902_v30  ;;  %v1539_v61 = vld [vmem:[%s11544_s28 + $0x98] sm:$0x3]  ;;  %v2336_v30 = vrot.slane %v12204_v24, 2  ;;  %v12223_v13 = vor.u32 %v2565_v56, %v2562_v7 }
 0x1f6   : > { %v1899_v43 = vadd.f32 %v1831_v9, %v1518_v35  ;;  %v2082_v47 = vpop.f32.mrf.mxu1  ;;  %v12219_v35 = vor.u32 %v1707_v55, %v1704_v34  ;;  %v1546_v58 = vunpack.c.l.b16 %v1539_v61  ;;  %v2558_v9 = vor.u32 %v2557_v52, %v2554_v19  ;;  %v2204_v34 = vld [vmem:[%s11544_s28 + $0xa0] sm:$0x3] }
 0x1f8   : > { %v2147_v16 = vadd.f32 %v2079_v50, %v1899_v43  ;;  %v2337_v50 = vsel %vm1929_vm3, %v2334_v38, %v2336_v30  ;;  %v1709_v51 = vsel %vm1548_vm4, %v1699_v25, %v12219_v35  ;;  %v2567_v38 = vsel %vm2550_vm5, %v2558_v9, %v12223_v13  ;;  %v11172_v9 = vld [vmem:[%s14543_s3 + $0xd8] sm:$0xff] }
 0x1f9   : > { %9788 = vmatmul.msk.bf16.gmra.mxu1 %vm617_vm0, %v1964_v41  ;;  %v1547_v41 = vpack.c.b16 %v1546_v58, %v1546_v58  ;;  %v2283_v25 = vunpack.c.l.b16 %v2204_v34 }
 0x1fa   : > { %v2452_v18 = vpop.f32.mrf.mxu2  ;;  %4857 = vmatpush.bf16.msrb.mxu1 %v11172_v9 }
 0x1fb   : > { %v12221_v12 = vadd.f32 %v2452_v18, %v2147_v16  ;;  %v1711_v19 = vshrl.u32 %v1547_v41, 16  ;;  %v1714_v52 = vshll.u32 %v1547_v41, 16  ;;  %v1965_v56 = vrot.slane %v1547_v41, 2  ;;  %v12252_v18 = vld [vmem:[%s11544_s28 + $0x20] sm:$0xff] }
 0x1fc   : > { %v1460_v57 = vpop.f32.mrf.mxu3  ;;  %v2569_v58 = vshrl.u32 %v12252_v18, 16 }
 0x1fd   : > { %v1834_v29 = vpop.f32.mrf.mxu0  ;;  %v12234_v61 = vadd.f32 %v1460_v57, %v11913_v53  ;;  %v1716_v34 = vrot.slane %v1714_v52, 2  ;;  %v1966_v6 = vsel %vm1929_vm3, %v1963_v5, %v1965_v56 }
 0x1fe   : > { %v1900_v55 = vadd.f32 %v1834_v29, %v12175_v59  ;;  %v2084_v43 = vpop.f32.mrf.mxu1  ;;  %v11170_v59 = vld [vmem:[%s14543_s3 + $0xc8] sm:$0xff] }
 0x1ff   : > { %9886 = vmatmul.msk.bf16.gmra.mxu2 %vm617_vm0, %v2337_v50  ;;  %4477 = vmatpush.bf16.msrb.mxu0 %v11170_v59  ;;  %v2302_v50 = vpack.c.b16 %v2283_v25, %v2283_v25 }
 0x200   : > { %9758 = vmatmul.msk.bf16.gmra.mxu0 %vm617_vm0, %v1709_v51  ;;  %v2148_v53 = vadd.f32 %v2082_v47, %v1900_v55  ;;  %v2572_v47 = vshll.u32 %v12252_v18, 16  ;;  %v1713_v51 = vrot.slane %v1711_v19, 1 }
 0x201   : > { %9900 = vmatmul.msk.bf16.vlgmr.msra.gmra.mxu3 %vm617_vm0, %v2567_v38  ;;  %v2338_v25 = vrot.slane %v2302_v50, 2 }
 0x202   : > { %v2455_v7 = vpop.f32.mrf.mxu2  ;;  %v2574_v59 = vrot.slane %v2572_v47, 3  ;;  %v1717_v19 = vor.u32 %v1716_v34, %v1713_v51 }
 0x203   : > { %v12249_v16 = vadd.f32 %v2455_v7, %v2148_v53  ;;  %v2571_v53 = vrot.slane %v2569_v58, 2  ;;  %v2339_v5 = vsel %vm1929_vm3, %v2336_v30, %v2338_v25  ;;  %v11290_v58 = vld [vmem:[%s12271_s9] sm:$0xff]  }
 0x204   : > { %v1463_v57 = vpop.f32.mrf.mxu3  ;;  %v1718_v56 = vsel %vm1548_vm4, %v12219_v35, %v1717_v19  ;;  %v3640_v35 = vshll.u32 %v11290_v58, 16  ;;  %v14551_v19 = vunpack.c.l.b16 %v11778_v21 }
 0x205   : > { %v1836_v29 = vpop.f32.mrf.mxu0  ;;  %v12261_v55 = vadd.f32 %v1463_v57, %v11928_v0  ;;  %v2922_v57 = vld [vmem:[%s11544_s28 + $0x10] sm:$0x8] }
 0x206   : > { %v1901_v41 = vadd.f32 %v1836_v29, %v12185_v48  ;;  %v2087_v38 = vpop.f32.mrf.mxu1  ;;  %v2575_v48 = vor.u32 %v2574_v59, %v2571_v53  ;;  %v11131_v29 = vld [vmem:[%s12271_s9 + $0x8] sm:$0xff]  ;;  %v2929_v51 = vunpack.c.l.b16 %v2922_v57  ;;  %v3638_v53 = vshrl.u32 %v11290_v58, 16 }
 0x207   : > { %v3645_v59 = vshll.u32 %v11131_v29, 16 }
 0x208   : > { %v2149_v7 = vadd.f32 %v2084_v43, %v1901_v41  ;;  %v2576_v24 = vsel %vm2550_vm5, %v12223_v13, %v2575_v48  ;;  %v3642_v13 = vrot.slane %v3640_v35, 1  ;;  %v2933_v35 = vrot.slane %v12199_v62, 3 }
 0x209   : > { %9789 = vmatmul.msk.bf16.gmra.mxu1 %vm617_vm0, %v1966_v6 }
 0x20a   : > { %v2457_v0 = vpop.f32.mrf.mxu2 }
 0x20b   : > { %v12273_v28 = vadd.f32 %v2457_v0, %v2149_v7  ;;  %v2930_v0 = vpack.c.b16 %v14551_v19, %v2929_v51  ;;  %v12320_v19 = vld [vmem:[%s11544_s28 + $0x30] sm:$0xff] }
 0x20c   : > { %v1465_v43 = vpop.f32.mrf.mxu3 }
 0x20d   : > { %v1839_v52 = vpop.f32.mrf.mxu0  ;;  %v12282_v47 = vadd.f32 %v1465_v43, %v11939_v45  ;;  %v2932_v58 = vrot.slane %v2930_v0, 3  ;;  %v3649_v0 = vshrl.u32 %v11131_v29, 16 }
 0x20e   : > { %v1902_v9 = vadd.f32 %v1839_v52, %v12208_v17  ;;  %v2089_v50 = vpop.f32.mrf.mxu1  ;;  %v12295_v17 = vld [vmem:[%s11544_s28 + $0x28] sm:$0xff] }
 0x20f   : > { %9887 = vmatmul.msk.bf16.gmra.mxu2 %vm617_vm0, %v2339_v5  ;;  %v2578_v41 = vshrl.u32 %v12295_v17, 16  ;;  %v2581_v6 = vshll.u32 %v12295_v17, 16 }
 0x210   : > { %9759 = vmatmul.msk.bf16.gmra.mxu0 %vm617_vm0, %v1718_v56  ;;  %v2150_v30 = vadd.f32 %v2087_v38, %v1902_v9  ;;  %v11111_v38 = vld [vmem:[%s12271_s9] sm:$0xff] }
 0x211   : > { %9901 = vmatmul.msk.bf16.gmra.mxu3 %vm617_vm0, %v2576_v24  ;;  %v2580_v56 = vrot.slane %v2578_v41, 2  ;;  %v2583_v9 = vrot.slane %v2581_v6, 3  ;;  %v3643_v24 = vor.u32 %v3642_v13, %v3638_v53 }
 0x212   : > { %v2460_v34 = vpop.f32.mrf.mxu2 }
 0x213   : > { %v12292_v45 = vadd.f32 %v2460_v34, %v2150_v30  ;;  %v3647_v30 = vrot.slane %v3645_v59, 1  ;;  %v2584_v51 = vor.u32 %v2583_v9, %v2580_v56 }
 0x214   : > { %v1468_v7 = vpop.f32.mrf.mxu3 }
 0x215   : > { %v1841_v25 = vpop.f32.mrf.mxu0  ;;  %v1525_v5 = vadd.f32 %v1468_v7, %v11954_v14  ;;  %v3648_v14 = vsel %vm456_vm2, %v3643_v24, %v3647_v30  ;;  %v2585_v62 = vsel %vm2550_vm5, %v2575_v48, %v2584_v51  ;;  %v11132_v7 = vld [vmem:[%s12271_s9 + $0x10] sm:$0xff]  ;;  %v11112_v48 = vld [vmem:[%s12271_s9 + $0x8] sm:$0xff] }
 0x216   : > { %v1903_v43 = vadd.f32 %v1841_v25, %v12234_v61  ;;  %v2092_v52 = vpop.f32.mrf.mxu1 }
 0x218   : > { %v2151_v57 = vadd.f32 %v2089_v50, %v1903_v43  ;;  %v2934_v50 = vsel %vm2931_vm6, %v2932_v58, %v2933_v35  ;;  %v3653_v43 = vshll.u32 %v11132_v7, 16 }
 0x219   : > { %10032 = vmatmul.msk.bf16.vlgmr.msra.gmra.mxu1 %vm617_vm0, %v11111_v38 }
 0x21a   : > { %v2462_v34 = vpop.f32.mrf.mxu2 }
 0x21b   : > { %v12306_v21 = vadd.f32 %v2462_v34, %v2151_v57 }
 0x21c   : > { %v1470_v61 = vpop.f32.mrf.mxu3 }
 0x21d   : > { %v1844_v41 = vpop.f32.mrf.mxu0  ;;  %v1526_v6 = vadd.f32 %v1470_v61, %v11965_v15  ;;  %v2587_v15 = vshrl.u32 %v12320_v19, 16  ;;  %v3651_v61 = vor.u32 %v3649_v0, %v3647_v30  ;;  %v11133_v0 = vld [vmem:[%s12271_s9 + $0x18] sm:$0xff] }
 0x21e   : > { %v1904_v53 = vadd.f32 %v1844_v41, %v12261_v55  ;;  %v2094_v13 = vpop.f32.mrf.mxu1  ;;  %v2590_v55 = vshll.u32 %v12320_v19, 16  ;;  %v3655_v41 = vrot.slane %v3653_v43, 1 }
 0x21f   : > { %10130 = vmatmul.msk.bf16.vlgmr.msra.gmra.mxu2 %vm617_vm0, %v3648_v14  ;;  %v2589_v58 = vrot.slane %v2587_v15, 2 }
 0x220   : > { %9930 = vmatmul.msk.bf16.vlgmr.msra.gmra.mxu0 %vm617_vm0, %v2934_v50  ;;  %v2152_v59 = vadd.f32 %v2092_v52, %v1904_v53  ;;  %v2592_v34 = vrot.slane %v2590_v55, 3  ;;  %v2935_v50 = vrot.slane %v12252_v18, 3 }
 0x221   : > { %9902 = vmatmul.msk.bf16.gmra.mxu3 %vm617_vm0, %v2585_v62 }
 0x222   : > { %v2465_v25 = vpop.f32.mrf.mxu2  ;;  %v2593_v62 = vor.u32 %v2592_v34, %v2589_v58 }
 0x223   : > { %v12317_v38 = vadd.f32 %v2465_v25, %v2152_v59  ;;  %v2936_v25 = vsel %vm2931_vm6, %v2933_v35, %v2935_v50  ;;  %v3657_v35 = vshrl.u32 %v11132_v7, 16 }
 0x224   : > { %v1473_v56 = vpop.f32.mrf.mxu3  ;;  %v2594_v18 = vsel %vm2550_vm5, %v2584_v51, %v2593_v62  ;;  %v11113_v51 = vld [vmem:[%s12271_s9 + $0x10] sm:$0xff] }
 0x225   : > { %v1846_v9 = vpop.f32.mrf.mxu0  ;;  %v1527_v57 = vadd.f32 %v1473_v56, %v11980_v1  ;;  %v3656_v1 = vsel %vm456_vm2, %v3651_v61, %v3655_v41 }
 0x226   : > { %v1905_v52 = vadd.f32 %v1846_v9, %v12282_v47  ;;  %v2097_v24 = vpop.f32.mrf.mxu1  ;;  %v12342_v9 = vld [vmem:[%s11544_s28 + $0x38] sm:$0xff] }
 0x228   : > { %v2153_v14 = vadd.f32 %v2094_v13, %v1905_v52 }
 0x229   : > { %10033 = vmatmul.msk.bf16.gmra.mxu1 %vm617_vm0, %v11112_v48  ;;  %v3661_v48 = vshll.u32 %v11133_v0, 16 }
 0x22a   : > { %v2467_v29 = vpop.f32.mrf.mxu2 }
 0x22b   : > { %v12329_v53 = vadd.f32 %v2467_v29, %v2153_v14 }
 0x22c   : > { %v1475_v59 = vpop.f32.mrf.mxu3 }
 0x22d   : > { %v1849_v47 = vpop.f32.mrf.mxu0  ;;  %v1528_v13 = vadd.f32 %v1475_v59, %v11992_v10  ;;  %v2596_v10 = vshrl.u32 %v12342_v9, 16  ;;  %v3659_v59 = vor.u32 %v3657_v35, %v3655_v41  ;;  %v11134_v35 = vld [vmem:[%s12271_s9 + $0x20] sm:$0xff] }
 0x22e   : > { %v1906_v30 = vadd.f32 %v1849_v47, %v1525_v5  ;;  %v2099_v15 = vpop.f32.mrf.mxu1  ;;  %v2599_v5 = vshll.u32 %v12342_v9, 16  ;;  %v3663_v47 = vrot.slane %v3661_v48, 1 }
 0x22f   : > { %10131 = vmatmul.msk.bf16.gmra.mxu2 %vm617_vm0, %v3656_v1  ;;  %v2598_v61 = vrot.slane %v2596_v10, 2 }
 0x230   : > { %9931 = vmatmul.msk.bf16.gmra.mxu0 %vm617_vm0, %v2936_v25  ;;  %v2154_v55 = vadd.f32 %v2097_v24, %v1906_v30  ;;  %v2601_v29 = vrot.slane %v2599_v5, 3  ;;  %v2937_v25 = vrot.slane %v12295_v17, 3 }
 0x231   : > { %9903 = vmatmul.msk.bf16.gmra.mxu3 %vm617_vm0, %v2594_v18 }
 0x232   : > { %v2470_v43 = vpop.f32.mrf.mxu2  ;;  %v2602_v18 = vor.u32 %v2601_v29, %v2598_v61 }
 0x233   : > { %v12339_v56 = vadd.f32 %v2470_v43, %v2154_v55  ;;  %v3664_v55 = vsel %vm456_vm2, %v3659_v59, %v3663_v47  ;;  %v2938_v43 = vsel %vm2931_vm6, %v2935_v50, %v2937_v25  ;;  %v3665_v50 = vshrl.u32 %v11133_v0, 16 }
 0x234   : > { %v1478_v52 = vpop.f32.mrf.mxu3  ;;  %v2603_v17 = vsel %vm2550_vm5, %v2593_v62, %v2602_v18  ;;  %v11114_v62 = vld [vmem:[%s12271_s9 + $0x18] sm:$0xff] }
 0x235   : > { %v1851_v58 = vpop.f32.mrf.mxu0  ;;  %v1529_v34 = vadd.f32 %v1478_v52, %v12011_v8 }
 0x236   : > { %v1907_v24 = vadd.f32 %v1851_v58, %v1526_v6  ;;  %v2102_v14 = vpop.f32.mrf.mxu1  ;;  %v12363_v58 = vld [vmem:[%s11544_s28 + $0x40] sm:$0xff] }
 0x238   : > { %v2155_v1 = vadd.f32 %v2099_v15, %v1907_v24 }
 0x239   : > { %10034 = vmatmul.msk.bf16.gmra.mxu1 %vm617_vm0, %v11113_v51  ;;  %v3669_v51 = vshll.u32 %v11134_v35, 16 }
 0x23a   : > { %v2472_v30 = vpop.f32.mrf.mxu2 }
 0x23b   : > { %v12350_v7 = vadd.f32 %v2472_v30, %v2155_v1 }
 0x23c   : > { %v1480_v8 = vpop.f32.mrf.mxu3 }
 0x23d   : > { %v1854_v6 = vpop.f32.mrf.mxu0  ;;  %v1530_v15 = vadd.f32 %v1480_v8, %v12023_v26  ;;  %v2605_v26 = vshrl.u32 %v12363_v58, 16  ;;  %v3667_v8 = vor.u32 %v3665_v50, %v3663_v47  ;;  %v11135_v50 = vld [vmem:[%s12271_s9 + $0x28] sm:$0xff] }
 0x23e   : > { %v1908_v41 = vadd.f32 %v1854_v6, %v1527_v57  ;;  %v2104_v10 = vpop.f32.mrf.mxu1  ;;  %v2608_v57 = vshll.u32 %v12363_v58, 16  ;;  %v3671_v6 = vrot.slane %v3669_v51, 1 }
 0x23f   : > { %10132 = vmatmul.msk.bf16.gmra.mxu2 %vm617_vm0, %v3664_v55  ;;  %v2607_v59 = vrot.slane %v2605_v26, 2 }
 0x240   : > { %9932 = vmatmul.msk.bf16.gmra.mxu0 %vm617_vm0, %v2938_v43  ;;  %v2156_v5 = vadd.f32 %v2102_v14, %v1908_v41  ;;  %v2610_v30 = vrot.slane %v2608_v57, 3  ;;  %v2939_v43 = vrot.slane %v12320_v19, 3 }
 0x241   : > { %9904 = vmatmul.msk.bf16.gmra.mxu3 %vm617_vm0, %v2603_v17 }
 0x242   : > { %v2475_v48 = vpop.f32.mrf.mxu2  ;;  %v2611_v17 = vor.u32 %v2610_v30, %v2607_v59 }
 0x243   : > { %v12360_v52 = vadd.f32 %v2475_v48, %v2156_v5  ;;  %v3672_v5 = vsel %vm456_vm2, %v3667_v8, %v3671_v6  ;;  %v2940_v48 = vsel %vm2931_vm6, %v2937_v25, %v2939_v43  ;;  %v3673_v25 = vshrl.u32 %v11134_v35, 16 }
 0x244   : > { %v1483_v24 = vpop.f32.mrf.mxu3  ;;  %v2612_v19 = vsel %vm2550_vm5, %v2602_v18, %v2611_v17  ;;  %v11115_v18 = vld [vmem:[%s12271_s9 + $0x20] sm:$0xff] }
 0x245   : > { %v1856_v61 = vpop.f32.mrf.mxu0  ;;  %v1531_v29 = vadd.f32 %v1483_v24, %v11880_v32 }
 0x246   : > { %v1909_v14 = vadd.f32 %v1856_v61, %v1528_v13  ;;  %v2107_v1 = vpop.f32.mrf.mxu1  ;;  %v12384_v61 = vld [vmem:[%s11544_s28 + $0x48] sm:$0xff] }
 0x248   : > { %v2157_v55 = vadd.f32 %v2104_v10, %v1909_v14 }
 0x249   : > { %10035 = vmatmul.msk.bf16.gmra.mxu1 %vm617_vm0, %v11114_v62  ;;  %v3677_v62 = vshll.u32 %v11135_v50, 16 }
 0x24a   : > { %v2477_v41 = vpop.f32.mrf.mxu2 }
 0x24b   : > { %v12371_v0 = vadd.f32 %v2477_v41, %v2157_v55 }
 0x24c   : > { %v1485_v32 = vpop.f32.mrf.mxu3 }
 0x24d   : > { %v1859_v13 = vpop.f32.mrf.mxu0  ;;  %v1532_v10 = vadd.f32 %v1485_v32, %v11893_v60  ;;  %v2614_v60 = vshrl.u32 %v12384_v61, 16  ;;  %v3675_v32 = vor.u32 %v3673_v25, %v3671_v6  ;;  %v11136_v25 = vld [vmem:[%s12271_s9 + $0x30] sm:$0xff] }
 0x24e   : > { %v1910_v47 = vadd.f32 %v1859_v13, %v1529_v34  ;;  %v2109_v26 = vpop.f32.mrf.mxu1  ;;  %v2617_v34 = vshll.u32 %v12384_v61, 16  ;;  %v3679_v13 = vrot.slane %v3677_v62, 1 }
 0x24f   : > { %10133 = vmatmul.msk.bf16.gmra.mxu2 %vm617_vm0, %v3672_v5  ;;  %v2616_v8 = vrot.slane %v2614_v60, 2 }
 0x250   : > { %9933 = vmatmul.msk.bf16.gmra.mxu0 %vm617_vm0, %v2940_v48  ;;  %v2158_v57 = vadd.f32 %v2107_v1, %v1910_v47  ;;  %v2619_v41 = vrot.slane %v2617_v34, 3  ;;  %v2941_v48 = vrot.slane %v12342_v9, 3 }
 0x251   : > { %9905 = vmatmul.msk.bf16.gmra.mxu3 %vm617_vm0, %v2612_v19 }
 0x252   : > { %v2480_v51 = vpop.f32.mrf.mxu2  ;;  %v2620_v19 = vor.u32 %v2619_v41, %v2616_v8 }
 0x253   : > { %v12381_v24 = vadd.f32 %v2480_v51, %v2158_v57  ;;  %v3680_v57 = vsel %vm456_vm2, %v3675_v32, %v3679_v13  ;;  %v2942_v51 = vsel %vm2931_vm6, %v2939_v43, %v2941_v48  ;;  %v3681_v43 = vshrl.u32 %v11135_v50, 16 }
 0x254   : > { %v1488_v14 = vpop.f32.mrf.mxu3  ;;  %v2621_v9 = vsel %vm2550_vm5, %v2611_v17, %v2620_v19  ;;  %v11116_v17 = vld [vmem:[%s12271_s9 + $0x28] sm:$0xff] }
 0x255   : > { %v1861_v59 = vpop.f32.mrf.mxu0  ;;  %v1533_v30 = vadd.f32 %v1488_v14, %v11906_v39 }
 0x256   : > { %v1911_v1 = vadd.f32 %v1861_v59, %v1530_v15  ;;  %v2112_v55 = vpop.f32.mrf.mxu1  ;;  %v12405_v59 = vld [vmem:[%s11544_s28 + $0x50] sm:$0xff] }
 0x258   : > { %v2159_v5 = vadd.f32 %v2109_v26, %v1911_v1 }
 0x259   : > { %10036 = vmatmul.msk.bf16.gmra.mxu1 %vm617_vm0, %v11115_v18  ;;  %v3685_v18 = vshll.u32 %v11136_v25, 16 }
 0x25a   : > { %v2482_v47 = vpop.f32.mrf.mxu2 }
 0x25b   : > { %v12392_v35 = vadd.f32 %v2482_v47, %v2159_v5 }
 0x25c   : > { %v1490_v39 = vpop.f32.mrf.mxu3 }
 0x25d   : > { %v1864_v15 = vpop.f32.mrf.mxu0  ;;  %v1534_v26 = vadd.f32 %v1490_v39, %v11919_v3  ;;  %v2623_v3 = vshrl.u32 %v12405_v59, 16  ;;  %v3683_v39 = vor.u32 %v3681_v43, %v3679_v13  ;;  %v11137_v43 = vld [vmem:[%s12271_s9 + $0x38] sm:$0xff] }
 0x25e   : > { %v1912_v6 = vadd.f32 %v1864_v15, %v1531_v29  ;;  %v2114_v60 = vpop.f32.mrf.mxu1  ;;  %v2626_v29 = vshll.u32 %v12405_v59, 16  ;;  %v3687_v15 = vrot.slane %v3685_v18, 1 }
 0x25f   : > { %10134 = vmatmul.msk.bf16.gmra.mxu2 %vm617_vm0, %v3680_v57  ;;  %v2625_v32 = vrot.slane %v2623_v3, 2 }
 0x260   : > { %9934 = vmatmul.msk.bf16.gmra.mxu0 %vm617_vm0, %v2942_v51  ;;  %v2160_v34 = vadd.f32 %v2112_v55, %v1912_v6  ;;  %v2628_v47 = vrot.slane %v2626_v29, 3  ;;  %v2943_v51 = vrot.slane %v12363_v58, 3 }
 0x261   : > { %9906 = vmatmul.msk.bf16.gmra.mxu3 %vm617_vm0, %v2621_v9 }
 0x262   : > { %v2485_v62 = vpop.f32.mrf.mxu2  ;;  %v2629_v9 = vor.u32 %v2628_v47, %v2625_v32 }
 0x263   : > { %v12402_v14 = vadd.f32 %v2485_v62, %v2160_v34  ;;  %v3688_v34 = vsel %vm456_vm2, %v3683_v39, %v3687_v15  ;;  %v2944_v62 = vsel %vm2931_vm6, %v2941_v48, %v2943_v51  ;;  %v3689_v48 = vshrl.u32 %v11136_v25, 16 }
 0x264   : > { %v1493_v1 = vpop.f32.mrf.mxu3  ;;  %v2630_v58 = vsel %vm2550_vm5, %v2620_v19, %v2629_v9  ;;  %v11117_v19 = vld [vmem:[%s12271_s9 + $0x30] sm:$0xff] }
 0x265   : > { %v1866_v8 = vpop.f32.mrf.mxu0  ;;  %v1535_v41 = vadd.f32 %v1493_v1, %v11932_v23 }
 0x266   : > { %v1913_v55 = vadd.f32 %v1866_v8, %v1532_v10  ;;  %v2117_v5 = vpop.f32.mrf.mxu1  ;;  %v12426_v8 = vld [vmem:[%s11544_s28 + $0x58] sm:$0xff] }
 0x268   : > { %v2161_v57 = vadd.f32 %v2114_v60, %v1913_v55 }
 0x269   : > { %10037 = vmatmul.msk.bf16.gmra.mxu1 %vm617_vm0, %v11116_v17  ;;  %v3693_v17 = vshll.u32 %v11137_v43, 16 }
 0x26a   : > { %v2487_v6 = vpop.f32.mrf.mxu2 }
 0x26b   : > { %v12413_v50 = vadd.f32 %v2487_v6, %v2161_v57 }
 0x26c   : > { %v1495_v23 = vpop.f32.mrf.mxu3 }
 0x26d   : > { %v1869_v10 = vpop.f32.mrf.mxu0  ;;  %v1536_v60 = vadd.f32 %v1495_v23, %v11945_v54  ;;  %v2632_v54 = vshrl.u32 %v12426_v8, 16  ;;  %v3691_v23 = vor.u32 %v3689_v48, %v3687_v15  ;;  %v12445_v48 = vld [vmem:[%s12271_s9 + $0x40] sm:$0xff] }
 0x26e   : > { %v1914_v13 = vadd.f32 %v1869_v10, %v1533_v30  ;;  %v2119_v3 = vpop.f32.mrf.mxu1  ;;  %v2635_v30 = vshll.u32 %v12426_v8, 16  ;;  %v3695_v10 = vrot.slane %v3693_v17, 1 }
 0x26f   : > { %10135 = vmatmul.msk.bf16.gmra.mxu2 %vm617_vm0, %v3688_v34  ;;  %v2634_v39 = vrot.slane %v2632_v54, 2 }
 0x270   : > { %9935 = vmatmul.msk.bf16.gmra.mxu0 %vm617_vm0, %v2944_v62  ;;  %v2162_v29 = vadd.f32 %v2117_v5, %v1914_v13  ;;  %v2637_v6 = vrot.slane %v2635_v30, 3  ;;  %v2945_v62 = vrot.slane %v12384_v61, 3 }
 0x271   : > { %9907 = vmatmul.msk.bf16.gmra.mxu3 %vm617_vm0, %v2630_v58 }
 0x272   : > { %v2490_v18 = vpop.f32.mrf.mxu2  ;;  %v2638_v58 = vor.u32 %v2637_v6, %v2634_v39  ;;  %v11118_v39 = vld [vmem:[%s12271_s9 + $0x38] sm:$0xff] }
 0x273   : > { %v12423_v1 = vadd.f32 %v2490_v18, %v2162_v29  ;;  %v3696_v29 = vsel %vm456_vm2, %v3691_v23, %v3695_v10  ;;  %v2946_v18 = vsel %vm2931_vm6, %v2943_v51, %v2945_v62  ;;  %v12451_v51 = vld [vmem:[%s11544_s28 + $0x60] sm:$0xff]  ;;  %v11150_v23 = vld [vmem:[%s14543_s3 + $0xb0] sm:$0xff] }
 0x274   : > { %v1498_v55 = vpop.f32.mrf.mxu3  ;;  %v2639_v61 = vsel %vm2550_vm5, %v2629_v9, %v2638_v58  ;;  %4105 = vmatpush.bf16.msrb.mxu3 %v11150_v23 }
 0x275   : > { %v1871_v32 = vpop.f32.mrf.mxu0  ;;  %v1537_v47 = vadd.f32 %v1498_v55, %v11958_v27 }
 0x276   : > { %v1915_v5 = vadd.f32 %v1871_v32, %v1534_v26  ;;  %v2122_v57 = vpop.f32.mrf.mxu1  ;;  %v3697_v32 = vshrl.u32 %v11137_v43, 16  ;;  %v2947_v43 = vrot.slane %v12405_v59, 3 }
 0x278   : > { %v2163_v34 = vadd.f32 %v2119_v3, %v1915_v5 }
 0x279   : > { %10038 = vmatmul.msk.bf16.gmra.mxu1 %vm617_vm0, %v11117_v19  ;;  %v3701_v19 = vshll.u32 %v12445_v48, 16 }
 0x27a   : > { %v2492_v13 = vpop.f32.mrf.mxu2 }
 0x27b   : > { %v12434_v25 = vadd.f32 %v2492_v13, %v2163_v34 }
 0x27c   : > { %v1500_v27 = vpop.f32.mrf.mxu3 }
 0x27d   : > { %v1874_v26 = vpop.f32.mrf.mxu0  ;;  %v12439_v3 = vadd.f32 %v1500_v27, %v11971_v22  ;;  %v2641_v22 = vshrl.u32 %v12451_v51, 16 }
 0x27e   : > { %v1916_v15 = vadd.f32 %v1874_v26, %v1535_v41  ;;  %v2124_v54 = vpop.f32.mrf.mxu1  ;;  %v2644_v41 = vshll.u32 %v12451_v51, 16  ;;  %v3699_v26 = vor.u32 %v3697_v32, %v3695_v10  ;;  %v11173_v32 = vld [vmem:[%s14543_s3 + $0xe0] sm:$0xff] }
 0x27f   : > { %10136 = vmatmul.msk.bf16.gmra.mxu2 %vm617_vm0, %v3696_v29  ;;  %v2643_v13 = vrot.slane %v2641_v22, 2  ;;  %v2948_v22 = vsel %vm2931_vm6, %v2945_v62, %v2947_v43 }
 0x280   : > { %9936 = vmatmul.msk.bf16.gmra.mxu0 %vm617_vm0, %v2946_v18  ;;  %v2164_v30 = vadd.f32 %v2122_v57, %v1916_v15  ;;  %v2646_v29 = vrot.slane %v2644_v41, 3  ;;  %v3703_v18 = vrot.slane %v3701_v19, 1  ;;  %5105 = vmatpush.bf16.msrb.mxu2 %v11173_v32 }
 0x281   : > { %9908 = vmatmul.msk.bf16.gmra.mxu3 %vm617_vm0, %v2639_v61 }
 0x282   : > { %v2495_v17 = vpop.f32.mrf.mxu2  ;;  %v3704_v61 = vsel %vm456_vm2, %v3699_v26, %v3703_v18 }
 0x283   : > { %v12448_v55 = vadd.f32 %v2495_v17, %v2164_v30 }
 0x284   : > { %v2796_v5 = vpop.f32.mrf.mxu3 }
 0x285   : > { %v1876_v9 = vpop.f32.mrf.mxu0  ;;  %v2886_v6 = vadd.f32 %v2796_v5, %v12036_v44  ;;  %v2647_v44 = vor.u32 %v2646_v29, %v2643_v13 }
 0x286   : > { %v1917_v57 = vadd.f32 %v1876_v9, %v1536_v60  ;;  %v2127_v34 = vpop.f32.mrf.mxu1  ;;  %v11139_v9 = vld [vmem:[%s12271_s9 + $0x48] sm:$0xff] }
 0x287   : > { %v2648_v59 = vsel %vm2550_vm5, %v2638_v58, %v2647_v44  ;;  %v12482_v58 = vld [vmem:[%s11544_s28 + $0x68] sm:$0xff]  ;;  %v3709_v23 = vshll.u32 %v11139_v9, 16 }
 0x288   : > { %v2165_v27 = vadd.f32 %v2124_v54, %v1917_v57  ;;  %v2650_v5 = vshrl.u32 %v12482_v58, 16  ;;  %v11171_v57 = vld [vmem:[%s14543_s3 + $0xd0] sm:$0xff] }
 0x289   : > { %10039 = vmatmul.msk.bf16.gmra.mxu1 %vm617_vm0, %v11118_v39  ;;  %v2653_v39 = vshll.u32 %v12482_v58, 16 }
 0x28a   : > { %v2497_v15 = vpop.f32.mrf.mxu2  ;;  %4858 = vmatpush.bf16.msrb.mxu1 %v11171_v57 }
 0x28b   : > { %v12463_v60 = vadd.f32 %v2497_v15, %v2165_v27  ;;  %v11119_v27 = vld [vmem:[%s12271_s9 + $0x40] sm:$0xff] }
 0x28c   : > { %v2798_v17 = vpop.f32.mrf.mxu3 }
 0x28d   : > { %v1879_v30 = vpop.f32.mrf.mxu0  ;;  %v2887_v10 = vadd.f32 %v2798_v17, %v12045_v46  ;;  %v2655_v17 = vrot.slane %v2653_v39, 3 }
 0x28e   : > { %v1918_v54 = vadd.f32 %v1879_v30, %v1537_v47  ;;  %v2129_v41 = vpop.f32.mrf.mxu1  ;;  %v11169_v47 = vld [vmem:[%s14543_s3 + $0xc0] sm:$0xff]  ;;  %v2652_v30 = vrot.slane %v2650_v5, 2 }
 0x28f   : > { %10137 = vmatmul.msk.bf16.gmra.mxu2 %vm617_vm0, %v3704_v61  ;;  %4478 = vmatpush.bf16.msrb.mxu0 %v11169_v47 }
 0x290   : > { %9937 = vmatmul.msk.bf16.gmra.mxu0 %vm617_vm0, %v2948_v22  ;;  %v2166_v19 = vadd.f32 %v2127_v34, %v1918_v54  ;;  %v3705_v34 = vshrl.u32 %v12445_v48, 16  ;;  %v2949_v48 = vrot.slane %v12426_v8, 3  ;;  %v2656_v47 = vor.u32 %v2655_v17, %v2652_v30 }
 0x291   : > { %9909 = vmatmul.msk.bf16.gmra.mxu3 %vm617_vm0, %v2648_v59  ;;  %v3711_v59 = vrot.slane %v3709_v23, 1 }
 0x292   : > { %v2500_v46 = vpop.f32.mrf.mxu2  ;;  %v3707_v54 = vor.u32 %v3705_v34, %v3703_v18  ;;  %v2950_v5 = vsel %vm2931_vm6, %v2947_v43, %v2949_v48  ;;  %v2657_v8 = vsel %vm2550_vm5, %v2647_v44, %v2656_v47  ;;  %v11140_v34 = vld [vmem:[%s12271_s9 + $0x50] sm:$0xff]  ;;  %v3713_v43 = vshrl.u32 %v11139_v9, 16  ;;  %v11120_v44 = vld [vmem:[%s12271_s9 + $0x48] sm:$0xff] }
 0x293   : > { %v12479_v62 = vadd.f32 %v2500_v46, %v2166_v19 }
 0x294   : > { %v2801_v29 = vpop.f32.mrf.mxu3 }
 0x295   : > { %v1881_v13 = vpop.f32.mrf.mxu0  ;;  %v2888_v15 = vadd.f32 %v2801_v29, %v12058_v4  ;;  %v12508_v29 = vld [vmem:[%s11544_s28 + $0x70] sm:$0xff] }
 0x296   : > { %v1919_v26 = vadd.f32 %v1881_v13, %v12439_v3  ;;  %v3376_v61 = vpop.f32.mrf.mxu1  ;;  %v3712_v3 = vsel %vm456_vm2, %v3707_v54, %v3711_v59 }
 0x298   : > { %v2167_v22 = vadd.f32 %v2129_v41, %v1919_v26 }
 0x299   : > { %10040 = vmatmul.msk.bf16.gmra.mxu1 %vm617_vm0, %v11119_v27  ;;  %v3717_v27 = vshll.u32 %v11140_v34, 16 }
 0x29a   : > { %v2502_v32 = vpop.f32.mrf.mxu2 }
 0x29b   : > { %v12495_v19 = vadd.f32 %v2502_v32, %v2167_v22 }
 0x29c   : > { %v2803_v46 = vpop.f32.mrf.mxu3 }
 0x29d   : > { %v3044_v4 = vpop.f32.mrf.mxu0  ;;  %v2889_v41 = vadd.f32 %v2803_v46, %v12067_v31  ;;  %v2659_v31 = vshrl.u32 %v12508_v29, 16  ;;  %v3715_v46 = vor.u32 %v3713_v43, %v3711_v59  ;;  %v11141_v43 = vld [vmem:[%s12271_s9 + $0x58] sm:$0xff] }
 0x29e   : > { %v3134_v18 = vadd.f32 %v3044_v4, %v2886_v6  ;;  %v3378_v39 = vpop.f32.mrf.mxu1  ;;  %v2662_v6 = vshll.u32 %v12508_v29, 16  ;;  %v3719_v4 = vrot.slane %v3717_v27, 1 }
 0x29f   : > { %10138 = vmatmul.msk.bf16.gmra.mxu2 %vm617_vm0, %v3712_v3  ;;  %v2661_v54 = vrot.slane %v2659_v31, 2 }
 0x2a0   : > { %9938 = vmatmul.msk.bf16.gmra.mxu0 %vm617_vm0, %v2950_v5  ;;  %v3466_v57 = vadd.f32 %v3376_v61, %v3134_v18  ;;  %v2664_v32 = vrot.slane %v2662_v6, 3  ;;  %v2951_v5 = vrot.slane %v12451_v51, 3 }
 0x2a1   : > { %9910 = vmatmul.msk.bf16.gmra.mxu3 %vm617_vm0, %v2657_v8 }
 0x2a2   : > { %v3860_v23 = vpop.f32.mrf.mxu2  ;;  %v2665_v8 = vor.u32 %v2664_v32, %v2661_v54 }
 0x2a3   : > { %v12505_v13 = vadd.f32 %v3860_v23, %v3466_v57  ;;  %v3720_v57 = vsel %vm456_vm2, %v3715_v46, %v3719_v4  ;;  %v2952_v23 = vsel %vm2931_vm6, %v2949_v48, %v2951_v5  ;;  %v3721_v48 = vshrl.u32 %v11140_v34, 16 }
 0x2a4   : > { %v2806_v26 = vpop.f32.mrf.mxu3  ;;  %v2666_v51 = vsel %vm2550_vm5, %v2656_v47, %v2665_v8  ;;  %v11121_v47 = vld [vmem:[%s12271_s9 + $0x50] sm:$0xff] }
 0x2a5   : > { %v3046_v30 = vpop.f32.mrf.mxu0  ;;  %v2890_v17 = vadd.f32 %v2806_v26, %v12080_v40 }
 0x2a6   : > { %v3135_v61 = vadd.f32 %v3046_v30, %v2887_v10  ;;  %v3381_v22 = vpop.f32.mrf.mxu1  ;;  %v12529_v30 = vld [vmem:[%s11544_s28 + $0x78] sm:$0xff] }
 0x2a8   : > { %v3467_v3 = vadd.f32 %v3378_v39, %v3135_v61 }
 0x2a9   : > { %10041 = vmatmul.msk.bf16.gmra.mxu1 %vm617_vm0, %v11120_v44  ;;  %v3725_v44 = vshll.u32 %v11141_v43, 16 }
 0x2aa   : > { %v3862_v18 = vpop.f32.mrf.mxu2 }
 0x2ab   : > { %v12516_v9 = vadd.f32 %v3862_v18, %v3467_v3 }
 0x2ac   : > { %v2808_v40 = vpop.f32.mrf.mxu3 }
 0x2ad   : > { %v3049_v10 = vpop.f32.mrf.mxu0  ;;  %v2891_v39 = vadd.f32 %v2808_v40, %v12089_v20  ;;  %v2668_v20 = vshrl.u32 %v12529_v30, 16  ;;  %v3723_v40 = vor.u32 %v3721_v48, %v3719_v4  ;;  %v11142_v48 = vld [vmem:[%s12271_s9 + $0x60] sm:$0xff] }
 0x2ae   : > { %v3136_v59 = vadd.f32 %v3049_v10, %v2888_v15  ;;  %v3383_v31 = vpop.f32.mrf.mxu1  ;;  %v2671_v15 = vshll.u32 %v12529_v30, 16  ;;  %v3727_v10 = vrot.slane %v3725_v44, 1 }
 0x2af   : > { %10139 = vmatmul.msk.bf16.gmra.mxu2 %vm617_vm0, %v3720_v57  ;;  %v2670_v46 = vrot.slane %v2668_v20, 2 }
 0x2b0   : > { %9939 = vmatmul.msk.bf16.gmra.mxu0 %vm617_vm0, %v2952_v23  ;;  %v3468_v6 = vadd.f32 %v3381_v22, %v3136_v59  ;;  %v2673_v18 = vrot.slane %v2671_v15, 3  ;;  %v2953_v23 = vrot.slane %v12482_v58, 3 }
 0x2b1   : > { %9911 = vmatmul.msk.bf16.gmra.mxu3 %vm617_vm0, %v2666_v51 }
 0x2b2   : > { %v3865_v27 = vpop.f32.mrf.mxu2  ;;  %v2674_v51 = vor.u32 %v2673_v18, %v2670_v46 }
 0x2b3   : > { %v12526_v26 = vadd.f32 %v3865_v27, %v3468_v6  ;;  %v3728_v6 = vsel %vm456_vm2, %v3723_v40, %v3727_v10  ;;  %v2954_v27 = vsel %vm2931_vm6, %v2951_v5, %v2953_v23  ;;  %v3729_v5 = vshrl.u32 %v11141_v43, 16 }
 0x2b4   : > { %v2811_v61 = vpop.f32.mrf.mxu3  ;;  %v2675_v58 = vsel %vm2550_vm5, %v2665_v8, %v2674_v51  ;;  %v11122_v8 = vld [vmem:[%s12271_s9 + $0x58] sm:$0xff] }
 0x2b5   : > { %v3051_v54 = vpop.f32.mrf.mxu0  ;;  %v2892_v32 = vadd.f32 %v2811_v61, %v12102_v11 }
 0x2b6   : > { %v3137_v22 = vadd.f32 %v3051_v54, %v2889_v41  ;;  %v3386_v3 = vpop.f32.mrf.mxu1  ;;  %v12550_v54 = vld [vmem:[%s11544_s28 + $0x80] sm:$0xff] }
 0x2b8   : > { %v3469_v57 = vadd.f32 %v3383_v31, %v3137_v22 }
 0x2b9   : > { %10042 = vmatmul.msk.bf16.gmra.mxu1 %vm617_vm0, %v11121_v47  ;;  %v3733_v47 = vshll.u32 %v11142_v48, 16 }
 0x2ba   : > { %v3867_v59 = vpop.f32.mrf.mxu2 }
 0x2bb   : > { %v12537_v34 = vadd.f32 %v3867_v59, %v3469_v57 }
 0x2bc   : > { %v2813_v11 = vpop.f32.mrf.mxu3 }
 0x2bd   : > { %v3054_v41 = vpop.f32.mrf.mxu0  ;;  %v2893_v31 = vadd.f32 %v2813_v11, %v12111_v36  ;;  %v2677_v36 = vshrl.u32 %v12550_v54, 16  ;;  %v3731_v11 = vor.u32 %v3729_v5, %v3727_v10  ;;  %v11143_v5 = vld [vmem:[%s12271_s9 + $0x68] sm:$0xff] }
 0x2be   : > { %v3138_v4 = vadd.f32 %v3054_v41, %v2890_v17  ;;  %v3388_v20 = vpop.f32.mrf.mxu1  ;;  %v2680_v17 = vshll.u32 %v12550_v54, 16  ;;  %v3735_v41 = vrot.slane %v3733_v47, 1 }
 0x2bf   : > { %10140 = vmatmul.msk.bf16.gmra.mxu2 %vm617_vm0, %v3728_v6  ;;  %v2679_v40 = vrot.slane %v2677_v36, 2 }
 0x2c0   : > { %9940 = vmatmul.msk.bf16.gmra.mxu0 %vm617_vm0, %v2954_v27  ;;  %v3470_v15 = vadd.f32 %v3386_v3, %v3138_v4  ;;  %v2682_v59 = vrot.slane %v2680_v17, 3  ;;  %v2955_v27 = vrot.slane %v12508_v29, 3 }
 0x2c1   : > { %9912 = vmatmul.msk.bf16.gmra.mxu3 %vm617_vm0, %v2675_v58 }
 0x2c2   : > { %v3870_v44 = vpop.f32.mrf.mxu2  ;;  %v2683_v58 = vor.u32 %v2682_v59, %v2679_v40 }
 0x2c3   : > { %v12547_v61 = vadd.f32 %v3870_v44, %v3470_v15  ;;  %v3736_v15 = vsel %vm456_vm2, %v3731_v11, %v3735_v41  ;;  %v2956_v44 = vsel %vm2931_vm6, %v2953_v23, %v2955_v27  ;;  %v3737_v23 = vshrl.u32 %v11142_v48, 16 }
 0x2c4   : > { %v2816_v22 = vpop.f32.mrf.mxu3  ;;  %v2684_v29 = vsel %vm2550_vm5, %v2674_v51, %v2683_v58  ;;  %v11123_v51 = vld [vmem:[%s12271_s9 + $0x60] sm:$0xff] }
 0x2c5   : > { %v3056_v46 = vpop.f32.mrf.mxu0  ;;  %v2894_v18 = vadd.f32 %v2816_v22, %v12124_v63 }
 0x2c6   : > { %v3139_v3 = vadd.f32 %v3056_v46, %v2891_v39  ;;  %v3391_v57 = vpop.f32.mrf.mxu1  ;;  %v12571_v46 = vld [vmem:[%s11544_s28 + $0x88] sm:$0xff] }
 0x2c8   : > { %v3471_v6 = vadd.f32 %v3388_v20, %v3139_v3 }
 0x2c9   : > { %10043 = vmatmul.msk.bf16.gmra.mxu1 %vm617_vm0, %v11122_v8  ;;  %v3741_v8 = vshll.u32 %v11143_v5, 16 }
 0x2ca   : > { %v3872_v4 = vpop.f32.mrf.mxu2 }
 0x2cb   : > { %v12558_v43 = vadd.f32 %v3872_v4, %v3471_v6 }
 0x2cc   : > { %v2818_v63 = vpop.f32.mrf.mxu3 }
 0x2cd   : > { %v3059_v39 = vpop.f32.mrf.mxu0  ;;  %v2895_v20 = vadd.f32 %v2818_v63, %v12133_v33  ;;  %v2686_v33 = vshrl.u32 %v12571_v46, 16  ;;  %v3739_v63 = vor.u32 %v3737_v23, %v3735_v41  ;;  %v11144_v23 = vld [vmem:[%s12271_s9 + $0x70] sm:$0xff] }
 0x2ce   : > { %v3140_v10 = vadd.f32 %v3059_v39, %v2892_v32  ;;  %v3393_v36 = vpop.f32.mrf.mxu1  ;;  %v2689_v32 = vshll.u32 %v12571_v46, 16  ;;  %v3743_v39 = vrot.slane %v3741_v8, 1 }
 0x2cf   : > { %10141 = vmatmul.msk.bf16.gmra.mxu2 %vm617_vm0, %v3736_v15  ;;  %v2688_v11 = vrot.slane %v2686_v33, 2 }
 0x2d0   : > { %9941 = vmatmul.msk.bf16.gmra.mxu0 %vm617_vm0, %v2956_v44  ;;  %v3472_v17 = vadd.f32 %v3391_v57, %v3140_v10  ;;  %v2691_v4 = vrot.slane %v2689_v32, 3  ;;  %v2957_v44 = vrot.slane %v12529_v30, 3 }
 0x2d1   : > { %9913 = vmatmul.msk.bf16.gmra.mxu3 %vm617_vm0, %v2684_v29 }
 0x2d2   : > { %v3875_v47 = vpop.f32.mrf.mxu2  ;;  %v2692_v29 = vor.u32 %v2691_v4, %v2688_v11 }
 0x2d3   : > { %v12568_v22 = vadd.f32 %v3875_v47, %v3472_v17  ;;  %v3744_v17 = vsel %vm456_vm2, %v3739_v63, %v3743_v39  ;;  %v2958_v47 = vsel %vm2931_vm6, %v2955_v27, %v2957_v44  ;;  %v3745_v27 = vshrl.u32 %v11143_v5, 16 }
 0x2d4   : > { %v2821_v3 = vpop.f32.mrf.mxu3  ;;  %v2693_v30 = vsel %vm2550_vm5, %v2683_v58, %v2692_v29  ;;  %v11124_v58 = vld [vmem:[%s12271_s9 + $0x68] sm:$0xff] }
 0x2d5   : > { %v3061_v40 = vpop.f32.mrf.mxu0  ;;  %v2896_v59 = vadd.f32 %v2821_v3, %v12146_v42 }
 0x2d6   : > { %v3141_v57 = vadd.f32 %v3061_v40, %v2893_v31  ;;  %v3396_v6 = vpop.f32.mrf.mxu1  ;;  %v12592_v40 = vld [vmem:[%s11544_s28 + $0x90] sm:$0xff] }
 0x2d8   : > { %v3473_v15 = vadd.f32 %v3393_v36, %v3141_v57 }
 0x2d9   : > { %10044 = vmatmul.msk.bf16.gmra.mxu1 %vm617_vm0, %v11123_v51  ;;  %v3749_v51 = vshll.u32 %v11144_v23, 16 }
 0x2da   : > { %v3877_v10 = vpop.f32.mrf.mxu2 }
 0x2db   : > { %v12579_v48 = vadd.f32 %v3877_v10, %v3473_v15 }
 0x2dc   : > { %v2823_v42 = vpop.f32.mrf.mxu3 }
 0x2dd   : > { %v3064_v31 = vpop.f32.mrf.mxu0  ;;  %v2897_v36 = vadd.f32 %v2823_v42, %v12155_v37  ;;  %v2695_v37 = vshrl.u32 %v12592_v40, 16  ;;  %v3747_v42 = vor.u32 %v3745_v27, %v3743_v39  ;;  %v11145_v27 = vld [vmem:[%s12271_s9 + $0x78] sm:$0xff] }
 0x2de   : > { %v3142_v41 = vadd.f32 %v3064_v31, %v2894_v18  ;;  %v3398_v33 = vpop.f32.mrf.mxu1  ;;  %v2698_v18 = vshll.u32 %v12592_v40, 16  ;;  %v3751_v31 = vrot.slane %v3749_v51, 1 }
 0x2df   : > { %10142 = vmatmul.msk.bf16.gmra.mxu2 %vm617_vm0, %v3744_v17  ;;  %v2697_v63 = vrot.slane %v2695_v37, 2 }
 0x2e0   : > { %9942 = vmatmul.msk.bf16.gmra.mxu0 %vm617_vm0, %v2958_v47  ;;  %v3474_v32 = vadd.f32 %v3396_v6, %v3142_v41  ;;  %v2700_v10 = vrot.slane %v2698_v18, 3  ;;  %v2959_v47 = vrot.slane %v12550_v54, 3 }
 0x2e1   : > { %9914 = vmatmul.msk.bf16.gmra.mxu3 %vm617_vm0, %v2693_v30 }
 0x2e2   : > { %v3880_v8 = vpop.f32.mrf.mxu2  ;;  %v2701_v30 = vor.u32 %v2700_v10, %v2697_v63  ;;  %v11125_v63 = vld [vmem:[%s12271_s9 + $0x70] sm:$0xff]  ;;  %v14553_v10 = vld [vmem:[#allocation2_spill] sm:$0xff] }
 0x2e3   : > { %v12589_v3 = vadd.f32 %v3880_v8, %v3474_v32  ;;  %v3752_v32 = vsel %vm456_vm2, %v3747_v42, %v3751_v31  ;;  %v2960_v8 = vsel %vm2931_vm6, %v2957_v44, %v2959_v47  ;;  %v3753_v44 = vshrl.u32 %v11144_v23, 16 }
 0x2e4   : > { %v2826_v57 = vpop.f32.mrf.mxu3  ;;  %v2702_v54 = vsel %vm2550_vm5, %v2692_v29, %v2701_v30 }
 0x2e5   : > { %v3066_v11 = vpop.f32.mrf.mxu0  ;;  %v2898_v4 = vadd.f32 %v2826_v57, %v12169_v49 }
 0x2e6   : > { %v3143_v6 = vadd.f32 %v3066_v11, %v2895_v20  ;;  %v3401_v15 = vpop.f32.mrf.mxu1  ;;  %v12613_v11 = vld [vmem:[%s11544_s28 + $0x98] sm:$0xff] }
 0x2e8   : > { %v3475_v17 = vadd.f32 %v3398_v33, %v3143_v6 }
 0x2e9   : > { %10045 = vmatmul.msk.bf16.gmra.mxu1 %vm617_vm0, %v11124_v58  ;;  %v3757_v58 = vshll.u32 %v11145_v27, 16 }
 0x2ea   : > { %v3882_v41 = vpop.f32.mrf.mxu2 }
 0x2eb   : > { %v12600_v5 = vadd.f32 %v3882_v41, %v3475_v17 }
 0x2ec   : > { %v2828_v49 = vpop.f32.mrf.mxu3 }
 0x2ed   : > { %v3069_v20 = vpop.f32.mrf.mxu0  ;;  %v2899_v33 = vadd.f32 %v2828_v49, %v12180_v2  ;;  %v2704_v2 = vshrl.u32 %v12613_v11, 16 }
 0x2ee   : > { %v3144_v39 = vadd.f32 %v3069_v20, %v2896_v59  ;;  %v3403_v37 = vpop.f32.mrf.mxu1  ;;  %v2707_v59 = vshll.u32 %v12613_v11, 16  ;;  %v3755_v20 = vor.u32 %v3753_v44, %v3751_v31 }
 0x2ef   : > { %10143 = vmatmul.msk.bf16.gmra.mxu2 %vm617_vm0, %v3752_v32  ;;  %v2706_v41 = vrot.slane %v2704_v2, 2 }
 0x2f0   : > { %9943 = vmatmul.msk.bf16.gmra.mxu0 %vm617_vm0, %v2960_v8  ;;  %v3476_v18 = vadd.f32 %v3401_v15, %v3144_v39  ;;  %v2709_v32 = vrot.slane %v2707_v59, 3  ;;  %v3759_v8 = vrot.slane %v3757_v58, 1  ;;  %v2541_v39 = vld [vmem:[%s11544_s28 + $0xa0] sm:$0x7] }
 0x2f1   : > { %9915 = vmatmul.msk.bf16.gmra.mxu3 %vm617_vm0, %v2702_v54  ;;  %v2961_v54 = vrot.slane %v12571_v46, 3 }
 0x2f2   : > { %v3885_v51 = vpop.f32.mrf.mxu2 }
 0x2f3   : > { %v12610_v57 = vadd.f32 %v3885_v51, %v3476_v18  ;;  %v2710_v51 = vor.u32 %v2709_v32, %v2706_v41  ;;  %v2962_v2 = vsel %vm2931_vm6, %v2959_v47, %v2961_v54  ;;  %v3761_v47 = vshrl.u32 %v11145_v27, 16 }
 0x2f4   : > { %v2831_v6 = vpop.f32.mrf.mxu3 }
 0x2f5   : > { %14552 = vst [vmem:[#allocation3_spill] sm:$0xff] %v12610_v57  ;;  %v3071_v29 = vpop.f32.mrf.mxu0  ;;  %v2900_v15 = vadd.f32 %v2831_v6, %v14553_v10  ;;  %v2548_v57 = vunpack.c.l.b16 %v2541_v39  ;;  %v3760_v6 = vsel %vm456_vm2, %v3755_v20, %v3759_v8  ;;  %v2711_v46 = vsel %vm2550_vm5, %v2701_v30, %v2710_v51  ;;  %v11126_v30 = vld [vmem:[%s12271_s9 + $0x78] sm:$0xff] }
 0x2f6   : > { %v3145_v17 = vadd.f32 %v3071_v29, %v2897_v36  ;;  %v3406_v42 = vpop.f32.mrf.mxu1 }
 0x2f7   : > { %v12629_v44 = vpack.c.b16 %v2548_v57, %v2548_v57 }
 0x2f8   : > { %v3477_v49 = vadd.f32 %v3403_v37, %v3145_v17 }
 0x2f9   : > { %10046 = vmatmul.msk.bf16.gmra.mxu1 %vm617_vm0, %v11125_v63  ;;  %v11146_v63 = vld [vmem:[%s12271_s9 + $0x80] sm:$0xff] }
 0x2fa   : > { %v3887_v18 = vpop.f32.mrf.mxu2  ;;  %v3765_v41 = vshll.u32 %v11146_v63, 16 }
 0x2fb   : > { %v12622_v23 = vadd.f32 %v3887_v18, %v3477_v49 }
 0x2fc   : > { %v2833_v36 = vpop.f32.mrf.mxu3 }
 0x2fd   : > { %v3074_v29 = vpop.f32.mrf.mxu0  ;;  %v2901_v31 = vadd.f32 %v2833_v36, %v12221_v12  ;;  %v2713_v12 = vshrl.u32 %v12629_v44, 16  ;;  %v3763_v36 = vor.u32 %v3761_v47, %v3759_v8  ;;  %v12653_v47 = vld [vmem:[%s12271_s9 + $0x88] sm:$0xff] }
 0x2fe   : > { %v3146_v37 = vadd.f32 %v3074_v29, %v2898_v4  ;;  %v3408_v59 = vpop.f32.mrf.mxu1  ;;  %v2716_v4 = vshll.u32 %v12629_v44, 16  ;;  %v3767_v29 = vrot.slane %v3765_v41, 1 }
 0x2ff   : > { %10144 = vmatmul.msk.bf16.gmra.mxu2 %vm617_vm0, %v3760_v6 }
 0x300   : > { %9944 = vmatmul.msk.bf16.gmra.mxu0 %vm617_vm0, %v2962_v2  ;;  %v3478_v58 = vadd.f32 %v3406_v42, %v3146_v37  ;;  %v2715_v42 = vrot.slane %v2713_v12, 2  ;;  %v2718_v18 = vrot.slane %v2716_v4, 3  ;;  %v2963_v2 = vrot.slane %v12592_v40, 3 }
 0x301   : > { %9916 = vmatmul.msk.bf16.gmra.mxu3 %vm617_vm0, %v2711_v46 }
 0x302   : > { %v3890_v10 = vpop.f32.mrf.mxu2  ;;  %v2719_v46 = vor.u32 %v2718_v18, %v2715_v42  ;;  %v11127_v42 = vld [vmem:[%s12271_s9 + $0x80] sm:$0xff] }
 0x303   : > { %v12634_v17 = vadd.f32 %v3890_v10, %v3478_v58  ;;  %v3768_v58 = vsel %vm456_vm2, %v3763_v36, %v3767_v29 }
 0x304   : > { %v2836_v32 = vpop.f32.mrf.mxu3  ;;  %v2720_v40 = vsel %vm2550_vm5, %v2710_v51, %v2719_v46 }
 0x305   : > { %v3076_v49 = vpop.f32.mrf.mxu0  ;;  %v2902_v57 = vadd.f32 %v2836_v32, %v12249_v16 }
 0x306   : > { %v3147_v20 = vadd.f32 %v3076_v49, %v2899_v33  ;;  %v3411_v39 = vpop.f32.mrf.mxu1  ;;  %v2964_v33 = vsel %vm2931_vm6, %v2961_v54, %v2963_v2  ;;  %v3769_v54 = vshrl.u32 %v11146_v63, 16  ;;  %v11301_v49 = vld [vmem:[%s12271_s9] sm:$0xe] }
 0x308   : > { %v3479_v6 = vadd.f32 %v3408_v59, %v3147_v20 }
 0x309   : > { %10047 = vmatmul.msk.bf16.gmra.mxu1 %vm617_vm0, %v11126_v30 }
 0x30a   : > { %v3892_v37 = vpop.f32.mrf.mxu2 }
 0x30b   : > { %v12642_v27 = vadd.f32 %v3892_v37, %v3479_v6  ;;  %v11193_v6 = vld [vmem:[%s14543_s3 + $0xf8] sm:$0xff]  ;;  %v3771_v37 = vor.u32 %v3769_v54, %v3767_v29 }
 0x30c   : > { %v2838_v10 = vpop.f32.mrf.mxu3  ;;  %5477 = vmatpush.bf16.msra.mxu3 %v11193_v6 }
 0x30d   : > { %v3079_v16 = vpop.f32.mrf.mxu0  ;;  %v12647_v8 = vadd.f32 %v2838_v10, %v12273_v28  ;;  %v3773_v28 = vshll.u32 %v12653_v47, 16  ;;  %v3538_v10 = vld [vmem:[%s12271_s9 + $0x90] sm:$0x1] }
 0x30e   : > { %v3148_v59 = vadd.f32 %v3079_v16, %v2900_v15  ;;  %v3413_v12 = vpop.f32.mrf.mxu1  ;;  %v11300_v15 = vld [vmem:[%s12271_s9] sm:$0xf0]  ;;  %v3617_v29 = vunpack.c.l.b16 %v3538_v10 }
 0x30f   : > { %10145 = vmatmul.msk.bf16.gmra.mxu2 %vm617_vm0, %v3768_v58  ;;  %v11302_v36 = vor.u32 %v11301_v49, %v11300_v15  ;;  %v3775_v46 = vrot.slane %v3773_v28, 1  ;;  %v2965_v58 = vrot.slane %v12613_v11, 3  ;;  %v4233_v15 = vld [vmem:[%s12271_s9 + $0x8] sm:$0xe]  ;;  %v12684_v49 = vld [vmem:[%s12271_s9 + $0xc] sm:$0xf] }
 0x310   : > { %9945 = vmatmul.msk.bf16.gmra.mxu0 %vm617_vm0, %v2964_v33  ;;  %v3480_v4 = vadd.f32 %v3411_v39, %v3148_v59  ;;  %v12674_v33 = vld [vmem:[%s12271_s9 + $0x8] sm:$0xff] }
 0x311   : > { %9917 = vmatmul.msk.bf16.gmra.mxu3 %vm617_vm0, %v2720_v40  ;;  %v14546_v59 = vrot.slane %v12674_v33, 1 }
 0x312   : > { %v3895_v41 = vpop.f32.mrf.mxu2 }
 0x313   : > { %v12656_v32 = vadd.f32 %v3895_v41, %v3480_v4  ;;  %v2966_v41 = vsel %vm2931_vm6, %v2963_v2, %v2965_v58  ;;  %v12694_v2 = vpack.c.b16 %v3617_v29, %v3617_v29 }
 0x314   : > { %v2841_v30 = vpop.f32.mrf.mxu3 }
 0x315   : > { %v3081_v20 = vpop.f32.mrf.mxu0  ;;  %v12663_v51 = vadd.f32 %v2841_v30, %v12292_v45  ;;  %14554 = vst [vmem:[#allocation2_spill] sm:$0xff] %v12694_v2 }
 0x316   : > { %v3149_v39 = vadd.f32 %v3081_v20, %v2901_v31  ;;  %v3416_v18 = vpop.f32.mrf.mxu1  ;;  %v3995_v31 = vrot.slane %v11302_v36, 1  ;;  %v11217_v20 = vld [vmem:[%s14543_s3 + $0x128] sm:$0xff] }
 0x317   : > { %6436 = vmatpush.bf16.msra.mxu2 %v11217_v20 }
 0x318   : > { %v3481_v63 = vadd.f32 %v3413_v12, %v3149_v39  ;;  %v3776_v12 = vsel %vm456_vm2, %v3771_v37, %v3775_v46  ;;  %v3997_v30 = vsel %vm927_vm1, %v3995_v31, %v14546_v59  ;;  %v4313_v39 = vunpack.c.l.b16 %v12684_v49  ;;  %v11128_v31 = vld [vmem:[%s12271_s9 + $0x88] sm:$0xff] }
 0x319   : > { %10048 = vmatmul.msk.bf16.gmra.mxu1 %vm617_vm0, %v11127_v42  ;;  %v4312_v42 = vunpack.c.l.b16 %v4233_v15  ;;  %v3781_v37 = vshll.u32 %v12694_v2, 16  ;;  %v2967_v49 = vrot.slane %v12629_v44, 3 }
 0x31a   : > { %v3897_v45 = vpop.f32.mrf.mxu2 }
 0x31b   : > { %v12671_v16 = vadd.f32 %v3897_v45, %v3481_v63  ;;  %v3777_v63 = vshrl.u32 %v12653_v47, 16  ;;  %v3783_v47 = vrot.slane %v3781_v37, 1 }
 0x31c   : > { %v2843_v40 = vpop.f32.mrf.mxu3 }
 0x31d   : > { %v3084_v4 = vpop.f32.mrf.mxu0  ;;  %v12680_v54 = vadd.f32 %v2843_v40, %v12306_v21  ;;  %v3779_v15 = vor.u32 %v3777_v63, %v3775_v46  ;;  %v2968_v63 = vsel %vm2931_vm6, %v2965_v58, %v2967_v49 }
 0x31e   : > { %v3150_v11 = vadd.f32 %v3084_v4, %v2902_v57  ;;  %v3418_v28 = vpop.f32.mrf.mxu1  ;;  %v11195_v57 = vld [vmem:[%s14543_s3 + $0x108] sm:$0xff] }
 0x31f   : > { %10146 = vmatmul.msk.bf16.gmra.mxu2 %vm617_vm0, %v3776_v12  ;;  %5857 = vmatpush.bf16.msra.mxu0 %v11195_v57  ;;  %v12709_v12 = vpack.c.b16 %v4313_v39, %v4312_v42  ;;  %v11376_v42 = vld [vmem:[%s12271_s9 + $0x10] sm:$0xff]  ;;  %v3784_v46 = vsel %vm456_vm2, %v3779_v15, %v3783_v47 }
 0x320   : > { %9946 = vmatmul.msk.bf16.gmra.mxu0 %vm617_vm0, %v2966_v41  ;;  %v3482_v21 = vadd.f32 %v3416_v18, %v3150_v11  ;;  %v11197_v18 = vld [vmem:[%s14543_s3 + $0x118] sm:$0xff]  ;;  %v12716_v41 = vld [vmem:[%s12271_s9 + $0x10] sm:$0xff] }
 0x321   : > { %10160 = vmatmul.msk.bf16.vlgmr.msrb.gmra.mxu3 %vm617_vm0, %v3997_v30  ;;  %6104 = vmatpush.bf16.msra.mxu1 %v11197_v18  ;;  %v4616_v30 = vshrl.u32 %v12709_v12, 16  ;;  %v4619_v20 = vshll.u32 %v12709_v12, 16 }
 0x322   : > { %v3900_v6 = vpop.f32.mrf.mxu2 }
 0x323   : > { %v12701_v36 = vadd.f32 %v3900_v6, %v3482_v21  ;;  %v4618_v44 = vrot.slane %v4616_v30, 1  ;;  %v4621_v37 = vrot.slane %v4619_v20, 2 }
 0x324   : > { %v2846_v10 = vpop.f32.mrf.mxu3 }
 0x325   : > { %v3086_v45 = vpop.f32.mrf.mxu0  ;;  %v12712_v29 = vadd.f32 %v2846_v10, %v12317_v38  ;;  %v4624_v38 = vshrl.u32 %v12716_v41, 16  ;;  %v4986_v10 = vld [vmem:[%s12271_s9 + $0x8] sm:$0xc] }
 0x326   : > { %v3151_v40 = vadd.f32 %v3086_v45, %v12647_v8  ;;  %v3421_v4 = vpop.f32.mrf.mxu1  ;;  %v4627_v8 = vshll.u32 %v12716_v41, 16  ;;  %v4993_v47 = vunpack.c.l.b16 %v4986_v10 }
 0x327   : > { %v4626_v59 = vrot.slane %v4624_v38, 1 }
 0x328   : > { %v3483_v11 = vadd.f32 %v3418_v28, %v3151_v40  ;;  %v3998_v28 = vrot.slane %v11376_v42, 1  ;;  %v4629_v2 = vrot.slane %v4627_v8, 2  ;;  %v4994_v20 = vpack.c.b16 %v4313_v39, %v4993_v47 }
 0x329   : > { %10049 = vmatmul.msk.bf16.gmra.mxu1 %vm617_vm0, %v11128_v31 }
 0x32a   : > { %v3902_v21 = vpop.f32.mrf.mxu2  ;;  %v4630_v30 = vor.u32 %v4629_v2, %v4626_v59  ;;  %v4368_v59 = vrot.slane %v12709_v12, 1  ;;  %v4369_v2 = vrot.slane %v12716_v41, 1 }
 0x32b   : > { %v12724_v57 = vadd.f32 %v3902_v21, %v3483_v11  ;;  %v14555_v11 = vrot.slane %v12674_v33, 1 }
 0x32c   : > { %v2848_v6 = vpop.f32.mrf.mxu3 }
 0x32d   : > { %v3089_v18 = vpop.f32.mrf.mxu0  ;;  %v2907_v45 = vadd.f32 %v2848_v6, %v12329_v53  ;;  %v3999_v15 = vsel %vm927_vm1, %v14555_v11, %v3998_v28  ;;  %v4622_v53 = vor.u32 %v4621_v37, %v4618_v44  ;;  %v11377_v37 = vld [vmem:[%s12271_s9 + $0x18] sm:$0xff] }
 0x32e   : > { %v3152_v31 = vadd.f32 %v3089_v18, %v12663_v51  ;;  %v3423_v40 = vpop.f32.mrf.mxu1  ;;  %v4995_v18 = vrot.slane %v4994_v20, 2  ;;  %v4000_v10 = vrot.slane %v11377_v37, 1 }
 0x32f   : > { %10147 = vmatmul.msk.bf16.gmra.mxu2 %vm617_vm0, %v3784_v46  ;;  %v4631_v46 = vsel %vm1548_vm4, %v4622_v53, %v4630_v30 }
 0x330   : > { %9947 = vmatmul.msk.bf16.gmra.mxu0 %vm617_vm0, %v2968_v63  ;;  %v3484_v58 = vadd.f32 %v3421_v4, %v3152_v31  ;;  %v12744_v4 = vld [vmem:[%s12271_s9 + $0x18] sm:$0xff]  ;;  %v4996_v63 = vrot.slane %v12716_v41, 2  ;;  %v4001_v53 = vsel %vm927_vm1, %v3998_v28, %v4000_v10 }
 0x331   : > { %10161 = vmatmul.msk.bf16.gmra.mxu3 %vm617_vm0, %v3999_v15  ;;  %v4370_v15 = vsel %vm927_vm1, %v4368_v59, %v4369_v2 }
 0x332   : > { %v3905_v49 = vpop.f32.mrf.mxu2  ;;  %v4997_v31 = vsel %vm1929_vm3, %v4995_v18, %v4996_v63 }
 0x333   : > { %v12738_v51 = vadd.f32 %v3905_v49, %v3484_v58 }
 0x334   : > { %v2851_v21 = vpop.f32.mrf.mxu3 }
 0x335   : > { %v3091_v38 = vpop.f32.mrf.mxu0  ;;  %v2908_v33 = vadd.f32 %v2851_v21, %v12339_v56  ;;  %v4633_v56 = vshrl.u32 %v12744_v4, 16 }
 0x336   : > { %v3153_v8 = vadd.f32 %v3091_v38, %v12680_v54  ;;  %v3426_v42 = vpop.f32.mrf.mxu1  ;;  %v4636_v54 = vshll.u32 %v12744_v4, 16 }
 0x337   : > { %v4635_v47 = vrot.slane %v4633_v56, 1  ;;  %v4371_v56 = vrot.slane %v12744_v4, 1 }
 0x338   : > { %v3485_v6 = vadd.f32 %v3423_v40, %v3153_v8  ;;  %v4638_v49 = vrot.slane %v4636_v54, 2 }
 0x339   : > { %10288 = vmatmul.msk.bf16.vlgmr.msrb.gmra.mxu1 %vm617_vm0, %v4631_v46 }
 0x33a   : > { %v3907_v39 = vpop.f32.mrf.mxu2  ;;  %v4639_v38 = vor.u32 %v4638_v49, %v4635_v47 }
 0x33b   : > { %v12752_v44 = vadd.f32 %v3907_v39, %v3485_v6  ;;  %v12768_v39 = vld [vmem:[%s12271_s9 + $0x20] sm:$0xff] }
 0x33c   : > { %v2853_v40 = vpop.f32.mrf.mxu3  ;;  %v4640_v59 = vsel %vm1548_vm4, %v4630_v30, %v4639_v38  ;;  %v4642_v37 = vshrl.u32 %v12768_v39, 16 }
 0x33d   : > { %v3094_v11 = vpop.f32.mrf.mxu0  ;;  %v2909_v58 = vadd.f32 %v2853_v40, %v12350_v7 }
 0x33e   : > { %v3154_v12 = vadd.f32 %v3094_v11, %v12712_v29  ;;  %v3428_v41 = vpop.f32.mrf.mxu1 }
 0x33f   : > { %10318 = vmatmul.msk.bf16.vlgmr.msrb.gmra.mxu2 %vm617_vm0, %v4997_v31  ;;  %v4645_v31 = vshll.u32 %v12768_v39, 16 }
 0x340   : > { %10258 = vmatmul.msk.bf16.vlgmr.msrb.gmra.mxu0 %vm617_vm0, %v4370_v15  ;;  %v3486_v20 = vadd.f32 %v3426_v42, %v3154_v12  ;;  %v4998_v42 = vrot.slane %v12744_v4, 2  ;;  %v4372_v12 = vsel %vm927_vm1, %v4369_v2, %v4371_v56  ;;  %v4644_v4 = vrot.slane %v4642_v37, 1 }
 0x341   : > { %10162 = vmatmul.msk.bf16.gmra.mxu3 %vm617_vm0, %v4001_v53  ;;  %v4647_v53 = vrot.slane %v4645_v31, 2  ;;  %v4373_v37 = vrot.slane %v12768_v39, 1 }
 0x342   : > { %v3910_v21 = vpop.f32.mrf.mxu2  ;;  %v4999_v30 = vsel %vm1929_vm3, %v4996_v63, %v4998_v42 }
 0x343   : > { %v12763_v8 = vadd.f32 %v3910_v21, %v3486_v20  ;;  %v4648_v63 = vor.u32 %v4647_v53, %v4644_v4 }
 0x344   : > { %v2856_v7 = vpop.f32.mrf.mxu3 }
 0x345   : > { %v3096_v29 = vpop.f32.mrf.mxu0  ;;  %v2910_v46 = vadd.f32 %v2856_v7, %v12360_v52  ;;  %v11378_v52 = vld [vmem:[%s12271_s9 + $0x20] sm:$0xff] }
 0x346   : > { %v3155_v6 = vadd.f32 %v3096_v29, %v2907_v45  ;;  %v3431_v18 = vpop.f32.mrf.mxu1  ;;  %v4002_v45 = vrot.slane %v11378_v52, 1 }
 0x348   : > { %v3487_v28 = vadd.f32 %v3428_v41, %v3155_v6  ;;  %v4003_v20 = vsel %vm927_vm1, %v4000_v10, %v4002_v45 }
 0x349   : > { %10289 = vmatmul.msk.bf16.gmra.mxu1 %vm617_vm0, %v4640_v59 }
 0x34a   : > { %v3912_v54 = vpop.f32.mrf.mxu2 }
 0x34b   : > { %v12775_v40 = vadd.f32 %v3912_v54, %v3487_v28  ;;  %v4649_v28 = vsel %vm1548_vm4, %v4639_v38, %v4648_v63  ;;  %v12790_v54 = vld [vmem:[%s12271_s9 + $0x28] sm:$0xff] }
 0x34c   : > { %v2858_v11 = vpop.f32.mrf.mxu3  ;;  %v4651_v52 = vshrl.u32 %v12790_v54, 16 }
 0x34d   : > { %v3099_v15 = vpop.f32.mrf.mxu0  ;;  %v2911_v41 = vadd.f32 %v2858_v11, %v12371_v0 }
 0x34e   : > { %v3156_v47 = vadd.f32 %v3099_v15, %v2908_v33  ;;  %v3433_v49 = vpop.f32.mrf.mxu1 }
 0x34f   : > { %10319 = vmatmul.msk.bf16.gmra.mxu2 %vm617_vm0, %v4999_v30  ;;  %v4654_v30 = vshll.u32 %v12790_v54, 16 }
 0x350   : > { %10259 = vmatmul.msk.bf16.gmra.mxu0 %vm617_vm0, %v4372_v12  ;;  %v3488_v21 = vadd.f32 %v3431_v18, %v3156_v47  ;;  %v5000_v18 = vrot.slane %v12768_v39, 2  ;;  %v4374_v47 = vsel %vm927_vm1, %v4371_v56, %v4373_v37  ;;  %v4653_v39 = vrot.slane %v4651_v52, 1 }
 0x351   : > { %10163 = vmatmul.msk.bf16.gmra.mxu3 %vm617_vm0, %v4003_v20  ;;  %v4656_v20 = vrot.slane %v4654_v30, 2  ;;  %v4375_v52 = vrot.slane %v12790_v54, 1 }
 0x352   : > { %v3915_v7 = vpop.f32.mrf.mxu2  ;;  %v5001_v38 = vsel %vm1929_vm3, %v4998_v42, %v5000_v18 }
 0x353   : > { %v12785_v29 = vadd.f32 %v3915_v7, %v3488_v21  ;;  %v4657_v42 = vor.u32 %v4656_v20, %v4653_v39 }
 0x354   : > { %v2861_v0 = vpop.f32.mrf.mxu3 }
 0x355   : > { %v3101_v33 = vpop.f32.mrf.mxu0  ;;  %v2912_v2 = vadd.f32 %v2861_v0, %v12381_v24  ;;  %v11379_v24 = vld [vmem:[%s12271_s9 + $0x28] sm:$0xff] }
 0x356   : > { %v3157_v6 = vadd.f32 %v3101_v33, %v2909_v58  ;;  %v3436_v59 = vpop.f32.mrf.mxu1  ;;  %v4004_v58 = vrot.slane %v11379_v24, 1 }
 0x358   : > { %v3489_v10 = vadd.f32 %v3433_v49, %v3157_v6  ;;  %v4005_v21 = vsel %vm927_vm1, %v4002_v45, %v4004_v58 }
 0x359   : > { %10290 = vmatmul.msk.bf16.gmra.mxu1 %vm617_vm0, %v4649_v28 }
 0x35a   : > { %v3917_v31 = vpop.f32.mrf.mxu2 }
 0x35b   : > { %v12797_v11 = vadd.f32 %v3917_v31, %v3489_v10  ;;  %v4658_v10 = vsel %vm1548_vm4, %v4648_v63, %v4657_v42  ;;  %v12812_v31 = vld [vmem:[%s12271_s9 + $0x30] sm:$0xff] }
 0x35c   : > { %v2863_v15 = vpop.f32.mrf.mxu3  ;;  %v4660_v24 = vshrl.u32 %v12812_v31, 16 }
 0x35d   : > { %v3104_v12 = vpop.f32.mrf.mxu0  ;;  %v2913_v49 = vadd.f32 %v2863_v15, %v12392_v35 }
 0x35e   : > { %v3158_v4 = vadd.f32 %v3104_v12, %v2910_v46  ;;  %v3438_v53 = vpop.f32.mrf.mxu1 }
 0x35f   : > { %10320 = vmatmul.msk.bf16.gmra.mxu2 %vm617_vm0, %v5001_v38  ;;  %v4663_v38 = vshll.u32 %v12812_v31, 16 }
 0x360   : > { %10260 = vmatmul.msk.bf16.gmra.mxu0 %vm617_vm0, %v4374_v47  ;;  %v3490_v7 = vadd.f32 %v3436_v59, %v3158_v4  ;;  %v5002_v59 = vrot.slane %v12790_v54, 2  ;;  %v4376_v4 = vsel %vm927_vm1, %v4373_v37, %v4375_v52  ;;  %v4662_v54 = vrot.slane %v4660_v24, 1 }
 0x361   : > { %10164 = vmatmul.msk.bf16.gmra.mxu3 %vm617_vm0, %v4005_v21  ;;  %v4665_v21 = vrot.slane %v4663_v38, 2  ;;  %v4377_v24 = vrot.slane %v12812_v31, 1 }
 0x362   : > { %v3920_v0 = vpop.f32.mrf.mxu2  ;;  %v5003_v63 = vsel %vm1929_vm3, %v5000_v18, %v5002_v59 }
 0x363   : > { %v12807_v33 = vadd.f32 %v3920_v0, %v3490_v7  ;;  %v4666_v18 = vor.u32 %v4665_v21, %v4662_v54 }
 0x364   : > { %v2866_v35 = vpop.f32.mrf.mxu3 }
 0x365   : > { %v3106_v46 = vpop.f32.mrf.mxu0  ;;  %v2914_v56 = vadd.f32 %v2866_v35, %v12402_v14  ;;  %v11380_v14 = vld [vmem:[%s12271_s9 + $0x30] sm:$0xff] }
 0x366   : > { %v3159_v6 = vadd.f32 %v3106_v46, %v2911_v41  ;;  %v3441_v28 = vpop.f32.mrf.mxu1  ;;  %v4006_v41 = vrot.slane %v11380_v14, 1 }
 0x368   : > { %v3491_v45 = vadd.f32 %v3438_v53, %v3159_v6  ;;  %v4007_v7 = vsel %vm927_vm1, %v4004_v58, %v4006_v41 }
 0x369   : > { %10291 = vmatmul.msk.bf16.gmra.mxu1 %vm617_vm0, %v4658_v10 }
 0x36a   : > { %v3922_v30 = vpop.f32.mrf.mxu2 }
 0x36b   : > { %v12819_v15 = vadd.f32 %v3922_v30, %v3491_v45  ;;  %v4667_v45 = vsel %vm1548_vm4, %v4657_v42, %v4666_v18  ;;  %v12834_v30 = vld [vmem:[%s12271_s9 + $0x38] sm:$0xff] }
 0x36c   : > { %v2868_v12 = vpop.f32.mrf.mxu3  ;;  %v4669_v14 = vshrl.u32 %v12834_v30, 16 }
 0x36d   : > { %v3109_v47 = vpop.f32.mrf.mxu0  ;;  %v2915_v53 = vadd.f32 %v2868_v12, %v12413_v50 }
 0x36e   : > { %v3160_v39 = vadd.f32 %v3109_v47, %v2912_v2  ;;  %v3443_v20 = vpop.f32.mrf.mxu1 }
 0x36f   : > { %10321 = vmatmul.msk.bf16.gmra.mxu2 %vm617_vm0, %v5003_v63  ;;  %v4672_v63 = vshll.u32 %v12834_v30, 16 }
 0x370   : > { %10261 = vmatmul.msk.bf16.gmra.mxu0 %vm617_vm0, %v4376_v4  ;;  %v3492_v0 = vadd.f32 %v3441_v28, %v3160_v39  ;;  %v5004_v28 = vrot.slane %v12812_v31, 2  ;;  %v4378_v39 = vsel %vm927_vm1, %v4375_v52, %v4377_v24  ;;  %v4671_v31 = vrot.slane %v4669_v14, 1 }
 0x371   : > { %10165 = vmatmul.msk.bf16.gmra.mxu3 %vm617_vm0, %v4007_v7  ;;  %v4674_v7 = vrot.slane %v4672_v63, 2  ;;  %v4379_v14 = vrot.slane %v12834_v30, 1 }
 0x372   : > { %v3925_v35 = vpop.f32.mrf.mxu2  ;;  %v5005_v42 = vsel %vm1929_vm3, %v5002_v59, %v5004_v28 }
 0x373   : > { %v12829_v46 = vadd.f32 %v3925_v35, %v3492_v0  ;;  %v4675_v59 = vor.u32 %v4674_v7, %v4671_v31 }
 0x374   : > { %v2871_v50 = vpop.f32.mrf.mxu3 }
 0x375   : > { %v3111_v2 = vpop.f32.mrf.mxu0  ;;  %v2916_v37 = vadd.f32 %v2871_v50, %v12423_v1  ;;  %v11381_v1 = vld [vmem:[%s12271_s9 + $0x38] sm:$0xff] }
 0x376   : > { %v3161_v6 = vadd.f32 %v3111_v2, %v2913_v49  ;;  %v3446_v10 = vpop.f32.mrf.mxu1  ;;  %v4008_v49 = vrot.slane %v11381_v1, 1 }
 0x378   : > { %v3493_v58 = vadd.f32 %v3443_v20, %v3161_v6  ;;  %v4009_v0 = vsel %vm927_vm1, %v4006_v41, %v4008_v49 }
 0x379   : > { %10292 = vmatmul.msk.bf16.gmra.mxu1 %vm617_vm0, %v4667_v45 }
 0x37a   : > { %v3927_v38 = vpop.f32.mrf.mxu2 }
 0x37b   : > { %v12841_v12 = vadd.f32 %v3927_v38, %v3493_v58  ;;  %v4676_v58 = vsel %vm1548_vm4, %v4666_v18, %v4675_v59  ;;  %v12856_v38 = vld [vmem:[%s12271_s9 + $0x40] sm:$0xff] }
 0x37c   : > { %v2873_v47 = vpop.f32.mrf.mxu3  ;;  %v4678_v1 = vshrl.u32 %v12856_v38, 16 }
 0x37d   : > { %v3114_v4 = vpop.f32.mrf.mxu0  ;;  %v2917_v20 = vadd.f32 %v2873_v47, %v12434_v25 }
 0x37e   : > { %v3162_v54 = vadd.f32 %v3114_v4, %v2914_v56  ;;  %v3448_v21 = vpop.f32.mrf.mxu1 }
 0x37f   : > { %10322 = vmatmul.msk.bf16.gmra.mxu2 %vm617_vm0, %v5005_v42  ;;  %v4681_v42 = vshll.u32 %v12856_v38, 16 }
 0x380   : > { %10262 = vmatmul.msk.bf16.gmra.mxu0 %vm617_vm0, %v4378_v39  ;;  %v3494_v35 = vadd.f32 %v3446_v10, %v3162_v54  ;;  %v5006_v10 = vrot.slane %v12834_v30, 2  ;;  %v4380_v54 = vsel %vm927_vm1, %v4377_v24, %v4379_v14  ;;  %v4680_v30 = vrot.slane %v4678_v1, 1 }
 0x381   : > { %10166 = vmatmul.msk.bf16.gmra.mxu3 %vm617_vm0, %v4009_v0  ;;  %v4683_v0 = vrot.slane %v4681_v42, 2  ;;  %v4381_v1 = vrot.slane %v12856_v38, 1 }
 0x382   : > { %v3930_v50 = vpop.f32.mrf.mxu2  ;;  %v5007_v18 = vsel %vm1929_vm3, %v5004_v28, %v5006_v10 }
 0x383   : > { %v12851_v2 = vadd.f32 %v3930_v50, %v3494_v35  ;;  %v4684_v28 = vor.u32 %v4683_v0, %v4680_v30 }
 0x384   : > { %v2876_v25 = vpop.f32.mrf.mxu3 }
 0x385   : > { %v3116_v56 = vpop.f32.mrf.mxu0  ;;  %v2918_v52 = vadd.f32 %v2876_v25, %v12448_v55  ;;  %v11382_v55 = vld [vmem:[%s12271_s9 + $0x40] sm:$0xff] }
 0x386   : > { %v3163_v6 = vadd.f32 %v3116_v56, %v2915_v53  ;;  %v3451_v45 = vpop.f32.mrf.mxu1  ;;  %v4010_v53 = vrot.slane %v11382_v55, 1 }
 0x388   : > { %v3495_v41 = vadd.f32 %v3448_v21, %v3163_v6  ;;  %v4011_v35 = vsel %vm927_vm1, %v4008_v49, %v4010_v53 }
 0x389   : > { %10293 = vmatmul.msk.bf16.gmra.mxu1 %vm617_vm0, %v4676_v58 }
 0x38a   : > { %v3932_v63 = vpop.f32.mrf.mxu2 }
 0x38b   : > { %v12863_v47 = vadd.f32 %v3932_v63, %v3495_v41  ;;  %v4685_v41 = vsel %vm1548_vm4, %v4675_v59, %v4684_v28  ;;  %v12878_v63 = vld [vmem:[%s12271_s9 + $0x48] sm:$0xff] }
 0x38c   : > { %v2878_v4 = vpop.f32.mrf.mxu3  ;;  %v4687_v55 = vshrl.u32 %v12878_v63, 16 }
 0x38d   : > { %v3119_v39 = vpop.f32.mrf.mxu0  ;;  %v2919_v21 = vadd.f32 %v2878_v4, %v12463_v60 }
 0x38e   : > { %v3164_v31 = vadd.f32 %v3119_v39, %v2916_v37  ;;  %v3453_v7 = vpop.f32.mrf.mxu1 }
 0x38f   : > { %10323 = vmatmul.msk.bf16.gmra.mxu2 %vm617_vm0, %v5007_v18  ;;  %v4690_v18 = vshll.u32 %v12878_v63, 16 }
 0x390   : > { %10263 = vmatmul.msk.bf16.gmra.mxu0 %vm617_vm0, %v4380_v54  ;;  %v3496_v50 = vadd.f32 %v3451_v45, %v3164_v31  ;;  %v5008_v45 = vrot.slane %v12856_v38, 2  ;;  %v4382_v31 = vsel %vm927_vm1, %v4379_v14, %v4381_v1  ;;  %v4689_v38 = vrot.slane %v4687_v55, 1 }
 0x391   : > { %10167 = vmatmul.msk.bf16.gmra.mxu3 %vm617_vm0, %v4011_v35  ;;  %v4692_v35 = vrot.slane %v4690_v18, 2  ;;  %v5010_v55 = vrot.slane %v12878_v63, 2  ;;  %v4383_v18 = vrot.slane %v12878_v63, 1 }
 0x392   : > { %v3935_v25 = vpop.f32.mrf.mxu2  ;;  %v5009_v59 = vsel %vm1929_vm3, %v5006_v10, %v5008_v45 }
 0x393   : > { %v12873_v56 = vadd.f32 %v3935_v25, %v3496_v50  ;;  %v4693_v10 = vor.u32 %v4692_v35, %v4689_v38 }
 0x394   : > { %v2881_v60 = vpop.f32.mrf.mxu3 }
 0x395   : > { %v3121_v37 = vpop.f32.mrf.mxu0  ;;  %v2920_v24 = vadd.f32 %v2881_v60, %v12479_v62  ;;  %v11383_v62 = vld [vmem:[%s12271_s9 + $0x48] sm:$0xff] }
 0x396   : > { %v3165_v6 = vadd.f32 %v3121_v37, %v2917_v20  ;;  %v3456_v58 = vpop.f32.mrf.mxu1  ;;  %v4012_v20 = vrot.slane %v11383_v62, 1 }
 0x398   : > { %v3497_v49 = vadd.f32 %v3453_v7, %v3165_v6  ;;  %v4013_v50 = vsel %vm927_vm1, %v4010_v53, %v4012_v20  ;;  %v11192_v53 = vld [vmem:[%s14543_s3 + $0xf0] sm:$0xff] }
 0x399   : > { %10294 = vmatmul.msk.bf16.gmra.mxu1 %vm617_vm0, %v4685_v41  ;;  %5478 = vmatpush.bf16.msra.mxu3 %v11192_v53 }
 0x39a   : > { %v3937_v42 = vpop.f32.mrf.mxu2 }
 0x39b   : > { %v12885_v4 = vadd.f32 %v3937_v42, %v3497_v49  ;;  %v4694_v49 = vsel %vm1548_vm4, %v4684_v28, %v4693_v10  ;;  %v12900_v42 = vld [vmem:[%s12271_s9 + $0x50] sm:$0xff] }
 0x39c   : > { %v2883_v39 = vpop.f32.mrf.mxu3  ;;  %v4699_v62 = vshll.u32 %v12900_v42, 16 }
 0x39d   : > { %v3124_v54 = vpop.f32.mrf.mxu0  ;;  %v2921_v7 = vadd.f32 %v2883_v39, %v12495_v19 }
 0x39e   : > { %v3166_v30 = vadd.f32 %v3124_v54, %v2918_v52  ;;  %v3458_v0 = vpop.f32.mrf.mxu1  ;;  %v5011_v54 = vsel %vm1929_vm3, %v5008_v45, %v5010_v55 }
 0x39f   : > { %10324 = vmatmul.msk.bf16.gmra.mxu2 %vm617_vm0, %v5009_v59  ;;  %v11384_v59 = vld [vmem:[%s12271_s9 + $0x50] sm:$0xff] }
 0x3a0   : > { %10264 = vmatmul.msk.bf16.gmra.mxu0 %vm617_vm0, %v4382_v31  ;;  %v3498_v25 = vadd.f32 %v3456_v58, %v3166_v30  ;;  %v4014_v39 = vrot.slane %v11384_v59, 1  ;;  %v5012_v59 = vrot.slane %v12900_v42, 2 }
 0x3a1   : > { %10168 = vmatmul.msk.bf16.gmra.mxu3 %vm617_vm0, %v4013_v50 }
 0x3a2   : > { %v3940_v60 = vpop.f32.mrf.mxu2 }
 0x3a3   : > { %v12895_v37 = vadd.f32 %v3940_v60, %v3498_v25  ;;  %v4701_v25 = vrot.slane %v4699_v62, 2  ;;  %v4015_v60 = vsel %vm927_vm1, %v4012_v20, %v4014_v39  ;;  %v11196_v20 = vld [vmem:[%s14543_s3 + $0x110] sm:$0xff] }
 0x3a4   : > { %v4107_v19 = vpop.f32.mrf.mxu3  ;;  %6105 = vmatpush.bf16.msra.mxu1 %v11196_v20 }
 0x3a5   : > { %v3126_v14 = vpop.f32.mrf.mxu0  ;;  %v4197_v6 = vadd.f32 %v4107_v19, %v12505_v13  ;;  %v4696_v13 = vshrl.u32 %v12900_v42, 16 }
 0x3a6   : > { %v3167_v52 = vadd.f32 %v3126_v14, %v2919_v21  ;;  %v3461_v41 = vpop.f32.mrf.mxu1  ;;  %v11216_v14 = vld [vmem:[%s14543_s3 + $0x120] sm:$0xff] }
 0x3a7   : > { %v4698_v63 = vrot.slane %v4696_v13, 1  ;;  %6437 = vmatpush.bf16.msra.mxu2 %v11216_v14  ;;  %v12934_v13 = vld [vmem:[%s12271_s9 + $0x58] sm:$0xff] }
 0x3a8   : > { %v3499_v58 = vadd.f32 %v3458_v0, %v3167_v52  ;;  %v4384_v0 = vsel %vm927_vm1, %v4381_v1, %v4383_v18 }
 0x3a9   : > { %10295 = vmatmul.msk.bf16.gmra.mxu1 %vm617_vm0, %v4694_v49  ;;  %v4702_v1 = vor.u32 %v4701_v25, %v4698_v63 }
 0x3aa   : > { %v3942_v21 = vpop.f32.mrf.mxu2 }
 0x3ab   : > { %v12910_v28 = vadd.f32 %v3942_v21, %v3499_v58  ;;  %v4703_v21 = vsel %vm1548_vm4, %v4693_v10, %v4702_v1  ;;  %v5013_v10 = vsel %vm1929_vm3, %v5010_v55, %v5012_v59 }
 0x3ac   : > { %v4109_v30 = vpop.f32.mrf.mxu3 }
 0x3ad   : > { %v3129_v31 = vpop.f32.mrf.mxu0  ;;  %v4198_v35 = vadd.f32 %v4109_v30, %v12516_v9  ;;  %v4705_v30 = vshrl.u32 %v12934_v13, 16 }
 0x3ae   : > { %v3168_v38 = vadd.f32 %v3129_v31, %v2920_v24  ;;  %v3463_v50 = vpop.f32.mrf.mxu1  ;;  %v11194_v24 = vld [vmem:[%s14543_s3 + $0x100] sm:$0xff] }
 0x3af   : > { %10325 = vmatmul.msk.bf16.gmra.mxu2 %vm617_vm0, %v5011_v54  ;;  %5858 = vmatpush.bf16.msra.mxu0 %v11194_v24  ;;  %v4385_v54 = vrot.slane %v12900_v42, 1  ;;  %v4707_v42 = vrot.slane %v4705_v30, 1  ;;  %v4387_v30 = vrot.slane %v12934_v13, 1 }
 0x3b0   : > { %10265 = vmatmul.msk.bf16.gmra.mxu0 %vm617_vm0, %v4384_v0  ;;  %v3500_v45 = vadd.f32 %v3461_v41, %v3168_v38  ;;  %v4708_v0 = vshll.u32 %v12934_v13, 16 }
 0x3b1   : > { %10169 = vmatmul.msk.bf16.gmra.mxu3 %vm617_vm0, %v4015_v60 }
 0x3b2   : > { %v3945_v9 = vpop.f32.mrf.mxu2  ;;  %v4710_v24 = vrot.slane %v4708_v0, 2 }
 0x3b3   : > { %v12926_v19 = vadd.f32 %v3945_v9, %v3500_v45 }
 0x3b4   : > { %v4112_v41 = vpop.f32.mrf.mxu3  ;;  %v4711_v55 = vor.u32 %v4710_v24, %v4707_v42 }
 0x3b5   : > { %v3131_v52 = vpop.f32.mrf.mxu0  ;;  %v4199_v53 = vadd.f32 %v4112_v41, %v12526_v26  ;;  %v11385_v26 = vld [vmem:[%s12271_s9 + $0x58] sm:$0xff] }
 0x3b6   : > { %v3169_v49 = vadd.f32 %v3131_v52, %v2921_v7  ;;  %v4860_v58 = vpop.f32.mrf.mxu1  ;;  %v4016_v38 = vrot.slane %v11385_v26, 1 }
 0x3b8   : > { %v3501_v62 = vadd.f32 %v3463_v50, %v3169_v49  ;;  %v4386_v50 = vsel %vm927_vm1, %v4383_v18, %v4385_v54  ;;  %v4017_v9 = vsel %vm927_vm1, %v4014_v39, %v4016_v38 }
 0x3b9   : > { %10296 = vmatmul.msk.bf16.gmra.mxu1 %vm617_vm0, %v4703_v21 }
 0x3ba   : > { %v3947_v31 = vpop.f32.mrf.mxu2 }
 0x3bb   : > { %v12941_v7 = vadd.f32 %v3947_v31, %v3501_v62  ;;  %v4712_v62 = vsel %vm1548_vm4, %v4702_v1, %v4711_v55  ;;  %v12956_v31 = vld [vmem:[%s12271_s9 + $0x60] sm:$0xff] }
 0x3bc   : > { %v4114_v63 = vpop.f32.mrf.mxu3  ;;  %v4714_v26 = vshrl.u32 %v12956_v31, 16 }
 0x3bd   : > { %v4480_v25 = vpop.f32.mrf.mxu0  ;;  %v4200_v60 = vadd.f32 %v4114_v63, %v12537_v34 }
 0x3be   : > { %v4570_v14 = vadd.f32 %v4480_v25, %v4197_v6  ;;  %v4862_v45 = vpop.f32.mrf.mxu1 }
 0x3bf   : > { %10326 = vmatmul.msk.bf16.gmra.mxu2 %vm617_vm0, %v5013_v10  ;;  %v4717_v10 = vshll.u32 %v12956_v31, 16 }
 0x3c0   : > { %10266 = vmatmul.msk.bf16.gmra.mxu0 %vm617_vm0, %v4386_v50  ;;  %v4950_v20 = vadd.f32 %v4860_v58, %v4570_v14  ;;  %v5014_v58 = vrot.slane %v12934_v13, 2  ;;  %v4388_v14 = vsel %vm927_vm1, %v4385_v54, %v4387_v30  ;;  %v4716_v13 = vrot.slane %v4714_v26, 1 }
 0x3c1   : > { %10170 = vmatmul.msk.bf16.gmra.mxu3 %vm617_vm0, %v4017_v9  ;;  %v4719_v9 = vrot.slane %v4717_v10, 2  ;;  %v4389_v26 = vrot.slane %v12956_v31, 1 }
 0x3c2   : > { %v5107_v52 = vpop.f32.mrf.mxu2  ;;  %v5015_v1 = vsel %vm1929_vm3, %v5012_v59, %v5014_v58 }
 0x3c3   : > { %v12951_v41 = vadd.f32 %v5107_v52, %v4950_v20  ;;  %v4720_v59 = vor.u32 %v4719_v9, %v4716_v13 }
 0x3c4   : > { %v4117_v34 = vpop.f32.mrf.mxu3 }
 0x3c5   : > { %v4482_v6 = vpop.f32.mrf.mxu0  ;;  %v4201_v18 = vadd.f32 %v4117_v34, %v12547_v61  ;;  %v11386_v61 = vld [vmem:[%s12271_s9 + $0x60] sm:$0xff] }
 0x3c6   : > { %v4571_v49 = vadd.f32 %v4482_v6, %v4198_v35  ;;  %v4865_v21 = vpop.f32.mrf.mxu1  ;;  %v4018_v35 = vrot.slane %v11386_v61, 1 }
 0x3c8   : > { %v4951_v39 = vadd.f32 %v4862_v45, %v4571_v49  ;;  %v4019_v20 = vsel %vm927_vm1, %v4016_v38, %v4018_v35 }
 0x3c9   : > { %10297 = vmatmul.msk.bf16.gmra.mxu1 %vm617_vm0, %v4712_v62 }
 0x3ca   : > { %v5109_v0 = vpop.f32.mrf.mxu2 }
 0x3cb   : > { %v12963_v63 = vadd.f32 %v5109_v0, %v4951_v39  ;;  %v4721_v39 = vsel %vm1548_vm4, %v4711_v55, %v4720_v59  ;;  %v12978_v0 = vld [vmem:[%s12271_s9 + $0x68] sm:$0xff] }
 0x3cc   : > { %v4119_v25 = vpop.f32.mrf.mxu3  ;;  %v4723_v61 = vshrl.u32 %v12978_v0, 16 }
 0x3cd   : > { %v4485_v50 = vpop.f32.mrf.mxu0  ;;  %v4202_v45 = vadd.f32 %v4119_v25, %v12558_v43 }
 0x3ce   : > { %v4572_v42 = vadd.f32 %v4485_v50, %v4199_v53  ;;  %v4867_v24 = vpop.f32.mrf.mxu1 }
 0x3cf   : > { %10327 = vmatmul.msk.bf16.gmra.mxu2 %vm617_vm0, %v5015_v1  ;;  %v4726_v1 = vshll.u32 %v12978_v0, 16 }
 0x3d0   : > { %10267 = vmatmul.msk.bf16.gmra.mxu0 %vm617_vm0, %v4388_v14  ;;  %v4952_v52 = vadd.f32 %v4865_v21, %v4572_v42  ;;  %v5016_v21 = vrot.slane %v12956_v31, 2  ;;  %v4390_v42 = vsel %vm927_vm1, %v4387_v30, %v4389_v26  ;;  %v4725_v31 = vrot.slane %v4723_v61, 1 }
 0x3d1   : > { %10171 = vmatmul.msk.bf16.gmra.mxu3 %vm617_vm0, %v4019_v20  ;;  %v4728_v20 = vrot.slane %v4726_v1, 2  ;;  %v4391_v61 = vrot.slane %v12978_v0, 1 }
 0x3d2   : > { %v5112_v34 = vpop.f32.mrf.mxu2  ;;  %v5017_v55 = vsel %vm1929_vm3, %v5014_v58, %v5016_v21 }
 0x3d3   : > { %v12973_v6 = vadd.f32 %v5112_v34, %v4952_v52  ;;  %v4729_v58 = vor.u32 %v4728_v20, %v4725_v31 }
 0x3d4   : > { %v4122_v43 = vpop.f32.mrf.mxu3 }
 0x3d5   : > { %v4487_v53 = vpop.f32.mrf.mxu0  ;;  %v4203_v54 = vadd.f32 %v4122_v43, %v12568_v22  ;;  %v11387_v22 = vld [vmem:[%s12271_s9 + $0x68] sm:$0xff] }
 0x3d6   : > { %v4573_v49 = vadd.f32 %v4487_v53, %v4200_v60  ;;  %v4870_v62 = vpop.f32.mrf.mxu1  ;;  %v4020_v60 = vrot.slane %v11387_v22, 1 }
 0x3d8   : > { %v4953_v38 = vadd.f32 %v4867_v24, %v4573_v49  ;;  %v4021_v52 = vsel %vm927_vm1, %v4018_v35, %v4020_v60 }
 0x3d9   : > { %10298 = vmatmul.msk.bf16.gmra.mxu1 %vm617_vm0, %v4721_v39 }
 0x3da   : > { %v5114_v10 = vpop.f32.mrf.mxu2 }
 0x3db   : > { %v12985_v25 = vadd.f32 %v5114_v10, %v4953_v38  ;;  %v4730_v38 = vsel %vm1548_vm4, %v4720_v59, %v4729_v58  ;;  %v13000_v10 = vld [vmem:[%s12271_s9 + $0x70] sm:$0xff] }
 0x3dc   : > { %v4124_v50 = vpop.f32.mrf.mxu3  ;;  %v4732_v22 = vshrl.u32 %v13000_v10, 16 }
 0x3dd   : > { %v4490_v14 = vpop.f32.mrf.mxu0  ;;  %v4204_v24 = vadd.f32 %v4124_v50, %v12579_v48 }
 0x3de   : > { %v4574_v13 = vadd.f32 %v4490_v14, %v4201_v18  ;;  %v4872_v9 = vpop.f32.mrf.mxu1 }
 0x3df   : > { %10328 = vmatmul.msk.bf16.gmra.mxu2 %vm617_vm0, %v5017_v55  ;;  %v4735_v55 = vshll.u32 %v13000_v10, 16 }
 0x3e0   : > { %10268 = vmatmul.msk.bf16.gmra.mxu0 %vm617_vm0, %v4390_v42  ;;  %v4954_v34 = vadd.f32 %v4870_v62, %v4574_v13  ;;  %v5018_v62 = vrot.slane %v12978_v0, 2  ;;  %v4392_v13 = vsel %vm927_vm1, %v4389_v26, %v4391_v61  ;;  %v4734_v0 = vrot.slane %v4732_v22, 1  ;;  %v14556_v26 = vld [vmem:[#allocation3_spill] sm:$0xff]  ;;  %v13022_v22 = vld [vmem:[%s12271_s9 + $0x78] sm:$0xff] }
 0x3e1   : > { %10172 = vmatmul.msk.bf16.gmra.mxu3 %vm617_vm0, %v4021_v52  ;;  %v4737_v52 = vrot.slane %v4735_v55, 2  ;;  %v4393_v55 = vrot.slane %v13000_v10, 1 }
 0x3e2   : > { %v5117_v43 = vpop.f32.mrf.mxu2  ;;  %v5019_v59 = vsel %vm1929_vm3, %v5016_v21, %v5018_v62 }
 0x3e3   : > { %v12995_v53 = vadd.f32 %v5117_v43, %v4954_v34  ;;  %v4738_v21 = vor.u32 %v4737_v52, %v4734_v0 }
 0x3e4   : > { %v4127_v48 = vpop.f32.mrf.mxu3 }
 0x3e5   : > { %v4492_v18 = vpop.f32.mrf.mxu0  ;;  %v4205_v30 = vadd.f32 %v4127_v48, %v12589_v3  ;;  %v11388_v3 = vld [vmem:[%s12271_s9 + $0x70] sm:$0xff] }
 0x3e6   : > { %v4575_v49 = vadd.f32 %v4492_v18, %v4202_v45  ;;  %v4875_v39 = vpop.f32.mrf.mxu1  ;;  %v4022_v45 = vrot.slane %v11388_v3, 1 }
 0x3e8   : > { %v4955_v35 = vadd.f32 %v4872_v9, %v4575_v49  ;;  %v4023_v34 = vsel %vm927_vm1, %v4020_v60, %v4022_v45 }
 0x3e9   : > { %10299 = vmatmul.msk.bf16.gmra.mxu1 %vm617_vm0, %v4730_v38 }
 0x3ea   : > { %v5119_v1 = vpop.f32.mrf.mxu2 }
 0x3eb   : > { %v13007_v50 = vadd.f32 %v5119_v1, %v4955_v35  ;;  %v4739_v1 = vsel %vm1548_vm4, %v4729_v58, %v4738_v21 }
 0x3ec   : > { %v4129_v14 = vpop.f32.mrf.mxu3 }
 0x3ed   : > { %v4495_v42 = vpop.f32.mrf.mxu0  ;;  %v4206_v9 = vadd.f32 %v4129_v14, %v12600_v5  ;;  %v4744_v14 = vshll.u32 %v13022_v22, 16 }
 0x3ee   : > { %v4576_v31 = vadd.f32 %v4495_v42, %v4203_v54  ;;  %v4877_v20 = vpop.f32.mrf.mxu1 }
 0x3ef   : > { %10329 = vmatmul.msk.bf16.gmra.mxu2 %vm617_vm0, %v5019_v59  ;;  %v4741_v59 = vshrl.u32 %v13022_v22, 16 }
 0x3f0   : > { %10269 = vmatmul.msk.bf16.gmra.mxu0 %vm617_vm0, %v4392_v13  ;;  %v4956_v43 = vadd.f32 %v4875_v39, %v4576_v31  ;;  %v5020_v39 = vrot.slane %v13000_v10, 2 }
 0x3f1   : > { %10173 = vmatmul.msk.bf16.gmra.mxu3 %vm617_vm0, %v4023_v34  ;;  %v4743_v10 = vrot.slane %v4741_v59, 1  ;;  %v13044_v59 = vld [vmem:[%s12271_s9 + $0x80] sm:$0xff] }
 0x3f2   : > { %v5122_v48 = vpop.f32.mrf.mxu2  ;;  %v5021_v58 = vsel %vm1929_vm3, %v5018_v62, %v5020_v39 }
 0x3f3   : > { %v13017_v18 = vadd.f32 %v5122_v48, %v4956_v43  ;;  %v4746_v48 = vrot.slane %v4744_v14, 2  ;;  %v4395_v14 = vrot.slane %v13022_v22, 1 }
 0x3f4   : > { %v4132_v5 = vpop.f32.mrf.mxu3 }
 0x3f5   : > { %v4497_v54 = vpop.f32.mrf.mxu0  ;;  %v4207_v49 = vadd.f32 %v4132_v5, %v14556_v26  ;;  %v4747_v62 = vor.u32 %v4746_v48, %v4743_v10 }
 0x3f6   : > { %v4577_v38 = vadd.f32 %v4497_v54, %v4204_v24  ;;  %v4880_v35 = vpop.f32.mrf.mxu1  ;;  %v11389_v24 = vld [vmem:[%s12271_s9 + $0x78] sm:$0xff] }
 0x3f7   : > { %v4024_v13 = vrot.slane %v11389_v24, 1 }
 0x3f8   : > { %v4957_v60 = vadd.f32 %v4877_v20, %v4577_v38  ;;  %v4394_v20 = vsel %vm927_vm1, %v4391_v61, %v4393_v55 }
 0x3f9   : > { %10300 = vmatmul.msk.bf16.gmra.mxu1 %vm617_vm0, %v4739_v1  ;;  %v4025_v5 = vsel %vm927_vm1, %v4022_v45, %v4024_v13 }
 0x3fa   : > { %v5124_v3 = vpop.f32.mrf.mxu2 }
 0x3fb   : > { %v13029_v42 = vadd.f32 %v5124_v3, %v4957_v60  ;;  %v4748_v3 = vsel %vm1548_vm4, %v4738_v21, %v4747_v62 }
 0x3fc   : > { %v4134_v31 = vpop.f32.mrf.mxu3 }
 0x3fd   : > { %v4500_v0 = vpop.f32.mrf.mxu0  ;;  %v4208_v52 = vadd.f32 %v4134_v31, %v12622_v23  ;;  %v4753_v31 = vshll.u32 %v13044_v59, 16 }
 0x3fe   : > { %v4578_v34 = vadd.f32 %v4500_v0, %v4205_v30  ;;  %v4882_v43 = vpop.f32.mrf.mxu1 }
 0x3ff   : > { %10330 = vmatmul.msk.bf16.gmra.mxu2 %vm617_vm0, %v5021_v58  ;;  %v4750_v58 = vshrl.u32 %v13044_v59, 16 }
 0x400   : > { %10270 = vmatmul.msk.bf16.gmra.mxu0 %vm617_vm0, %v4394_v20  ;;  %v4958_v54 = vadd.f32 %v4880_v35, %v4578_v34  ;;  %v5022_v35 = vrot.slane %v13022_v22, 2 }
 0x401   : > { %10174 = vmatmul.msk.bf16.gmra.mxu3 %vm617_vm0, %v4025_v5  ;;  %v4752_v22 = vrot.slane %v4750_v58, 1  ;;  %v13066_v58 = vld [vmem:[%s12271_s9 + $0x88] sm:$0xff] }
 0x402   : > { %v5127_v26 = vpop.f32.mrf.mxu2  ;;  %v5023_v21 = vsel %vm1929_vm3, %v5020_v39, %v5022_v35 }
 0x403   : > { %v13039_v38 = vadd.f32 %v5127_v26, %v4958_v54  ;;  %v4755_v54 = vrot.slane %v4753_v31, 2  ;;  %v4397_v31 = vrot.slane %v13044_v59, 1 }
 0x404   : > { %v4137_v23 = vpop.f32.mrf.mxu3 }
 0x405   : > { %v4502_v30 = vpop.f32.mrf.mxu0  ;;  %v4209_v61 = vadd.f32 %v4137_v23, %v12634_v17  ;;  %v11390_v17 = vld [vmem:[%s12271_s9 + $0x80] sm:$0xff]  ;;  %v4756_v39 = vor.u32 %v4755_v54, %v4752_v22 }
 0x406   : > { %v4579_v1 = vadd.f32 %v4502_v30, %v4206_v9  ;;  %v4885_v60 = vpop.f32.mrf.mxu1  ;;  %v4026_v9 = vrot.slane %v11390_v17, 1 }
 0x408   : > { %v4959_v45 = vadd.f32 %v4882_v43, %v4579_v1  ;;  %v4396_v43 = vsel %vm927_vm1, %v4393_v55, %v4395_v14  ;;  %v4027_v26 = vsel %vm927_vm1, %v4024_v13, %v4026_v9 }
 0x409   : > { %10301 = vmatmul.msk.bf16.gmra.mxu1 %vm617_vm0, %v4748_v3 }
 0x40a   : > { %v5129_v24 = vpop.f32.mrf.mxu2 }
 0x40b   : > { %v13051_v0 = vadd.f32 %v5129_v24, %v4959_v45  ;;  %v4757_v24 = vsel %vm1548_vm4, %v4747_v62, %v4756_v39 }
 0x40c   : > { %v4139_v20 = vpop.f32.mrf.mxu3 }
 0x40d   : > { %v4505_v34 = vpop.f32.mrf.mxu0  ;;  %v4210_v10 = vadd.f32 %v4139_v20, %v12642_v27  ;;  %v4762_v20 = vshll.u32 %v13066_v58, 16 }
 0x40e   : > { %v4580_v48 = vadd.f32 %v4505_v34, %v4207_v49  ;;  %v4887_v5 = vpop.f32.mrf.mxu1 }
 0x40f   : > { %10331 = vmatmul.msk.bf16.gmra.mxu2 %vm617_vm0, %v5023_v21  ;;  %v4759_v21 = vshrl.u32 %v13066_v58, 16 }
 0x410   : > { %10271 = vmatmul.msk.bf16.gmra.mxu0 %vm617_vm0, %v4396_v43  ;;  %v4960_v23 = vadd.f32 %v4885_v60, %v4580_v48  ;;  %v5024_v60 = vrot.slane %v13044_v59, 2 }
 0x411   : > { %10175 = vmatmul.msk.bf16.gmra.mxu3 %vm617_vm0, %v4027_v26  ;;  %v4761_v59 = vrot.slane %v4759_v21, 1  ;;  %v13090_v21 = vld [vmem:[%s12271_s9 + $0x90] sm:$0xff] }
 0x412   : > { %v5132_v30 = vpop.f32.mrf.mxu2  ;;  %v5025_v62 = vsel %vm1929_vm3, %v5022_v35, %v5024_v60 }
 0x413   : > { %v13061_v1 = vadd.f32 %v5132_v30, %v4960_v23  ;;  %v4764_v23 = vrot.slane %v4762_v20, 2  ;;  %v4399_v20 = vrot.slane %v13066_v58, 1 }
 0x414   : > { %v4142_v27 = vpop.f32.mrf.mxu3 }
 0x415   : > { %v4507_v49 = vpop.f32.mrf.mxu0  ;;  %v4211_v55 = vadd.f32 %v4142_v27, %v12656_v32  ;;  %v11391_v32 = vld [vmem:[%s12271_s9 + $0x88] sm:$0xff]  ;;  %v4765_v35 = vor.u32 %v4764_v23, %v4761_v59 }
 0x416   : > { %v4581_v3 = vadd.f32 %v4507_v49, %v4208_v52  ;;  %v4890_v45 = vpop.f32.mrf.mxu1  ;;  %v4028_v52 = vrot.slane %v11391_v32, 1 }
 0x418   : > { %v4961_v13 = vadd.f32 %v4887_v5, %v4581_v3  ;;  %v4398_v5 = vsel %vm927_vm1, %v4395_v14, %v4397_v31  ;;  %v4029_v30 = vsel %vm927_vm1, %v4026_v9, %v4028_v52 }
 0x419   : > { %10302 = vmatmul.msk.bf16.gmra.mxu1 %vm617_vm0, %v4757_v24 }
 0x41a   : > { %v5134_v17 = vpop.f32.mrf.mxu2 }
 0x41b   : > { %v13073_v34 = vadd.f32 %v5134_v17, %v4961_v13  ;;  %v4766_v17 = vsel %vm1548_vm4, %v4756_v39, %v4765_v35 }
 0x41c   : > { %v4144_v43 = vpop.f32.mrf.mxu3 }
 0x41d   : > { %v4510_v48 = vpop.f32.mrf.mxu0  ;;  %v4212_v22 = vadd.f32 %v4144_v43, %v12671_v16 }
 0x41e   : > { %v4582_v54 = vadd.f32 %v4510_v48, %v4209_v61  ;;  %v4892_v26 = vpop.f32.mrf.mxu1 }
 0x41f   : > { %10332 = vmatmul.msk.bf16.gmra.mxu2 %vm617_vm0, %v5025_v62  ;;  %v4768_v62 = vshrl.u32 %v13090_v21, 16 }
 0x420   : > { %10272 = vmatmul.msk.bf16.gmra.mxu0 %vm617_vm0, %v4398_v5  ;;  %v4962_v27 = vadd.f32 %v4890_v45, %v4582_v54  ;;  %v5026_v45 = vrot.slane %v13066_v58, 2 }
 0x421   : > { %10176 = vmatmul.msk.bf16.gmra.mxu3 %vm617_vm0, %v4029_v30  ;;  %v4770_v30 = vrot.slane %v4768_v62, 1 }
 0x422   : > { %v5137_v49 = vpop.f32.mrf.mxu2  ;;  %v5027_v48 = vsel %vm1929_vm3, %v5024_v60, %v5026_v45  ;;  %v5233_v60 = vld [vmem:[%s12271_s9 + $0x10] sm:$0xc] }
 0x423   : > { %v13083_v3 = vadd.f32 %v5137_v49, %v4962_v27 }
 0x424   : > { %v4147_v14 = vpop.f32.mrf.mxu3 }
 0x425   : > { %v4512_v16 = vpop.f32.mrf.mxu0  ;;  %v13086_v61 = vadd.f32 %v4147_v14, %v12701_v36  ;;  %v4771_v36 = vshll.u32 %v13090_v21, 16  ;;  %v4606_v14 = vld [vmem:[%s12271_s9 + $0x98] sm:$0x3] }
 0x426   : > { %v4583_v24 = vadd.f32 %v4512_v16, %v4210_v10  ;;  %v4895_v13 = vpop.f32.mrf.mxu1  ;;  %v14557_v10 = vld [vmem:[#allocation2_spill] sm:$0xff] }
 0x427   : > { %v4030_v39 = vrot.slane %v14557_v10, 1  ;;  %v4773_v27 = vrot.slane %v4771_v36, 2 }
 0x428   : > { %v4963_v9 = vadd.f32 %v4892_v26, %v4583_v24  ;;  %v4400_v26 = vsel %vm927_vm1, %v4397_v31, %v4399_v20  ;;  %v13111_v24 = vld [vmem:[%s12271_s9 + $0x14] sm:$0xf] }
 0x429   : > { %10303 = vmatmul.msk.bf16.gmra.mxu1 %vm617_vm0, %v4766_v17  ;;  %v4031_v49 = vsel %vm927_vm1, %v4028_v52, %v4030_v39 }
 0x42a   : > { %v5139_v32 = vpop.f32.mrf.mxu2 }
 0x42b   : > { %v13097_v43 = vadd.f32 %v5139_v32, %v4963_v9  ;;  %v5312_v9 = vunpack.c.l.b16 %v5233_v60  ;;  %v5313_v32 = vunpack.c.l.b16 %v13111_v24 }
 0x42c   : > { %v4149_v5 = vpop.f32.mrf.mxu3 }
 0x42d   : > { %v4515_v54 = vpop.f32.mrf.mxu0  ;;  %v13103_v58 = vadd.f32 %v4149_v5, %v12724_v57  ;;  %v4774_v57 = vor.u32 %v4773_v27, %v4770_v30  ;;  %v11236_v5 = vld [vmem:[%s14543_s3 + $0x138] sm:$0xff]  ;;  %v5028_v30 = vrot.slane %v13090_v21, 2 }
 0x42e   : > { %v4584_v59 = vadd.f32 %v4515_v54, %v4211_v55  ;;  %v4897_v23 = vpop.f32.mrf.mxu1  ;;  %v4613_v55 = vunpack.c.l.b16 %v4606_v14  ;;  %v13125_v54 = vld [vmem:[%s12271_s9 + $0x18] sm:$0xff]  ;;  %6920 = vmatpush.bf16.msrb.mxu3 %v11236_v5 }
 0x42f   : > { %10333 = vmatmul.msk.bf16.gmra.mxu2 %vm617_vm0, %v5027_v48  ;;  %v4775_v39 = vsel %vm1548_vm4, %v4765_v35, %v4774_v57  ;;  %v5029_v60 = vsel %vm1929_vm3, %v5026_v45, %v5028_v30  ;;  %v11259_v45 = vld [vmem:[%s14543_s3 + $0x168] sm:$0xff] }
 0x430   : > { %10273 = vmatmul.msk.bf16.gmra.mxu0 %vm617_vm0, %v4400_v26  ;;  %v4964_v16 = vadd.f32 %v4895_v13, %v4584_v59  ;;  %v4614_v48 = vpack.c.b16 %v4613_v55, %v4613_v55  ;;  %v13129_v26 = vpack.c.b16 %v5313_v32, %v5312_v9  ;;  %7920 = vmatpush.bf16.msrb.mxu2 %v11259_v45 }
 0x431   : > { %10177 = vmatmul.msk.bf16.gmra.mxu3 %vm617_vm0, %v4031_v49 }
 0x432   : > { %v5142_v31 = vpop.f32.mrf.mxu2  ;;  %v4777_v35 = vshrl.u32 %v4614_v48, 16  ;;  %v4780_v27 = vshll.u32 %v4614_v48, 16  ;;  %v5368_v14 = vrot.slane %v13129_v26, 2 }
 0x433   : > { %v13114_v17 = vadd.f32 %v5142_v31, %v4964_v16  ;;  %v5369_v16 = vrot.slane %v13125_v54, 2 }
 0x434   : > { %v4152_v62 = vpop.f32.mrf.mxu3 }
 0x435   : > { %v4517_v52 = vpop.f32.mrf.mxu0  ;;  %v13118_v36 = vadd.f32 %v4152_v62, %v12738_v51  ;;  %v4401_v51 = vrot.slane %v13090_v21, 1  ;;  %v5370_v5 = vsel %vm1929_vm3, %v5368_v14, %v5369_v16 }
 0x436   : > { %v4585_v13 = vadd.f32 %v4517_v52, %v4212_v22  ;;  %v4900_v10 = vpop.f32.mrf.mxu1  ;;  %v4779_v52 = vrot.slane %v4777_v35, 1 }
 0x437   : > { %v4402_v55 = vsel %vm927_vm1, %v4399_v20, %v4401_v51 }
 0x438   : > { %v4965_v59 = vadd.f32 %v4897_v23, %v4585_v13  ;;  %v4782_v13 = vrot.slane %v4780_v27, 2 }
 0x439   : > { %10304 = vmatmul.msk.bf16.gmra.mxu1 %vm617_vm0, %v4775_v39  ;;  %v4269_v39 = vld [vmem:[%s12271_s9 + $0x98] sm:$0x1] }
 0x43a   : > { %v5144_v22 = vpop.f32.mrf.mxu2 }
 0x43b   : > { %v13134_v49 = vadd.f32 %v5144_v22, %v4965_v59  ;;  %v4783_v22 = vor.u32 %v4782_v13, %v4779_v52  ;;  %v13167_v52 = vld [vmem:[%s12271_s9 + $0x20] sm:$0xff]  ;;  %v5986_v13 = vld [vmem:[%s12271_s9 + $0x10] sm:$0x8] }
 0x43c   : > { %v4154_v23 = vpop.f32.mrf.mxu3 }
 0x43d   : > { %v4520_v31 = vpop.f32.mrf.mxu0  ;;  %v13141_v9 = vadd.f32 %v4154_v23, %v12752_v44  ;;  %v11238_v44 = vld [vmem:[%s14543_s3 + $0x148] sm:$0xff] }
 0x43e   : > { %v4586_v21 = vadd.f32 %v4520_v31, %v13086_v61  ;;  %v4902_v62 = vpop.f32.mrf.mxu1  ;;  %v4348_v61 = vunpack.c.l.b16 %v4269_v39  ;;  %7167 = vmatpush.bf16.msrb.mxu0 %v11238_v44  ;;  %v5993_v44 = vunpack.c.l.b16 %v5986_v13 }
 0x43f   : > { %10334 = vmatmul.msk.bf16.gmra.mxu2 %vm617_vm0, %v5029_v60 }
 0x440   : > { %10274 = vmatmul.msk.bf16.gmra.mxu0 %vm617_vm0, %v4402_v55  ;;  %v4966_v20 = vadd.f32 %v4900_v10, %v4586_v21  ;;  %v11257_v10 = vld [vmem:[%s14543_s3 + $0x158] sm:$0xff]  ;;  %v4367_v60 = vpack.c.b16 %v4348_v61, %v4348_v61  ;;  %v4784_v21 = vsel %vm1548_vm4, %v4774_v57, %v4783_v22 }
 0x441   : > { %10416 = vmatmul.msk.bf16.vlgmr.msra.gmra.mxu3 %vm617_vm0, %v5370_v5  ;;  %7540 = vmatpush.bf16.msrb.mxu1 %v11257_v10  ;;  %v5030_v5 = vrot.slane %v4614_v48, 2 }
 0x442   : > { %v5147_v59 = vpop.f32.mrf.mxu2  ;;  %v4403_v45 = vrot.slane %v4367_v60, 1  ;;  %v5616_v60 = vshrl.u32 %v13129_v26, 16 }
 0x443   : > { %v13156_v35 = vadd.f32 %v5147_v59, %v4966_v20 }
 0x444   : > { %v4157_v27 = vpop.f32.mrf.mxu3  ;;  %v4404_v22 = vsel %vm927_vm1, %v4401_v51, %v4403_v45  ;;  %v5619_v51 = vshll.u32 %v13129_v26, 16  ;;  %v5618_v13 = vrot.slane %v5616_v60, 2 }
 0x445   : > { %v4522_v14 = vpop.f32.mrf.mxu0  ;;  %v13162_v23 = vadd.f32 %v4157_v27, %v12763_v8  ;;  %v5371_v8 = vrot.slane %v13167_v52, 2  ;;  %v5994_v27 = vpack.c.b16 %v5313_v32, %v5993_v44  ;;  %v5996_v32 = vrot.slane %v13125_v54, 3 }
 0x446   : > { %v4587_v31 = vadd.f32 %v4522_v14, %v13103_v58  ;;  %v4905_v55 = vpop.f32.mrf.mxu1  ;;  %v5031_v58 = vsel %vm1929_vm3, %v5028_v30, %v5030_v5 }
 0x447   : > { %v5372_v14 = vsel %vm1929_vm3, %v5369_v16, %v5371_v8  ;;  %v5995_v24 = vrot.slane %v5994_v27, 3 }
 0x448   : > { %v4967_v39 = vadd.f32 %v4902_v62, %v4587_v31  ;;  %v5624_v31 = vshrl.u32 %v13125_v54, 16 }
 0x449   : > { %10305 = vmatmul.msk.bf16.gmra.mxu1 %vm617_vm0, %v4784_v21 }
 0x44a   : > { %v5149_v20 = vpop.f32.mrf.mxu2  ;;  %v5626_v26 = vrot.slane %v5624_v31, 2 }
 0x44b   : > { %v13171_v61 = vadd.f32 %v5149_v20, %v4967_v39  ;;  %v5621_v39 = vrot.slane %v5619_v51, 3 }
 0x44c   : > { %v4159_v59 = vpop.f32.mrf.mxu3 }
 0x44d   : > { %v4525_v57 = vpop.f32.mrf.mxu0  ;;  %v4218_v48 = vadd.f32 %v4159_v59, %v12775_v40  ;;  %v5627_v40 = vshll.u32 %v13125_v54, 16  ;;  %v13196_v59 = vld [vmem:[%s12271_s9 + $0x28] sm:$0xff] }
 0x44e   : > { %v4588_v62 = vadd.f32 %v4525_v57, %v13118_v36  ;;  %v4907_v10 = vpop.f32.mrf.mxu1  ;;  %v5622_v57 = vor.u32 %v5621_v39, %v5618_v13  ;;  %v5373_v27 = vrot.slane %v13196_v59, 2 }
 0x44f   : > { %10335 = vmatmul.msk.bf16.gmra.mxu2 %vm617_vm0, %v5031_v58  ;;  %v5629_v5 = vrot.slane %v5627_v40, 3  ;;  %v5997_v58 = vsel %vm2931_vm6, %v5995_v24, %v5996_v32  ;;  %v5633_v24 = vshrl.u32 %v13167_v52, 16 }
 0x450   : > { %10275 = vmatmul.msk.bf16.gmra.mxu0 %vm617_vm0, %v4404_v22  ;;  %v4968_v30 = vadd.f32 %v4905_v55, %v4588_v62 }
 0x451   : > { %10417 = vmatmul.msk.bf16.gmra.mxu3 %vm617_vm0, %v5372_v14  ;;  %v5630_v22 = vor.u32 %v5629_v5, %v5626_v26  ;;  %v5635_v26 = vrot.slane %v5633_v24, 2  ;;  %v5642_v24 = vshrl.u32 %v13196_v59, 16 }
 0x452   : > { %v5152_v36 = vpop.f32.mrf.mxu2 }
 0x453   : > { %v13190_v16 = vadd.f32 %v5152_v36, %v4968_v30  ;;  %v5631_v60 = vsel %vm2550_vm5, %v5622_v57, %v5630_v22 }
 0x454   : > { %v4162_v55 = vpop.f32.mrf.mxu3 }
 0x455   : > { %v4527_v21 = vpop.f32.mrf.mxu0  ;;  %v4219_v45 = vadd.f32 %v4162_v55, %v12785_v29  ;;  %v5636_v55 = vshll.u32 %v13167_v52, 16 }
 0x456   : > { %v4589_v20 = vadd.f32 %v4527_v21, %v13141_v9  ;;  %v4910_v44 = vpop.f32.mrf.mxu1  ;;  %v11198_v9 = vld [vmem:[%s13201_s14] sm:$0xff] }
 0x458   : > { %v4969_v54 = vadd.f32 %v4907_v10, %v4589_v20  ;;  %v5374_v10 = vsel %vm1929_vm3, %v5371_v8, %v5373_v27  ;;  %v5638_v8 = vrot.slane %v5636_v55, 3  ;;  %v5645_v55 = vshll.u32 %v13196_v59, 16 }
 0x459   : > { %10476 = vmatmul.msk.bf16.vlgmr.msra.gmra.mxu1 %vm617_vm0, %v5997_v58 }
 0x45a   : > { %v5154_v62 = vpop.f32.mrf.mxu2 }
 0x45b   : > { %v13204_v29 = vadd.f32 %v5154_v62, %v4969_v54  ;;  %v13223_v54 = vld [vmem:[%s12271_s9 + $0x30] sm:$0xff]  ;;  %v5639_v62 = vor.u32 %v5638_v8, %v5635_v26 }
 0x45c   : > { %v4164_v14 = vpop.f32.mrf.mxu3 }
 0x45d   : > { %v4530_v30 = vpop.f32.mrf.mxu0  ;;  %v4220_v51 = vadd.f32 %v4164_v14, %v12797_v11  ;;  %v5998_v11 = vrot.slane %v13167_v52, 3  ;;  %v11199_v14 = vld [vmem:[%s13201_s14 + $0x8] sm:$0xff] }
 0x45e   : > { %v4590_v31 = vadd.f32 %v4530_v30, %v13162_v23  ;;  %v4912_v40 = vpop.f32.mrf.mxu1  ;;  %v5375_v30 = vrot.slane %v13223_v54, 2 }
 0x45f   : > { %10578 = vmatmul.msk.bf16.vlgmr.msra.gmra.mxu2 %vm617_vm0, %v11198_v9  ;;  %v5999_v58 = vsel %vm2931_vm6, %v5996_v32, %v5998_v11 }
 0x460   : > { %10446 = vmatmul.msk.bf16.vlgmr.msra.gmra.mxu0 %vm617_vm0, %v5631_v60  ;;  %v4970_v36 = vadd.f32 %v4910_v44, %v4590_v31 }
 0x461   : > { %10418 = vmatmul.msk.bf16.gmra.mxu3 %vm617_vm0, %v5374_v10 }
 0x462   : > { %v5157_v21 = vpop.f32.mrf.mxu2 }
 0x463   : > { %v13218_v23 = vadd.f32 %v5157_v21, %v4970_v36 }
 0x464   : > { %v4167_v13 = vpop.f32.mrf.mxu3 }
 0x465   : > { %v4532_v39 = vpop.f32.mrf.mxu0  ;;  %v4221_v5 = vadd.f32 %v4167_v13, %v12807_v33  ;;  %v5640_v33 = vsel %vm2550_vm5, %v5630_v22, %v5639_v62  ;;  %v6000_v22 = vrot.slane %v13196_v59, 3 }
 0x466   : > { %v4591_v20 = vadd.f32 %v4532_v39, %v4218_v48  ;;  %v4915_v44 = vpop.f32.mrf.mxu1  ;;  %v5644_v39 = vrot.slane %v5642_v24, 2  ;;  %v5651_v24 = vshrl.u32 %v13223_v54, 16 }
 0x468   : > { %v4971_v57 = vadd.f32 %v4912_v40, %v4591_v20  ;;  %v5376_v40 = vsel %vm1929_vm3, %v5373_v27, %v5375_v30  ;;  %v5647_v27 = vrot.slane %v5645_v55, 3  ;;  %v5654_v55 = vshll.u32 %v13223_v54, 16 }
 0x469   : > { %10477 = vmatmul.msk.bf16.gmra.mxu1 %vm617_vm0, %v5999_v58  ;;  %v13244_v58 = vld [vmem:[%s12271_s9 + $0x38] sm:$0xff] }
 0x46a   : > { %v5159_v52 = vpop.f32.mrf.mxu2 }
 0x46b   : > { %v13226_v9 = vadd.f32 %v5159_v52, %v4971_v57  ;;  %v5648_v52 = vor.u32 %v5647_v27, %v5644_v39 }
 0x46c   : > { %v4169_v60 = vpop.f32.mrf.mxu3 }
 0x46d   : > { %v4535_v31 = vpop.f32.mrf.mxu0  ;;  %v4222_v48 = vadd.f32 %v4169_v60, %v12819_v15  ;;  %v11200_v60 = vld [vmem:[%s13201_s14 + $0x10] sm:$0xff] }
 0x46e   : > { %v4592_v10 = vadd.f32 %v4535_v31, %v4219_v45  ;;  %v4917_v32 = vpop.f32.mrf.mxu1  ;;  %v5377_v31 = vrot.slane %v13244_v58, 2 }
 0x46f   : > { %10579 = vmatmul.msk.bf16.gmra.mxu2 %vm617_vm0, %v11199_v14 }
 0x470   : > { %10447 = vmatmul.msk.bf16.gmra.mxu0 %vm617_vm0, %v5640_v33  ;;  %v4972_v36 = vadd.f32 %v4915_v44, %v4592_v10  ;;  %v6001_v44 = vsel %vm2931_vm6, %v5998_v11, %v6000_v22 }
 0x471   : > { %10419 = vmatmul.msk.bf16.gmra.mxu3 %vm617_vm0, %v5376_v40 }
 0x472   : > { %v5162_v21 = vpop.f32.mrf.mxu2 }
 0x473   : > { %v13239_v15 = vadd.f32 %v5162_v21, %v4972_v36 }
 0x474   : > { %v4172_v45 = vpop.f32.mrf.mxu3 }
 0x475   : > { %v4537_v13 = vpop.f32.mrf.mxu0  ;;  %v4223_v26 = vadd.f32 %v4172_v45, %v12829_v46  ;;  %v5649_v46 = vsel %vm2550_vm5, %v5639_v62, %v5648_v52  ;;  %v6002_v62 = vrot.slane %v13223_v54, 3 }
 0x476   : > { %v4593_v8 = vadd.f32 %v4537_v13, %v4220_v51  ;;  %v4920_v20 = vpop.f32.mrf.mxu1  ;;  %v5653_v13 = vrot.slane %v5651_v24, 2  ;;  %v5660_v24 = vshrl.u32 %v13244_v58, 16 }
 0x478   : > { %v4973_v57 = vadd.f32 %v4917_v32, %v4593_v8  ;;  %v5378_v32 = vsel %vm1929_vm3, %v5375_v30, %v5377_v31  ;;  %v5656_v30 = vrot.slane %v5654_v55, 3  ;;  %v5663_v55 = vshll.u32 %v13244_v58, 16 }
 0x479   : > { %10478 = vmatmul.msk.bf16.gmra.mxu1 %vm617_vm0, %v6001_v44  ;;  %v13265_v44 = vld [vmem:[%s12271_s9 + $0x40] sm:$0xff] }
 0x47a   : > { %v5164_v59 = vpop.f32.mrf.mxu2 }
 0x47b   : > { %v13247_v14 = vadd.f32 %v5164_v59, %v4973_v57  ;;  %v5657_v59 = vor.u32 %v5656_v30, %v5653_v13 }
 0x47c   : > { %v4174_v33 = vpop.f32.mrf.mxu3 }
 0x47d   : > { %v4540_v10 = vpop.f32.mrf.mxu0  ;;  %v4224_v51 = vadd.f32 %v4174_v33, %v12841_v12  ;;  %v11201_v33 = vld [vmem:[%s13201_s14 + $0x18] sm:$0xff] }
 0x47e   : > { %v4594_v40 = vadd.f32 %v4540_v10, %v4221_v5  ;;  %v4922_v11 = vpop.f32.mrf.mxu1  ;;  %v5379_v10 = vrot.slane %v13265_v44, 2 }
 0x47f   : > { %10580 = vmatmul.msk.bf16.gmra.mxu2 %vm617_vm0, %v11200_v60 }
 0x480   : > { %10448 = vmatmul.msk.bf16.gmra.mxu0 %vm617_vm0, %v5649_v46  ;;  %v4974_v36 = vadd.f32 %v4920_v20, %v4594_v40  ;;  %v6003_v20 = vsel %vm2931_vm6, %v6000_v22, %v6002_v62 }
 0x481   : > { %10420 = vmatmul.msk.bf16.gmra.mxu3 %vm617_vm0, %v5378_v32 }
 0x482   : > { %v5167_v21 = vpop.f32.mrf.mxu2 }
 0x483   : > { %v13260_v12 = vadd.f32 %v5167_v21, %v4974_v36 }
 0x484   : > { %v4177_v5 = vpop.f32.mrf.mxu3 }
 0x485   : > { %v4542_v45 = vpop.f32.mrf.mxu0  ;;  %v4225_v39 = vadd.f32 %v4177_v5, %v12851_v2  ;;  %v5658_v2 = vsel %vm2550_vm5, %v5648_v52, %v5657_v59  ;;  %v6004_v52 = vrot.slane %v13244_v58, 3 }
 0x486   : > { %v4595_v27 = vadd.f32 %v4542_v45, %v4222_v48  ;;  %v4925_v8 = vpop.f32.mrf.mxu1  ;;  %v5662_v45 = vrot.slane %v5660_v24, 2  ;;  %v5669_v24 = vshrl.u32 %v13265_v44, 16 }
 0x488   : > { %v4975_v57 = vadd.f32 %v4922_v11, %v4595_v27  ;;  %v5380_v11 = vsel %vm1929_vm3, %v5377_v31, %v5379_v10  ;;  %v5665_v31 = vrot.slane %v5663_v55, 3  ;;  %v5672_v55 = vshll.u32 %v13265_v44, 16 }
 0x489   : > { %10479 = vmatmul.msk.bf16.gmra.mxu1 %vm617_vm0, %v6003_v20  ;;  %v13286_v20 = vld [vmem:[%s12271_s9 + $0x48] sm:$0xff] }
 0x48a   : > { %v5169_v54 = vpop.f32.mrf.mxu2 }
 0x48b   : > { %v13268_v60 = vadd.f32 %v5169_v54, %v4975_v57  ;;  %v5666_v54 = vor.u32 %v5665_v31, %v5662_v45 }
 0x48c   : > { %v4179_v46 = vpop.f32.mrf.mxu3 }
 0x48d   : > { %v4545_v40 = vpop.f32.mrf.mxu0  ;;  %v4226_v48 = vadd.f32 %v4179_v46, %v12863_v47  ;;  %v11202_v46 = vld [vmem:[%s13201_s14 + $0x20] sm:$0xff] }
 0x48e   : > { %v4596_v32 = vadd.f32 %v4545_v40, %v4223_v26  ;;  %v4927_v22 = vpop.f32.mrf.mxu1  ;;  %v5381_v40 = vrot.slane %v13286_v20, 2 }
 0x48f   : > { %10581 = vmatmul.msk.bf16.gmra.mxu2 %vm617_vm0, %v11201_v33 }
 0x490   : > { %10449 = vmatmul.msk.bf16.gmra.mxu0 %vm617_vm0, %v5658_v2  ;;  %v4976_v36 = vadd.f32 %v4925_v8, %v4596_v32  ;;  %v6005_v8 = vsel %vm2931_vm6, %v6002_v62, %v6004_v52 }
 0x491   : > { %10421 = vmatmul.msk.bf16.gmra.mxu3 %vm617_vm0, %v5380_v11 }
 0x492   : > { %v5172_v21 = vpop.f32.mrf.mxu2 }
 0x493   : > { %v13281_v47 = vadd.f32 %v5172_v21, %v4976_v36 }
 0x494   : > { %v4182_v26 = vpop.f32.mrf.mxu3 }
 0x495   : > { %v4547_v5 = vpop.f32.mrf.mxu0  ;;  %v4227_v13 = vadd.f32 %v4182_v26, %v12873_v56  ;;  %v5667_v56 = vsel %vm2550_vm5, %v5657_v59, %v5666_v54  ;;  %v6006_v59 = vrot.slane %v13265_v44, 3 }
 0x496   : > { %v4597_v30 = vadd.f32 %v4547_v5, %v4224_v51  ;;  %v4930_v27 = vpop.f32.mrf.mxu1  ;;  %v5671_v5 = vrot.slane %v5669_v24, 2  ;;  %v5678_v24 = vshrl.u32 %v13286_v20, 16 }
 0x498   : > { %v4977_v57 = vadd.f32 %v4927_v22, %v4597_v30  ;;  %v5382_v22 = vsel %vm1929_vm3, %v5379_v10, %v5381_v40  ;;  %v5674_v10 = vrot.slane %v5672_v55, 3  ;;  %v5681_v55 = vshll.u32 %v13286_v20, 16 }
 0x499   : > { %10480 = vmatmul.msk.bf16.gmra.mxu1 %vm617_vm0, %v6005_v8  ;;  %v13307_v8 = vld [vmem:[%s12271_s9 + $0x50] sm:$0xff] }
 0x49a   : > { %v5174_v58 = vpop.f32.mrf.mxu2 }
 0x49b   : > { %v13289_v33 = vadd.f32 %v5174_v58, %v4977_v57  ;;  %v5675_v58 = vor.u32 %v5674_v10, %v5671_v5 }
 0x49c   : > { %v4184_v2 = vpop.f32.mrf.mxu3 }
 0x49d   : > { %v4550_v32 = vpop.f32.mrf.mxu0  ;;  %v4228_v51 = vadd.f32 %v4184_v2, %v12885_v4  ;;  %v11203_v2 = vld [vmem:[%s13201_s14 + $0x28] sm:$0xff] }
 0x49e   : > { %v4598_v11 = vadd.f32 %v4550_v32, %v4225_v39  ;;  %v4932_v62 = vpop.f32.mrf.mxu1  ;;  %v5383_v32 = vrot.slane %v13307_v8, 2 }
 0x49f   : > { %10582 = vmatmul.msk.bf16.gmra.mxu2 %vm617_vm0, %v11202_v46 }
 0x4a0   : > { %10450 = vmatmul.msk.bf16.gmra.mxu0 %vm617_vm0, %v5667_v56  ;;  %v4978_v36 = vadd.f32 %v4930_v27, %v4598_v11  ;;  %v6007_v27 = vsel %vm2931_vm6, %v6004_v52, %v6006_v59 }
 0x4a1   : > { %10422 = vmatmul.msk.bf16.gmra.mxu3 %vm617_vm0, %v5382_v22 }
 0x4a2   : > { %v5177_v21 = vpop.f32.mrf.mxu2 }
 0x4a3   : > { %v13302_v4 = vadd.f32 %v5177_v21, %v4978_v36 }
 0x4a4   : > { %v4187_v39 = vpop.f32.mrf.mxu3 }
 0x4a5   : > { %v4552_v26 = vpop.f32.mrf.mxu0  ;;  %v4229_v45 = vadd.f32 %v4187_v39, %v12895_v37  ;;  %v5676_v37 = vsel %vm2550_vm5, %v5666_v54, %v5675_v58  ;;  %v6008_v54 = vrot.slane %v13286_v20, 3 }
 0x4a6   : > { %v4599_v31 = vadd.f32 %v4552_v26, %v4226_v48  ;;  %v4935_v30 = vpop.f32.mrf.mxu1  ;;  %v5680_v26 = vrot.slane %v5678_v24, 2  ;;  %v5687_v24 = vshrl.u32 %v13307_v8, 16 }
 0x4a8   : > { %v4979_v57 = vadd.f32 %v4932_v62, %v4599_v31  ;;  %v5384_v62 = vsel %vm1929_vm3, %v5381_v40, %v5383_v32  ;;  %v5683_v40 = vrot.slane %v5681_v55, 3  ;;  %v5690_v55 = vshll.u32 %v13307_v8, 16 }
 0x4a9   : > { %10481 = vmatmul.msk.bf16.gmra.mxu1 %vm617_vm0, %v6007_v27  ;;  %v13328_v27 = vld [vmem:[%s12271_s9 + $0x58] sm:$0xff] }
 0x4aa   : > { %v5179_v44 = vpop.f32.mrf.mxu2 }
 0x4ab   : > { %v13310_v46 = vadd.f32 %v5179_v44, %v4979_v57  ;;  %v5684_v44 = vor.u32 %v5683_v40, %v5680_v26 }
 0x4ac   : > { %v4189_v56 = vpop.f32.mrf.mxu3 }
 0x4ad   : > { %v4555_v11 = vpop.f32.mrf.mxu0  ;;  %v4230_v48 = vadd.f32 %v4189_v56, %v12910_v28  ;;  %v11204_v56 = vld [vmem:[%s13201_s14 + $0x30] sm:$0xff] }
 0x4ae   : > { %v4600_v22 = vadd.f32 %v4555_v11, %v4227_v13  ;;  %v4937_v52 = vpop.f32.mrf.mxu1  ;;  %v5385_v11 = vrot.slane %v13328_v27, 2 }
 0x4af   : > { %10583 = vmatmul.msk.bf16.gmra.mxu2 %vm617_vm0, %v11203_v2 }
 0x4b0   : > { %10451 = vmatmul.msk.bf16.gmra.mxu0 %vm617_vm0, %v5676_v37  ;;  %v4980_v36 = vadd.f32 %v4935_v30, %v4600_v22  ;;  %v6009_v30 = vsel %vm2931_vm6, %v6006_v59, %v6008_v54 }
 0x4b1   : > { %10423 = vmatmul.msk.bf16.gmra.mxu3 %vm617_vm0, %v5384_v62 }
 0x4b2   : > { %v5182_v21 = vpop.f32.mrf.mxu2 }
 0x4b3   : > { %v13323_v28 = vadd.f32 %v5182_v21, %v4980_v36 }
 0x4b4   : > { %v4192_v13 = vpop.f32.mrf.mxu3 }
 0x4b5   : > { %v4557_v39 = vpop.f32.mrf.mxu0  ;;  %v4231_v5 = vadd.f32 %v4192_v13, %v12926_v19  ;;  %v5685_v19 = vsel %vm2550_vm5, %v5675_v58, %v5684_v44  ;;  %v6010_v58 = vrot.slane %v13307_v8, 3 }
 0x4b6   : > { %v4601_v10 = vadd.f32 %v4557_v39, %v4228_v51  ;;  %v4940_v31 = vpop.f32.mrf.mxu1  ;;  %v5689_v39 = vrot.slane %v5687_v24, 2  ;;  %v11258_v24 = vld [vmem:[%s14543_s3 + $0x160] sm:$0xff] }
 0x4b7   : > { %7921 = vmatpush.bf16.msrb.mxu2 %v11258_v24 }
 0x4b8   : > { %v4981_v57 = vadd.f32 %v4937_v52, %v4601_v10  ;;  %v5386_v52 = vsel %vm1929_vm3, %v5383_v32, %v5385_v11  ;;  %v5692_v32 = vrot.slane %v5690_v55, 3 }
 0x4b9   : > { %10482 = vmatmul.msk.bf16.gmra.mxu1 %vm617_vm0, %v6009_v30  ;;  %v11235_v30 = vld [vmem:[%s14543_s3 + $0x130] sm:$0xff] }
 0x4ba   : > { %v5184_v20 = vpop.f32.mrf.mxu2  ;;  %6921 = vmatpush.bf16.msrb.mxu3 %v11235_v30 }
 0x4bb   : > { %v13331_v2 = vadd.f32 %v5184_v20, %v4981_v57  ;;  %v13352_v57 = vld [vmem:[%s12271_s9 + $0x60] sm:$0xff]  ;;  %v5693_v20 = vor.u32 %v5692_v32, %v5689_v39 }
 0x4bc   : > { %v4194_v37 = vpop.f32.mrf.mxu3 }
 0x4bd   : > { %v4560_v22 = vpop.f32.mrf.mxu0  ;;  %v4232_v51 = vadd.f32 %v4194_v37, %v12941_v7 }
 0x4be   : > { %v4602_v62 = vadd.f32 %v4560_v22, %v4229_v45  ;;  %v4942_v59 = vpop.f32.mrf.mxu1 }
 0x4bf   : > { %10584 = vmatmul.msk.bf16.gmra.mxu2 %vm617_vm0, %v11204_v56 }
 0x4c0   : > { %10452 = vmatmul.msk.bf16.gmra.mxu0 %vm617_vm0, %v5685_v19  ;;  %v4982_v36 = vadd.f32 %v4940_v31, %v4602_v62  ;;  %v6011_v31 = vsel %vm2931_vm6, %v6008_v54, %v6010_v58  ;;  %v5694_v54 = vsel %vm2550_vm5, %v5684_v44, %v5693_v20 }
 0x4c1   : > { %10424 = vmatmul.msk.bf16.gmra.mxu3 %vm617_vm0, %v5386_v52 }
 0x4c2   : > { %v5187_v21 = vpop.f32.mrf.mxu2 }
 0x4c3   : > { %v13344_v7 = vadd.f32 %v5187_v21, %v4982_v36  ;;  %v11237_v21 = vld [vmem:[%s14543_s3 + $0x140] sm:$0xff] }
 0x4c4   : > { %v5480_v13 = vpop.f32.mrf.mxu3  ;;  %7168 = vmatpush.bf16.msrb.mxu0 %v11237_v21 }
 0x4c5   : > { %v4562_v45 = vpop.f32.mrf.mxu0  ;;  %v5570_v40 = vadd.f32 %v5480_v13, %v12951_v41  ;;  %v5387_v41 = vrot.slane %v13352_v57, 2  ;;  %v11256_v13 = vld [vmem:[%s14543_s3 + $0x150] sm:$0xff] }
 0x4c6   : > { %v4603_v26 = vadd.f32 %v4562_v45, %v4230_v48  ;;  %v4945_v10 = vpop.f32.mrf.mxu1  ;;  %v11205_v48 = vld [vmem:[%s13201_s14 + $0x38] sm:$0xff]  ;;  %7541 = vmatpush.bf16.msrb.mxu1 %v11256_v13 }
 0x4c8   : > { %v4983_v8 = vadd.f32 %v4942_v59, %v4603_v26  ;;  %v5388_v59 = vsel %vm1929_vm3, %v5385_v11, %v5387_v41  ;;  %v6012_v11 = vrot.slane %v13328_v27, 3 }
 0x4c9   : > { %10483 = vmatmul.msk.bf16.gmra.mxu1 %vm617_vm0, %v6011_v31 }
 0x4ca   : > { %v5189_v56 = vpop.f32.mrf.mxu2 }
 0x4cb   : > { %v13355_v37 = vadd.f32 %v5189_v56, %v4983_v8  ;;  %v6013_v56 = vsel %vm2931_vm6, %v6010_v58, %v6012_v11 }
 0x4cc   : > { %v5482_v19 = vpop.f32.mrf.mxu3 }
 0x4cd   : > { %v4565_v22 = vpop.f32.mrf.mxu0  ;;  %v5571_v52 = vadd.f32 %v5482_v19, %v12963_v63  ;;  %v5699_v63 = vshll.u32 %v13328_v27, 16 }
 0x4ce   : > { %v4604_v62 = vadd.f32 %v4565_v22, %v4231_v5  ;;  %v4947_v36 = vpop.f32.mrf.mxu1  ;;  %v5696_v5 = vshrl.u32 %v13328_v27, 16  ;;  %v13382_v27 = vld [vmem:[%s12271_s9 + $0x68] sm:$0xff] }
 0x4cf   : > { %10585 = vmatmul.msk.bf16.gmra.mxu2 %vm617_vm0, %v11205_v48 }
 0x4d0   : > { %10453 = vmatmul.msk.bf16.gmra.mxu0 %vm617_vm0, %v5694_v54  ;;  %v4984_v55 = vadd.f32 %v4945_v10, %v4604_v62  ;;  %v5698_v26 = vrot.slane %v5696_v5, 2  ;;  %v5701_v10 = vrot.slane %v5699_v63, 3  ;;  %v11206_v62 = vld [vmem:[%s13201_s14 + $0x40] sm:$0xff]  ;;  %v5705_v63 = vshrl.u32 %v13352_v57, 16 }
 0x4d1   : > { %10425 = vmatmul.msk.bf16.gmra.mxu3 %vm617_vm0, %v5388_v59  ;;  %v5389_v59 = vrot.slane %v13382_v27, 2 }
 0x4d2   : > { %v5192_v44 = vpop.f32.mrf.mxu2  ;;  %v5702_v22 = vor.u32 %v5701_v10, %v5698_v26 }
 0x4d3   : > { %v13374_v45 = vadd.f32 %v5192_v44, %v4984_v55  ;;  %v5708_v44 = vshll.u32 %v13352_v57, 16 }
 0x4d4   : > { %v5485_v32 = vpop.f32.mrf.mxu3 }
 0x4d5   : > { %v4567_v39 = vpop.f32.mrf.mxu0  ;;  %v5572_v30 = vadd.f32 %v5485_v32, %v12973_v6  ;;  %v5707_v32 = vrot.slane %v5705_v63, 2  ;;  %v5714_v63 = vshrl.u32 %v13382_v27, 16 }
 0x4d6   : > { %v4605_v31 = vadd.f32 %v4567_v39, %v4232_v51  ;;  %v6107_v8 = vpop.f32.mrf.mxu1  ;;  %v5703_v51 = vsel %vm2550_vm5, %v5693_v20, %v5702_v22  ;;  %v6014_v20 = vrot.slane %v13352_v57, 3 }
 0x4d8   : > { %v4985_v48 = vadd.f32 %v4947_v36, %v4605_v31  ;;  %v5390_v36 = vsel %vm1929_vm3, %v5387_v41, %v5389_v59  ;;  %v5710_v41 = vrot.slane %v5708_v44, 3  ;;  %v5717_v44 = vshll.u32 %v13382_v27, 16 }
 0x4d9   : > { %10484 = vmatmul.msk.bf16.gmra.mxu1 %vm617_vm0, %v6013_v56  ;;  %v13403_v56 = vld [vmem:[%s12271_s9 + $0x70] sm:$0xff] }
 0x4da   : > { %v5194_v19 = vpop.f32.mrf.mxu2 }
 0x4db   : > { %v13385_v54 = vadd.f32 %v5194_v19, %v4985_v48  ;;  %v5711_v19 = vor.u32 %v5710_v41, %v5707_v32 }
 0x4dc   : > { %v5487_v24 = vpop.f32.mrf.mxu3 }
 0x4dd   : > { %v5860_v55 = vpop.f32.mrf.mxu0  ;;  %v5573_v6 = vadd.f32 %v5487_v24, %v12985_v25  ;;  %v11207_v24 = vld [vmem:[%s13201_s14 + $0x48] sm:$0xff] }
 0x4de   : > { %v5950_v21 = vadd.f32 %v5860_v55, %v5570_v40  ;;  %v6109_v58 = vpop.f32.mrf.mxu1  ;;  %v5391_v55 = vrot.slane %v13403_v56, 2 }
 0x4df   : > { %10586 = vmatmul.msk.bf16.gmra.mxu2 %vm617_vm0, %v11206_v62 }
 0x4e0   : > { %10454 = vmatmul.msk.bf16.gmra.mxu0 %vm617_vm0, %v5703_v51  ;;  %v6197_v5 = vadd.f32 %v6107_v8, %v5950_v21  ;;  %v6015_v8 = vsel %vm2931_vm6, %v6012_v11, %v6014_v20 }
 0x4e1   : > { %10426 = vmatmul.msk.bf16.gmra.mxu3 %vm617_vm0, %v5390_v36 }
 0x4e2   : > { %v6439_v13 = vpop.f32.mrf.mxu2 }
 0x4e3   : > { %v13398_v25 = vadd.f32 %v6439_v13, %v6197_v5 }
 0x4e4   : > { %v5490_v40 = vpop.f32.mrf.mxu3 }
 0x4e5   : > { %v5862_v39 = vpop.f32.mrf.mxu0  ;;  %v5574_v26 = vadd.f32 %v5490_v40, %v12995_v53  ;;  %v5712_v53 = vsel %vm2550_vm5, %v5702_v22, %v5711_v19  ;;  %v6016_v22 = vrot.slane %v13382_v27, 3 }
 0x4e6   : > { %v5951_v10 = vadd.f32 %v5862_v39, %v5571_v52  ;;  %v6112_v31 = vpop.f32.mrf.mxu1  ;;  %v5716_v39 = vrot.slane %v5714_v63, 2  ;;  %v5723_v63 = vshrl.u32 %v13403_v56, 16 }
 0x4e8   : > { %v6198_v48 = vadd.f32 %v6109_v58, %v5951_v10  ;;  %v5392_v58 = vsel %vm1929_vm3, %v5389_v59, %v5391_v55  ;;  %v5719_v59 = vrot.slane %v5717_v44, 3  ;;  %v5726_v44 = vshll.u32 %v13403_v56, 16 }
 0x4e9   : > { %10485 = vmatmul.msk.bf16.gmra.mxu1 %vm617_vm0, %v6015_v8  ;;  %v13424_v8 = vld [vmem:[%s12271_s9 + $0x78] sm:$0xff] }
 0x4ea   : > { %v6441_v57 = vpop.f32.mrf.mxu2 }
 0x4eb   : > { %v13406_v62 = vadd.f32 %v6441_v57, %v6198_v48  ;;  %v5720_v57 = vor.u32 %v5719_v59, %v5716_v39 }
 0x4ec   : > { %v5492_v51 = vpop.f32.mrf.mxu3 }
 0x4ed   : > { %v5865_v21 = vpop.f32.mrf.mxu0  ;;  %v5575_v52 = vadd.f32 %v5492_v51, %v13007_v50  ;;  %v11208_v51 = vld [vmem:[%s13201_s14 + $0x50] sm:$0xff] }
 0x4ee   : > { %v5952_v36 = vadd.f32 %v5865_v21, %v5572_v30  ;;  %v6114_v11 = vpop.f32.mrf.mxu1  ;;  %v5393_v21 = vrot.slane %v13424_v8, 2 }
 0x4ef   : > { %10587 = vmatmul.msk.bf16.gmra.mxu2 %vm617_vm0, %v11207_v24 }
 0x4f0   : > { %10455 = vmatmul.msk.bf16.gmra.mxu0 %vm617_vm0, %v5712_v53  ;;  %v6199_v5 = vadd.f32 %v6112_v31, %v5952_v36  ;;  %v6017_v31 = vsel %vm2931_vm6, %v6014_v20, %v6016_v22 }
 0x4f1   : > { %10427 = vmatmul.msk.bf16.gmra.mxu3 %vm617_vm0, %v5392_v58 }
 0x4f2   : > { %v6444_v13 = vpop.f32.mrf.mxu2 }
 0x4f3   : > { %v13419_v50 = vadd.f32 %v6444_v13, %v6199_v5 }
 0x4f4   : > { %v5495_v30 = vpop.f32.mrf.mxu3 }
 0x4f5   : > { %v5867_v40 = vpop.f32.mrf.mxu0  ;;  %v5576_v32 = vadd.f32 %v5495_v30, %v13017_v18  ;;  %v5721_v18 = vsel %vm2550_vm5, %v5711_v19, %v5720_v57  ;;  %v6018_v19 = vrot.slane %v13403_v56, 3 }
 0x4f6   : > { %v5953_v41 = vadd.f32 %v5867_v40, %v5573_v6  ;;  %v6117_v10 = vpop.f32.mrf.mxu1  ;;  %v5725_v40 = vrot.slane %v5723_v63, 2  ;;  %v5732_v63 = vshrl.u32 %v13424_v8, 16 }
 0x4f8   : > { %v6200_v48 = vadd.f32 %v6114_v11, %v5953_v41  ;;  %v5394_v11 = vsel %vm1929_vm3, %v5391_v55, %v5393_v21  ;;  %v5728_v55 = vrot.slane %v5726_v44, 3  ;;  %v5735_v44 = vshll.u32 %v13424_v8, 16 }
 0x4f9   : > { %10486 = vmatmul.msk.bf16.gmra.mxu1 %vm617_vm0, %v6017_v31  ;;  %v13445_v31 = vld [vmem:[%s12271_s9 + $0x80] sm:$0xff] }
 0x4fa   : > { %v6446_v27 = vpop.f32.mrf.mxu2 }
 0x4fb   : > { %v13427_v24 = vadd.f32 %v6446_v27, %v6200_v48  ;;  %v5729_v27 = vor.u32 %v5728_v55, %v5725_v40 }
 0x4fc   : > { %v5497_v53 = vpop.f32.mrf.mxu3 }
 0x4fd   : > { %v5870_v36 = vpop.f32.mrf.mxu0  ;;  %v5577_v6 = vadd.f32 %v5497_v53, %v13029_v42  ;;  %v11209_v53 = vld [vmem:[%s13201_s14 + $0x58] sm:$0xff] }
 0x4fe   : > { %v5954_v58 = vadd.f32 %v5870_v36, %v5574_v26  ;;  %v6119_v20 = vpop.f32.mrf.mxu1  ;;  %v5395_v36 = vrot.slane %v13445_v31, 2 }
 0x4ff   : > { %10588 = vmatmul.msk.bf16.gmra.mxu2 %vm617_vm0, %v11208_v51 }
 0x500   : > { %10456 = vmatmul.msk.bf16.gmra.mxu0 %vm617_vm0, %v5721_v18  ;;  %v6201_v5 = vadd.f32 %v6117_v10, %v5954_v58  ;;  %v6019_v10 = vsel %vm2931_vm6, %v6016_v22, %v6018_v19 }
 0x501   : > { %10428 = vmatmul.msk.bf16.gmra.mxu3 %vm617_vm0, %v5394_v11 }
 0x502   : > { %v6449_v13 = vpop.f32.mrf.mxu2 }
 0x503   : > { %v13440_v42 = vadd.f32 %v6449_v13, %v6201_v5 }
 0x504   : > { %v5500_v26 = vpop.f32.mrf.mxu3 }
 0x505   : > { %v5872_v30 = vpop.f32.mrf.mxu0  ;;  %v5578_v39 = vadd.f32 %v5500_v26, %v13039_v38  ;;  %v5730_v38 = vsel %vm2550_vm5, %v5720_v57, %v5729_v27  ;;  %v6020_v57 = vrot.slane %v13424_v8, 3 }
 0x506   : > { %v5955_v59 = vadd.f32 %v5872_v30, %v5575_v52  ;;  %v6122_v41 = vpop.f32.mrf.mxu1  ;;  %v5734_v30 = vrot.slane %v5732_v63, 2  ;;  %v5741_v63 = vshrl.u32 %v13445_v31, 16 }
 0x508   : > { %v6202_v48 = vadd.f32 %v6119_v20, %v5955_v59  ;;  %v5396_v20 = vsel %vm1929_vm3, %v5393_v21, %v5395_v36  ;;  %v5737_v21 = vrot.slane %v5735_v44, 3  ;;  %v5744_v44 = vshll.u32 %v13445_v31, 16 }
 0x509   : > { %10487 = vmatmul.msk.bf16.gmra.mxu1 %vm617_vm0, %v6019_v10  ;;  %v13466_v10 = vld [vmem:[%s12271_s9 + $0x88] sm:$0xff] }
 0x50a   : > { %v6451_v56 = vpop.f32.mrf.mxu2 }
 0x50b   : > { %v13448_v51 = vadd.f32 %v6451_v56, %v6202_v48  ;;  %v5738_v56 = vor.u32 %v5737_v21, %v5734_v30 }
 0x50c   : > { %v5502_v18 = vpop.f32.mrf.mxu3 }
 0x50d   : > { %v5875_v58 = vpop.f32.mrf.mxu0  ;;  %v5579_v52 = vadd.f32 %v5502_v18, %v13051_v0  ;;  %v11210_v18 = vld [vmem:[%s13201_s14 + $0x60] sm:$0xff] }
 0x50e   : > { %v5956_v11 = vadd.f32 %v5875_v58, %v5576_v32  ;;  %v6124_v22 = vpop.f32.mrf.mxu1  ;;  %v5397_v58 = vrot.slane %v13466_v10, 2 }
 0x50f   : > { %10589 = vmatmul.msk.bf16.gmra.mxu2 %vm617_vm0, %v11209_v53 }
 0x510   : > { %10457 = vmatmul.msk.bf16.gmra.mxu0 %vm617_vm0, %v5730_v38  ;;  %v6203_v5 = vadd.f32 %v6122_v41, %v5956_v11  ;;  %v6021_v41 = vsel %vm2931_vm6, %v6018_v19, %v6020_v57 }
 0x511   : > { %10429 = vmatmul.msk.bf16.gmra.mxu3 %vm617_vm0, %v5396_v20 }
 0x512   : > { %v6454_v13 = vpop.f32.mrf.mxu2 }
 0x513   : > { %v13461_v0 = vadd.f32 %v6454_v13, %v6203_v5 }
 0x514   : > { %v5505_v32 = vpop.f32.mrf.mxu3 }
 0x515   : > { %v5877_v26 = vpop.f32.mrf.mxu0  ;;  %v5580_v40 = vadd.f32 %v5505_v32, %v13061_v1  ;;  %v5739_v1 = vsel %vm2550_vm5, %v5729_v27, %v5738_v56  ;;  %v6022_v27 = vrot.slane %v13445_v31, 3 }
 0x516   : > { %v5957_v55 = vadd.f32 %v5877_v26, %v5577_v6  ;;  %v6127_v59 = vpop.f32.mrf.mxu1  ;;  %v5743_v26 = vrot.slane %v5741_v63, 2  ;;  %v5750_v63 = vshrl.u32 %v13466_v10, 16 }
 0x518   : > { %v6204_v48 = vadd.f32 %v6124_v22, %v5957_v55  ;;  %v5398_v22 = vsel %vm1929_vm3, %v5395_v36, %v5397_v58  ;;  %v5746_v36 = vrot.slane %v5744_v44, 3  ;;  %v5753_v44 = vshll.u32 %v13466_v10, 16 }
 0x519   : > { %10488 = vmatmul.msk.bf16.gmra.mxu1 %vm617_vm0, %v6021_v41  ;;  %v13487_v41 = vld [vmem:[%s12271_s9 + $0x90] sm:$0xff] }
 0x51a   : > { %v6456_v8 = vpop.f32.mrf.mxu2 }
 0x51b   : > { %v13469_v53 = vadd.f32 %v6456_v8, %v6204_v48  ;;  %v5747_v8 = vor.u32 %v5746_v36, %v5743_v26 }
 0x51c   : > { %v5507_v38 = vpop.f32.mrf.mxu3 }
 0x51d   : > { %v5880_v11 = vpop.f32.mrf.mxu0  ;;  %v5581_v6 = vadd.f32 %v5507_v38, %v13073_v34  ;;  %v11211_v38 = vld [vmem:[%s13201_s14 + $0x68] sm:$0xff] }
 0x51e   : > { %v5958_v20 = vadd.f32 %v5880_v11, %v5578_v39  ;;  %v6129_v19 = vpop.f32.mrf.mxu1  ;;  %v5399_v11 = vrot.slane %v13487_v41, 2 }
 0x51f   : > { %10590 = vmatmul.msk.bf16.gmra.mxu2 %vm617_vm0, %v11210_v18 }
 0x520   : > { %10458 = vmatmul.msk.bf16.gmra.mxu0 %vm617_vm0, %v5739_v1  ;;  %v6205_v5 = vadd.f32 %v6127_v59, %v5958_v20  ;;  %v6023_v59 = vsel %vm2931_vm6, %v6020_v57, %v6022_v27 }
 0x521   : > { %10430 = vmatmul.msk.bf16.gmra.mxu3 %vm617_vm0, %v5398_v22 }
 0x522   : > { %v6459_v13 = vpop.f32.mrf.mxu2 }
 0x523   : > { %v13482_v34 = vadd.f32 %v6459_v13, %v6205_v5 }
 0x524   : > { %v5510_v39 = vpop.f32.mrf.mxu3 }
 0x525   : > { %v5882_v32 = vpop.f32.mrf.mxu0  ;;  %v5582_v30 = vadd.f32 %v5510_v39, %v13083_v3  ;;  %v5748_v3 = vsel %vm2550_vm5, %v5738_v56, %v5747_v8  ;;  %v6024_v56 = vrot.slane %v13466_v10, 3 }
 0x526   : > { %v5959_v21 = vadd.f32 %v5882_v32, %v5579_v52  ;;  %v6132_v55 = vpop.f32.mrf.mxu1  ;;  %v5752_v32 = vrot.slane %v5750_v63, 2  ;;  %v5269_v63 = vld [vmem:[%s12271_s9 + $0xa0] sm:$0x3] }
 0x528   : > { %v6206_v48 = vadd.f32 %v6129_v19, %v5959_v21  ;;  %v5400_v19 = vsel %vm1929_vm3, %v5397_v58, %v5399_v11  ;;  %v5755_v58 = vrot.slane %v5753_v44, 3  ;;  %v5759_v44 = vshrl.u32 %v13487_v41, 16 }
 0x529   : > { %10489 = vmatmul.msk.bf16.gmra.mxu1 %vm617_vm0, %v6023_v59  ;;  %v13508_v59 = vld [vmem:[%s12271_s9 + $0x98] sm:$0xff] }
 0x52a   : > { %v6461_v31 = vpop.f32.mrf.mxu2  ;;  %v5756_v10 = vor.u32 %v5755_v58, %v5752_v32 }
 0x52b   : > { %v13490_v18 = vadd.f32 %v6461_v31, %v6206_v48 }
 0x52c   : > { %v5512_v1 = vpop.f32.mrf.mxu3 }
 0x52d   : > { %v5885_v20 = vpop.f32.mrf.mxu0  ;;  %v5583_v52 = vadd.f32 %v5512_v1, %v13097_v43  ;;  %v11212_v1 = vld [vmem:[%s13201_s14 + $0x70] sm:$0xff] }
 0x52e   : > { %v5960_v22 = vadd.f32 %v5885_v20, %v5580_v40  ;;  %v6134_v57 = vpop.f32.mrf.mxu1  ;;  %v5401_v20 = vrot.slane %v13508_v59, 2 }
 0x52f   : > { %10591 = vmatmul.msk.bf16.gmra.mxu2 %vm617_vm0, %v11211_v38 }
 0x530   : > { %10459 = vmatmul.msk.bf16.gmra.mxu0 %vm617_vm0, %v5748_v3  ;;  %v6207_v5 = vadd.f32 %v6132_v55, %v5960_v22  ;;  %v6025_v55 = vsel %vm2931_vm6, %v6022_v27, %v6024_v56 }
 0x531   : > { %10431 = vmatmul.msk.bf16.gmra.mxu3 %vm617_vm0, %v5400_v19 }
 0x532   : > { %v6464_v13 = vpop.f32.mrf.mxu2 }
 0x533   : > { %v13503_v43 = vadd.f32 %v6464_v13, %v6207_v5  ;;  %v5762_v13 = vshll.u32 %v13487_v41, 16 }
 0x534   : > { %v5515_v40 = vpop.f32.mrf.mxu3 }
 0x535   : > { %v5887_v39 = vpop.f32.mrf.mxu0  ;;  %v5584_v26 = vadd.f32 %v5515_v40, %v13114_v17  ;;  %v5757_v17 = vsel %vm2550_vm5, %v5747_v8, %v5756_v10  ;;  %v6026_v8 = vrot.slane %v13487_v41, 3  ;;  %v5764_v58 = vrot.slane %v5762_v13, 3  ;;  %v11294_v13 = vld [vmem:[%s13201_s14] sm:$0xff]  }
 0x536   : > { %v5961_v36 = vadd.f32 %v5887_v39, %v5581_v6  ;;  %v6137_v21 = vpop.f32.mrf.mxu1 }
 0x538   : > { %v6208_v48 = vadd.f32 %v6134_v57, %v5961_v36  ;;  %v5402_v57 = vsel %vm1929_vm3, %v5399_v11, %v5401_v20  ;;  %v5761_v11 = vrot.slane %v5759_v44, 2 }
 0x539   : > { %10490 = vmatmul.msk.bf16.gmra.mxu1 %vm617_vm0, %v6025_v55 }
 0x53a   : > { %v6466_v31 = vpop.f32.mrf.mxu2  ;;  %v5765_v41 = vor.u32 %v5764_v58, %v5761_v11 }
 0x53b   : > { %v13511_v38 = vadd.f32 %v6466_v31, %v6208_v48  ;;  %v6027_v48 = vsel %vm2931_vm6, %v6024_v56, %v6026_v8 }
 0x53c   : > { %v5517_v3 = vpop.f32.mrf.mxu3 }
 0x53d   : > { %v5890_v22 = vpop.f32.mrf.mxu0  ;;  %v5585_v6 = vadd.f32 %v5517_v3, %v13134_v49 }
 0x53e   : > { %v5962_v27 = vadd.f32 %v5890_v22, %v5582_v30  ;;  %v6139_v19 = vpop.f32.mrf.mxu1  ;;  %v5348_v30 = vunpack.c.l.b16 %v5269_v63 }
 0x53f   : > { %10592 = vmatmul.msk.bf16.gmra.mxu2 %vm617_vm0, %v11212_v1 }
 0x540   : > { %10460 = vmatmul.msk.bf16.gmra.mxu0 %vm617_vm0, %v5757_v17  ;;  %v6209_v5 = vadd.f32 %v6137_v21, %v5962_v27  ;;  %v5367_v31 = vpack.c.b16 %v5348_v30, %v5348_v30  ;;  %v11213_v17 = vld [vmem:[%s13201_s14 + $0x78] sm:$0xff]  ;;  %v5771_v30 = vshll.u32 %v13508_v59, 16 }
 0x541   : > { %10432 = vmatmul.msk.bf16.gmra.mxu3 %vm617_vm0, %v5402_v57 }
 0x542   : > { %v6469_v40 = vpop.f32.mrf.mxu2  ;;  %v5403_v27 = vrot.slane %v5367_v31, 2 }
 0x543   : > { %v13525_v49 = vadd.f32 %v6469_v40, %v6209_v5  ;;  %v5768_v40 = vshrl.u32 %v13508_v59, 16 }
 0x544   : > { %v5520_v39 = vpop.f32.mrf.mxu3 }
 0x545   : > { %v5892_v32 = vpop.f32.mrf.mxu0  ;;  %v5586_v36 = vadd.f32 %v5520_v39, %v13156_v35  ;;  %v5766_v35 = vsel %vm2550_vm5, %v5756_v10, %v5765_v41  ;;  %v13548_v10 = vld [vmem:[%s13201_s14 + $0x8] sm:$0xff]  ;;  %v5770_v58 = vrot.slane %v5768_v40, 2 }
 0x546   : > { %v5963_v21 = vadd.f32 %v5892_v32, %v5583_v52  ;;  %v6142_v55 = vpop.f32.mrf.mxu1  ;;  %v6703_v32 = vshll.u32 %v11294_v13, 16 }
 0x548   : > { %v6210_v1 = vadd.f32 %v6139_v19, %v5963_v21  ;;  %v5404_v19 = vsel %vm1929_vm3, %v5401_v20, %v5403_v27  ;;  %v5773_v21 = vrot.slane %v5771_v30, 3  ;;  %v6708_v27 = vshll.u32 %v13548_v10, 16 }
 0x549   : > { %10491 = vmatmul.msk.bf16.gmra.mxu1 %vm617_vm0, %v6027_v48 }
 0x54a   : > { %v6471_v3 = vpop.f32.mrf.mxu2 }
 0x54b   : > { %v13530_v22 = vadd.f32 %v6471_v3, %v6210_v1  ;;  %v6701_v3 = vshrl.u32 %v11294_v13, 16 }
 0x54c   : > { %v5522_v57 = vpop.f32.mrf.mxu3 }
 0x54d   : > { %v5895_v5 = vpop.f32.mrf.mxu0  ;;  %v13535_v52 = vadd.f32 %v5522_v57, %v13171_v61  ;;  %v6028_v61 = vrot.slane %v13508_v59, 3  ;;  %v11261_v59 = vld [vmem:[%s14543_s3 + $0x178] sm:$0xff]  ;;  %v5606_v57 = vld [vmem:[%s12271_s9 + $0xa0] sm:$0x7]  ;;  %s14323_s9 = scalar_lea.vmem %s14544_s4, %s9477_s16 }
 0x54e   : > { %v5964_v56 = vadd.f32 %v5895_v5, %v5584_v26  ;;  %v6144_v63 = vpop.f32.mrf.mxu1  ;;  %8167 = vmatpush.bf16.msra.mxu3 %v11261_v59 }
 0x54f   : > { %10593 = vmatmul.msk.bf16.gmra.mxu2 %vm617_vm0, %v11213_v17  ;;  %v6029_v1 = vsel %vm2931_vm6, %v6026_v8, %v6028_v61  ;;  %v6705_v17 = vrot.slane %v6703_v32, 1 }
 0x550   : > { %10461 = vmatmul.msk.bf16.gmra.mxu0 %vm617_vm0, %v5766_v35  ;;  %v6211_v44 = vadd.f32 %v6142_v55, %v5964_v56  ;;  %v5613_v56 = vunpack.c.l.b16 %v5606_v57 }
 0x551   : > { %10433 = vmatmul.msk.bf16.gmra.mxu3 %vm617_vm0, %v5404_v19  ;;  %v11214_v19 = vld [vmem:[%s13201_s14 + $0x80] sm:$0xff]  ;;  %v6706_v8 = vor.u32 %v6705_v17, %v6701_v3  ;;  %v13580_v3 = vld [vmem:[%s13201_s14 + $0x10] sm:$0xff]  ;;  %v7296_v17 = vld [vmem:[%s13201_s14 + $0x8] sm:$0xe] }
 0x552   : > { %v6474_v39 = vpop.f32.mrf.mxu2 }
 0x553   : > { %v13545_v26 = vadd.f32 %v6474_v39, %v6211_v44  ;;  %v6710_v44 = vrot.slane %v6708_v27, 1  ;;  %v13587_v27 = vld [vmem:[%s13201_s14 + $0xc] sm:$0xf] }
 0x554   : > { %v5525_v20 = vpop.f32.mrf.mxu3  ;;  %14558 = vst [vmem:[#allocation3_spill] sm:$0xff] %v13587_v27 }
 0x555   : > { %v5897_v11 = vpop.f32.mrf.mxu0  ;;  %v13551_v55 = vadd.f32 %v5525_v20, %v13190_v16  ;;  %v5774_v16 = vor.u32 %v5773_v21, %v5770_v58  ;;  %v5614_v20 = vpack.c.b16 %v5613_v56, %v5613_v56  ;;  %v11284_v58 = vld [vmem:[%s14543_s3 + $0x1a8] sm:$0xff] }
 0x556   : > { %v5965_v48 = vadd.f32 %v5897_v11, %v5585_v6  ;;  %v6147_v31 = vpop.f32.mrf.mxu1  ;;  %v6711_v11 = vsel %vm456_vm2, %v6706_v8, %v6710_v44  ;;  %9167 = vmatpush.bf16.msra.mxu2 %v11284_v58 }
 0x557   : > { %v5775_v13 = vsel %vm2550_vm5, %v5765_v41, %v5774_v16  ;;  %v5780_v21 = vshll.u32 %v5614_v20, 16 }
 0x558   : > { %v6212_v5 = vadd.f32 %v6144_v63, %v5965_v48 }
 0x559   : > { %10492 = vmatmul.msk.bf16.gmra.mxu1 %vm617_vm0, %v6029_v1  ;;  %v6030_v1 = vrot.slane %v5614_v20, 3  ;;  %v5782_v56 = vrot.slane %v5780_v21, 3 }
 0x55a   : > { %v6476_v35 = vpop.f32.mrf.mxu2 }
 0x55b   : > { %v13560_v6 = vadd.f32 %v6476_v35, %v6212_v5 }
 0x55c   : > { %v5527_v40 = vpop.f32.mrf.mxu3 }
 0x55d   : > { %v5900_v30 = vpop.f32.mrf.mxu0  ;;  %v13565_v39 = vadd.f32 %v5527_v40, %v13204_v29  ;;  %v11280_v29 = vld [vmem:[%s14543_s3 + $0x188] sm:$0xff] }
 0x55e   : > { %v5966_v32 = vadd.f32 %v5900_v30, %v5586_v36  ;;  %v6149_v63 = vpop.f32.mrf.mxu1  ;;  %v5777_v36 = vshrl.u32 %v5614_v20, 16  ;;  %8540 = vmatpush.bf16.msra.mxu0 %v11280_v29  ;;  %v6031_v30 = vsel %vm2931_vm6, %v6028_v61, %v6030_v1  ;;  %v7375_v20 = vunpack.c.l.b16 %v7296_v17 }
 0x55f   : > { %10594 = vmatmul.msk.bf16.gmra.mxu2 %vm617_vm0, %v11214_v19 }
 0x560   : > { %10462 = vmatmul.msk.bf16.gmra.mxu0 %vm617_vm0, %v5775_v13  ;;  %v6213_v41 = vadd.f32 %v6147_v31, %v5966_v32  ;;  %v11282_v31 = vld [vmem:[%s14543_s3 + $0x198] sm:$0xff]  ;;  %v5779_v35 = vrot.slane %v5777_v36, 2  ;;  %v6712_v13 = vshrl.u32 %v13548_v10, 16  ;;  %v6716_v32 = vshll.u32 %v13580_v3, 16  ;;  %v11215_v36 = vld [vmem:[%s13201_s14 + $0x88] sm:$0xff] }
 0x561   : > { %10676 = vmatmul.msk.bf16.vlgmr.msrb.gmra.mxu3 %vm617_vm0, %v6711_v11  ;;  %8920 = vmatpush.bf16.msra.mxu1 %v11282_v31  ;;  %v14548_v11 = vunpack.c.l.b16 %v13587_v27 }
 0x562   : > { %v6479_v48 = vpop.f32.mrf.mxu2  ;;  %v6718_v21 = vrot.slane %v6716_v32, 1  ;;  %v11303_v32 = vld [vmem:[%s13201_s14] sm:$0xf0] }
 0x563   : > { %v13577_v59 = vadd.f32 %v6479_v48, %v6213_v41  ;;  %v5783_v41 = vor.u32 %v5782_v56, %v5779_v35  ;;  %v7412_v61 = vpack.c.b16 %v14548_v11, %v7375_v20  ;;  %v13604_v48 = vld [vmem:[%s13201_s14 + $0x10] sm:$0xff]  ;;  %v11304_v20 = vld [vmem:[%s13201_s14] sm:$0xe] }
 0x564   : > { %v5530_v57 = vpop.f32.mrf.mxu3 }
 0x565   : > { %v5902_v5 = vpop.f32.mrf.mxu0  ;;  %v13590_v19 = vadd.f32 %v5530_v57, %v13218_v23  ;;  %v5784_v17 = vsel %vm2550_vm5, %v5774_v16, %v5783_v41  ;;  %v7679_v35 = vshrl.u32 %v7412_v61, 16  ;;  %v7687_v16 = vshrl.u32 %v13604_v48, 16  ;;  %v13623_v41 = vld [vmem:[%s13201_s14 + $0x18] sm:$0xff] }
 0x566   : > { %v5967_v8 = vadd.f32 %v5902_v5, %v13535_v52  ;;  %v6152_v40 = vpop.f32.mrf.mxu1  ;;  %v6714_v52 = vor.u32 %v6712_v13, %v6710_v44  ;;  %v7431_v13 = vrot.slane %v7412_v61, 1 }
 0x568   : > { %v6214_v58 = vadd.f32 %v6149_v63, %v5967_v8  ;;  %v6719_v44 = vsel %vm456_vm2, %v6714_v52, %v6718_v21  ;;  %v7682_v8 = vshll.u32 %v7412_v61, 16 }
 0x569   : > { %10493 = vmatmul.msk.bf16.gmra.mxu1 %vm617_vm0, %v6031_v30  ;;  %v7690_v30 = vshll.u32 %v13604_v48, 16 }
 0x56a   : > { %v6481_v29 = vpop.f32.mrf.mxu2 }
 0x56b   : > { %v13598_v23 = vadd.f32 %v6481_v29, %v6214_v58  ;;  %v7681_v29 = vrot.slane %v7679_v35, 1  ;;  %v7692_v52 = vrot.slane %v7690_v30, 2  ;;  %v7059_v30 = vrot.slane %v13548_v10, 1 }
 0x56c   : > { %v5532_v1 = vpop.f32.mrf.mxu3 }
 0x56d   : > { %v5905_v31 = vpop.f32.mrf.mxu0  ;;  %v13608_v63 = vadd.f32 %v5532_v1, %v13226_v9 }
 0x56e   : > { %v5968_v57 = vadd.f32 %v5905_v31, %v13551_v55  ;;  %v6154_v5 = vpop.f32.mrf.mxu1  ;;  %v7432_v55 = vrot.slane %v13604_v48, 1 }
 0x56f   : > { %10595 = vmatmul.msk.bf16.gmra.mxu2 %vm617_vm0, %v11215_v36  ;;  %v7684_v36 = vrot.slane %v7682_v8, 2 }
 0x570   : > { %10463 = vmatmul.msk.bf16.gmra.mxu0 %vm617_vm0, %v5784_v17  ;;  %v6215_v56 = vadd.f32 %v6152_v40, %v5968_v57  ;;  %v7689_v40 = vrot.slane %v7687_v16, 1  ;;  %v11305_v17 = vor.u32 %v11304_v20, %v11303_v32  ;;  %v7433_v48 = vsel %vm927_vm1, %v7431_v13, %v7432_v55  ;;  %v13636_v13 = vld [vmem:[%s13201_s14 + $0x18] sm:$0xff] }
 0x571   : > { %10677 = vmatmul.msk.bf16.gmra.mxu3 %vm617_vm0, %v6719_v44  ;;  %v7685_v35 = vor.u32 %v7684_v36, %v7681_v29 }
 0x572   : > { %v6484_v9 = vpop.f32.mrf.mxu2  ;;  %v7693_v8 = vor.u32 %v7692_v52, %v7689_v40  ;;  %v7058_v16 = vrot.slane %v11305_v17, 1  ;;  %v7699_v52 = vshll.u32 %v13636_v13, 16 }
 0x573   : > { %v13620_v58 = vadd.f32 %v6484_v9, %v6215_v56  ;;  %v6720_v56 = vshrl.u32 %v13580_v3, 16  ;;  %v6724_v9 = vshll.u32 %v13623_v41, 16 }
 0x574   : > { %v5535_v1 = vpop.f32.mrf.mxu3 }
 0x575   : > { %v5907_v31 = vpop.f32.mrf.mxu0  ;;  %v5592_v57 = vadd.f32 %v5535_v1, %v13239_v15  ;;  %v6726_v20 = vrot.slane %v6724_v9, 1  ;;  %v7694_v1 = vsel %vm1548_vm4, %v7685_v35, %v7693_v8 }
 0x576   : > { %v5969_v44 = vadd.f32 %v5907_v31, %v13565_v39  ;;  %v6157_v61 = vpop.f32.mrf.mxu1  ;;  %v6722_v39 = vor.u32 %v6720_v56, %v6718_v21  ;;  %v7696_v21 = vshrl.u32 %v13636_v13, 16 }
 0x578   : > { %v6216_v11 = vadd.f32 %v6154_v5, %v5969_v44  ;;  %v7060_v5 = vsel %vm927_vm1, %v7058_v16, %v7059_v30  ;;  %v6727_v10 = vsel %vm456_vm2, %v6722_v39, %v6726_v20  ;;  %v7434_v44 = vrot.slane %v13636_v13, 1 }
 0x579   : > { %10804 = vmatmul.msk.bf16.vlgmr.msrb.gmra.mxu1 %vm617_vm0, %v7433_v48  ;;  %v7701_v48 = vrot.slane %v7699_v52, 2  ;;  %v6728_v39 = vshrl.u32 %v13623_v41, 16 }
 0x57a   : > { %v6486_v32 = vpop.f32.mrf.mxu2 }
 0x57b   : > { %v13632_v15 = vadd.f32 %v6486_v32, %v6216_v11  ;;  %v7435_v32 = vsel %vm927_vm1, %v7432_v55, %v7434_v44 }
 0x57c   : > { %v5537_v31 = vpop.f32.mrf.mxu3 }
 0x57d   : > { %v5910_v27 = vpop.f32.mrf.mxu0  ;;  %v5593_v29 = vadd.f32 %v5537_v31, %v13247_v14 }
 0x57e   : > { %v5970_v36 = vadd.f32 %v5910_v27, %v13590_v19  ;;  %v6159_v40 = vpop.f32.mrf.mxu1  ;;  %v13651_v27 = vld [vmem:[%s13201_s14 + $0x20] sm:$0xff]  ;;  %v7698_v19 = vrot.slane %v7696_v21, 1 }
 0x57f   : > { %10834 = vmatmul.msk.bf16.vlgmr.msrb.gmra.mxu2 %vm617_vm0, %v7694_v1  ;;  %v6732_v1 = vshll.u32 %v13651_v27, 16  ;;  %v13664_v21 = vld [vmem:[%s13201_s14 + $0x20] sm:$0xff] }
 0x580   : > { %10706 = vmatmul.msk.bf16.vlgmr.msrb.gmra.mxu0 %vm617_vm0, %v7060_v5  ;;  %v6217_v11 = vadd.f32 %v6157_v61, %v5970_v36  ;;  %v7702_v31 = vor.u32 %v7701_v48, %v7698_v19  ;;  %v7061_v5 = vrot.slane %v13580_v3, 1 }
 0x581   : > { %10678 = vmatmul.msk.bf16.gmra.mxu3 %vm617_vm0, %v6727_v10 }
 0x582   : > { %v6489_v17 = vpop.f32.mrf.mxu2 }
 0x583   : > { %v13648_v14 = vadd.f32 %v6489_v17, %v6217_v11  ;;  %v6730_v11 = vor.u32 %v6728_v39, %v6726_v20  ;;  %v7062_v17 = vsel %vm927_vm1, %v7059_v30, %v7061_v5  ;;  %v7436_v30 = vrot.slane %v13664_v21, 1 }
 0x584   : > { %v5540_v56 = vpop.f32.mrf.mxu3 }
 0x585   : > { %v5912_v9 = vpop.f32.mrf.mxu0  ;;  %v5594_v61 = vadd.f32 %v5540_v56, %v13260_v12  ;;  %v6734_v12 = vrot.slane %v6732_v1, 1  ;;  %v7708_v56 = vshll.u32 %v13664_v21, 16 }
 0x586   : > { %v5971_v35 = vadd.f32 %v5912_v9, %v13608_v63  ;;  %v6162_v16 = vpop.f32.mrf.mxu1  ;;  %v7703_v63 = vsel %vm1548_vm4, %v7693_v8, %v7702_v31  ;;  %v7705_v8 = vshrl.u32 %v13664_v21, 16 }
 0x587   : > { %v6735_v3 = vsel %vm456_vm2, %v6730_v11, %v6734_v12  ;;  %v7437_v11 = vsel %vm927_vm1, %v7434_v44, %v7436_v30 }
 0x588   : > { %v6218_v13 = vadd.f32 %v6159_v40, %v5971_v35 }
 0x589   : > { %10805 = vmatmul.msk.bf16.gmra.mxu1 %vm617_vm0, %v7435_v32  ;;  %v7710_v32 = vrot.slane %v7708_v56, 2 }
 0x58a   : > { %v6491_v36 = vpop.f32.mrf.mxu2 }
 0x58b   : > { %v13660_v10 = vadd.f32 %v6491_v36, %v6218_v13 }
 0x58c   : > { %v5542_v55 = vpop.f32.mrf.mxu3 }
 0x58d   : > { %v5915_v52 = vpop.f32.mrf.mxu0  ;;  %v5595_v40 = vadd.f32 %v5542_v55, %v13268_v60  ;;  %v13678_v60 = vld [vmem:[%s13201_s14 + $0x28] sm:$0xff] }
 0x58e   : > { %v5972_v19 = vadd.f32 %v5915_v52, %v5592_v57  ;;  %v6164_v48 = vpop.f32.mrf.mxu1  ;;  %v7707_v57 = vrot.slane %v7705_v8, 1  ;;  %v6740_v55 = vshll.u32 %v13678_v60, 16 }
 0x58f   : > { %10835 = vmatmul.msk.bf16.gmra.mxu2 %vm617_vm0, %v7703_v63  ;;  %v6736_v63 = vshrl.u32 %v13651_v27, 16 }
 0x590   : > { %10707 = vmatmul.msk.bf16.gmra.mxu0 %vm617_vm0, %v7062_v17  ;;  %v6219_v20 = vadd.f32 %v6162_v16, %v5972_v19  ;;  %v7711_v52 = vor.u32 %v7710_v32, %v7707_v57  ;;  %v7063_v17 = vrot.slane %v13623_v41, 1  ;;  %v6742_v8 = vrot.slane %v6740_v55, 1 }
 0x591   : > { %10679 = vmatmul.msk.bf16.gmra.mxu3 %vm617_vm0, %v6735_v3 }
 0x592   : > { %v6494_v9 = vpop.f32.mrf.mxu2 }
 0x593   : > { %v13675_v35 = vadd.f32 %v6494_v9, %v6219_v20  ;;  %v6738_v20 = vor.u32 %v6736_v63, %v6734_v12  ;;  %v7064_v9 = vsel %vm927_vm1, %v7061_v5, %v7063_v17 }
 0x594   : > { %v5545_v39 = vpop.f32.mrf.mxu3 }
 0x595   : > { %v5917_v1 = vpop.f32.mrf.mxu0  ;;  %v5596_v16 = vadd.f32 %v5545_v39, %v13281_v47  ;;  %v7712_v47 = vsel %vm1548_vm4, %v7702_v31, %v7711_v52  ;;  %v6743_v41 = vsel %vm456_vm2, %v6738_v20, %v6742_v8 }
 0x596   : > { %v5973_v13 = vadd.f32 %v5917_v1, %v5593_v29  ;;  %v6167_v36 = vpop.f32.mrf.mxu1  ;;  %v13690_v29 = vld [vmem:[%s13201_s14 + $0x28] sm:$0xff] }
 0x597   : > { %v7714_v31 = vshrl.u32 %v13690_v29, 16  ;;  %v7717_v39 = vshll.u32 %v13690_v29, 16  ;;  %v7438_v5 = vrot.slane %v13690_v29, 1 }
 0x598   : > { %v6220_v21 = vadd.f32 %v6164_v48, %v5973_v13 }
 0x599   : > { %10806 = vmatmul.msk.bf16.gmra.mxu1 %vm617_vm0, %v7437_v11  ;;  %v7719_v11 = vrot.slane %v7717_v39, 2  ;;  %v7439_v20 = vsel %vm927_vm1, %v7436_v30, %v7438_v5 }
 0x59a   : > { %v6496_v19 = vpop.f32.mrf.mxu2 }
 0x59b   : > { %v13686_v3 = vadd.f32 %v6496_v19, %v6220_v21 }
 0x59c   : > { %v5547_v44 = vpop.f32.mrf.mxu3 }
 0x59d   : > { %v5920_v56 = vpop.f32.mrf.mxu0  ;;  %v5597_v48 = vadd.f32 %v5547_v44, %v13289_v33  ;;  %v13704_v33 = vld [vmem:[%s13201_s14 + $0x30] sm:$0xff] }
 0x59e   : > { %v5974_v57 = vadd.f32 %v5920_v56, %v5594_v61  ;;  %v6169_v32 = vpop.f32.mrf.mxu1  ;;  %v7716_v61 = vrot.slane %v7714_v31, 1  ;;  %v6748_v44 = vshll.u32 %v13704_v33, 16 }
 0x59f   : > { %10836 = vmatmul.msk.bf16.gmra.mxu2 %vm617_vm0, %v7712_v47  ;;  %v6744_v47 = vshrl.u32 %v13678_v60, 16 }
 0x5a0   : > { %10708 = vmatmul.msk.bf16.gmra.mxu0 %vm617_vm0, %v7064_v9  ;;  %v6221_v12 = vadd.f32 %v6167_v36, %v5974_v57  ;;  %v7720_v56 = vor.u32 %v7719_v11, %v7716_v61  ;;  %v7065_v9 = vrot.slane %v13651_v27, 1  ;;  %v6750_v31 = vrot.slane %v6748_v44, 1 }
 0x5a1   : > { %10680 = vmatmul.msk.bf16.gmra.mxu3 %vm617_vm0, %v6743_v41 }
 0x5a2   : > { %v6499_v1 = vpop.f32.mrf.mxu2 }
 0x5a3   : > { %v13701_v13 = vadd.f32 %v6499_v1, %v6221_v12  ;;  %v6746_v12 = vor.u32 %v6744_v47, %v6742_v8  ;;  %v7066_v1 = vsel %vm927_vm1, %v7063_v17, %v7065_v9 }
 0x5a4   : > { %v5550_v63 = vpop.f32.mrf.mxu3 }
 0x5a5   : > { %v5922_v55 = vpop.f32.mrf.mxu0  ;;  %v5598_v36 = vadd.f32 %v5550_v63, %v13302_v4  ;;  %v7721_v4 = vsel %vm1548_vm4, %v7711_v52, %v7720_v56  ;;  %v6751_v27 = vsel %vm456_vm2, %v6746_v12, %v6750_v31 }
 0x5a6   : > { %v5975_v21 = vadd.f32 %v5922_v55, %v5595_v40  ;;  %v6172_v19 = vpop.f32.mrf.mxu1  ;;  %v13716_v40 = vld [vmem:[%s13201_s14 + $0x30] sm:$0xff] }
 0x5a7   : > { %v7723_v52 = vshrl.u32 %v13716_v40, 16  ;;  %v7726_v63 = vshll.u32 %v13716_v40, 16  ;;  %v7440_v17 = vrot.slane %v13716_v40, 1 }
 0x5a8   : > { %v6222_v29 = vadd.f32 %v6169_v32, %v5975_v21 }
 0x5a9   : > { %10807 = vmatmul.msk.bf16.gmra.mxu1 %vm617_vm0, %v7439_v20  ;;  %v7728_v20 = vrot.slane %v7726_v63, 2  ;;  %v7441_v12 = vsel %vm927_vm1, %v7438_v5, %v7440_v17 }
 0x5aa   : > { %v6501_v57 = vpop.f32.mrf.mxu2 }
 0x5ab   : > { %v13712_v41 = vadd.f32 %v6501_v57, %v6222_v29 }
 0x5ac   : > { %v5552_v30 = vpop.f32.mrf.mxu3 }
 0x5ad   : > { %v5925_v39 = vpop.f32.mrf.mxu0  ;;  %v5599_v32 = vadd.f32 %v5552_v30, %v13310_v46  ;;  %v13730_v46 = vld [vmem:[%s13201_s14 + $0x38] sm:$0xff] }
 0x5ae   : > { %v5976_v61 = vadd.f32 %v5925_v39, %v5596_v16  ;;  %v6174_v11 = vpop.f32.mrf.mxu1  ;;  %v7725_v16 = vrot.slane %v7723_v52, 1  ;;  %v6756_v30 = vshll.u32 %v13730_v46, 16 }
 0x5af   : > { %10837 = vmatmul.msk.bf16.gmra.mxu2 %vm617_vm0, %v7721_v4  ;;  %v6752_v4 = vshrl.u32 %v13704_v33, 16 }
 0x5b0   : > { %10709 = vmatmul.msk.bf16.gmra.mxu0 %vm617_vm0, %v7066_v1  ;;  %v6223_v8 = vadd.f32 %v6172_v19, %v5976_v61  ;;  %v7729_v39 = vor.u32 %v7728_v20, %v7725_v16  ;;  %v7067_v1 = vrot.slane %v13678_v60, 1  ;;  %v6758_v52 = vrot.slane %v6756_v30, 1 }
 0x5b1   : > { %10681 = vmatmul.msk.bf16.gmra.mxu3 %vm617_vm0, %v6751_v27 }
 0x5b2   : > { %v6504_v55 = vpop.f32.mrf.mxu2 }
 0x5b3   : > { %v13727_v21 = vadd.f32 %v6504_v55, %v6223_v8  ;;  %v6754_v8 = vor.u32 %v6752_v4, %v6750_v31  ;;  %v7068_v55 = vsel %vm927_vm1, %v7065_v9, %v7067_v1 }
 0x5b4   : > { %v5555_v47 = vpop.f32.mrf.mxu3 }
 0x5b5   : > { %v5927_v44 = vpop.f32.mrf.mxu0  ;;  %v5600_v19 = vadd.f32 %v5555_v47, %v13323_v28  ;;  %v7730_v28 = vsel %vm1548_vm4, %v7720_v56, %v7729_v39  ;;  %v6759_v60 = vsel %vm456_vm2, %v6754_v8, %v6758_v52 }
 0x5b6   : > { %v5977_v29 = vadd.f32 %v5927_v44, %v5597_v48  ;;  %v6177_v57 = vpop.f32.mrf.mxu1  ;;  %v13742_v48 = vld [vmem:[%s13201_s14 + $0x38] sm:$0xff] }
 0x5b7   : > { %v7732_v56 = vshrl.u32 %v13742_v48, 16  ;;  %v7735_v47 = vshll.u32 %v13742_v48, 16  ;;  %v7442_v9 = vrot.slane %v13742_v48, 1 }
 0x5b8   : > { %v6224_v40 = vadd.f32 %v6174_v11, %v5977_v29 }
 0x5b9   : > { %10808 = vmatmul.msk.bf16.gmra.mxu1 %vm617_vm0, %v7441_v12  ;;  %v7737_v12 = vrot.slane %v7735_v47, 2  ;;  %v7443_v8 = vsel %vm927_vm1, %v7440_v17, %v7442_v9 }
 0x5ba   : > { %v6506_v61 = vpop.f32.mrf.mxu2 }
 0x5bb   : > { %v13738_v27 = vadd.f32 %v6506_v61, %v6224_v40 }
 0x5bc   : > { %v5557_v5 = vpop.f32.mrf.mxu3 }
 0x5bd   : > { %v5930_v63 = vpop.f32.mrf.mxu0  ;;  %v5601_v11 = vadd.f32 %v5557_v5, %v13331_v2  ;;  %v13756_v2 = vld [vmem:[%s13201_s14 + $0x40] sm:$0xff] }
 0x5be   : > { %v5978_v16 = vadd.f32 %v5930_v63, %v5598_v36  ;;  %v6179_v20 = vpop.f32.mrf.mxu1  ;;  %v7734_v36 = vrot.slane %v7732_v56, 1  ;;  %v6764_v5 = vshll.u32 %v13756_v2, 16 }
 0x5bf   : > { %10838 = vmatmul.msk.bf16.gmra.mxu2 %vm617_vm0, %v7730_v28  ;;  %v6760_v28 = vshrl.u32 %v13730_v46, 16 }
 0x5c0   : > { %10710 = vmatmul.msk.bf16.gmra.mxu0 %vm617_vm0, %v7068_v55  ;;  %v6225_v31 = vadd.f32 %v6177_v57, %v5978_v16  ;;  %v7738_v63 = vor.u32 %v7737_v12, %v7734_v36  ;;  %v7069_v55 = vrot.slane %v13704_v33, 1  ;;  %v6766_v56 = vrot.slane %v6764_v5, 1 }
 0x5c1   : > { %10682 = vmatmul.msk.bf16.gmra.mxu3 %vm617_vm0, %v6759_v60 }
 0x5c2   : > { %v6509_v44 = vpop.f32.mrf.mxu2 }
 0x5c3   : > { %v13753_v29 = vadd.f32 %v6509_v44, %v6225_v31  ;;  %v6762_v31 = vor.u32 %v6760_v28, %v6758_v52  ;;  %v7070_v44 = vsel %vm927_vm1, %v7067_v1, %v7069_v55 }
 0x5c4   : > { %v5560_v4 = vpop.f32.mrf.mxu3 }
 0x5c5   : > { %v5932_v30 = vpop.f32.mrf.mxu0  ;;  %v5602_v57 = vadd.f32 %v5560_v4, %v13344_v7  ;;  %v7739_v7 = vsel %vm1548_vm4, %v7729_v39, %v7738_v63  ;;  %v6767_v33 = vsel %vm456_vm2, %v6762_v31, %v6766_v56 }
 0x5c6   : > { %v5979_v40 = vadd.f32 %v5932_v30, %v5599_v32  ;;  %v6182_v61 = vpop.f32.mrf.mxu1  ;;  %v13768_v32 = vld [vmem:[%s13201_s14 + $0x40] sm:$0xff] }
 0x5c7   : > { %v7741_v39 = vshrl.u32 %v13768_v32, 16  ;;  %v7744_v4 = vshll.u32 %v13768_v32, 16  ;;  %v7444_v1 = vrot.slane %v13768_v32, 1 }
 0x5c8   : > { %v6226_v48 = vadd.f32 %v6179_v20, %v5979_v40 }
 0x5c9   : > { %10809 = vmatmul.msk.bf16.gmra.mxu1 %vm617_vm0, %v7443_v8  ;;  %v7746_v8 = vrot.slane %v7744_v4, 2  ;;  %v7445_v31 = vsel %vm927_vm1, %v7442_v9, %v7444_v1 }
 0x5ca   : > { %v6511_v16 = vpop.f32.mrf.mxu2 }
 0x5cb   : > { %v13764_v60 = vadd.f32 %v6511_v16, %v6226_v48 }
 0x5cc   : > { %v5562_v17 = vpop.f32.mrf.mxu3 }
 0x5cd   : > { %v5935_v47 = vpop.f32.mrf.mxu0  ;;  %v5603_v20 = vadd.f32 %v5562_v17, %v13355_v37  ;;  %v13782_v37 = vld [vmem:[%s13201_s14 + $0x48] sm:$0xff] }
 0x5ce   : > { %v5980_v36 = vadd.f32 %v5935_v47, %v5600_v19  ;;  %v6184_v12 = vpop.f32.mrf.mxu1  ;;  %v7743_v19 = vrot.slane %v7741_v39, 1  ;;  %v6772_v17 = vshll.u32 %v13782_v37, 16 }
 0x5cf   : > { %10839 = vmatmul.msk.bf16.gmra.mxu2 %vm617_vm0, %v7739_v7  ;;  %v6768_v7 = vshrl.u32 %v13756_v2, 16 }
 0x5d0   : > { %10711 = vmatmul.msk.bf16.gmra.mxu0 %vm617_vm0, %v7070_v44  ;;  %v6227_v52 = vadd.f32 %v6182_v61, %v5980_v36  ;;  %v7747_v47 = vor.u32 %v7746_v8, %v7743_v19  ;;  %v7071_v44 = vrot.slane %v13730_v46, 1  ;;  %v6774_v39 = vrot.slane %v6772_v17, 1 }
 0x5d1   : > { %10683 = vmatmul.msk.bf16.gmra.mxu3 %vm617_vm0, %v6767_v33 }
 0x5d2   : > { %v6514_v30 = vpop.f32.mrf.mxu2 }
 0x5d3   : > { %v13779_v40 = vadd.f32 %v6514_v30, %v6227_v52  ;;  %v6770_v52 = vor.u32 %v6768_v7, %v6766_v56  ;;  %v7072_v30 = vsel %vm927_vm1, %v7069_v55, %v7071_v44 }
 0x5d4   : > { %v5565_v28 = vpop.f32.mrf.mxu3 }
 0x5d5   : > { %v5937_v5 = vpop.f32.mrf.mxu0  ;;  %v5604_v61 = vadd.f32 %v5565_v28, %v13374_v45  ;;  %v7748_v45 = vsel %vm1548_vm4, %v7738_v63, %v7747_v47  ;;  %v6775_v46 = vsel %vm456_vm2, %v6770_v52, %v6774_v39 }
 0x5d6   : > { %v5981_v48 = vadd.f32 %v5937_v5, %v5601_v11  ;;  %v6187_v16 = vpop.f32.mrf.mxu1  ;;  %v13794_v11 = vld [vmem:[%s13201_s14 + $0x48] sm:$0xff] }
 0x5d7   : > { %v7750_v63 = vshrl.u32 %v13794_v11, 16  ;;  %v7753_v28 = vshll.u32 %v13794_v11, 16  ;;  %v7446_v55 = vrot.slane %v13794_v11, 1  ;;  %v6776_v11 = vshrl.u32 %v13782_v37, 16 }
 0x5d8   : > { %v6228_v32 = vadd.f32 %v6184_v12, %v5981_v48 }
 0x5d9   : > { %10810 = vmatmul.msk.bf16.gmra.mxu1 %vm617_vm0, %v7445_v31  ;;  %v7752_v48 = vrot.slane %v7750_v63, 1  ;;  %v7755_v31 = vrot.slane %v7753_v28, 2  ;;  %v7447_v52 = vsel %vm927_vm1, %v7444_v1, %v7446_v55  ;;  %v13827_v63 = vld [vmem:[%s13201_s14 + $0x50] sm:$0xff] }
 0x5da   : > { %v6516_v36 = vpop.f32.mrf.mxu2 }
 0x5db   : > { %v13790_v33 = vadd.f32 %v6516_v36, %v6228_v32 }
 0x5dc   : > { %v5567_v9 = vpop.f32.mrf.mxu3 }
 0x5dd   : > { %v5940_v4 = vpop.f32.mrf.mxu0  ;;  %v13798_v12 = vadd.f32 %v5567_v9, %v13385_v54 }
 0x5de   : > { %v5982_v19 = vadd.f32 %v5940_v4, %v5602_v57  ;;  %v6189_v8 = vpop.f32.mrf.mxu1  ;;  %v13810_v57 = vld [vmem:[%s13201_s14 + $0x50] sm:$0xff] }
 0x5df   : > { %10840 = vmatmul.msk.bf16.gmra.mxu2 %vm617_vm0, %v7748_v45  ;;  %v11260_v45 = vld [vmem:[%s14543_s3 + $0x170] sm:$0xff]  ;;  %v6780_v9 = vshll.u32 %v13810_v57, 16 }
 0x5e0   : > { %10712 = vmatmul.msk.bf16.gmra.mxu0 %vm617_vm0, %v7072_v30  ;;  %v6229_v56 = vadd.f32 %v6187_v16, %v5982_v19  ;;  %v7756_v30 = vor.u32 %v7755_v31, %v7752_v48  ;;  %8168 = vmatpush.bf16.msra.mxu3 %v11260_v45  ;;  %v13847_v45 = vld [vmem:[%s13201_s14 + $0x58] sm:$0xff] }
 0x5e1   : > { %10684 = vmatmul.msk.bf16.gmra.mxu3 %vm617_vm0, %v6775_v46  ;;  %v6778_v46 = vor.u32 %v6776_v11, %v6774_v39  ;;  %v6782_v1 = vrot.slane %v6780_v9, 1  ;;  %v11283_v39 = vld [vmem:[%s14543_s3 + $0x1a0] sm:$0xff] }
 0x5e2   : > { %v6519_v5 = vpop.f32.mrf.mxu2  ;;  %9168 = vmatpush.bf16.msra.mxu2 %v11283_v39  ;;  %v7075_v39 = vrot.slane %v13782_v37, 1 }
 0x5e3   : > { %v13807_v54 = vadd.f32 %v6519_v5, %v6229_v56  ;;  %v7757_v56 = vsel %vm1548_vm4, %v7747_v47, %v7756_v30 }
 0x5e4   : > { %v6923_v17 = vpop.f32.mrf.mxu3 }
 0x5e5   : > { %v5942_v7 = vpop.f32.mrf.mxu0  ;;  %v13813_v16 = vadd.f32 %v6923_v17, %v13398_v25  ;;  %v7073_v25 = vrot.slane %v13756_v2, 1  ;;  %v6783_v2 = vsel %vm456_vm2, %v6778_v46, %v6782_v1  ;;  %v7759_v17 = vshrl.u32 %v13827_v63, 16 }
 0x5e6   : > { %v5983_v32 = vadd.f32 %v5942_v7, %v5603_v20  ;;  %v6192_v36 = vpop.f32.mrf.mxu1 }
 0x5e7   : > { %v7074_v7 = vsel %vm927_vm1, %v7071_v44, %v7073_v25  ;;  %v7762_v44 = vshll.u32 %v13827_v63, 16  ;;  %v7761_v11 = vrot.slane %v7759_v17, 1 }
 0x5e8   : > { %v6230_v4 = vadd.f32 %v6189_v8, %v5983_v32  ;;  %v7448_v32 = vrot.slane %v13827_v63, 1 }
 0x5e9   : > { %10811 = vmatmul.msk.bf16.gmra.mxu1 %vm617_vm0, %v7447_v52  ;;  %v7764_v9 = vrot.slane %v7762_v44, 2 }
 0x5ea   : > { %v6521_v20 = vpop.f32.mrf.mxu2 }
 0x5eb   : > { %v13823_v19 = vadd.f32 %v6521_v20, %v6230_v4 }
 0x5ec   : > { %v6925_v5 = vpop.f32.mrf.mxu3 }
 0x5ed   : > { %v5945_v28 = vpop.f32.mrf.mxu0  ;;  %v7014_v48 = vadd.f32 %v6925_v5, %v13406_v62  ;;  %v11279_v62 = vld [vmem:[%s14543_s3 + $0x180] sm:$0xff]  ;;  %v6784_v5 = vshrl.u32 %v13810_v57, 16 }
 0x5ee   : > { %v5984_v8 = vadd.f32 %v5945_v28, %v5604_v61  ;;  %v6194_v31 = vpop.f32.mrf.mxu1  ;;  %8541 = vmatpush.bf16.msra.mxu0 %v11279_v62  ;;  %v7449_v28 = vsel %vm927_vm1, %v7446_v55, %v7448_v32  ;;  %v13863_v62 = vld [vmem:[%s13201_s14 + $0x58] sm:$0xff] }
 0x5ef   : > { %10841 = vmatmul.msk.bf16.gmra.mxu2 %vm617_vm0, %v7757_v56  ;;  %v6786_v44 = vor.u32 %v6784_v5, %v6782_v1 }
 0x5f0   : > { %10713 = vmatmul.msk.bf16.gmra.mxu0 %vm617_vm0, %v7074_v7  ;;  %v6231_v47 = vadd.f32 %v6192_v36, %v5984_v8  ;;  %v11281_v36 = vld [vmem:[%s14543_s3 + $0x190] sm:$0xff]  ;;  %v6788_v7 = vshll.u32 %v13847_v45, 16 }
 0x5f1   : > { %10685 = vmatmul.msk.bf16.gmra.mxu3 %vm617_vm0, %v6783_v2  ;;  %8921 = vmatpush.bf16.msra.mxu1 %v11281_v36  ;;  %v7765_v2 = vor.u32 %v7764_v9, %v7761_v11  ;;  %v7076_v36 = vsel %vm927_vm1, %v7073_v25, %v7075_v39  ;;  %v7450_v25 = vrot.slane %v13863_v62, 1 }
 0x5f2   : > { %v6524_v61 = vpop.f32.mrf.mxu2 }
 0x5f3   : > { %v13844_v52 = vadd.f32 %v6524_v61, %v6231_v47 }
 0x5f4   : > { %v6928_v20 = vpop.f32.mrf.mxu3 }
 0x5f5   : > { %v5947_v4 = vpop.f32.mrf.mxu0  ;;  %v7015_v56 = vadd.f32 %v6928_v20, %v13419_v50  ;;  %v7766_v50 = vsel %vm1548_vm4, %v7756_v30, %v7765_v2  ;;  %v7768_v30 = vshrl.u32 %v13863_v62, 16 }
 0x5f6   : > { %v5985_v46 = vadd.f32 %v5947_v4, %v13798_v12  ;;  %v7543_v63 = vpop.f32.mrf.mxu1  ;;  %v6790_v12 = vrot.slane %v6788_v7, 1  ;;  %v7771_v4 = vshll.u32 %v13863_v62, 16 }
 0x5f8   : > { %v6232_v8 = vadd.f32 %v6194_v31, %v5985_v46  ;;  %v6791_v37 = vsel %vm456_vm2, %v6786_v44, %v6790_v12  ;;  %v7770_v46 = vrot.slane %v7768_v30, 1  ;;  %v7451_v44 = vsel %vm927_vm1, %v7448_v32, %v7450_v25 }
 0x5f9   : > { %10812 = vmatmul.msk.bf16.gmra.mxu1 %vm617_vm0, %v7449_v28  ;;  %v7773_v28 = vrot.slane %v7771_v4, 2 }
 0x5fa   : > { %v6526_v47 = vpop.f32.mrf.mxu2 }
 0x5fb   : > { %v13859_v17 = vadd.f32 %v6526_v47, %v6232_v8 }
 0x5fc   : > { %v6930_v55 = vpop.f32.mrf.mxu3 }
 0x5fd   : > { %v7170_v61 = vpop.f32.mrf.mxu0  ;;  %v7016_v31 = vadd.f32 %v6930_v55, %v13427_v24 }
 0x5fe   : > { %v7260_v11 = vadd.f32 %v7170_v61, %v13813_v16  ;;  %v7545_v9 = vpop.f32.mrf.mxu1  ;;  %v13878_v16 = vld [vmem:[%s13201_s14 + $0x60] sm:$0xff]  ;;  %v7774_v61 = vor.u32 %v7773_v28, %v7770_v46 }
 0x5ff   : > { %10842 = vmatmul.msk.bf16.gmra.mxu2 %vm617_vm0, %v7766_v50  ;;  %v6792_v50 = vshrl.u32 %v13847_v45, 16  ;;  %v6796_v55 = vshll.u32 %v13878_v16, 16 }
 0x600   : > { %10714 = vmatmul.msk.bf16.gmra.mxu0 %vm617_vm0, %v7076_v36  ;;  %v7633_v1 = vadd.f32 %v7543_v63, %v7260_v11  ;;  %v7077_v36 = vrot.slane %v13810_v57, 1 }
 0x601   : > { %10686 = vmatmul.msk.bf16.gmra.mxu3 %vm617_vm0, %v6791_v37  ;;  %v6798_v30 = vrot.slane %v6796_v55, 1 }
 0x602   : > { %v7923_v20 = vpop.f32.mrf.mxu2 }
 0x603   : > { %v13875_v24 = vadd.f32 %v7923_v20, %v7633_v1  ;;  %v6794_v1 = vor.u32 %v6792_v50, %v6790_v12  ;;  %v7078_v20 = vsel %vm927_vm1, %v7075_v39, %v7077_v36 }
 0x604   : > { %v6933_v5 = vpop.f32.mrf.mxu3 }
 0x605   : > { %v7172_v7 = vpop.f32.mrf.mxu0  ;;  %v7017_v63 = vadd.f32 %v6933_v5, %v13440_v42  ;;  %v7775_v42 = vsel %vm1548_vm4, %v7765_v2, %v7774_v61  ;;  %v6799_v57 = vsel %vm456_vm2, %v6794_v1, %v6798_v30 }
 0x606   : > { %v7261_v8 = vadd.f32 %v7172_v7, %v7014_v48  ;;  %v7548_v47 = vpop.f32.mrf.mxu1  ;;  %v13890_v48 = vld [vmem:[%s13201_s14 + $0x60] sm:$0xff] }
 0x607   : > { %v7777_v2 = vshrl.u32 %v13890_v48, 16  ;;  %v7780_v5 = vshll.u32 %v13890_v48, 16  ;;  %v7452_v39 = vrot.slane %v13890_v48, 1 }
 0x608   : > { %v7634_v62 = vadd.f32 %v7545_v9, %v7261_v8 }
 0x609   : > { %10813 = vmatmul.msk.bf16.gmra.mxu1 %vm617_vm0, %v7451_v44  ;;  %v7782_v44 = vrot.slane %v7780_v5, 2  ;;  %v7453_v1 = vsel %vm927_vm1, %v7450_v25, %v7452_v39 }
 0x60a   : > { %v7925_v11 = vpop.f32.mrf.mxu2 }
 0x60b   : > { %v13886_v37 = vadd.f32 %v7925_v11, %v7634_v62 }
 0x60c   : > { %v6935_v32 = vpop.f32.mrf.mxu3 }
 0x60d   : > { %v7175_v4 = vpop.f32.mrf.mxu0  ;;  %v7018_v9 = vadd.f32 %v6935_v32, %v13448_v51  ;;  %v13904_v51 = vld [vmem:[%s13201_s14 + $0x68] sm:$0xff] }
 0x60e   : > { %v7262_v46 = vadd.f32 %v7175_v4, %v7015_v56  ;;  %v7550_v28 = vpop.f32.mrf.mxu1  ;;  %v7779_v56 = vrot.slane %v7777_v2, 1  ;;  %v6804_v32 = vshll.u32 %v13904_v51, 16 }
 0x60f   : > { %10843 = vmatmul.msk.bf16.gmra.mxu2 %vm617_vm0, %v7775_v42  ;;  %v6800_v42 = vshrl.u32 %v13878_v16, 16 }
 0x610   : > { %10715 = vmatmul.msk.bf16.gmra.mxu0 %vm617_vm0, %v7078_v20  ;;  %v7635_v12 = vadd.f32 %v7548_v47, %v7262_v46  ;;  %v7783_v4 = vor.u32 %v7782_v44, %v7779_v56  ;;  %v7079_v20 = vrot.slane %v13847_v45, 1  ;;  %v6806_v2 = vrot.slane %v6804_v32, 1 }
 0x611   : > { %10687 = vmatmul.msk.bf16.gmra.mxu3 %vm617_vm0, %v6799_v57 }
 0x612   : > { %v7928_v7 = vpop.f32.mrf.mxu2 }
 0x613   : > { %v13901_v8 = vadd.f32 %v7928_v7, %v7635_v12  ;;  %v6802_v12 = vor.u32 %v6800_v42, %v6798_v30  ;;  %v7080_v7 = vsel %vm927_vm1, %v7077_v36, %v7079_v20 }
 0x614   : > { %v6938_v50 = vpop.f32.mrf.mxu3 }
 0x615   : > { %v7177_v55 = vpop.f32.mrf.mxu0  ;;  %v7019_v47 = vadd.f32 %v6938_v50, %v13461_v0  ;;  %v7784_v0 = vsel %vm1548_vm4, %v7774_v61, %v7783_v4  ;;  %v6807_v45 = vsel %vm456_vm2, %v6802_v12, %v6806_v2 }
 0x616   : > { %v7263_v62 = vadd.f32 %v7177_v55, %v7016_v31  ;;  %v7553_v11 = vpop.f32.mrf.mxu1  ;;  %v13916_v31 = vld [vmem:[%s13201_s14 + $0x68] sm:$0xff] }
 0x617   : > { %v7786_v61 = vshrl.u32 %v13916_v31, 16  ;;  %v7789_v50 = vshll.u32 %v13916_v31, 16  ;;  %v7454_v36 = vrot.slane %v13916_v31, 1 }
 0x618   : > { %v7636_v48 = vadd.f32 %v7550_v28, %v7263_v62 }
 0x619   : > { %10814 = vmatmul.msk.bf16.gmra.mxu1 %vm617_vm0, %v7453_v1  ;;  %v7791_v1 = vrot.slane %v7789_v50, 2  ;;  %v7455_v12 = vsel %vm927_vm1, %v7452_v39, %v7454_v36 }
 0x61a   : > { %v7930_v46 = vpop.f32.mrf.mxu2 }
 0x61b   : > { %v13912_v57 = vadd.f32 %v7930_v46, %v7636_v48 }
 0x61c   : > { %v6940_v25 = vpop.f32.mrf.mxu3 }
 0x61d   : > { %v7180_v5 = vpop.f32.mrf.mxu0  ;;  %v7020_v28 = vadd.f32 %v6940_v25, %v13469_v53  ;;  %v13930_v53 = vld [vmem:[%s13201_s14 + $0x70] sm:$0xff] }
 0x61e   : > { %v7264_v56 = vadd.f32 %v7180_v5, %v7017_v63  ;;  %v7555_v44 = vpop.f32.mrf.mxu1  ;;  %v7788_v63 = vrot.slane %v7786_v61, 1  ;;  %v6812_v25 = vshll.u32 %v13930_v53, 16 }
 0x61f   : > { %10844 = vmatmul.msk.bf16.gmra.mxu2 %vm617_vm0, %v7784_v0  ;;  %v6808_v0 = vshrl.u32 %v13904_v51, 16 }
 0x620   : > { %10716 = vmatmul.msk.bf16.gmra.mxu0 %vm617_vm0, %v7080_v7  ;;  %v7637_v30 = vadd.f32 %v7553_v11, %v7264_v56  ;;  %v7792_v5 = vor.u32 %v7791_v1, %v7788_v63  ;;  %v7081_v7 = vrot.slane %v13878_v16, 1  ;;  %v6814_v61 = vrot.slane %v6812_v25, 1 }
 0x621   : > { %10688 = vmatmul.msk.bf16.gmra.mxu3 %vm617_vm0, %v6807_v45 }
 0x622   : > { %v7933_v55 = vpop.f32.mrf.mxu2 }
 0x623   : > { %v13927_v62 = vadd.f32 %v7933_v55, %v7637_v30  ;;  %v6810_v30 = vor.u32 %v6808_v0, %v6806_v2  ;;  %v7082_v55 = vsel %vm927_vm1, %v7079_v20, %v7081_v7 }
 0x624   : > { %v6943_v42 = vpop.f32.mrf.mxu3 }
 0x625   : > { %v7182_v32 = vpop.f32.mrf.mxu0  ;;  %v7021_v11 = vadd.f32 %v6943_v42, %v13482_v34  ;;  %v7793_v34 = vsel %vm1548_vm4, %v7783_v4, %v7792_v5  ;;  %v6815_v16 = vsel %vm456_vm2, %v6810_v30, %v6814_v61 }
 0x626   : > { %v7265_v48 = vadd.f32 %v7182_v32, %v7018_v9  ;;  %v7558_v46 = vpop.f32.mrf.mxu1  ;;  %v13942_v9 = vld [vmem:[%s13201_s14 + $0x70] sm:$0xff] }
 0x627   : > { %v7795_v4 = vshrl.u32 %v13942_v9, 16  ;;  %v7798_v42 = vshll.u32 %v13942_v9, 16  ;;  %v7456_v20 = vrot.slane %v13942_v9, 1 }
 0x628   : > { %v7638_v31 = vadd.f32 %v7555_v44, %v7265_v48 }
 0x629   : > { %10815 = vmatmul.msk.bf16.gmra.mxu1 %vm617_vm0, %v7455_v12  ;;  %v7800_v12 = vrot.slane %v7798_v42, 2  ;;  %v7457_v30 = vsel %vm927_vm1, %v7454_v36, %v7456_v20 }
 0x62a   : > { %v7935_v56 = vpop.f32.mrf.mxu2 }
 0x62b   : > { %v13938_v45 = vadd.f32 %v7935_v56, %v7638_v31 }
 0x62c   : > { %v6945_v39 = vpop.f32.mrf.mxu3 }
 0x62d   : > { %v7185_v50 = vpop.f32.mrf.mxu0  ;;  %v7022_v44 = vadd.f32 %v6945_v39, %v13490_v18  ;;  %v13956_v18 = vld [vmem:[%s13201_s14 + $0x78] sm:$0xff] }
 0x62e   : > { %v7266_v63 = vadd.f32 %v7185_v50, %v7019_v47  ;;  %v7560_v1 = vpop.f32.mrf.mxu1  ;;  %v7797_v47 = vrot.slane %v7795_v4, 1  ;;  %v6820_v39 = vshll.u32 %v13956_v18, 16 }
 0x62f   : > { %10845 = vmatmul.msk.bf16.gmra.mxu2 %vm617_vm0, %v7793_v34  ;;  %v6816_v34 = vshrl.u32 %v13930_v53, 16 }
 0x630   : > { %10717 = vmatmul.msk.bf16.gmra.mxu0 %vm617_vm0, %v7082_v55  ;;  %v7639_v2 = vadd.f32 %v7558_v46, %v7266_v63  ;;  %v7801_v50 = vor.u32 %v7800_v12, %v7797_v47  ;;  %v7083_v55 = vrot.slane %v13904_v51, 1  ;;  %v6822_v4 = vrot.slane %v6820_v39, 1 }
 0x631   : > { %10689 = vmatmul.msk.bf16.gmra.mxu3 %vm617_vm0, %v6815_v16 }
 0x632   : > { %v7938_v32 = vpop.f32.mrf.mxu2 }
 0x633   : > { %v13953_v48 = vadd.f32 %v7938_v32, %v7639_v2  ;;  %v6818_v2 = vor.u32 %v6816_v34, %v6814_v61  ;;  %v7084_v32 = vsel %vm927_vm1, %v7081_v7, %v7083_v55 }
 0x634   : > { %v6948_v0 = vpop.f32.mrf.mxu3 }
 0x635   : > { %v7187_v25 = vpop.f32.mrf.mxu0  ;;  %v7023_v46 = vadd.f32 %v6948_v0, %v13503_v43  ;;  %v7802_v43 = vsel %vm1548_vm4, %v7792_v5, %v7801_v50  ;;  %v6823_v51 = vsel %vm456_vm2, %v6818_v2, %v6822_v4 }
 0x636   : > { %v7267_v31 = vadd.f32 %v7187_v25, %v7020_v28  ;;  %v7563_v56 = vpop.f32.mrf.mxu1  ;;  %v13968_v28 = vld [vmem:[%s13201_s14 + $0x78] sm:$0xff] }
 0x637   : > { %v7804_v5 = vshrl.u32 %v13968_v28, 16  ;;  %v7807_v0 = vshll.u32 %v13968_v28, 16  ;;  %v7458_v7 = vrot.slane %v13968_v28, 1 }
 0x638   : > { %v7640_v9 = vadd.f32 %v7560_v1, %v7267_v31 }
 0x639   : > { %10816 = vmatmul.msk.bf16.gmra.mxu1 %vm617_vm0, %v7457_v30  ;;  %v7809_v30 = vrot.slane %v7807_v0, 2  ;;  %v7459_v2 = vsel %vm927_vm1, %v7456_v20, %v7458_v7 }
 0x63a   : > { %v7940_v63 = vpop.f32.mrf.mxu2 }
 0x63b   : > { %v13964_v16 = vadd.f32 %v7940_v63, %v7640_v9 }
 0x63c   : > { %v6950_v36 = vpop.f32.mrf.mxu3 }
 0x63d   : > { %v7190_v42 = vpop.f32.mrf.mxu0  ;;  %v7024_v1 = vadd.f32 %v6950_v36, %v13511_v38  ;;  %v13982_v38 = vld [vmem:[%s13201_s14 + $0x80] sm:$0xff] }
 0x63e   : > { %v7268_v47 = vadd.f32 %v7190_v42, %v7021_v11  ;;  %v7565_v12 = vpop.f32.mrf.mxu1  ;;  %v7806_v11 = vrot.slane %v7804_v5, 1  ;;  %v6828_v36 = vshll.u32 %v13982_v38, 16 }
 0x63f   : > { %10846 = vmatmul.msk.bf16.gmra.mxu2 %vm617_vm0, %v7802_v43  ;;  %v6824_v43 = vshrl.u32 %v13956_v18, 16 }
 0x640   : > { %10718 = vmatmul.msk.bf16.gmra.mxu0 %vm617_vm0, %v7084_v32  ;;  %v7641_v61 = vadd.f32 %v7563_v56, %v7268_v47  ;;  %v7810_v42 = vor.u32 %v7809_v30, %v7806_v11  ;;  %v7085_v32 = vrot.slane %v13930_v53, 1  ;;  %v6830_v5 = vrot.slane %v6828_v36, 1 }
 0x641   : > { %10690 = vmatmul.msk.bf16.gmra.mxu3 %vm617_vm0, %v6823_v51 }
 0x642   : > { %v7943_v25 = vpop.f32.mrf.mxu2 }
 0x643   : > { %v13979_v31 = vadd.f32 %v7943_v25, %v7641_v61  ;;  %v6826_v61 = vor.u32 %v6824_v43, %v6822_v4  ;;  %v7086_v25 = vsel %vm927_vm1, %v7083_v55, %v7085_v32 }
 0x644   : > { %v6953_v34 = vpop.f32.mrf.mxu3 }
 0x645   : > { %v7192_v39 = vpop.f32.mrf.mxu0  ;;  %v7025_v56 = vadd.f32 %v6953_v34, %v13525_v49  ;;  %v7811_v49 = vsel %vm1548_vm4, %v7801_v50, %v7810_v42  ;;  %v6831_v53 = vsel %vm456_vm2, %v6826_v61, %v6830_v5 }
 0x646   : > { %v7269_v9 = vadd.f32 %v7192_v39, %v7022_v44  ;;  %v7568_v63 = vpop.f32.mrf.mxu1  ;;  %v13994_v44 = vld [vmem:[%s13201_s14 + $0x80] sm:$0xff] }
 0x647   : > { %v7813_v50 = vshrl.u32 %v13994_v44, 16  ;;  %v7816_v34 = vshll.u32 %v13994_v44, 16  ;;  %v7460_v55 = vrot.slane %v13994_v44, 1 }
 0x648   : > { %v7642_v28 = vadd.f32 %v7565_v12, %v7269_v9 }
 0x649   : > { %10817 = vmatmul.msk.bf16.gmra.mxu1 %vm617_vm0, %v7459_v2  ;;  %v7818_v2 = vrot.slane %v7816_v34, 2  ;;  %v7461_v61 = vsel %vm927_vm1, %v7458_v7, %v7460_v55  ;;  %v6601_v7 = vld [vmem:[%s13201_s14 + $0x90] sm:$0x1] }
 0x64a   : > { %v7945_v47 = vpop.f32.mrf.mxu2 }
 0x64b   : > { %v13990_v51 = vadd.f32 %v7945_v47, %v7642_v28 }
 0x64c   : > { %v6955_v20 = vpop.f32.mrf.mxu3 }
 0x64d   : > { %v7195_v0 = vpop.f32.mrf.mxu0  ;;  %v7026_v12 = vadd.f32 %v6955_v20, %v13530_v22  ;;  %v14008_v22 = vld [vmem:[%s13201_s14 + $0x88] sm:$0xff] }
 0x64e   : > { %v7270_v11 = vadd.f32 %v7195_v0, %v7023_v46  ;;  %v7570_v30 = vpop.f32.mrf.mxu1  ;;  %v7815_v46 = vrot.slane %v7813_v50, 1  ;;  %v6836_v44 = vshll.u32 %v14008_v22, 16  ;;  %v14020_v50 = vld [vmem:[%s13201_s14 + $0x88] sm:$0xff] }
 0x64f   : > { %10847 = vmatmul.msk.bf16.gmra.mxu2 %vm617_vm0, %v7811_v49  ;;  %v6832_v49 = vshrl.u32 %v13982_v38, 16 }
 0x650   : > { %10719 = vmatmul.msk.bf16.gmra.mxu0 %vm617_vm0, %v7086_v25  ;;  %v7643_v4 = vadd.f32 %v7568_v63, %v7270_v11  ;;  %v7819_v0 = vor.u32 %v7818_v2, %v7815_v46  ;;  %v7087_v25 = vrot.slane %v13956_v18, 1 }
 0x651   : > { %10691 = vmatmul.msk.bf16.gmra.mxu3 %vm617_vm0, %v6831_v53 }
 0x652   : > { %v7948_v39 = vpop.f32.mrf.mxu2 }
 0x653   : > { %v14005_v9 = vadd.f32 %v7948_v39, %v7643_v4  ;;  %v6834_v4 = vor.u32 %v6832_v49, %v6830_v5 }
 0x654   : > { %v6958_v43 = vpop.f32.mrf.mxu3 }
 0x655   : > { %v7197_v36 = vpop.f32.mrf.mxu0  ;;  %v7027_v63 = vadd.f32 %v6958_v43, %v13545_v26  ;;  %v6838_v26 = vrot.slane %v6836_v44, 1  ;;  %v7088_v43 = vsel %vm927_vm1, %v7085_v32, %v7087_v25  ;;  %v7462_v32 = vrot.slane %v14020_v50, 1 }
 0x656   : > { %v7271_v28 = vadd.f32 %v7197_v36, %v7024_v1  ;;  %v7573_v47 = vpop.f32.mrf.mxu1  ;;  %v7820_v1 = vsel %vm1548_vm4, %v7810_v42, %v7819_v0  ;;  %v6680_v36 = vunpack.c.l.b16 %v6601_v7  ;;  %v7822_v42 = vshrl.u32 %v14020_v50, 16 }
 0x657   : > { %v6839_v18 = vsel %vm456_vm2, %v6834_v4, %v6838_v26  ;;  %v7463_v7 = vsel %vm927_vm1, %v7460_v55, %v7462_v32 }
 0x658   : > { %v7644_v20 = vadd.f32 %v7570_v30, %v7271_v28  ;;  %v7825_v28 = vshll.u32 %v14020_v50, 16  ;;  %v7824_v49 = vrot.slane %v7822_v42, 1  ;;  %v14046_v42 = vld [vmem:[%s13201_s14 + $0x90] sm:$0xff] }
 0x659   : > { %10818 = vmatmul.msk.bf16.gmra.mxu1 %vm617_vm0, %v7461_v61 }
 0x65a   : > { %v7950_v11 = vpop.f32.mrf.mxu2  ;;  %v7827_v44 = vrot.slane %v7825_v28, 2 }
 0x65b   : > { %v14016_v53 = vadd.f32 %v7950_v11, %v7644_v20 }
 0x65c   : > { %v6960_v34 = vpop.f32.mrf.mxu3 }
 0x65d   : > { %v7200_v39 = vpop.f32.mrf.mxu0  ;;  %v7028_v30 = vadd.f32 %v6960_v34, %v13560_v6  ;;  %v6840_v34 = vshrl.u32 %v14008_v22, 16 }
 0x65e   : > { %v7272_v46 = vadd.f32 %v7200_v39, %v7025_v56  ;;  %v7575_v2 = vpop.f32.mrf.mxu1  ;;  %v14034_v56 = vpack.c.b16 %v6680_v36, %v6680_v36 }
 0x65f   : > { %10848 = vmatmul.msk.bf16.gmra.mxu2 %vm617_vm0, %v7820_v1 }
 0x660   : > { %10720 = vmatmul.msk.bf16.gmra.mxu0 %vm617_vm0, %v7088_v43  ;;  %v7645_v5 = vadd.f32 %v7573_v47, %v7272_v46  ;;  %v6844_v39 = vshll.u32 %v14034_v56, 16  ;;  %v7828_v43 = vor.u32 %v7827_v44, %v7824_v49  ;;  %v7089_v46 = vrot.slane %v13982_v38, 1 }
 0x661   : > { %10692 = vmatmul.msk.bf16.gmra.mxu3 %vm617_vm0, %v6839_v18 }
 0x662   : > { %v7953_v61 = vpop.f32.mrf.mxu2 }
 0x663   : > { %v14032_v6 = vadd.f32 %v7953_v61, %v7645_v5  ;;  %v6842_v5 = vor.u32 %v6840_v34, %v6838_v26  ;;  %v7090_v61 = vsel %vm927_vm1, %v7087_v25, %v7089_v46 }
 0x664   : > { %v6963_v20 = vpop.f32.mrf.mxu3 }
 0x665   : > { %v7202_v11 = vpop.f32.mrf.mxu0  ;;  %v7029_v47 = vadd.f32 %v6963_v20, %v13577_v59  ;;  %v6846_v59 = vrot.slane %v6844_v39, 1  ;;  %v7834_v20 = vshll.u32 %v14046_v42, 16 }
 0x666   : > { %v7273_v4 = vadd.f32 %v7202_v11, %v7026_v12  ;;  %v7578_v1 = vpop.f32.mrf.mxu1  ;;  %v7829_v12 = vsel %vm1548_vm4, %v7819_v0, %v7828_v43  ;;  %v7831_v0 = vshrl.u32 %v14046_v42, 16  ;;  %v8049_v11 = vld [vmem:[%s13201_s14 + $0x8] sm:$0xc] }
 0x667   : > { %v6847_v38 = vsel %vm456_vm2, %v6842_v5, %v6846_v59  ;;  %v7836_v34 = vrot.slane %v7834_v20, 2 }
 0x668   : > { %v7646_v50 = vadd.f32 %v7575_v2, %v7273_v4  ;;  %v8056_v4 = vunpack.c.l.b16 %v8049_v11 }
 0x669   : > { %10819 = vmatmul.msk.bf16.gmra.mxu1 %vm617_vm0, %v7463_v7  ;;  %v7833_v7 = vrot.slane %v7831_v0, 1  ;;  %v7091_v0 = vrot.slane %v14008_v22, 1 }
 0x66a   : > { %v7955_v18 = vpop.f32.mrf.mxu2 }
 0x66b   : > { %v14042_v36 = vadd.f32 %v7955_v18, %v7646_v50  ;;  %v7669_v18 = vld [vmem:[%s13201_s14 + $0x98] sm:$0x3] }
 0x66c   : > { %v6965_v55 = vpop.f32.mrf.mxu3 }
 0x66d   : > { %v7205_v28 = vpop.f32.mrf.mxu0  ;;  %v14050_v2 = vadd.f32 %v6965_v55, %v13598_v23  ;;  %v7464_v23 = vrot.slane %v14046_v42, 1  ;;  %v14559_v55 = vld [vmem:[#allocation3_spill] sm:$0xff]  ;;  %v7332_v42 = vld [vmem:[%s13201_s14 + $0x98] sm:$0x1] }
 0x66e   : > { %v7274_v49 = vadd.f32 %v7205_v28, %v7027_v63  ;;  %v7580_v44 = vpop.f32.mrf.mxu1  ;;  %v14560_v28 = vunpack.c.l.b16 %v14559_v55  ;;  %v8297_v55 = vld [vmem:[%s13201_s14 + $0x14] sm:$0xf] }
 0x66f   : > { %10849 = vmatmul.msk.bf16.gmra.mxu2 %vm617_vm0, %v7829_v12  ;;  %v7465_v12 = vsel %vm927_vm1, %v7462_v32, %v7464_v23 }
 0x670   : > { %10721 = vmatmul.msk.bf16.gmra.mxu0 %vm617_vm0, %v7090_v61  ;;  %v7647_v26 = vadd.f32 %v7578_v1, %v7274_v49  ;;  %v8057_v61 = vpack.c.b16 %v14560_v28, %v8056_v4 }
 0x671   : > { %10693 = vmatmul.msk.bf16.gmra.mxu3 %vm617_vm0, %v6847_v38  ;;  %v7837_v38 = vor.u32 %v7836_v34, %v7833_v7  ;;  %v7092_v34 = vsel %vm927_vm1, %v7089_v46, %v7091_v0 }
 0x672   : > { %v7958_v25 = vpop.f32.mrf.mxu2 }
 0x673   : > { %v14060_v63 = vadd.f32 %v7958_v25, %v7647_v26  ;;  %v7676_v26 = vunpack.c.l.b16 %v7669_v18  ;;  %v11392_v25 = vld [vmem:[%s13201_s14 + $0x10] sm:$0xff] }
 0x674   : > { %v6968_v39 = vpop.f32.mrf.mxu3  ;;  %v8059_v32 = vrot.slane %v11392_v25, 2 }
 0x675   : > { %v7207_v50 = vpop.f32.mrf.mxu0  ;;  %v14064_v1 = vadd.f32 %v6968_v39, %v13620_v58  ;;  %v7411_v58 = vunpack.c.l.b16 %v7332_v42  ;;  %v7838_v39 = vsel %vm1548_vm4, %v7828_v43, %v7837_v38  ;;  %v14076_v4 = vpack.c.b16 %v7676_v26, %v7676_v26 }
 0x676   : > { %v7275_v5 = vadd.f32 %v7207_v50, %v7028_v30  ;;  %v7583_v59 = vpop.f32.mrf.mxu1  ;;  %v8058_v30 = vrot.slane %v8057_v61, 2 }
 0x677   : > { %v7840_v61 = vshrl.u32 %v14076_v4, 16  ;;  %v7843_v42 = vshll.u32 %v14076_v4, 16 }
 0x678   : > { %v7648_v49 = vadd.f32 %v7580_v44, %v7275_v5  ;;  %v7430_v5 = vpack.c.b16 %v7411_v58, %v7411_v58  ;;  %v8060_v28 = vsel %vm1929_vm3, %v8058_v30, %v8059_v32 }
 0x679   : > { %10820 = vmatmul.msk.bf16.gmra.mxu1 %vm617_vm0, %v7465_v12  ;;  %v8296_v12 = vld [vmem:[%s13201_s14 + $0x10] sm:$0xc]  ;;  %v7845_v58 = vrot.slane %v7843_v42, 2 }
 0x67a   : > { %v7960_v20 = vpop.f32.mrf.mxu2  ;;  %v8375_v46 = vunpack.c.l.b16 %v8296_v12 }
 0x67b   : > { %v14072_v11 = vadd.f32 %v7960_v20, %v7648_v49  ;;  %v7842_v20 = vrot.slane %v7840_v61, 1 }
 0x67c   : > { %v6970_v44 = vpop.f32.mrf.mxu3 }
 0x67d   : > { %14561 = vst [vmem:[#allocation2_spill] sm:$0xff] %v14072_v11  ;;  %v7210_v7 = vpop.f32.mrf.mxu0  ;;  %v14080_v50 = vadd.f32 %v6970_v44, %v13632_v15  ;;  %v8376_v15 = vunpack.c.l.b16 %v8297_v55  ;;  %v7846_v12 = vor.u32 %v7845_v58, %v7842_v20  ;;  %v7093_v55 = vrot.slane %v14034_v56, 1 }
 0x67e   : > { %v7276_v22 = vadd.f32 %v7210_v7, %v7029_v47  ;;  %v7585_v18 = vpop.f32.mrf.mxu1  ;;  %v7466_v47 = vrot.slane %v7430_v5, 1 }
 0x67f   : > { %10850 = vmatmul.msk.bf16.gmra.mxu2 %vm617_vm0, %v7838_v39  ;;  %v14092_v39 = vpack.c.b16 %v8376_v15, %v8375_v46  ;;  %v7094_v20 = vsel %vm927_vm1, %v7091_v0, %v7093_v55 }
 0x680   : > { %10722 = vmatmul.msk.bf16.gmra.mxu0 %vm617_vm0, %v7092_v34  ;;  %v7649_v43 = vadd.f32 %v7583_v59, %v7276_v22  ;;  %v7467_v34 = vsel %vm927_vm1, %v7464_v23, %v7466_v47  ;;  %v14100_v22 = vld [vmem:[%s13201_s14 + $0x18] sm:$0xff] }
 0x681   : > { %10864 = vmatmul.msk.bf16.vlgmr.msra.gmra.mxu3 %vm617_vm0, %v8060_v28  ;;  %v8679_v28 = vshrl.u32 %v14092_v39, 16  ;;  %v8687_v61 = vshrl.u32 %v14100_v22, 16  ;;  %v11393_v23 = vld [vmem:[%s13201_s14 + $0x18] sm:$0xff] }
 0x682   : > { %v7963_v49 = vpop.f32.mrf.mxu2  ;;  %v8061_v46 = vrot.slane %v11393_v23, 2 }
 0x683   : > { %v14090_v26 = vadd.f32 %v7963_v49, %v7649_v43  ;;  %v8682_v43 = vshll.u32 %v14092_v39, 16  ;;  %v8681_v56 = vrot.slane %v8679_v28, 2 }
 0x684   : > { %v6973_v25 = vpop.f32.mrf.mxu3 }
 0x685   : > { %14562 = vst [vmem:[#allocation3_spill] sm:$0xff] %v14090_v26  ;;  %v7212_v30 = vpop.f32.mrf.mxu0  ;;  %v14095_v59 = vadd.f32 %v6973_v25, %v13648_v14  ;;  %v8684_v58 = vrot.slane %v8682_v43, 3  ;;  %v9049_v25 = vld [vmem:[%s13201_s14 + $0x10] sm:$0x8]  ;;  %v8689_v26 = vrot.slane %v8687_v61, 2 }
 0x686   : > { %v7277_v44 = vadd.f32 %v7212_v30, %v14050_v2  ;;  %v7588_v7 = vpop.f32.mrf.mxu1  ;;  %v8690_v2 = vshll.u32 %v14100_v22, 16 }
 0x687   : > { %v8685_v55 = vor.u32 %v8684_v58, %v8681_v56  ;;  %v11394_v56 = vld [vmem:[%s13201_s14 + $0x20] sm:$0xff] }
 0x688   : > { %v7650_v5 = vadd.f32 %v7585_v18, %v7277_v44  ;;  %v7847_v18 = vsel %vm1548_vm4, %v7837_v38, %v7846_v12  ;;  %v8692_v11 = vrot.slane %v8690_v2, 3  ;;  %v9056_v12 = vunpack.c.l.b16 %v9049_v25 }
 0x689   : > { %10821 = vmatmul.msk.bf16.gmra.mxu1 %vm617_vm0, %v7467_v34  ;;  %v8063_v58 = vrot.slane %v11394_v56, 2 }
 0x68a   : > { %v7965_v14 = vpop.f32.mrf.mxu2  ;;  %v8693_v28 = vor.u32 %v8692_v11, %v8689_v26  ;;  %v8431_v11 = vrot.slane %v14092_v39, 2 }
 0x68b   : > { %v14108_v42 = vadd.f32 %v7965_v14, %v7650_v5  ;;  %v8062_v5 = vsel %vm1929_vm3, %v8059_v32, %v8061_v46 }
 0x68c   : > { %v6975_v49 = vpop.f32.mrf.mxu3  ;;  %v8694_v23 = vsel %vm2550_vm5, %v8685_v55, %v8693_v28  ;;  %v8064_v55 = vsel %vm1929_vm3, %v8061_v46, %v8063_v58 }
 0x68d   : > { %v7215_v47 = vpop.f32.mrf.mxu0  ;;  %v7034_v30 = vadd.f32 %v6975_v49, %v13660_v10 }
 0x68e   : > { %v7278_v44 = vadd.f32 %v7215_v47, %v14064_v1  ;;  %v7590_v34 = vpop.f32.mrf.mxu1  ;;  %v9057_v1 = vpack.c.b16 %v8376_v15, %v9056_v12  ;;  %v9059_v47 = vrot.slane %v14100_v22, 3  ;;  %v8432_v15 = vrot.slane %v14100_v22, 2 }
 0x68f   : > { %10851 = vmatmul.msk.bf16.gmra.mxu2 %vm617_vm0, %v7847_v18 }
 0x690   : > { %10723 = vmatmul.msk.bf16.gmra.mxu0 %vm617_vm0, %v7094_v20  ;;  %v7651_v38 = vadd.f32 %v7588_v7, %v7278_v44  ;;  %v14126_v7 = vld [vmem:[%s13201_s14 + $0x20] sm:$0xff]  ;;  %v9058_v49 = vrot.slane %v9057_v1, 3 }
 0x691   : > { %10865 = vmatmul.msk.bf16.gmra.mxu3 %vm617_vm0, %v8062_v5  ;;  %v8433_v5 = vsel %vm1929_vm3, %v8431_v11, %v8432_v15 }
 0x692   : > { %v7968_v0 = vpop.f32.mrf.mxu2  ;;  %v9060_v25 = vsel %vm2931_vm6, %v9058_v49, %v9059_v47 }
 0x693   : > { %v14120_v10 = vadd.f32 %v7968_v0, %v7651_v38 }
 0x694   : > { %v6978_v43 = vpop.f32.mrf.mxu3 }
 0x695   : > { %v7217_v14 = vpop.f32.mrf.mxu0  ;;  %v7035_v61 = vadd.f32 %v6978_v43, %v13675_v35  ;;  %v8696_v35 = vshrl.u32 %v14126_v7, 16 }
 0x696   : > { %v7279_v32 = vadd.f32 %v7217_v14, %v14080_v50  ;;  %v7593_v2 = vpop.f32.mrf.mxu1  ;;  %v8699_v50 = vshll.u32 %v14126_v7, 16 }
 0x697   : > { %v8698_v12 = vrot.slane %v8696_v35, 2  ;;  %v8434_v35 = vrot.slane %v14126_v7, 2 }
 0x698   : > { %v7652_v18 = vadd.f32 %v7590_v34, %v7279_v32  ;;  %v8701_v0 = vrot.slane %v8699_v50, 3 }
 0x699   : > { %10992 = vmatmul.msk.bf16.vlgmr.msra.gmra.mxu1 %vm617_vm0, %v8694_v23 }
 0x69a   : > { %v7970_v26 = vpop.f32.mrf.mxu2  ;;  %v8702_v14 = vor.u32 %v8701_v0, %v8698_v12 }
 0x69b   : > { %v14134_v20 = vadd.f32 %v7970_v26, %v7652_v18  ;;  %v14150_v26 = vld [vmem:[%s13201_s14 + $0x28] sm:$0xff] }
 0x69c   : > { %v6980_v44 = vpop.f32.mrf.mxu3  ;;  %v8703_v11 = vsel %vm2550_vm5, %v8693_v28, %v8702_v14  ;;  %v8705_v56 = vshrl.u32 %v14150_v26, 16 }
 0x69d   : > { %v7220_v34 = vpop.f32.mrf.mxu0  ;;  %v7036_v38 = vadd.f32 %v6980_v44, %v13686_v3 }
 0x69e   : > { %v7280_v39 = vadd.f32 %v7220_v34, %v14095_v59  ;;  %v7595_v22 = vpop.f32.mrf.mxu1 }
 0x69f   : > { %11022 = vmatmul.msk.bf16.vlgmr.msra.gmra.mxu2 %vm617_vm0, %v9060_v25  ;;  %v8708_v25 = vshll.u32 %v14150_v26, 16 }
 0x6a0   : > { %10962 = vmatmul.msk.bf16.vlgmr.msra.gmra.mxu0 %vm617_vm0, %v8433_v5  ;;  %v7653_v1 = vadd.f32 %v7593_v2, %v7280_v39  ;;  %v9061_v2 = vrot.slane %v14126_v7, 3  ;;  %v8435_v39 = vsel %vm1929_vm3, %v8432_v15, %v8434_v35  ;;  %v8707_v7 = vrot.slane %v8705_v56, 2 }
 0x6a1   : > { %10866 = vmatmul.msk.bf16.gmra.mxu3 %vm617_vm0, %v8064_v55  ;;  %v8710_v55 = vrot.slane %v8708_v25, 3  ;;  %v8436_v56 = vrot.slane %v14150_v26, 2 }
 0x6a2   : > { %v7973_v43 = vpop.f32.mrf.mxu2  ;;  %v9062_v28 = vsel %vm2931_vm6, %v9059_v47, %v9061_v2 }
 0x6a3   : > { %v14145_v32 = vadd.f32 %v7973_v43, %v7653_v1  ;;  %v8711_v47 = vor.u32 %v8710_v55, %v8707_v7 }
 0x6a4   : > { %v6983_v3 = vpop.f32.mrf.mxu3 }
 0x6a5   : > { %v7222_v59 = vpop.f32.mrf.mxu0  ;;  %v7037_v23 = vadd.f32 %v6983_v3, %v13701_v13  ;;  %v11395_v13 = vld [vmem:[%s13201_s14 + $0x28] sm:$0xff] }
 0x6a6   : > { %v7281_v18 = vadd.f32 %v7222_v59, %v7034_v30  ;;  %v7598_v49 = vpop.f32.mrf.mxu1  ;;  %v8065_v30 = vrot.slane %v11395_v13, 2 }
 0x6a8   : > { %v7654_v46 = vadd.f32 %v7595_v22, %v7281_v18  ;;  %v8066_v1 = vsel %vm1929_vm3, %v8063_v58, %v8065_v30 }
 0x6a9   : > { %10993 = vmatmul.msk.bf16.gmra.mxu1 %vm617_vm0, %v8703_v11 }
 0x6aa   : > { %v7975_v50 = vpop.f32.mrf.mxu2 }
 0x6ab   : > { %v14157_v44 = vadd.f32 %v7975_v50, %v7654_v46  ;;  %v8712_v46 = vsel %vm2550_vm5, %v8702_v14, %v8711_v47  ;;  %v14172_v50 = vld [vmem:[%s13201_s14 + $0x30] sm:$0xff] }
 0x6ac   : > { %v6985_v34 = vpop.f32.mrf.mxu3  ;;  %v8714_v13 = vshrl.u32 %v14172_v50, 16 }
 0x6ad   : > { %v7225_v5 = vpop.f32.mrf.mxu0  ;;  %v7038_v22 = vadd.f32 %v6985_v34, %v13712_v41 }
 0x6ae   : > { %v7282_v12 = vadd.f32 %v7225_v5, %v7035_v61  ;;  %v7600_v0 = vpop.f32.mrf.mxu1 }
 0x6af   : > { %11023 = vmatmul.msk.bf16.gmra.mxu2 %vm617_vm0, %v9062_v28  ;;  %v8717_v28 = vshll.u32 %v14172_v50, 16 }
 0x6b0   : > { %10963 = vmatmul.msk.bf16.gmra.mxu0 %vm617_vm0, %v8435_v39  ;;  %v7655_v43 = vadd.f32 %v7598_v49, %v7282_v12  ;;  %v9063_v49 = vrot.slane %v14150_v26, 3  ;;  %v8437_v12 = vsel %vm1929_vm3, %v8434_v35, %v8436_v56  ;;  %v8716_v26 = vrot.slane %v8714_v13, 2 }
 0x6b1   : > { %10867 = vmatmul.msk.bf16.gmra.mxu3 %vm617_vm0, %v8066_v1  ;;  %v8719_v1 = vrot.slane %v8717_v28, 3  ;;  %v8438_v13 = vrot.slane %v14172_v50, 2 }
 0x6b2   : > { %v7978_v3 = vpop.f32.mrf.mxu2  ;;  %v9064_v14 = vsel %vm2931_vm6, %v9061_v2, %v9063_v49 }
 0x6b3   : > { %v14167_v59 = vadd.f32 %v7978_v3, %v7655_v43  ;;  %v8720_v2 = vor.u32 %v8719_v1, %v8716_v26 }
 0x6b4   : > { %v6988_v41 = vpop.f32.mrf.mxu3 }
 0x6b5   : > { %v7227_v61 = vpop.f32.mrf.mxu0  ;;  %v7039_v15 = vadd.f32 %v6988_v41, %v13727_v21  ;;  %v11396_v21 = vld [vmem:[%s13201_s14 + $0x30] sm:$0xff] }
 0x6b6   : > { %v7283_v18 = vadd.f32 %v7227_v61, %v7036_v38  ;;  %v7603_v11 = vpop.f32.mrf.mxu1  ;;  %v8067_v38 = vrot.slane %v11396_v21, 2 }
 0x6b8   : > { %v7656_v58 = vadd.f32 %v7600_v0, %v7283_v18  ;;  %v8068_v43 = vsel %vm1929_vm3, %v8065_v30, %v8067_v38 }
 0x6b9   : > { %10994 = vmatmul.msk.bf16.gmra.mxu1 %vm617_vm0, %v8712_v46 }
 0x6ba   : > { %v7980_v25 = vpop.f32.mrf.mxu2 }
 0x6bb   : > { %v14179_v34 = vadd.f32 %v7980_v25, %v7656_v58  ;;  %v8721_v58 = vsel %vm2550_vm5, %v8711_v47, %v8720_v2  ;;  %v14194_v25 = vld [vmem:[%s13201_s14 + $0x38] sm:$0xff] }
 0x6bc   : > { %v6990_v5 = vpop.f32.mrf.mxu3  ;;  %v8723_v21 = vshrl.u32 %v14194_v25, 16 }
 0x6bd   : > { %v7230_v39 = vpop.f32.mrf.mxu0  ;;  %v7040_v0 = vadd.f32 %v6990_v5, %v13738_v27 }
 0x6be   : > { %v7284_v7 = vadd.f32 %v7230_v39, %v7037_v23  ;;  %v7605_v55 = vpop.f32.mrf.mxu1 }
 0x6bf   : > { %11024 = vmatmul.msk.bf16.gmra.mxu2 %vm617_vm0, %v9064_v14  ;;  %v8726_v14 = vshll.u32 %v14194_v25, 16 }
 0x6c0   : > { %10964 = vmatmul.msk.bf16.gmra.mxu0 %vm617_vm0, %v8437_v12  ;;  %v7657_v3 = vadd.f32 %v7603_v11, %v7284_v7  ;;  %v9065_v11 = vrot.slane %v14172_v50, 3  ;;  %v8439_v7 = vsel %vm1929_vm3, %v8436_v56, %v8438_v13  ;;  %v8725_v50 = vrot.slane %v8723_v21, 2 }
 0x6c1   : > { %10868 = vmatmul.msk.bf16.gmra.mxu3 %vm617_vm0, %v8068_v43  ;;  %v8728_v43 = vrot.slane %v8726_v14, 3  ;;  %v8440_v21 = vrot.slane %v14194_v25, 2 }
 0x6c2   : > { %v7983_v41 = vpop.f32.mrf.mxu2  ;;  %v9066_v47 = vsel %vm2931_vm6, %v9063_v49, %v9065_v11 }
 0x6c3   : > { %v14189_v61 = vadd.f32 %v7983_v41, %v7657_v3  ;;  %v8729_v49 = vor.u32 %v8728_v43, %v8725_v50 }
 0x6c4   : > { %v6993_v27 = vpop.f32.mrf.mxu3 }
 0x6c5   : > { %v7232_v23 = vpop.f32.mrf.mxu0  ;;  %v7041_v35 = vadd.f32 %v6993_v27, %v13753_v29  ;;  %v11397_v29 = vld [vmem:[%s13201_s14 + $0x38] sm:$0xff] }
 0x6c6   : > { %v7285_v18 = vadd.f32 %v7232_v23, %v7038_v22  ;;  %v7608_v46 = vpop.f32.mrf.mxu1  ;;  %v8069_v22 = vrot.slane %v11397_v29, 2 }
 0x6c8   : > { %v7658_v30 = vadd.f32 %v7605_v55, %v7285_v18  ;;  %v8070_v3 = vsel %vm1929_vm3, %v8067_v38, %v8069_v22 }
 0x6c9   : > { %10995 = vmatmul.msk.bf16.gmra.mxu1 %vm617_vm0, %v8721_v58 }
 0x6ca   : > { %v7985_v28 = vpop.f32.mrf.mxu2 }
 0x6cb   : > { %v14201_v5 = vadd.f32 %v7985_v28, %v7658_v30  ;;  %v8730_v30 = vsel %vm2550_vm5, %v8720_v2, %v8729_v49  ;;  %v14216_v28 = vld [vmem:[%s13201_s14 + $0x40] sm:$0xff] }
 0x6cc   : > { %v6995_v39 = vpop.f32.mrf.mxu3  ;;  %v8732_v29 = vshrl.u32 %v14216_v28, 16 }
 0x6cd   : > { %v7235_v12 = vpop.f32.mrf.mxu0  ;;  %v7042_v55 = vadd.f32 %v6995_v39, %v13764_v60 }
 0x6ce   : > { %v7286_v26 = vadd.f32 %v7235_v12, %v7039_v15  ;;  %v7610_v1 = vpop.f32.mrf.mxu1 }
 0x6cf   : > { %11025 = vmatmul.msk.bf16.gmra.mxu2 %vm617_vm0, %v9066_v47  ;;  %v8735_v47 = vshll.u32 %v14216_v28, 16 }
 0x6d0   : > { %10965 = vmatmul.msk.bf16.gmra.mxu0 %vm617_vm0, %v8439_v7  ;;  %v7659_v41 = vadd.f32 %v7608_v46, %v7286_v26  ;;  %v9067_v46 = vrot.slane %v14194_v25, 3  ;;  %v8441_v26 = vsel %vm1929_vm3, %v8438_v13, %v8440_v21  ;;  %v8734_v25 = vrot.slane %v8732_v29, 2 }
 0x6d1   : > { %10869 = vmatmul.msk.bf16.gmra.mxu3 %vm617_vm0, %v8070_v3  ;;  %v8737_v3 = vrot.slane %v8735_v47, 3  ;;  %v8442_v29 = vrot.slane %v14216_v28, 2 }
 0x6d2   : > { %v7988_v27 = vpop.f32.mrf.mxu2  ;;  %v9068_v2 = vsel %vm2931_vm6, %v9065_v11, %v9067_v46 }
 0x6d3   : > { %v14211_v23 = vadd.f32 %v7988_v27, %v7659_v41  ;;  %v8738_v11 = vor.u32 %v8737_v3, %v8734_v25 }
 0x6d4   : > { %v6998_v60 = vpop.f32.mrf.mxu3 }
 0x6d5   : > { %v7237_v15 = vpop.f32.mrf.mxu0  ;;  %v7043_v56 = vadd.f32 %v6998_v60, %v13779_v40  ;;  %v11398_v40 = vld [vmem:[%s13201_s14 + $0x40] sm:$0xff] }
 0x6d6   : > { %v7287_v18 = vadd.f32 %v7237_v15, %v7040_v0  ;;  %v7613_v58 = vpop.f32.mrf.mxu1  ;;  %v8071_v0 = vrot.slane %v11398_v40, 2 }
 0x6d8   : > { %v7660_v38 = vadd.f32 %v7610_v1, %v7287_v18  ;;  %v8072_v41 = vsel %vm1929_vm3, %v8069_v22, %v8071_v0 }
 0x6d9   : > { %10996 = vmatmul.msk.bf16.gmra.mxu1 %vm617_vm0, %v8730_v30 }
 0x6da   : > { %v7990_v14 = vpop.f32.mrf.mxu2 }
 0x6db   : > { %v14223_v39 = vadd.f32 %v7990_v14, %v7660_v38  ;;  %v8739_v38 = vsel %vm2550_vm5, %v8729_v49, %v8738_v11  ;;  %v14238_v14 = vld [vmem:[%s13201_s14 + $0x48] sm:$0xff] }
 0x6dc   : > { %v7000_v12 = vpop.f32.mrf.mxu3  ;;  %v8741_v40 = vshrl.u32 %v14238_v14, 16 }
 0x6dd   : > { %v7240_v7 = vpop.f32.mrf.mxu0  ;;  %v7044_v1 = vadd.f32 %v7000_v12, %v13790_v33 }
 0x6de   : > { %v7288_v50 = vadd.f32 %v7240_v7, %v7041_v35  ;;  %v7615_v43 = vpop.f32.mrf.mxu1 }
 0x6df   : > { %11026 = vmatmul.msk.bf16.gmra.mxu2 %vm617_vm0, %v9068_v2  ;;  %v8744_v2 = vshll.u32 %v14238_v14, 16 }
 0x6e0   : > { %10966 = vmatmul.msk.bf16.gmra.mxu0 %vm617_vm0, %v8441_v26  ;;  %v7661_v27 = vadd.f32 %v7613_v58, %v7288_v50  ;;  %v9069_v58 = vrot.slane %v14216_v28, 3  ;;  %v8443_v50 = vsel %vm1929_vm3, %v8440_v21, %v8442_v29  ;;  %v8743_v28 = vrot.slane %v8741_v40, 2 }
 0x6e1   : > { %10870 = vmatmul.msk.bf16.gmra.mxu3 %vm617_vm0, %v8072_v41  ;;  %v8746_v41 = vrot.slane %v8744_v2, 3  ;;  %v8444_v40 = vrot.slane %v14238_v14, 2 }
 0x6e2   : > { %v7993_v60 = vpop.f32.mrf.mxu2  ;;  %v9070_v49 = vsel %vm2931_vm6, %v9067_v46, %v9069_v58 }
 0x6e3   : > { %v14233_v15 = vadd.f32 %v7993_v60, %v7661_v27  ;;  %v8747_v46 = vor.u32 %v8746_v41, %v8743_v28 }
 0x6e4   : > { %v7003_v33 = vpop.f32.mrf.mxu3 }
 0x6e5   : > { %v7242_v35 = vpop.f32.mrf.mxu0  ;;  %v7045_v13 = vadd.f32 %v7003_v33, %v13807_v54  ;;  %v11399_v54 = vld [vmem:[%s13201_s14 + $0x48] sm:$0xff] }
 0x6e6   : > { %v7289_v18 = vadd.f32 %v7242_v35, %v7042_v55  ;;  %v7618_v30 = vpop.f32.mrf.mxu1  ;;  %v8073_v55 = vrot.slane %v11399_v54, 2 }
 0x6e8   : > { %v7662_v22 = vadd.f32 %v7615_v43, %v7289_v18  ;;  %v8074_v27 = vsel %vm1929_vm3, %v8071_v0, %v8073_v55 }
 0x6e9   : > { %10997 = vmatmul.msk.bf16.gmra.mxu1 %vm617_vm0, %v8739_v38 }
 0x6ea   : > { %v7995_v47 = vpop.f32.mrf.mxu2 }
 0x6eb   : > { %v14245_v12 = vadd.f32 %v7995_v47, %v7662_v22  ;;  %v8748_v22 = vsel %vm2550_vm5, %v8738_v11, %v8747_v46  ;;  %v14260_v47 = vld [vmem:[%s13201_s14 + $0x50] sm:$0xff] }
 0x6ec   : > { %v7005_v7 = vpop.f32.mrf.mxu3  ;;  %v8750_v54 = vshrl.u32 %v14260_v47, 16 }
 0x6ed   : > { %v7245_v26 = vpop.f32.mrf.mxu0  ;;  %v7046_v43 = vadd.f32 %v7005_v7, %v13823_v19 }
 0x6ee   : > { %v7290_v25 = vadd.f32 %v7245_v26, %v7043_v56  ;;  %v7620_v3 = vpop.f32.mrf.mxu1 }
 0x6ef   : > { %11027 = vmatmul.msk.bf16.gmra.mxu2 %vm617_vm0, %v9070_v49  ;;  %v8753_v49 = vshll.u32 %v14260_v47, 16 }
 0x6f0   : > { %10967 = vmatmul.msk.bf16.gmra.mxu0 %vm617_vm0, %v8443_v50  ;;  %v7663_v60 = vadd.f32 %v7618_v30, %v7290_v25  ;;  %v9071_v30 = vrot.slane %v14238_v14, 3  ;;  %v8445_v25 = vsel %vm1929_vm3, %v8442_v29, %v8444_v40  ;;  %v8752_v14 = vrot.slane %v8750_v54, 2 }
 0x6f1   : > { %10871 = vmatmul.msk.bf16.gmra.mxu3 %vm617_vm0, %v8074_v27  ;;  %v8755_v27 = vrot.slane %v8753_v49, 3 }
 0x6f2   : > { %v7998_v33 = vpop.f32.mrf.mxu2  ;;  %v9072_v11 = vsel %vm2931_vm6, %v9069_v58, %v9071_v30 }
 0x6f3   : > { %v14255_v35 = vadd.f32 %v7998_v33, %v7663_v60  ;;  %v8756_v58 = vor.u32 %v8755_v27, %v8752_v14 }
 0x6f4   : > { %v7008_v19 = vpop.f32.mrf.mxu3 }
 0x6f5   : > { %v7247_v56 = vpop.f32.mrf.mxu0  ;;  %v7047_v21 = vadd.f32 %v7008_v19, %v13844_v52  ;;  %v11400_v52 = vld [vmem:[%s13201_s14 + $0x50] sm:$0xff] }
 0x6f6   : > { %v7291_v18 = vadd.f32 %v7247_v56, %v7044_v1  ;;  %v7623_v38 = vpop.f32.mrf.mxu1  ;;  %v8075_v1 = vrot.slane %v11400_v52, 2 }
 0x6f8   : > { %v7664_v0 = vadd.f32 %v7620_v3, %v7291_v18  ;;  %v8076_v60 = vsel %vm1929_vm3, %v8073_v55, %v8075_v1  ;;  %v9073_v55 = vrot.slane %v14260_v47, 3 }
 0x6f9   : > { %10998 = vmatmul.msk.bf16.gmra.mxu1 %vm617_vm0, %v8748_v22  ;;  %v8757_v22 = vsel %vm2550_vm5, %v8747_v46, %v8756_v58 }
 0x6fa   : > { %v8000_v2 = vpop.f32.mrf.mxu2  ;;  %v9074_v46 = vsel %vm2931_vm6, %v9071_v30, %v9073_v55 }
 0x6fb   : > { %v14267_v7 = vadd.f32 %v8000_v2, %v7664_v0  ;;  %v14281_v0 = vld [vmem:[%s13201_s14 + $0x58] sm:$0xff] }
 0x6fc   : > { %v7010_v26 = vpop.f32.mrf.mxu3  ;;  %v8759_v49 = vshrl.u32 %v14281_v0, 16  ;;  %v8762_v52 = vshll.u32 %v14281_v0, 16 }
 0x6fd   : > { %v7250_v50 = vpop.f32.mrf.mxu0  ;;  %v7048_v3 = vadd.f32 %v7010_v26, %v13859_v17 }
 0x6fe   : > { %v7292_v28 = vadd.f32 %v7250_v50, %v7045_v13  ;;  %v7625_v41 = vpop.f32.mrf.mxu1  ;;  %v8764_v27 = vrot.slane %v8762_v52, 3 }
 0x6ff   : > { %11028 = vmatmul.msk.bf16.gmra.mxu2 %vm617_vm0, %v9072_v11 }
 0x700   : > { %10968 = vmatmul.msk.bf16.gmra.mxu0 %vm617_vm0, %v8445_v25  ;;  %v7665_v33 = vadd.f32 %v7623_v38, %v7292_v28  ;;  %v8446_v38 = vrot.slane %v14260_v47, 2  ;;  %v8761_v47 = vrot.slane %v8759_v49, 2  ;;  %v8448_v49 = vrot.slane %v14281_v0, 2 }
 0x701   : > { %10872 = vmatmul.msk.bf16.gmra.mxu3 %vm617_vm0, %v8076_v60 }
 0x702   : > { %v8003_v19 = vpop.f32.mrf.mxu2  ;;  %v8447_v28 = vsel %vm1929_vm3, %v8444_v40, %v8446_v38 }
 0x703   : > { %v14277_v29 = vadd.f32 %v8003_v19, %v7665_v33  ;;  %v8765_v19 = vor.u32 %v8764_v27, %v8761_v47  ;;  %v8449_v27 = vsel %vm1929_vm3, %v8446_v38, %v8448_v49 }
 0x704   : > { %v8170_v13 = vpop.f32.mrf.mxu3 }
 0x705   : > { %v7252_v17 = vpop.f32.mrf.mxu0 }
 0x706   : > { %v7293_v56 = vadd.f32 %v7252_v17, %v7046_v43  ;;  %v7628_v18 = vpop.f32.mrf.mxu1  ;;  %v11401_v43 = vld [vmem:[%s13201_s14 + $0x58] sm:$0xff] }
 0x707   : > { %v8077_v26 = vrot.slane %v11401_v43, 2 }
 0x708   : > { %v7666_v2 = vadd.f32 %v7625_v41, %v7293_v56 }
 0x709   : > { %10999 = vmatmul.msk.bf16.gmra.mxu1 %vm617_vm0, %v8757_v22  ;;  %v8078_v60 = vsel %vm1929_vm3, %v8075_v1, %v8077_v26  ;;  %v14303_v1 = vld [vmem:[%s13201_s14 + $0x60] sm:$0xff] }
 0x70a   : > { %v8005_v54 = vpop.f32.mrf.mxu2  ;;  %v8768_v43 = vshrl.u32 %v14303_v1, 16 }
 0x70b   : > { %v14288_v11 = vadd.f32 %v8005_v54, %v7666_v2  ;;  %v8766_v2 = vsel %vm2550_vm5, %v8756_v58, %v8765_v19 }
 0x70c   : > { %v8172_v25 = vpop.f32.mrf.mxu3 }
 0x70d   : > { %v7255_v50 = vpop.f32.mrf.mxu0 }
 0x70e   : > { %v7294_v41 = vadd.f32 %v7255_v50, %v7047_v21  ;;  %v7630_v14 = vpop.f32.mrf.mxu1  ;;  %v11402_v50 = vld [vmem:[%s13201_s14 + $0x60] sm:$0xff] }
 0x70f   : > { %11029 = vmatmul.msk.bf16.gmra.mxu2 %vm617_vm0, %v9074_v46  ;;  %v8771_v46 = vshll.u32 %v14303_v1, 16  ;;  %v8079_v58 = vrot.slane %v11402_v50, 2  ;;  %v9077_v50 = vrot.slane %v14303_v1, 3 }
 0x710   : > { %10969 = vmatmul.msk.bf16.gmra.mxu0 %vm617_vm0, %v8447_v28  ;;  %v7667_v33 = vadd.f32 %v7628_v18, %v7294_v41  ;;  %v9075_v18 = vrot.slane %v14281_v0, 3  ;;  %v8260_v28 = vadd.f32 %v8170_v13, %v13875_v24 }
 0x711   : > { %10873 = vmatmul.msk.bf16.gmra.mxu3 %vm617_vm0, %v8078_v60 }
 0x712   : > { %v8008_v30 = vpop.f32.mrf.mxu2  ;;  %v9076_v41 = vsel %vm2931_vm6, %v9073_v55, %v9075_v18 }
 0x713   : > { %v14298_v17 = vadd.f32 %v8008_v30, %v7667_v33  ;;  %v8770_v33 = vrot.slane %v8768_v43, 2  ;;  %v8773_v30 = vrot.slane %v8771_v46, 3  ;;  %v14330_v43 = vld [vmem:[%s13201_s14 + $0x68] sm:$0xff] }
 0x714   : > { %v8175_v40 = vpop.f32.mrf.mxu3 }
 0x715   : > { %v7257_v21 = vpop.f32.mrf.mxu0  ;;  %v8774_v55 = vor.u32 %v8773_v30, %v8770_v33  ;;  %v8262_v33 = vadd.f32 %v8175_v40, %v13901_v8 }
 0x716   : > { %v7295_v56 = vadd.f32 %v7257_v21, %v7048_v3  ;;  %v8923_v22 = vpop.f32.mrf.mxu1  ;;  %v8080_v21 = vsel %vm1929_vm3, %v8077_v26, %v8079_v58 }
 0x718   : > { %v7668_v54 = vadd.f32 %v7630_v14, %v7295_v56  ;;  %v8261_v56 = vadd.f32 %v8172_v25, %v13886_v37  ;;  %v8777_v37 = vshrl.u32 %v14330_v43, 16  ;;  %v8780_v25 = vshll.u32 %v14330_v43, 16 }
 0x719   : > { %11000 = vmatmul.msk.bf16.gmra.mxu1 %vm617_vm0, %v8766_v2 }
 0x71a   : > { %v8010_v52 = vpop.f32.mrf.mxu2 }
 0x71b   : > { %v14311_v3 = vadd.f32 %v8010_v52, %v7668_v54  ;;  %v8775_v52 = vsel %vm2550_vm5, %v8765_v19, %v8774_v55  ;;  %v9078_v19 = vsel %vm2931_vm6, %v9075_v18, %v9077_v50 }
 0x71c   : > { %v8177_v14 = vpop.f32.mrf.mxu3 }
 0x71d   : > { %v8543_v47 = vpop.f32.mrf.mxu0 }
 0x71e   : > { %v8633_v60 = vadd.f32 %v8543_v47, %v8260_v28  ;;  %v8925_v0 = vpop.f32.mrf.mxu1  ;;  %v8450_v28 = vrot.slane %v14303_v1, 2 }
 0x71f   : > { %11030 = vmatmul.msk.bf16.gmra.mxu2 %vm617_vm0, %v9076_v41 }
 0x720   : > { %10970 = vmatmul.msk.bf16.gmra.mxu0 %vm617_vm0, %v8449_v27  ;;  %v9013_v24 = vadd.f32 %v8923_v22, %v8633_v60  ;;  %v11403_v27 = vld [vmem:[%s13201_s14 + $0x68] sm:$0xff] }
 0x721   : > { %10874 = vmatmul.msk.bf16.gmra.mxu3 %vm617_vm0, %v8080_v21  ;;  %v8081_v60 = vrot.slane %v11403_v27, 2  ;;  %v8451_v21 = vsel %vm1929_vm3, %v8448_v49, %v8450_v28 }
 0x722   : > { %v9170_v13 = vpop.f32.mrf.mxu2 }
 0x723   : > { %v9260_v38 = vadd.f32 %v9170_v13, %v9013_v24  ;;  %v8779_v13 = vrot.slane %v8777_v37, 2 }
 0x724   : > { %v8180_v2 = vpop.f32.mrf.mxu3 }
 0x725   : > { %9296 = vst [vmem:[%s14323_s9] sm:$0xff] %v9260_v38  ;;  %v8545_v26 = vpop.f32.mrf.mxu0  ;;  %v8782_v38 = vrot.slane %v8780_v25, 3 }
 0x726   : > { %v8634_v54 = vadd.f32 %v8545_v26, %v8261_v56  ;;  %v8928_v22 = vpop.f32.mrf.mxu1  ;;  %v8082_v56 = vsel %vm1929_vm3, %v8079_v58, %v8081_v60  ;;  %v14350_v58 = vld [vmem:[%s13201_s14 + $0x70] sm:$0xff] }
 0x727   : > { %v8783_v18 = vor.u32 %v8782_v38, %v8779_v13 }
 0x728   : > { %v9014_v46 = vadd.f32 %v8925_v0, %v8634_v54  ;;  %v8263_v54 = vadd.f32 %v8177_v14, %v13912_v57  ;;  %v8786_v57 = vshrl.u32 %v14350_v58, 16  ;;  %v8789_v14 = vshll.u32 %v14350_v58, 16 }
 0x729   : > { %11001 = vmatmul.msk.bf16.gmra.mxu1 %vm617_vm0, %v8775_v52  ;;  %v8784_v37 = vsel %vm2550_vm5, %v8774_v55, %v8783_v18 }
 0x72a   : > { %v9172_v41 = vpop.f32.mrf.mxu2 }
 0x72b   : > { %v9261_v47 = vadd.f32 %v9172_v41, %v9014_v46 }
 0x72c   : > { %v8182_v0 = vpop.f32.mrf.mxu3 }
 0x72d   : > { %9297 = vst [vmem:[%s14323_s9 + $0x8] sm:$0xff] %v9261_v47  ;;  %v8548_v30 = vpop.f32.mrf.mxu0  ;;  %v8452_v47 = vrot.slane %v14330_v43, 2 }
 0x72e   : > { %v8635_v24 = vadd.f32 %v8548_v30, %v8262_v33  ;;  %v8930_v1 = vpop.f32.mrf.mxu1 }
 0x72f   : > { %11031 = vmatmul.msk.bf16.gmra.mxu2 %vm617_vm0, %v9078_v19  ;;  %v11404_v19 = vld [vmem:[%s13201_s14 + $0x70] sm:$0xff]  ;;  %v8453_v13 = vsel %vm1929_vm3, %v8450_v28, %v8452_v47 }
 0x730   : > { %10971 = vmatmul.msk.bf16.gmra.mxu0 %vm617_vm0, %v8451_v21  ;;  %v9015_v8 = vadd.f32 %v8928_v22, %v8635_v24  ;;  %v9079_v22 = vrot.slane %v14330_v43, 3  ;;  %v8083_v30 = vrot.slane %v11404_v19, 2  ;;  %v8264_v21 = vadd.f32 %v8180_v2, %v13927_v62  ;;  %v11405_v19 = vld [vmem:[%s13201_s14 + $0x78] sm:$0xff] }
 0x731   : > { %10875 = vmatmul.msk.bf16.gmra.mxu3 %vm617_vm0, %v8082_v56  ;;  %v8788_v56 = vrot.slane %v8786_v57, 2  ;;  %v8454_v57 = vrot.slane %v14350_v58, 2 }
 0x732   : > { %v9175_v40 = vpop.f32.mrf.mxu2  ;;  %v9080_v55 = vsel %vm2931_vm6, %v9077_v50, %v9079_v22 }
 0x733   : > { %v9262_v26 = vadd.f32 %v9175_v40, %v9015_v8  ;;  %v8791_v8 = vrot.slane %v8789_v14, 3  ;;  %v8084_v40 = vsel %vm1929_vm3, %v8081_v60, %v8083_v30  ;;  %v14370_v60 = vld [vmem:[%s13201_s14 + $0x78] sm:$0xff] }
 0x734   : > { %v8185_v49 = vpop.f32.mrf.mxu3 }
 0x735   : > { %9298 = vst [vmem:[%s14323_s9 + $0x10] sm:$0xff] %v9262_v26  ;;  %v8550_v52 = vpop.f32.mrf.mxu0  ;;  %v8792_v50 = vor.u32 %v8791_v8, %v8788_v56 }
 0x736   : > { %v8636_v46 = vadd.f32 %v8550_v52, %v8263_v54  ;;  %v8933_v41 = vpop.f32.mrf.mxu1  ;;  %v8265_v54 = vadd.f32 %v8182_v0, %v13938_v45  ;;  %v8795_v45 = vshrl.u32 %v14370_v60, 16  ;;  %v8798_v0 = vshll.u32 %v14370_v60, 16 }
 0x738   : > { %v9016_v25 = vadd.f32 %v8930_v1, %v8636_v46  ;;  %v8797_v56 = vrot.slane %v8795_v45, 2  ;;  %v8800_v8 = vrot.slane %v8798_v0, 3  ;;  %v11406_v0 = vld [vmem:[%s13201_s14 + $0x80] sm:$0xff] }
 0x739   : > { %11002 = vmatmul.msk.bf16.gmra.mxu1 %vm617_vm0, %v8784_v37 }
 0x73a   : > { %v9177_v27 = vpop.f32.mrf.mxu2 }
 0x73b   : > { %v9263_v33 = vadd.f32 %v9177_v27, %v9016_v25  ;;  %v8793_v25 = vsel %vm2550_vm5, %v8783_v18, %v8792_v50 }
 0x73c   : > { %v8187_v24 = vpop.f32.mrf.mxu3 }
 0x73d   : > { %9299 = vst [vmem:[%s14323_s9 + $0x18] sm:$0xff] %v9263_v33  ;;  %v8553_v1 = vpop.f32.mrf.mxu0 }
 0x73e   : > { %v8637_v38 = vadd.f32 %v8553_v1, %v8264_v21  ;;  %v8935_v43 = vpop.f32.mrf.mxu1  ;;  %v8085_v21 = vrot.slane %v11405_v19, 2 }
 0x73f   : > { %11032 = vmatmul.msk.bf16.gmra.mxu2 %vm617_vm0, %v9080_v55  ;;  %v8266_v55 = vadd.f32 %v8185_v49, %v13953_v48 }
 0x740   : > { %10972 = vmatmul.msk.bf16.gmra.mxu0 %vm617_vm0, %v8453_v13  ;;  %v9017_v62 = vadd.f32 %v8933_v41, %v8637_v38  ;;  %v9081_v41 = vrot.slane %v14350_v58, 3  ;;  %v8455_v38 = vsel %vm1929_vm3, %v8452_v47, %v8454_v57 }
 0x741   : > { %10876 = vmatmul.msk.bf16.gmra.mxu3 %vm617_vm0, %v8084_v40  ;;  %v8086_v40 = vsel %vm1929_vm3, %v8083_v30, %v8085_v21  ;;  %v14390_v30 = vld [vmem:[%s13201_s14 + $0x80] sm:$0xff] }
 0x742   : > { %v9180_v2 = vpop.f32.mrf.mxu2  ;;  %v9082_v18 = vsel %vm2931_vm6, %v9079_v22, %v9081_v41  ;;  %v8801_v22 = vor.u32 %v8800_v8, %v8797_v56 }
 0x743   : > { %v9264_v26 = vadd.f32 %v9180_v2, %v9017_v62  ;;  %v8267_v2 = vadd.f32 %v8187_v24, %v13964_v16  ;;  %v8804_v16 = vshrl.u32 %v14390_v30, 16  ;;  %v8807_v24 = vshll.u32 %v14390_v30, 16 }
 0x744   : > { %v8190_v28 = vpop.f32.mrf.mxu3 }
 0x745   : > { %9300 = vst [vmem:[%s14323_s9 + $0x20] sm:$0xff] %v9264_v26  ;;  %v8555_v52 = vpop.f32.mrf.mxu0  ;;  %v8268_v19 = vadd.f32 %v8190_v28, %v13979_v31 }
 0x746   : > { %v8638_v46 = vadd.f32 %v8555_v52, %v8265_v54  ;;  %v8938_v37 = vpop.f32.mrf.mxu1 }
 0x748   : > { %v9018_v27 = vadd.f32 %v8935_v43, %v8638_v46  ;;  %v8802_v46 = vsel %vm2550_vm5, %v8792_v50, %v8801_v22 }
 0x749   : > { %11003 = vmatmul.msk.bf16.gmra.mxu1 %vm617_vm0, %v8793_v25 }
 0x74a   : > { %v9182_v14 = vpop.f32.mrf.mxu2 }
 0x74b   : > { %v9265_v33 = vadd.f32 %v9182_v14, %v9018_v27  ;;  %v8456_v27 = vrot.slane %v14370_v60, 2 }
 0x74c   : > { %v8192_v1 = vpop.f32.mrf.mxu3 }
 0x74d   : > { %9301 = vst [vmem:[%s14323_s9 + $0x28] sm:$0xff] %v9265_v33  ;;  %v8558_v13 = vpop.f32.mrf.mxu0  ;;  %v8087_v33 = vrot.slane %v11406_v0, 2 }
 0x74e   : > { %v8639_v43 = vadd.f32 %v8558_v13, %v8266_v55  ;;  %v8940_v58 = vpop.f32.mrf.mxu1  ;;  %v8457_v13 = vsel %vm1929_vm3, %v8454_v57, %v8456_v27 }
 0x74f   : > { %11033 = vmatmul.msk.bf16.gmra.mxu2 %vm617_vm0, %v9082_v18  ;;  %v8088_v56 = vsel %vm1929_vm3, %v8085_v21, %v8087_v33  ;;  %v14410_v21 = vld [vmem:[%s13201_s14 + $0x88] sm:$0xff] }
 0x750   : > { %10973 = vmatmul.msk.bf16.gmra.mxu0 %vm617_vm0, %v8455_v38  ;;  %v9019_v48 = vadd.f32 %v8938_v37, %v8639_v43  ;;  %v9083_v37 = vrot.slane %v14370_v60, 3  ;;  %v8806_v43 = vrot.slane %v8804_v16, 2 }
 0x751   : > { %10877 = vmatmul.msk.bf16.gmra.mxu3 %vm617_vm0, %v8086_v40  ;;  %v8269_v40 = vadd.f32 %v8192_v1, %v13990_v51  ;;  %v8813_v51 = vshrl.u32 %v14410_v21, 16  ;;  %v8816_v1 = vshll.u32 %v14410_v21, 16 }
 0x752   : > { %v9185_v49 = vpop.f32.mrf.mxu2  ;;  %v9084_v50 = vsel %vm2931_vm6, %v9081_v41, %v9083_v37 }
 0x753   : > { %v9266_v62 = vadd.f32 %v9185_v49, %v9019_v48 }
 0x754   : > { %v8195_v47 = vpop.f32.mrf.mxu3 }
 0x755   : > { %9302 = vst [vmem:[%s14323_s9 + $0x30] sm:$0xff] %v9266_v62  ;;  %v8560_v26 = vpop.f32.mrf.mxu0 }
 0x756   : > { %v8640_v54 = vadd.f32 %v8560_v26, %v8267_v2  ;;  %v8943_v52 = vpop.f32.mrf.mxu1 }
 0x758   : > { %v9020_v25 = vadd.f32 %v8940_v58, %v8640_v54  ;;  %v8809_v58 = vrot.slane %v8807_v24, 3  ;;  %v9085_v54 = vrot.slane %v14390_v30, 3  ;;  %v8270_v24 = vadd.f32 %v8195_v47, %v14005_v9 }
 0x759   : > { %11004 = vmatmul.msk.bf16.gmra.mxu1 %vm617_vm0, %v8802_v46 }
 0x75a   : > { %v9187_v14 = vpop.f32.mrf.mxu2  ;;  %v8810_v41 = vor.u32 %v8809_v58, %v8806_v43 }
 0x75b   : > { %v9267_v45 = vadd.f32 %v9187_v14, %v9020_v25  ;;  %v11407_v14 = vld [vmem:[%s13201_s14 + $0x88] sm:$0xff] }
 0x75c   : > { %v8197_v55 = vpop.f32.mrf.mxu3  ;;  %v8811_v2 = vsel %vm2550_vm5, %v8801_v22, %v8810_v41  ;;  %v8089_v16 = vrot.slane %v11407_v14, 2  ;;  %v9086_v22 = vsel %vm2931_vm6, %v9083_v37, %v9085_v54 }
 0x75d   : > { %9303 = vst [vmem:[%s14323_s9 + $0x38] sm:$0xff] %v9267_v45  ;;  %v8563_v18 = vpop.f32.mrf.mxu0  ;;  %v8271_v43 = vadd.f32 %v8197_v55, %v14016_v53 }
 0x75e   : > { %v8641_v38 = vadd.f32 %v8563_v18, %v8268_v19  ;;  %v8945_v60 = vpop.f32.mrf.mxu1  ;;  %v8815_v18 = vrot.slane %v8813_v51, 2 }
 0x75f   : > { %11034 = vmatmul.msk.bf16.gmra.mxu2 %vm617_vm0, %v9084_v50 }
 0x760   : > { %10974 = vmatmul.msk.bf16.gmra.mxu0 %vm617_vm0, %v8457_v13  ;;  %v9021_v31 = vadd.f32 %v8943_v52, %v8641_v38  ;;  %v8458_v52 = vrot.slane %v14390_v30, 2  ;;  %v8818_v13 = vrot.slane %v8816_v1, 3  ;;  %v8090_v38 = vsel %vm1929_vm3, %v8087_v33, %v8089_v16  ;;  %v14430_v33 = vld [vmem:[%s13201_s14 + $0x90] sm:$0xff] }
 0x761   : > { %10878 = vmatmul.msk.bf16.gmra.mxu3 %vm617_vm0, %v8088_v56  ;;  %v8822_v53 = vshrl.u32 %v14430_v33, 16  ;;  %v8825_v55 = vshll.u32 %v14430_v33, 16 }
 0x762   : > { %v9190_v28 = vpop.f32.mrf.mxu2  ;;  %v8459_v19 = vsel %vm1929_vm3, %v8456_v27, %v8458_v52  ;;  %v8819_v37 = vor.u32 %v8818_v13, %v8815_v18 }
 0x763   : > { %v9268_v8 = vadd.f32 %v9190_v28, %v9021_v31 }
 0x764   : > { %v8200_v57 = vpop.f32.mrf.mxu3  ;;  %v8820_v28 = vsel %vm2550_vm5, %v8810_v41, %v8819_v37 }
 0x765   : > { %9304 = vst [vmem:[%s14323_s9 + $0x40] sm:$0xff] %v9268_v8  ;;  %v8565_v48 = vpop.f32.mrf.mxu0 }
 0x766   : > { %v8642_v49 = vadd.f32 %v8565_v48, %v8269_v40  ;;  %v8948_v62 = vpop.f32.mrf.mxu1  ;;  %v9087_v40 = vrot.slane %v14410_v21, 3  ;;  %v8460_v48 = vrot.slane %v14410_v21, 2 }
 0x768   : > { %v9022_v26 = vadd.f32 %v8945_v60, %v8642_v49  ;;  %v9088_v41 = vsel %vm2931_vm6, %v9085_v54, %v9087_v40 }
 0x769   : > { %11005 = vmatmul.msk.bf16.gmra.mxu1 %vm617_vm0, %v8811_v2  ;;  %v11408_v2 = vld [vmem:[%s13201_s14 + $0x90] sm:$0xff] }
 0x76a   : > { %v9192_v46 = vpop.f32.mrf.mxu2 }
 0x76b   : > { %v9269_v25 = vadd.f32 %v9192_v46, %v9022_v26  ;;  %v8091_v26 = vrot.slane %v11408_v2, 2  ;;  %v8272_v46 = vadd.f32 %v8200_v57, %v14032_v6 }
 0x76c   : > { %v8202_v45 = vpop.f32.mrf.mxu3 }
 0x76d   : > { %9305 = vst [vmem:[%s14323_s9 + $0x48] sm:$0xff] %v9269_v25  ;;  %v8568_v0 = vpop.f32.mrf.mxu0  ;;  %v8461_v25 = vsel %vm1929_vm3, %v8458_v52, %v8460_v48 }
 0x76e   : > { %v8643_v50 = vadd.f32 %v8568_v0, %v8270_v24  ;;  %v8950_v30 = vpop.f32.mrf.mxu1  ;;  %v8824_v24 = vrot.slane %v8822_v53, 2  ;;  %v8092_v0 = vsel %vm1929_vm3, %v8089_v16, %v8091_v26 }
 0x76f   : > { %11035 = vmatmul.msk.bf16.gmra.mxu2 %vm617_vm0, %v9086_v22  ;;  %v8827_v22 = vrot.slane %v8825_v55, 3 }
 0x770   : > { %10975 = vmatmul.msk.bf16.gmra.mxu0 %vm617_vm0, %v8459_v19  ;;  %v9023_v9 = vadd.f32 %v8948_v62, %v8643_v50  ;;  %v8273_v50 = vadd.f32 %v8202_v45, %v14042_v36 }
 0x771   : > { %10879 = vmatmul.msk.bf16.gmra.mxu3 %vm617_vm0, %v8090_v38  ;;  %v8828_v54 = vor.u32 %v8827_v22, %v8824_v24 }
 0x772   : > { %v9195_v47 = vpop.f32.mrf.mxu2 }
 0x773   : > { %v9270_v60 = vadd.f32 %v9195_v47, %v9023_v9  ;;  %v8829_v38 = vsel %vm2550_vm5, %v8819_v37, %v8828_v54  ;;  %v14450_v9 = vld [vmem:[%s13201_s14 + $0x98] sm:$0xff]  ;;  %v9089_v47 = vrot.slane %v14430_v33, 3 }
 0x774   : > { %v8205_v27 = vpop.f32.mrf.mxu3  ;;  %v8831_v36 = vshrl.u32 %v14450_v9, 16  ;;  %v8834_v45 = vshll.u32 %v14450_v9, 16 }
 0x775   : > { %9306 = vst [vmem:[%s14323_s9 + $0x50] sm:$0xff] %v9270_v60  ;;  %v8570_v58 = vpop.f32.mrf.mxu0  ;;  %v8462_v60 = vrot.slane %v14430_v33, 2  ;;  %v8274_v37 = vadd.f32 %v8205_v27, %v14060_v63 }
 0x776   : > { %v8644_v56 = vadd.f32 %v8570_v58, %v8271_v43  ;;  %v8953_v31 = vpop.f32.mrf.mxu1  ;;  %v8833_v55 = vrot.slane %v8831_v36, 2 }
 0x778   : > { %v9024_v8 = vadd.f32 %v8950_v30, %v8644_v56  ;;  %v8093_v56 = vrot.slane %v14076_v4, 2 }
 0x779   : > { %11006 = vmatmul.msk.bf16.gmra.mxu1 %vm617_vm0, %v8820_v28 }
 0x77a   : > { %v9197_v49 = vpop.f32.mrf.mxu2  ;;  %v8094_v2 = vsel %vm1929_vm3, %v8091_v26, %v8093_v56 }
 0x77b   : > { %v9271_v62 = vadd.f32 %v9197_v49, %v9024_v8  ;;  %v8463_v49 = vsel %vm1929_vm3, %v8460_v48, %v8462_v60  ;;  %v14563_v48 = vld [vmem:[#allocation2_spill] sm:$0xff] }
 0x77c   : > { %v8207_v51 = vpop.f32.mrf.mxu3 }
 0x77d   : > { %9307 = vst [vmem:[%s14323_s9 + $0x58] sm:$0xff] %v9271_v62  ;;  %v8573_v1 = vpop.f32.mrf.mxu0  ;;  %v8836_v62 = vrot.slane %v8834_v45, 3 }
 0x77e   : > { %v8645_v14 = vadd.f32 %v8573_v1, %v8272_v46  ;;  %v8955_v21 = vpop.f32.mrf.mxu1  ;;  %v8669_v46 = vld [vmem:[%s13201_s14 + $0xa0] sm:$0x7]  ;;  %v8275_v1 = vadd.f32 %v8207_v51, %v14563_v48 }
 0x77f   : > { %11036 = vmatmul.msk.bf16.gmra.mxu2 %vm617_vm0, %v9088_v41  ;;  %v8837_v27 = vor.u32 %v8836_v62, %v8833_v55 }
 0x780   : > { %10976 = vmatmul.msk.bf16.gmra.mxu0 %vm617_vm0, %v8461_v25  ;;  %v9025_v6 = vadd.f32 %v8953_v31, %v8645_v14  ;;  %v9090_v31 = vsel %vm2931_vm6, %v9087_v40, %v9089_v47  ;;  %v8676_v40 = vunpack.c.l.b16 %v8669_v46 }
 0x781   : > { %10880 = vmatmul.msk.bf16.gmra.mxu3 %vm617_vm0, %v8092_v0  ;;  %v8838_v26 = vsel %vm2550_vm5, %v8828_v54, %v8837_v27 }
 0x782   : > { %v9200_v57 = vpop.f32.mrf.mxu2  ;;  %v8677_v22 = vpack.c.b16 %v8676_v40, %v8676_v40 }
 0x783   : > { %v9272_v19 = vadd.f32 %v9200_v57, %v9025_v6  ;;  %v9091_v6 = vrot.slane %v14450_v9, 3  ;;  %v8464_v57 = vrot.slane %v14450_v9, 2 }
 0x784   : > { %v8210_v52 = vpop.f32.mrf.mxu3  ;;  %v8843_v51 = vshll.u32 %v8677_v22, 16 }
 0x785   : > { %9308 = vst [vmem:[%s14323_s9 + $0x60] sm:$0xff] %v9272_v19  ;;  %v8575_v30 = vpop.f32.mrf.mxu0 }
 0x786   : > { %v8646_v18 = vadd.f32 %v8575_v30, %v8273_v50  ;;  %v8958_v13 = vpop.f32.mrf.mxu1  ;;  %v8840_v50 = vshrl.u32 %v8677_v22, 16  ;;  %v8845_v56 = vrot.slane %v8843_v51, 3 }
 0x788   : > { %v9026_v16 = vadd.f32 %v8955_v21, %v8646_v18  ;;  %v14564_v18 = vld [vmem:[#allocation3_spill] sm:$0xff] }
 0x789   : > { %11007 = vmatmul.msk.bf16.gmra.mxu1 %vm617_vm0, %v8829_v38  ;;  %v9092_v38 = vsel %vm2931_vm6, %v9089_v47, %v9091_v6 }
 0x78a   : > { %v9202_v43 = vpop.f32.mrf.mxu2 }
 0x78b   : > { %v9273_v58 = vadd.f32 %v9202_v43, %v9026_v16  ;;  %v8465_v43 = vsel %vm1929_vm3, %v8462_v60, %v8464_v57 }
 0x78c   : > { %v8212_v28 = vpop.f32.mrf.mxu3 }
 0x78d   : > { %9309 = vst [vmem:[%s14323_s9 + $0x68] sm:$0xff] %v9273_v58  ;;  %v8578_v8 = vpop.f32.mrf.mxu0  ;;  %v8842_v58 = vrot.slane %v8840_v50, 2 }
 0x78e   : > { %v8647_v33 = vadd.f32 %v8578_v8, %v8274_v37  ;;  %v8960_v53 = vpop.f32.mrf.mxu1  ;;  %v8332_v37 = vld [vmem:[%s13201_s14 + $0xa0] sm:$0x3] }
 0x78f   : > { %11037 = vmatmul.msk.bf16.gmra.mxu2 %vm617_vm0, %v9090_v31  ;;  %v8411_v31 = vunpack.c.l.b16 %v8332_v37  ;;  %v8846_v8 = vor.u32 %v8845_v56, %v8842_v58 }
 0x790   : > { %10977 = vmatmul.msk.bf16.gmra.mxu0 %vm617_vm0, %v8463_v49  ;;  %v9027_v63 = vadd.f32 %v8958_v13, %v8647_v33  ;;  %v8276_v13 = vadd.f32 %v8210_v52, %v14564_v18  ;;  %v8277_v49 = vadd.f32 %v8212_v28, %v14108_v42 }
 0x791   : > { %10881 = vmatmul.msk.bf16.gmra.mxu3 %vm617_vm0, %v8094_v2  ;;  %v8847_v2 = vsel %vm2550_vm5, %v8837_v27, %v8846_v8 }
 0x792   : > { %v9205_v4 = vpop.f32.mrf.mxu2 }
 0x793   : > { %v9274_v41 = vadd.f32 %v9205_v4, %v9027_v63  ;;  %v9093_v63 = vrot.slane %v8677_v22, 3 }
 0x794   : > { %v8215_v25 = vpop.f32.mrf.mxu3 }
 0x795   : > { %9310 = vst [vmem:[%s14323_s9 + $0x70] sm:$0xff] %v9274_v41  ;;  %v8580_v14 = vpop.f32.mrf.mxu0  ;;  %v8278_v48 = vadd.f32 %v8215_v25, %v14120_v10  ;;  %v9094_v42 = vsel %vm2931_vm6, %v9091_v6, %v9093_v63 }
 0x796   : > { %v8648_v21 = vadd.f32 %v8580_v14, %v8275_v1  ;;  %v8963_v24 = vpop.f32.mrf.mxu1 }
 0x798   : > { %v9028_v0 = vadd.f32 %v8960_v53, %v8648_v21  ;;  %v8430_v53 = vpack.c.b16 %v8411_v31, %v8411_v31 }
 0x799   : > { %11008 = vmatmul.msk.bf16.gmra.mxu1 %vm617_vm0, %v8838_v26 }
 0x79a   : > { %v9207_v19 = vpop.f32.mrf.mxu2  ;;  %v8466_v4 = vrot.slane %v8430_v53, 2 }
 0x79b   : > { %v9275_v30 = vadd.f32 %v9207_v19, %v9028_v0 }
 0x79c   : > { %v8217_v16 = vpop.f32.mrf.mxu3  ;;  %v8467_v14 = vsel %vm1929_vm3, %v8464_v57, %v8466_v4 }
 0x79d   : > { %9311 = vst [vmem:[%s14323_s9 + $0x78] sm:$0xff] %v9275_v30  ;;  %v8583_v54 = vpop.f32.mrf.mxu0  ;;  %v8279_v0 = vadd.f32 %v8217_v16, %v14134_v20 }
 0x79e   : > { %v8649_v36 = vadd.f32 %v8583_v54, %v8276_v13  ;;  %v8965_v45 = vpop.f32.mrf.mxu1 }
 0x79f   : > { %11038 = vmatmul.msk.bf16.gmra.mxu2 %vm617_vm0, %v9092_v38 }
 0x7a0   : > { %10978 = vmatmul.msk.bf16.gmra.mxu0 %vm617_vm0, %v8465_v43  ;;  %v9029_v9 = vadd.f32 %v8963_v24, %v8649_v36 }
 0x7a2   : > { %v9210_v52 = vpop.f32.mrf.mxu2 }
 0x7a3   : > { %v9276_v47 = vadd.f32 %v9210_v52, %v9029_v9 }
 0x7a4   : > { %v8220_v33 = vpop.f32.mrf.mxu3 }
 0x7a5   : > { %9312 = vst [vmem:[%s14323_s9 + $0x80] sm:$0xff] %v9276_v47  ;;  %v8585_v60 = vpop.f32.mrf.mxu0  ;;  %v8280_v30 = vadd.f32 %v8220_v33, %v14145_v32 }
 0x7a6   : > { %v8650_v55 = vadd.f32 %v8585_v60, %v8277_v49  ;;  %v8968_v62 = vpop.f32.mrf.mxu1 }
 0x7a8   : > { %v9030_v46 = vadd.f32 %v8965_v45, %v8650_v55 }
 0x7a9   : > { %11009 = vmatmul.msk.bf16.gmra.mxu1 %vm617_vm0, %v8847_v2 }
 0x7aa   : > { %v9212_v40 = vpop.f32.mrf.mxu2 }
 0x7ab   : > { %v9277_v41 = vadd.f32 %v9212_v40, %v9030_v46 }
 0x7ac   : > { %v8222_v28 = vpop.f32.mrf.mxu3 }
 0x7ad   : > { %9313 = vst [vmem:[%s14323_s9 + $0x88] sm:$0xff] %v9277_v41  ;;  %v8588_v1 = vpop.f32.mrf.mxu0  ;;  %v8281_v16 = vadd.f32 %v8222_v28, %v14157_v44 }
 0x7ae   : > { %v8651_v21 = vadd.f32 %v8588_v1, %v8278_v48  ;;  %v8970_v24 = vpop.f32.mrf.mxu1 }
 0x7af   : > { %11039 = vmatmul.msk.bf16.gmra.mxu2 %vm617_vm0, %v9094_v42 }
 0x7b0   : > { %10979 = vmatmul.msk.bf16.gmra.mxu0 %vm617_vm0, %v8467_v14  ;;  %v9031_v27 = vadd.f32 %v8968_v62, %v8651_v21 }
 0x7b2   : > { %v9215_v26 = vpop.f32.mrf.mxu2 }
 0x7b3   : > { %v9278_v22 = vadd.f32 %v9215_v26, %v9031_v27 }
 0x7b4   : > { %v8225_v10 = vpop.f32.mrf.mxu3 }
 0x7b5   : > { %9314 = vst [vmem:[%s14323_s9 + $0x90] sm:$0xff] %v9278_v22  ;;  %v8590_v25 = vpop.f32.mrf.mxu0  ;;  %v8282_v52 = vadd.f32 %v8225_v10, %v14167_v59 }
 0x7b6   : > { %v8652_v6 = vadd.f32 %v8590_v25, %v8279_v0  ;;  %v8973_v19 = vpop.f32.mrf.mxu1 }
 0x7b8   : > { %v9032_v50 = vadd.f32 %v8970_v24, %v8652_v6 }
 0x7ba   : > { %v9217_v57 = vpop.f32.mrf.mxu2 }
 0x7bb   : > { %v9279_v51 = vadd.f32 %v9217_v57, %v9032_v50 }
 0x7bc   : > { %v8227_v18 = vpop.f32.mrf.mxu3 }
 0x7bd   : > { %9315 = vst [vmem:[%s14323_s9 + $0x98] sm:$0xff] %v9279_v51  ;;  %v8593_v13 = vpop.f32.mrf.mxu0  ;;  %v8283_v55 = vadd.f32 %v8227_v18, %v14179_v34 }
 0x7be   : > { %v8653_v38 = vadd.f32 %v8593_v13, %v8280_v30  ;;  %v8975_v54 = vpop.f32.mrf.mxu1 }
 0x7c0   : > { %v9033_v43 = vadd.f32 %v8973_v19, %v8653_v38 }
 0x7c2   : > { %v9220_v36 = vpop.f32.mrf.mxu2 }
 0x7c3   : > { %v9280_v20 = vadd.f32 %v9220_v36, %v9033_v43 }
 0x7c4   : > { %v8230_v45 = vpop.f32.mrf.mxu3 }
 0x7c5   : > { %9316 = vst [vmem:[%s14323_s9 + $0xa0] sm:$0xff] %v9280_v20  ;;  %v8595_v58 = vpop.f32.mrf.mxu0  ;;  %v8284_v41 = vadd.f32 %v8230_v45, %v14189_v61 }
 0x7c6   : > { %v8654_v56 = vadd.f32 %v8595_v58, %v8281_v16  ;;  %v8978_v37 = vpop.f32.mrf.mxu1 }
 0x7c8   : > { %v9034_v9 = vadd.f32 %v8975_v54, %v8654_v56 }
 0x7ca   : > { %v9222_v31 = vpop.f32.mrf.mxu2 }
 0x7cb   : > { %v9281_v32 = vadd.f32 %v9222_v31, %v9034_v9 }
 0x7cc   : > { %v8232_v8 = vpop.f32.mrf.mxu3 }
 0x7cd   : > { %9317 = vst [vmem:[%s14323_s9 + $0xa8] sm:$0xff] %v9281_v32  ;;  %v8598_v47 = vpop.f32.mrf.mxu0  ;;  %v8285_v24 = vadd.f32 %v8232_v8, %v14201_v5 }
 0x7ce   : > { %v8655_v49 = vadd.f32 %v8598_v47, %v8282_v52  ;;  %v8980_v33 = vpop.f32.mrf.mxu1 }
 0x7d0   : > { %v9035_v60 = vadd.f32 %v8978_v37, %v8655_v49 }
 0x7d2   : > { %v9225_v53 = vpop.f32.mrf.mxu2 }
 0x7d3   : > { %v9282_v44 = vadd.f32 %v9225_v53, %v9035_v60 }
 0x7d4   : > { %v8235_v63 = vpop.f32.mrf.mxu3 }
 0x7d5   : > { %9318 = vst [vmem:[%s14323_s9 + $0xb0] sm:$0xff] %v9282_v44  ;;  %v8600_v62 = vpop.f32.mrf.mxu0  ;;  %v8286_v6 = vadd.f32 %v8235_v63, %v14211_v23 }
 0x7d6   : > { %v8656_v2 = vadd.f32 %v8600_v62, %v8283_v55  ;;  %v8983_v46 = vpop.f32.mrf.mxu1 }
 0x7d8   : > { %v9036_v4 = vadd.f32 %v8980_v33, %v8656_v2 }
 0x7da   : > { %v9227_v40 = vpop.f32.mrf.mxu2 }
 0x7db   : > { %v9283_v59 = vadd.f32 %v9227_v40, %v9036_v4 }
 0x7dc   : > { %v8237_v14 = vpop.f32.mrf.mxu3 }
 0x7dd   : > { %9319 = vst [vmem:[%s14323_s9 + $0xb8] sm:$0xff] %v9283_v59  ;;  %v8603_v48 = vpop.f32.mrf.mxu0  ;;  %v8287_v5 = vadd.f32 %v8237_v14, %v14223_v39 }
 0x7de   : > { %v8657_v42 = vadd.f32 %v8603_v48, %v8284_v41  ;;  %v8985_v28 = vpop.f32.mrf.mxu1 }
 0x7e0   : > { %v9037_v1 = vadd.f32 %v8983_v46, %v8657_v42 }
 0x7e2   : > { %v9230_v21 = vpop.f32.mrf.mxu2 }
 0x7e3   : > { %v9284_v34 = vadd.f32 %v9230_v21, %v9037_v1 }
 0x7e4   : > { %v8240_v25 = vpop.f32.mrf.mxu3 }
 0x7e5   : > { %9320 = vst [vmem:[%s14323_s9 + $0xc0] sm:$0xff] %v9284_v34  ;;  %v8605_v27 = vpop.f32.mrf.mxu0  ;;  %v8288_v23 = vadd.f32 %v8240_v25, %v14233_v15 }
 0x7e6   : > { %v8658_v26 = vadd.f32 %v8605_v27, %v8285_v24  ;;  %v8988_v22 = vpop.f32.mrf.mxu1 }
 0x7e8   : > { %v9038_v0 = vadd.f32 %v8985_v28, %v8658_v26 }
 0x7ea   : > { %v9232_v10 = vpop.f32.mrf.mxu2 }
 0x7eb   : > { %v9285_v61 = vadd.f32 %v9232_v10, %v9038_v0 }
 0x7ec   : > { %v8242_v13 = vpop.f32.mrf.mxu3 }
 0x7ed   : > { %9321 = vst [vmem:[%s14323_s9 + $0xc8] sm:$0xff] %v9285_v61  ;;  %v8608_v19 = vpop.f32.mrf.mxu0  ;;  %v8289_v32 = vadd.f32 %v8242_v13, %v14245_v12 }
 0x7ee   : > { %v8659_v50 = vadd.f32 %v8608_v19, %v8286_v6  ;;  %v8990_v57 = vpop.f32.mrf.mxu1 }
 0x7f0   : > { %v9039_v51 = vadd.f32 %v8988_v22, %v8659_v50 }
 0x7f2   : > { %v9235_v30 = vpop.f32.mrf.mxu2 }
 0x7f3   : > { %v9286_v18 = vadd.f32 %v9235_v30, %v9039_v51 }
 0x7f4   : > { %v8245_v37 = vpop.f32.mrf.mxu3 }
 0x7f5   : > { %9322 = vst [vmem:[%s14323_s9 + $0xd0] sm:$0xff] %v9286_v18  ;;  %v8610_v38 = vpop.f32.mrf.mxu0  ;;  %v8290_v53 = vadd.f32 %v8245_v37, %v14255_v35 }
 0x7f6   : > { %v8660_v54 = vadd.f32 %v8610_v38, %v8287_v5  ;;  %v8993_v43 = vpop.f32.mrf.mxu1 }
 0x7f8   : > { %v9040_v36 = vadd.f32 %v8990_v57, %v8660_v54 }
 0x7fa   : > { %v9237_v20 = vpop.f32.mrf.mxu2 }
 0x7fb   : > { %v9287_v16 = vadd.f32 %v9237_v20, %v9040_v36 }
 0x7fc   : > { %v8247_v33 = vpop.f32.mrf.mxu3 }
 0x7fd   : > { %9323 = vst [vmem:[%s14323_s9 + $0xd8] sm:$0xff] %v9287_v16  ;;  %v8613_v45 = vpop.f32.mrf.mxu0  ;;  %v8291_v4 = vadd.f32 %v8247_v33, %v14267_v7 }
 0x7fe   : > { %v8661_v58 = vadd.f32 %v8613_v45, %v8288_v23  ;;  %v8995_v56 = vpop.f32.mrf.mxu1 }
 0x800   : > { %v9041_v9 = vadd.f32 %v8993_v43, %v8661_v58 }
 0x802   : > { %v9240_v31 = vpop.f32.mrf.mxu2 }
 0x803   : > { %v9288_v39 = vadd.f32 %v9240_v31, %v9041_v9 }
 0x804   : > { %v8250_v63 = vpop.f32.mrf.mxu3 }
 0x805   : > { %9324 = vst [vmem:[%s14323_s9 + $0xe0] sm:$0xff] %v9288_v39  ;;  %v8615_v52 = vpop.f32.mrf.mxu0  ;;  %v8292_v35 = vadd.f32 %v8250_v63, %v14277_v29 }
 0x806   : > { %v8662_v8 = vadd.f32 %v8615_v52, %v8289_v32  ;;  %v8998_v47 = vpop.f32.mrf.mxu1 }
 0x808   : > { %v9042_v49 = vadd.f32 %v8995_v56, %v8662_v8 }
 0x80a   : > { %v9242_v60 = vpop.f32.mrf.mxu2 }
 0x80b   : > { %v9289_v15 = vadd.f32 %v9242_v60, %v9042_v49 }
 0x80c   : > { %v8252_v1 = vpop.f32.mrf.mxu3 }
 0x80d   : > { %9325 = vst [vmem:[%s14323_s9 + $0xe8] sm:$0xff] %v9289_v15  ;;  %v8618_v44 = vpop.f32.mrf.mxu0  ;;  %v8293_v7 = vadd.f32 %v8252_v1, %v14288_v11 }
 0x80e   : > { %v8663_v55 = vadd.f32 %v8618_v44, %v8290_v53  ;;  %v9000_v62 = vpop.f32.mrf.mxu1 }
 0x810   : > { %v9043_v2 = vadd.f32 %v8998_v47, %v8663_v55 }
 0x812   : > { %v9245_v46 = vpop.f32.mrf.mxu2 }
 0x813   : > { %v9290_v12 = vadd.f32 %v9245_v46, %v9043_v2 }
 0x814   : > { %v8255_v10 = vpop.f32.mrf.mxu3 }
 0x815   : > { %9326 = vst [vmem:[%s14323_s9 + $0xf0] sm:$0xff] %v9290_v12  ;;  %v8620_v40 = vpop.f32.mrf.mxu0  ;;  %v8294_v29 = vadd.f32 %v8255_v10, %v14298_v17 }
 0x816   : > { %v8664_v59 = vadd.f32 %v8620_v40, %v8291_v4  ;;  %v9003_v48 = vpop.f32.mrf.mxu1 }
 0x818   : > { %v9044_v41 = vadd.f32 %v9000_v62, %v8664_v59 }
 0x81a   : > { %v9247_v42 = vpop.f32.mrf.mxu2 }
 0x81b   : > { %v9291_v28 = vadd.f32 %v9247_v42, %v9044_v41 }
 0x81c   : > { %v8257_v30 = vpop.f32.mrf.mxu3 }
 0x81d   : > { %9327 = vst [vmem:[%s14323_s9 + $0xf8] sm:$0xff] %v9291_v28  ;;  %v8623_v14 = vpop.f32.mrf.mxu0  ;;  %v8295_v11 = vadd.f32 %v8257_v30, %v14311_v3 }
 0x81e   : > { %v8665_v21 = vadd.f32 %v8623_v14, %v8292_v35  ;;  %v9005_v27 = vpop.f32.mrf.mxu1 }
 0x820   : > { %v9045_v34 = vadd.f32 %v9003_v48, %v8665_v21 }
 0x822   : > { %v9250_v24 = vpop.f32.mrf.mxu2 }
 0x823   : > { %v9292_v26 = vadd.f32 %v9250_v24, %v9045_v34 }
 0x825   : > { %9328 = vst [vmem:[%s14323_s9 + $0x100] sm:$0xff] %v9292_v26  ;;  %v8625_v22 = vpop.f32.mrf.mxu0 }
 0x826   : > { %v8666_v0 = vadd.f32 %v8625_v22, %v8293_v7  ;;  %v9008_v19 = vpop.f32.mrf.mxu1 }
 0x828   : > { %v9046_v25 = vadd.f32 %v9005_v27, %v8666_v0 }
 0x82a   : > { %v9252_v61 = vpop.f32.mrf.mxu2 }
 0x82b   : > { %v9293_v6 = vadd.f32 %v9252_v61, %v9046_v25 }
 0x82d   : > { %9329 = vst [vmem:[%s14323_s9 + $0x108] sm:$0xff] %v9293_v6  ;;  %v8628_v50 = vpop.f32.mrf.mxu0 }
 0x82e   : > { %v8667_v57 = vadd.f32 %v8628_v50, %v8294_v29  ;;  %v9010_v54 = vpop.f32.mrf.mxu1 }
 0x830   : > { %v9047_v51 = vadd.f32 %v9008_v19, %v8667_v57 }
 0x832   : > { %v9255_v18 = vpop.f32.mrf.mxu2 }
 0x833   : > { %v9294_v5 = vadd.f32 %v9255_v18, %v9047_v51 }
 0x835   : > { %9330 = vst [vmem:[%s14323_s9 + $0x110] sm:$0xff] %v9294_v5  ;;  %v8630_v13 = vpop.f32.mrf.mxu0 }
 0x836   : > { %v8668_v38 = vadd.f32 %v8630_v13, %v8295_v11 }
 0x838   : > { %v9048_v43 = vadd.f32 %v9010_v54, %v8668_v38 }
 0x83a   : > { %v9257_v36 = vpop.f32.mrf.mxu2 }
 0x83b   : > { %v9295_v20 = vadd.f32 %v9257_v36, %v9048_v43 }
 0x83d   : > { %9331 = vst [vmem:[%s14323_s9 + $0x118] sm:$0xff] %v9295_v20 }
 0x83e PF: > { %s14_s19 = sadd.s32 1, %s11447_s19   ;;  %s14565_s15 = smov %s11439_s17 }
 0x83f   : > { %p11_p10 = scmp.ge.s32.totalorder %s14_s19, 10   ;;  %s14566_s16 = smov %s11443_s18 }
 0x840   : > { %s14567_s17 = smov %s14570_s20  ;;  %s14568_s18 = smov %s14574_s21 }
 0x841   :  { %13 = sbr.rel (!%p11_p10) target bundleno = 3 (0x3), region = 98 }

</bundles_post_ra>
